<compile_context>
chip_gen: v7x
topology: tpu7x:2x2x1
jax: 0.10.0
libtpu: 0.0.40
codegen_flags: <defaults>
</compile_context>

<pallas_src>
import jax
import jax.numpy as jnp
from jax.experimental import pallas as pl
from jax.experimental.pallas import tpu as pltpu

# ----- equal earth projection constants (match the PyTorch module) -----------
M_ = float(jnp.sqrt(3.0)) / 2.0
SF = 66.50336
A1 = 1.340264
A2 = -0.081106
A3 = 0.000893
A4 = 0.003796
TWO_PI = 2.0 * float(jnp.pi)

f1 = lambda t: A1 + 3 * A2 * t ** 2 + t ** 6 * (7 * A3 + 9 * A4 * t ** 2)
f2 = lambda t: A1 + A2 * t ** 2 + t ** 6 * (A3 + A4 * t ** 2)


def equal_earth_projection(L):
    # L: (N, 2) = (lat_deg, lon_deg) -> (N, 2) projected coords.
    # Tiny (N,2) elementwise math (incl. arcsin) -> kept as plain-JAX glue.
    lat = jnp.deg2rad(L[:, 0])
    lon = jnp.deg2rad(L[:, 1])
    theta = jnp.arcsin(M_ * jnp.sin(lat))
    x = lon * jnp.cos(theta) / (M_ * f1(theta))
    y = theta * f2(theta)
    return jnp.stack((x, y), axis=1) * SF / 180.0


# ----- shared per-capsule compute (RFF encoding + 4-layer MLP on the MXU) ----
def _capsule_compute(loc_ref, bt_ref, w1_ref, s1_ref, b1_ref, w2_ref, s2_ref,
                     b2_ref, w3_ref, s3_ref, b3_ref, wh_ref, sh_ref, bh_ref):
    loc = loc_ref[...]                                    # (tile_n, 2) f32
    bt = bt_ref[...]                                      # (2, 256)    f32

    # rff pre-projection vp = 2*pi * loc @ B_c^T : K=2 contraction as two VPU FMAs.
    vp = TWO_PI * (loc[:, 0:1] * bt[0:1, :] + loc[:, 1:2] * bt[1:2, :])

    # GaussianEncoding features [cos(vp), sin(vp)] (N, 512).  Instead of a
    # lane-axis concatenate, feed each 256-wide half into the matching
    # (tile-aligned) half of W1 on the MXU.
    cos_e = jnp.cos(vp).astype(jnp.bfloat16)              # (tile_n, 256) bf16
    sin_e = jnp.sin(vp).astype(jnp.bfloat16)

    def qdot(x, wq):                                      # int8 weights -> bf16 MXU, f32 acc
        return jnp.dot(x, wq.astype(jnp.bfloat16),
                       preferred_element_type=jnp.float32)

    h = qdot(cos_e, w1_ref[:256, :]) + qdot(sin_e, w1_ref[256:, :])
    h = jnp.maximum(h * s1_ref[...] + b1_ref[...], 0.0)
    h = jnp.maximum(qdot(h.astype(jnp.bfloat16), w2_ref[...]) * s2_ref[...]
                    + b2_ref[...], 0.0)
    h = jnp.maximum(qdot(h.astype(jnp.bfloat16), w3_ref[...]) * s3_ref[...]
                    + b3_ref[...], 0.0)
    return qdot(h.astype(jnp.bfloat16), wh_ref[...]) * sh_ref[...] + bh_ref[...]


def capsule_accumulate_kernel(loc_ref, bt_ref, *rest):
    # Single-TC (v5e/v6e) variant: accumulate over the capsule grid axis into a
    # VMEM-resident output block (constant out_spec index).
    *param_refs, out_ref = rest
    y = _capsule_compute(loc_ref, bt_ref, *param_refs)

    @pl.when(pl.program_id(0) == 0)
    def _():
        out_ref[...] = y

    @pl.when(pl.program_id(0) > 0)
    def _():
        out_ref[...] += y


def capsule_parallel_kernel(loc_ref, bt_ref, *rest):
    # Megacore (v7x) variant: per-(capsule, batch-tile) output block; capsules
    # + batch tiles shard across the two TensorCores.
    *param_refs, out_ref = rest
    out_ref[...] = _capsule_compute(loc_ref, bt_ref, *param_refs)


# ----- wrapper ---------------------------------------------------------------
def _tensorcores_per_chip():
    try:
        kind = jax.devices()[0].device_kind.lower()
    except Exception:
        return 1
    return 2 if "v7" in kind else 1


def _round_up(x, m):
    return ((x + m - 1) // m) * m


def location_encoder_forward(location, params):
    """location: (N, 2) float32 lat/lon degrees.  Returns (N, 512) float32."""
    (bt, w1q, s1, b1, w2q, s2, b2, w3q, s3, b3, whq, sh, bh) = params
    N = location.shape[0]
    C = bt.shape[0]

    loc = equal_earth_projection(location.astype(jnp.float32))       # (N, 2)

    megacore = _tensorcores_per_chip() >= 2

    # Pad rows to a multiple of 8 (BlockSpec legality); padded rows produce
    # garbage and are sliced off below (never consume the raw kernel output).
    n_pad = _round_up(N, 8)
    if megacore and n_pad >= 16:
        # >= 2 batch tiles so the C x T work units split evenly across the
        # two TensorCores; cap tiles at 1024 rows to bound VMEM on v7x.
        tiles = max(2, -(-n_pad // 1024))
        tile_n = _round_up(-(-n_pad // tiles), 8)
        n_pad = tile_n * tiles
    else:
        tiles = 1
        tile_n = n_pad
    if n_pad != N:
        loc = jnp.pad(loc, ((0, n_pad - N), (0, 0)))

    cap_idx = lambda c, n: (c, 0, 0)

    def weight_spec(shape):
        if megacore:
            # keep several weight DMAs in flight on v7x (fast HBM, short steps)
            return pl.BlockSpec(shape, cap_idx, pipeline_mode=pl.Buffered(3))
        return pl.BlockSpec(shape, cap_idx)

    in_specs = [
        pl.BlockSpec((tile_n, 2), lambda c, n: (n, 0)),   # loc (full 2-wide)
        pl.BlockSpec((None, 2, 256), cap_idx),            # B_c^T
        weight_spec((None, 512, 1024)),                   # W1 int8
        pl.BlockSpec((None, 1, 1024), cap_idx),           # s1
        pl.BlockSpec((None, 1, 1024), cap_idx),           # b1
        weight_spec((None, 1024, 1024)),                  # W2 int8
        pl.BlockSpec((None, 1, 1024), cap_idx),           # s2
        pl.BlockSpec((None, 1, 1024), cap_idx),           # b2
        weight_spec((None, 1024, 1024)),                  # W3 int8
        pl.BlockSpec((None, 1, 1024), cap_idx),           # s3
        pl.BlockSpec((None, 1, 1024), cap_idx),           # b3
        weight_spec((None, 1024, 512)),                   # Wh int8
        pl.BlockSpec((None, 1, 512), cap_idx),            # sh
        pl.BlockSpec((None, 1, 512), cap_idx),            # bh
    ]

    # advisory cost estimate: memory-bound weight stream + modest MXU work
    flops = 2 * n_pad * (512 * 1024 + 1024 * 1024 + 1024 * 1024 + 1024 * 512) * C
    transcendentals = 2 * n_pad * 256 * C
    out_elems = (C if megacore else 1) * n_pad * 512
    bytes_accessed = (
        (w1q.size + w2q.size + w3q.size + whq.size) * 1            # int8 weights
        + (s1.size + b1.size + s2.size + b2.size
           + s3.size + b3.size + sh.size + bh.size) * 4            # f32 scale/bias
        + bt.size * 4 + loc.size * 4 * C + out_elems * 4)
    cost = pl.CostEstimate(flops=flops, transcendentals=transcendentals,
                           bytes_accessed=bytes_accessed)

    args = (loc, bt, w1q, s1, b1, w2q, s2, b2, w3q, s3, b3, whq, sh, bh)

    if megacore:
        out = pl.pallas_call(
            capsule_parallel_kernel,
            out_shape=jax.ShapeDtypeStruct((C, n_pad, 512), jnp.float32),
            grid=(C, tiles),
            in_specs=in_specs,
            out_specs=pl.BlockSpec((None, tile_n, 512), lambda c, n: (c, n, 0)),
            compiler_params=pltpu.CompilerParams(
                dimension_semantics=("parallel", "parallel"),
                vmem_limit_bytes=32 * 1024 * 1024),
            cost_estimate=cost,
        )(*args)
        out = jnp.sum(out, axis=0)                    # sum over sigma capsules
    else:
        # Single TC: capsule axis is an in-kernel reduction; the (n_pad, 512)
        # output stays VMEM-resident and is written back exactly once.
        out = pl.pallas_call(
            capsule_accumulate_kernel,
            out_shape=jax.ShapeDtypeStruct((n_pad, 512), jnp.float32),
            grid=(C, tiles),                          # tiles == 1 here
            in_specs=in_specs,
            out_specs=pl.BlockSpec((tile_n, 512), lambda c, n: (0, 0)),
            compiler_params=pltpu.CompilerParams(
                dimension_semantics=("arbitrary", "arbitrary"),
                vmem_limit_bytes=32 * 1024 * 1024),
            cost_estimate=cost,
        )(*args)

    if n_pad != N:
        out = out[:N]
    return out


# ----- pure-JAX reference (same int8/bf16 numerics, for correctness) ---------
def location_encoder_reference(location, params):
    (bt, w1q, s1, b1, w2q, s2, b2, w3q, s3, b3, whq, sh, bh) = params
    loc = equal_earth_projection(location.astype(jnp.float32))

    def qmm(x, q, s):
        return jnp.dot(x.astype(jnp.bfloat16), q.astype(jnp.bfloat16),
                       preferred_element_type=jnp.float32) * s

    total = None
    for c in range(bt.shape[0]):
        vp = TWO_PI * (loc[:, 0:1] * bt[c, 0:1, :] + loc[:, 1:2] * bt[c, 1:2, :])
        enc = jnp.concatenate([jnp.cos(vp), jnp.sin(vp)], axis=-1)
        h = jax.nn.relu(qmm(enc, w1q[c], s1[c]) + b1[c])
        h = jax.nn.relu(qmm(h, w2q[c], s2[c]) + b2[c])
        h = jax.nn.relu(qmm(h, w3q[c], s3[c]) + b3[c])
        y = qmm(h, whq[c], sh[c]) + bh[c]
        total = y if total is None else total + y
    return total


# ----- deterministic synthetic parameter init --------------------------------
def _quantize_per_out_channel(w):
    # weight-only int8: per-output-column absmax scale (f32), int8 mantissa
    amax = jnp.max(jnp.abs(w), axis=-2, keepdims=True)
    scale = jnp.maximum(amax, 1e-8) / 127.0
    q = jnp.clip(jnp.round(w / scale), -127.0, 127.0).astype(jnp.int8)
    return q, scale.astype(jnp.float32)


def init_params(key, sigmas=(1.0, 16.0, 256.0)):
    n = len(sigmas)
    ks = jax.random.split(key, 9)

    # GaussianEncoding b ~ sigma * N(0,1); stored pre-transposed: (C, 2, 256)
    bt = (jax.random.normal(ks[0], (n, 2, 256), jnp.float32)
          * jnp.asarray(sigmas, jnp.float32)[:, None, None])

    def linear(kw, kb, fan_in, fan_out):
        bound = 1.0 / float(fan_in) ** 0.5
        w = jax.random.uniform(kw, (n, fan_in, fan_out), jnp.float32, -bound, bound)
        b = jax.random.uniform(kb, (n, 1, fan_out), jnp.float32, -bound, bound)
        q, s = _quantize_per_out_channel(w)
        return q, s, b

    w1q, s1, b1 = linear(ks[1], ks[2], 512, 1024)
    w2q, s2, b2 = linear(ks[3], ks[4], 1024, 1024)
    w3q, s3, b3 = linear(ks[5], ks[6], 1024, 1024)
    whq, sh, bh = linear(ks[7], ks[8], 1024, 512)
    return (bt, w1q, s1, b1, w2q, s2, b2, w3q, s3, b3, whq, sh, bh)


if __name__ == "__main__":
    key = jax.random.PRNGKey(0)
    kp, kloc = jax.random.split(key)

    params = init_params(kp)

    # batch of 8 (lat, lon) pairs in degrees
    N = 8
    klat, klon = jax.random.split(kloc)
    lat = jax.random.uniform(klat, (N,), jnp.float32, -90.0, 90.0)
    lon = jax.random.uniform(klon, (N,), jnp.float32, -180.0, 180.0)
    location = jnp.stack([lat, lon], axis=1)          # (8, 2)

    out = jax.jit(location_encoder_forward)(location, params)
    out = jax.block_until_ready(out)

    ref = jax.block_until_ready(location_encoder_reference(location, params))

    assert out.shape == (N, 512) and out.dtype == jnp.float32
    assert jnp.allclose(out, ref, rtol=1e-2, atol=2e-2), "mismatch vs reference"

    print("KERNEL_OK")
</pallas_src>

<mosaic_0001>
module attributes {stable_mosaic.version = 11 : i64} {
  func.func @capsule_accumulate_kernel(%arg0: i32, %arg1: i32, %arg2: memref<8x2xf32, #tpu.memory_space<vmem>>, %arg3: memref<1x2x256xf32, #tpu.memory_space<vmem>>, %arg4: memref<1x512x1024xi8, #tpu.memory_space<vmem>>, %arg5: memref<1x1x1024xf32, #tpu.memory_space<vmem>>, %arg6: memref<1x1x1024xf32, #tpu.memory_space<vmem>>, %arg7: memref<1x1024x1024xi8, #tpu.memory_space<vmem>>, %arg8: memref<1x1x1024xf32, #tpu.memory_space<vmem>>, %arg9: memref<1x1x1024xf32, #tpu.memory_space<vmem>>, %arg10: memref<1x1024x1024xi8, #tpu.memory_space<vmem>>, %arg11: memref<1x1x1024xf32, #tpu.memory_space<vmem>>, %arg12: memref<1x1x1024xf32, #tpu.memory_space<vmem>>, %arg13: memref<1x1024x512xi8, #tpu.memory_space<vmem>>, %arg14: memref<1x1x512xf32, #tpu.memory_space<vmem>>, %arg15: memref<1x1x512xf32, #tpu.memory_space<vmem>>, %arg16: memref<8x512xf32, #tpu.memory_space<vmem>>) attributes {dimension_semantics = [#tpu.dimension_semantics<arbitrary>, #tpu.dimension_semantics<arbitrary>], iteration_bounds = array<i64: 3, 1>, scalar_prefetch = 0 : i64, scratch_operands = 0 : i64, tpu.core_type = #tpu.core_type<tc>, window_params = [{transform_indices = @transform_0, window_bounds = array<i64: 8, 2>}, {transform_indices = @transform_1, window_bounds = array<i64: 1, 2, 256>}, {transform_indices = @transform_2, window_bounds = array<i64: 1, 512, 1024>}, {transform_indices = @transform_3, window_bounds = array<i64: 1, 1, 1024>}, {transform_indices = @transform_4, window_bounds = array<i64: 1, 1, 1024>}, {transform_indices = @transform_5, window_bounds = array<i64: 1, 1024, 1024>}, {transform_indices = @transform_6, window_bounds = array<i64: 1, 1, 1024>}, {transform_indices = @transform_7, window_bounds = array<i64: 1, 1, 1024>}, {transform_indices = @transform_8, window_bounds = array<i64: 1, 1024, 1024>}, {transform_indices = @transform_9, window_bounds = array<i64: 1, 1, 1024>}, {transform_indices = @transform_10, window_bounds = array<i64: 1, 1, 1024>}, {transform_indices = @transform_11, window_bounds = array<i64: 1, 1024, 512>}, {transform_indices = @transform_12, window_bounds = array<i64: 1, 1, 512>}, {transform_indices = @transform_13, window_bounds = array<i64: 1, 1, 512>}, {pipeline_mode = #tpu.pipeline_mode<synchronous>, transform_indices = @transform_14, window_bounds = array<i64: 8, 512>}]} {
    %c0 = arith.constant 0 : index
    %c0_0 = arith.constant 0 : index
    %0 = vector.load %arg2[%c0, %c0_0] : memref<8x2xf32, #tpu.memory_space<vmem>>, vector<8x2xf32>
    %c0_1 = arith.constant 0 : index
    %c0_2 = arith.constant 0 : index
    %c0_3 = arith.constant 0 : index
    %1 = vector.load %arg3[%c0_1, %c0_2, %c0_3] : memref<1x2x256xf32, #tpu.memory_space<vmem>>, vector<1x2x256xf32>
    %2 = vector.shape_cast %1 : vector<1x2x256xf32> to vector<2x256xf32>
    %3 = vector.extract_strided_slice %0 {offsets = [0, 0], sizes = [8, 1], strides = [1, 1]} : vector<8x2xf32> to vector<8x1xf32>
    %4 = vector.extract_strided_slice %2 {offsets = [0, 0], sizes = [1, 256], strides = [1, 1]} : vector<2x256xf32> to vector<1x256xf32>
    %5 = vector.broadcast %3 : vector<8x1xf32> to vector<8x256xf32>
    %6 = vector.broadcast %4 : vector<1x256xf32> to vector<8x256xf32>
    %7 = arith.mulf %5, %6 : vector<8x256xf32>
    %8 = vector.extract_strided_slice %0 {offsets = [0, 1], sizes = [8, 1], strides = [1, 1]} : vector<8x2xf32> to vector<8x1xf32>
    %9 = vector.extract_strided_slice %2 {offsets = [1, 0], sizes = [1, 256], strides = [1, 1]} : vector<2x256xf32> to vector<1x256xf32>
    %10 = vector.broadcast %8 : vector<8x1xf32> to vector<8x256xf32>
    %11 = vector.broadcast %9 : vector<1x256xf32> to vector<8x256xf32>
    %12 = arith.mulf %10, %11 : vector<8x256xf32>
    %13 = arith.addf %7, %12 : vector<8x256xf32>
    %cst = arith.constant 6.28318548 : f32
    %14 = vector.broadcast %cst : f32 to vector<8x256xf32>
    %15 = arith.mulf %14, %13 : vector<8x256xf32>
    %16 = math.cos %15 : vector<8x256xf32>
    %17 = arith.truncf %16 : vector<8x256xf32> to vector<8x256xbf16>
    %18 = math.sin %15 : vector<8x256xf32>
    %19 = arith.truncf %18 : vector<8x256xf32> to vector<8x256xbf16>
    %c0_4 = arith.constant 0 : index
    %c0_5 = arith.constant 0 : index
    %c0_6 = arith.constant 0 : index
    %20 = vector.load %arg4[%c0_4, %c0_5, %c0_6] : memref<1x512x1024xi8, #tpu.memory_space<vmem>>, vector<1x256x1024xi8>
    %21 = vector.shape_cast %20 : vector<1x256x1024xi8> to vector<256x1024xi8>
    %22 = arith.sitofp %21 : vector<256x1024xi8> to vector<256x1024xbf16>
    %cst_7 = arith.constant dense<0.000000e+00> : vector<8x1024xf32>
    %23 = tpu.matmul %17, %22, %cst_7 {dimension_numbers = #tpu.dot_dimension_numbers<[1], [0], [0], [1], [0, 0, 1, 1], [], []>} : vector<8x256xbf16>, vector<256x1024xbf16>, vector<8x1024xf32> -> vector<8x1024xf32>
    %c0_8 = arith.constant 0 : index
    %c256 = arith.constant 256 : index
    %c0_9 = arith.constant 0 : index
    %24 = vector.load %arg4[%c0_8, %c256, %c0_9] : memref<1x512x1024xi8, #tpu.memory_space<vmem>>, vector<1x256x1024xi8>
    %25 = vector.shape_cast %24 : vector<1x256x1024xi8> to vector<256x1024xi8>
    %26 = arith.sitofp %25 : vector<256x1024xi8> to vector<256x1024xbf16>
    %cst_10 = arith.constant dense<0.000000e+00> : vector<8x1024xf32>
    %27 = tpu.matmul %19, %26, %cst_10 {dimension_numbers = #tpu.dot_dimension_numbers<[1], [0], [0], [1], [0, 0, 1, 1], [], []>} : vector<8x256xbf16>, vector<256x1024xbf16>, vector<8x1024xf32> -> vector<8x1024xf32>
    %28 = arith.addf %23, %27 : vector<8x1024xf32>
    %c0_11 = arith.constant 0 : index
    %c0_12 = arith.constant 0 : index
    %c0_13 = arith.constant 0 : index
    %29 = vector.load %arg5[%c0_11, %c0_12, %c0_13] : memref<1x1x1024xf32, #tpu.memory_space<vmem>>, vector<1x1x1024xf32>
    %30 = vector.shape_cast %29 : vector<1x1x1024xf32> to vector<1x1024xf32>
    %31 = vector.broadcast %30 : vector<1x1024xf32> to vector<8x1024xf32>
    %32 = arith.mulf %28, %31 : vector<8x1024xf32>
    %c0_14 = arith.constant 0 : index
    %c0_15 = arith.constant 0 : index
    %c0_16 = arith.constant 0 : index
    %33 = vector.load %arg6[%c0_14, %c0_15, %c0_16] : memref<1x1x1024xf32, #tpu.memory_space<vmem>>, vector<1x1x1024xf32>
    %34 = vector.shape_cast %33 : vector<1x1x1024xf32> to vector<1x1024xf32>
    %35 = vector.broadcast %34 : vector<1x1024xf32> to vector<8x1024xf32>
    %36 = arith.addf %32, %35 : vector<8x1024xf32>
    %cst_17 = arith.constant 0.000000e+00 : f32
    %37 = vector.broadcast %cst_17 : f32 to vector<8x1024xf32>
    %38 = arith.maximumf %36, %37 : vector<8x1024xf32>
    %39 = arith.truncf %38 : vector<8x1024xf32> to vector<8x1024xbf16>
    %c0_18 = arith.constant 0 : index
    %c0_19 = arith.constant 0 : index
    %c0_20 = arith.constant 0 : index
    %40 = vector.load %arg7[%c0_18, %c0_19, %c0_20] : memref<1x1024x1024xi8, #tpu.memory_space<vmem>>, vector<1x1024x1024xi8>
    %41 = vector.shape_cast %40 : vector<1x1024x1024xi8> to vector<1024x1024xi8>
    %42 = arith.sitofp %41 : vector<1024x1024xi8> to vector<1024x1024xbf16>
    %cst_21 = arith.constant dense<0.000000e+00> : vector<8x1024xf32>
    %43 = tpu.matmul %39, %42, %cst_21 {dimension_numbers = #tpu.dot_dimension_numbers<[1], [0], [0], [1], [0, 0, 1, 1], [], []>} : vector<8x1024xbf16>, vector<1024x1024xbf16>, vector<8x1024xf32> -> vector<8x1024xf32>
    %c0_22 = arith.constant 0 : index
    %c0_23 = arith.constant 0 : index
    %c0_24 = arith.constant 0 : index
    %44 = vector.load %arg8[%c0_22, %c0_23, %c0_24] : memref<1x1x1024xf32, #tpu.memory_space<vmem>>, vector<1x1x1024xf32>
    %45 = vector.shape_cast %44 : vector<1x1x1024xf32> to vector<1x1024xf32>
    %46 = vector.broadcast %45 : vector<1x1024xf32> to vector<8x1024xf32>
    %47 = arith.mulf %43, %46 : vector<8x1024xf32>
    %c0_25 = arith.constant 0 : index
    %c0_26 = arith.constant 0 : index
    %c0_27 = arith.constant 0 : index
    %48 = vector.load %arg9[%c0_25, %c0_26, %c0_27] : memref<1x1x1024xf32, #tpu.memory_space<vmem>>, vector<1x1x1024xf32>
    %49 = vector.shape_cast %48 : vector<1x1x1024xf32> to vector<1x1024xf32>
    %50 = vector.broadcast %49 : vector<1x1024xf32> to vector<8x1024xf32>
    %51 = arith.addf %47, %50 : vector<8x1024xf32>
    %cst_28 = arith.constant 0.000000e+00 : f32
    %52 = vector.broadcast %cst_28 : f32 to vector<8x1024xf32>
    %53 = arith.maximumf %51, %52 : vector<8x1024xf32>
    %54 = arith.truncf %53 : vector<8x1024xf32> to vector<8x1024xbf16>
    %c0_29 = arith.constant 0 : index
    %c0_30 = arith.constant 0 : index
    %c0_31 = arith.constant 0 : index
    %55 = vector.load %arg10[%c0_29, %c0_30, %c0_31] : memref<1x1024x1024xi8, #tpu.memory_space<vmem>>, vector<1x1024x1024xi8>
    %56 = vector.shape_cast %55 : vector<1x1024x1024xi8> to vector<1024x1024xi8>
    %57 = arith.sitofp %56 : vector<1024x1024xi8> to vector<1024x1024xbf16>
    %cst_32 = arith.constant dense<0.000000e+00> : vector<8x1024xf32>
    %58 = tpu.matmul %54, %57, %cst_32 {dimension_numbers = #tpu.dot_dimension_numbers<[1], [0], [0], [1], [0, 0, 1, 1], [], []>} : vector<8x1024xbf16>, vector<1024x1024xbf16>, vector<8x1024xf32> -> vector<8x1024xf32>
    %c0_33 = arith.constant 0 : index
    %c0_34 = arith.constant 0 : index
    %c0_35 = arith.constant 0 : index
    %59 = vector.load %arg11[%c0_33, %c0_34, %c0_35] : memref<1x1x1024xf32, #tpu.memory_space<vmem>>, vector<1x1x1024xf32>
    %60 = vector.shape_cast %59 : vector<1x1x1024xf32> to vector<1x1024xf32>
    %61 = vector.broadcast %60 : vector<1x1024xf32> to vector<8x1024xf32>
    %62 = arith.mulf %58, %61 : vector<8x1024xf32>
    %c0_36 = arith.constant 0 : index
    %c0_37 = arith.constant 0 : index
    %c0_38 = arith.constant 0 : index
    %63 = vector.load %arg12[%c0_36, %c0_37, %c0_38] : memref<1x1x1024xf32, #tpu.memory_space<vmem>>, vector<1x1x1024xf32>
    %64 = vector.shape_cast %63 : vector<1x1x1024xf32> to vector<1x1024xf32>
    %65 = vector.broadcast %64 : vector<1x1024xf32> to vector<8x1024xf32>
    %66 = arith.addf %62, %65 : vector<8x1024xf32>
    %cst_39 = arith.constant 0.000000e+00 : f32
    %67 = vector.broadcast %cst_39 : f32 to vector<8x1024xf32>
    %68 = arith.maximumf %66, %67 : vector<8x1024xf32>
    %69 = arith.truncf %68 : vector<8x1024xf32> to vector<8x1024xbf16>
    %c0_40 = arith.constant 0 : index
    %c0_41 = arith.constant 0 : index
    %c0_42 = arith.constant 0 : index
    %70 = vector.load %arg13[%c0_40, %c0_41, %c0_42] : memref<1x1024x512xi8, #tpu.memory_space<vmem>>, vector<1x1024x512xi8>
    %71 = vector.shape_cast %70 : vector<1x1024x512xi8> to vector<1024x512xi8>
    %72 = arith.sitofp %71 : vector<1024x512xi8> to vector<1024x512xbf16>
    %cst_43 = arith.constant dense<0.000000e+00> : vector<8x512xf32>
    %73 = tpu.matmul %69, %72, %cst_43 {dimension_numbers = #tpu.dot_dimension_numbers<[1], [0], [0], [1], [0, 0, 1, 1], [], []>} : vector<8x1024xbf16>, vector<1024x512xbf16>, vector<8x512xf32> -> vector<8x512xf32>
    %c0_44 = arith.constant 0 : index
    %c0_45 = arith.constant 0 : index
    %c0_46 = arith.constant 0 : index
    %74 = vector.load %arg14[%c0_44, %c0_45, %c0_46] : memref<1x1x512xf32, #tpu.memory_space<vmem>>, vector<1x1x512xf32>
    %75 = vector.shape_cast %74 : vector<1x1x512xf32> to vector<1x512xf32>
    %76 = vector.broadcast %75 : vector<1x512xf32> to vector<8x512xf32>
    %77 = arith.mulf %73, %76 : vector<8x512xf32>
    %c0_47 = arith.constant 0 : index
    %c0_48 = arith.constant 0 : index
    %c0_49 = arith.constant 0 : index
    %78 = vector.load %arg15[%c0_47, %c0_48, %c0_49] : memref<1x1x512xf32, #tpu.memory_space<vmem>>, vector<1x1x512xf32>
    %79 = vector.shape_cast %78 : vector<1x1x512xf32> to vector<1x512xf32>
    %80 = vector.broadcast %79 : vector<1x512xf32> to vector<8x512xf32>
    %81 = arith.addf %77, %80 : vector<8x512xf32>
    %c0_i32 = arith.constant 0 : i32
    %82 = arith.cmpi eq, %arg0, %c0_i32 : i32
    %83 = arith.extui %82 : i1 to i32
    %c0_i32_50 = arith.constant 0 : i32
    %84 = arith.cmpi ne, %83, %c0_i32_50 : i32
    scf.if %84 {
      %c0_53 = arith.constant 0 : index
      %c0_54 = arith.constant 0 : index
      %88 = vector.load %arg16[%c0_53, %c0_54] : memref<8x512xf32, #tpu.memory_space<vmem>>, vector<8x512xf32>
      tpu.vector_store %arg16[%c0_53, %c0_54], %81 {strides = array<i32>} : memref<8x512xf32, #tpu.memory_space<vmem>>, vector<8x512xf32>,
    } else {
    }
    %c0_i32_51 = arith.constant 0 : i32
    %85 = arith.cmpi sgt, %arg0, %c0_i32_51 : i32
    %86 = arith.extui %85 : i1 to i32
    %c0_i32_52 = arith.constant 0 : i32
    %87 = arith.cmpi ne, %86, %c0_i32_52 : i32
    scf.if %87 {
      %c0_53 = arith.constant 0 : index
      %c0_54 = arith.constant 0 : index
      %88 = vector.load %arg16[%c0_53, %c0_54] : memref<8x512xf32, #tpu.memory_space<vmem>>, vector<8x512xf32>
      %89 = arith.addf %88, %81 : vector<8x512xf32>
      %c0_55 = arith.constant 0 : index
      %c0_56 = arith.constant 0 : index
      %90 = vector.load %arg16[%c0_55, %c0_56] : memref<8x512xf32, #tpu.memory_space<vmem>>, vector<8x512xf32>
      tpu.vector_store %arg16[%c0_55, %c0_56], %89 {strides = array<i32>} : memref<8x512xf32, #tpu.memory_space<vmem>>, vector<8x512xf32>,
    } else {
    }
    return
  }
  func.func @transform_0(%arg0: i32, %arg1: i32) -> (i32, i32) {
    %c0_i32 = arith.constant 0 : i32
    %c0_i32_0 = arith.constant 0 : i32
    return %arg1, %c0_i32 : i32, i32
  }
  func.func @transform_1(%arg0: i32, %arg1: i32) -> (i32, i32, i32) {
    %c0_i32 = arith.constant 0 : i32
    %c0_i32_0 = arith.constant 0 : i32
    %c0_i32_1 = arith.constant 0 : i32
    return %arg0, %c0_i32, %c0_i32_0 : i32, i32, i32
  }
  func.func @transform_2(%arg0: i32, %arg1: i32) -> (i32, i32, i32) {
    %c0_i32 = arith.constant 0 : i32
    %c0_i32_0 = arith.constant 0 : i32
    %c0_i32_1 = arith.constant 0 : i32
    return %arg0, %c0_i32, %c0_i32_0 : i32, i32, i32
  }
  func.func @transform_3(%arg0: i32, %arg1: i32) -> (i32, i32, i32) {
    %c0_i32 = arith.constant 0 : i32
    %c0_i32_0 = arith.constant 0 : i32
    %c0_i32_1 = arith.constant 0 : i32
    return %arg0, %c0_i32, %c0_i32_0 : i32, i32, i32
  }
  func.func @transform_4(%arg0: i32, %arg1: i32) -> (i32, i32, i32) {
    %c0_i32 = arith.constant 0 : i32
    %c0_i32_0 = arith.constant 0 : i32
    %c0_i32_1 = arith.constant 0 : i32
    return %arg0, %c0_i32, %c0_i32_0 : i32, i32, i32
  }
  func.func @transform_5(%arg0: i32, %arg1: i32) -> (i32, i32, i32) {
    %c0_i32 = arith.constant 0 : i32
    %c0_i32_0 = arith.constant 0 : i32
    %c0_i32_1 = arith.constant 0 : i32
    return %arg0, %c0_i32, %c0_i32_0 : i32, i32, i32
  }
  func.func @transform_6(%arg0: i32, %arg1: i32) -> (i32, i32, i32) {
    %c0_i32 = arith.constant 0 : i32
    %c0_i32_0 = arith.constant 0 : i32
    %c0_i32_1 = arith.constant 0 : i32
    return %arg0, %c0_i32, %c0_i32_0 : i32, i32, i32
  }
  func.func @transform_7(%arg0: i32, %arg1: i32) -> (i32, i32, i32) {
    %c0_i32 = arith.constant 0 : i32
    %c0_i32_0 = arith.constant 0 : i32
    %c0_i32_1 = arith.constant 0 : i32
    return %arg0, %c0_i32, %c0_i32_0 : i32, i32, i32
  }
  func.func @transform_8(%arg0: i32, %arg1: i32) -> (i32, i32, i32) {
    %c0_i32 = arith.constant 0 : i32
    %c0_i32_0 = arith.constant 0 : i32
    %c0_i32_1 = arith.constant 0 : i32
    return %arg0, %c0_i32, %c0_i32_0 : i32, i32, i32
  }
  func.func @transform_9(%arg0: i32, %arg1: i32) -> (i32, i32, i32) {
    %c0_i32 = arith.constant 0 : i32
    %c0_i32_0 = arith.constant 0 : i32
    %c0_i32_1 = arith.constant 0 : i32
    return %arg0, %c0_i32, %c0_i32_0 : i32, i32, i32
  }
  func.func @transform_10(%arg0: i32, %arg1: i32) -> (i32, i32, i32) {
    %c0_i32 = arith.constant 0 : i32
    %c0_i32_0 = arith.constant 0 : i32
    %c0_i32_1 = arith.constant 0 : i32
    return %arg0, %c0_i32, %c0_i32_0 : i32, i32, i32
  }
  func.func @transform_11(%arg0: i32, %arg1: i32) -> (i32, i32, i32) {
    %c0_i32 = arith.constant 0 : i32
    %c0_i32_0 = arith.constant 0 : i32
    %c0_i32_1 = arith.constant 0 : i32
    return %arg0, %c0_i32, %c0_i32_0 : i32, i32, i32
  }
  func.func @transform_12(%arg0: i32, %arg1: i32) -> (i32, i32, i32) {
    %c0_i32 = arith.constant 0 : i32
    %c0_i32_0 = arith.constant 0 : i32
    %c0_i32_1 = arith.constant 0 : i32
    return %arg0, %c0_i32, %c0_i32_0 : i32, i32, i32
  }
  func.func @transform_13(%arg0: i32, %arg1: i32) -> (i32, i32, i32) {
    %c0_i32 = arith.constant 0 : i32
    %c0_i32_0 = arith.constant 0 : i32
    %c0_i32_1 = arith.constant 0 : i32
    return %arg0, %c0_i32, %c0_i32_0 : i32, i32, i32
  }
  func.func @transform_14(%arg0: i32, %arg1: i32) -> (i32, i32) {
    %c0_i32 = arith.constant 0 : i32
    %c0_i32_0 = arith.constant 0 : i32
    %c0_i32_1 = arith.constant 0 : i32
    return %c0_i32, %c0_i32_0 : i32, i32
  }
}

</mosaic_0001>

<bundles_post_ra>
// kernel: location_encoder_forward.1
= control target key start
LH: loop header
LB: loop body
LE: loop exit
PB: predicated region body
PF: predicated region fallthrough
CT: control target
= control target key end

     0   :  { %s9172_s0 = inlined_call_operand.vmem [shape: f32[8,2], index: 0, kind: input, shape index: {}]   ;;  %s9173_s1 = inlined_call_operand.hbm [shape: f32[3,2,256], index: 1, kind: input, shape index: {}]   ;;  %s9174_s2 = inlined_call_operand.hbm [shape: s8[3,512,1024], index: 2, kind: input, shape index: {}]   ;;  %s9175_s3 = inlined_call_operand.hbm [shape: f32[3,1,1024], index: 3, kind: input, shape index: {}]   ;;  %s9176_s4 = inlined_call_operand.hbm [shape: f32[3,1,1024], index: 4, kind: input, shape index: {}]   ;;  %s9177_s5 = inlined_call_operand.hbm [shape: s8[3,1024,1024], index: 5, kind: input, shape index: {}]   ;;  %s9178_s6 = inlined_call_operand.hbm [shape: f32[3,1,1024], index: 6, kind: input, shape index: {}]   ;;  %s9179_s7 = inlined_call_operand.hbm [shape: f32[3,1,1024], index: 7, kind: input, shape index: {}]   ;;  %s9180_s8 = inlined_call_operand.hbm [shape: s8[3,1024,1024], index: 8, kind: input, shape index: {}]   ;;  %s9181_s9 = inlined_call_operand.hbm [shape: f32[3,1,1024], index: 9, kind: input, shape index: {}]   ;;  %s9182_s10 = inlined_call_operand.hbm [shape: f32[3,1,1024], index: 10, kind: input, shape index: {}]   ;;  %s9183_s11 = inlined_call_operand.hbm [shape: s8[3,1024,512], index: 11, kind: input, shape index: {}]   ;;  %s9184_s12 = inlined_call_operand.hbm [shape: f32[3,1,512], index: 12, kind: input, shape index: {}]   ;;  %s9185_s13 = inlined_call_operand.hbm [shape: f32[3,1,512], index: 13, kind: input, shape index: {}]   ;;  %s9186_s14 = inlined_call_operand.hbm [shape: f32[8,512], index: 14, kind: output, shape index: {}]  }
   0x1   :  { %9210 = sst [smem:[#allocation41_spill]] %s9172_s0 }
   0x2   :  { %9211 = sst [smem:[#allocation42_spill]] %s9174_s2 }
   0x3   :  { %9212 = sst [smem:[#allocation43_spill]] %s9176_s4 }
   0x4   :  { %9213 = sst [smem:[#allocation44_spill]] %s9178_s6 }
   0x5   :  { %9214 = sst [smem:[#allocation45_spill]] %s9180_s8 }
   0x6   :  { %9215 = sst [smem:[#allocation46_spill]] %s9182_s10 }
   0x7   :  { %9216 = sst [smem:[#allocation47_spill]] %s9185_s13 }
   0x8   :  { %9217 = sst [smem:[#allocation48_spill]] %s9186_s14 }
   0x9   :  { %19 = vsyncpa [#allocation3], 0 }
   0xa   :  { %21 = vsyncpa [#allocation3 + $0x1], 0 }
   0xb   :  { %22 = vsyncpa [#allocation6], 0 }
   0xc   :  { %24 = vsyncpa [#allocation6 + $0x1], 0 }
   0xd   :  { %25 = vsyncpa [#allocation9], 0 }
   0xe   :  { %27 = vsyncpa [#allocation9 + $0x1], 0 }
   0xf   :  { %28 = vsyncpa [#allocation12], 0 }
  0x10   :  { %30 = vsyncpa [#allocation12 + $0x1], 0 }
  0x11   :  { %31 = vsyncpa [#allocation15], 0 }
  0x12   :  { %33 = vsyncpa [#allocation15 + $0x1], 0 }
  0x13   :  { %34 = vsyncpa [#allocation18], 0 }
  0x14   :  { %36 = vsyncpa [#allocation18 + $0x1], 0 }
  0x15   :  { %37 = vsyncpa [#allocation21], 0 }
  0x16   :  { %39 = vsyncpa [#allocation21 + $0x1], 0 }
  0x17   :  { %40 = vsyncpa [#allocation4], 0  ;;  %s7372_s29 = smov 0   ;;  %s7374_s30 = smov 0  }
  0x18   :  { %s7376_s15 = smov 0   ;;  %s7378_s16 = smov 0  }
  0x19   :  { %s7380_s17 = smov 0   ;;  %s7382_s18 = smov 0  }
  0x1a LB: > { %9218 = sst [smem:[#allocation32_spill]] %s7253_s30  ;;  %s7401_s19 = sadd.s32 4294967295, %s7269_s18   ;;  %s7269_s18 = sphi %s7382_s18, %s46_s18   ;;  %s7265_s17 = sphi %s7380_s17, %s9265_s17   ;;  %s7261_s16 = sphi %s7378_s16, %s9264_s16   ;;  %s7257_s15 = sphi %s7376_s15, %s9263_s15   ;;  %s7253_s30 = sphi %s7374_s30, %s9262_s30   ;;  %s7249_s29 = sphi %s7372_s29, %s9261_s29  }
  0x1b   : > { %9219 = sst [smem:[#allocation33_spill]] %s7257_s15  ;;  %s58_s20 = sadd.s32 1, %s7265_s17 }
  0x1c   : > { %9220 = sst [smem:[#allocation34_spill]] %s7261_s16  ;;  %p60_p0 = scmp.ge.s32.totalorder %s58_s20, 3 }
  0x1d   : > { %9221 = sst [smem:[#allocation35_spill]] %s7265_s17  ;;  %s91_s21 = sadd.s32 1, %s7257_s15 }
  0x1e   : > { %9222 = sst [smem:[#allocation36_spill]] %s7269_s18  ;;  %p98_p1 = scmp.ne.s32.totalorder %s7257_s15, %s7253_s30 }
  0x1f   : > { %9223 = sst [smem:[#allocation37_spill]] %s7401_s19  ;;  %p99_p2 = scmp.eq.s32.totalorder %s7269_s18, 0 }
  0x20   : > { %s9267_s20 = smov (%p60_p0, %s58_s20), 0  ;;  %p104_p4 = scmp.ne.s32.totalorder %s7253_s30, %s7249_s29 }
  0x21   : > { %9224 = sst [smem:[#allocation38_spill]] %s9267_s20  ;;  %p7410_p3 = por %p99_p2, %p98_p1 }
  0x22   : > { %s88_s23 = ssub.s32 %s7265_s17, %s9267_s20  ;;  %p105_p5 = scmp.eq.s32.totalorder %s7401_s19, 0 }
  0x23   : > { %p89_p6 = scmp.eq.s32.totalorder %s88_s23, 0  ;;  %p6459_p8 = scmp.ge.s32.totalorder %s7269_s18, 3 }
  0x24   : > { %p7418_p7 = por %p105_p5, %p104_p4  ;;  %s7427_s26 = sand.u32 (!%p6459_p8), 1, %s7257_s15  }
  0x25   : > { %s7423_s25 = scalar_select %p89_p6, %s7257_s15, %s91_s21  }
  0x26   : > { %s9226_s24 = scalar_select %p7418_p7, 1, 0 }
  0x27   : > { %9228 = sst [smem:[#allocation40_spill]] %s7423_s25  ;;  %464 = sbr.rel (%p6459_p8) target bundleno = 381 (0x17d), region = 20 }
  0x28   : > { %9227 = sst [smem:[#allocation39_spill]] %s9226_s24  ;;  %s7430_s27 = sand.u32 (!%p6459_p8), 1, %s7269_s18  }
  0x29   : > { %s6463_s28 = sshll.u32 (!%p6459_p8), %s7427_s26, 10  ;;  %s9192_s29 = sshll.u32 (!%p6459_p8), %s7265_s17, 14 }
  0x2a   : > { %s9229_s2 = sld [smem:[#allocation42_spill]] (!%p6459_p8)  ;;  %s491_s25 = scalar_lea.vmem (!%p6459_p8), [#allocation5], %s6463_s28 }
  0x2b   : > { %s498_s15 = sshll.u32 (!%p6459_p8), %s491_s25, 4  ;;  %s9199_s14 = scalar_lea.sflag (!%p6459_p8), [#allocation6], %s7430_s27  ;;  %s7443_s15 = int_to_ptr.vmem [resolvable:$true] %s498_s15 }
  0x30   : > { %s7439_s20 = scalar_lea.hbm %s9229_s2, %s9192_s29  ;;  %s6805_s21 = scalar_lea.hbm %s9229_s2, 49152 }
  0x31   : > { %s6801_s16 = scalar_lea.hbm %s7439_s20, 16384  ;;  %p6806_p12 = scmp.lt.u32.totalorder %s7439_s20, %s9229_s2 }
  0x32   : > { %p6802_p9 = scmp.ne.s32.totalorder %s7439_s20, %s6801_s16  ;;  %p6807_p13 = scmp.lt.u32.totalorder %s6805_s21, %s6801_s16 }
  0x33   : > { %p6809_p1 = scmp.lt.u32.totalorder %s6801_s16, %s7439_s20 }
  0x34   : > { %p6803_p10 = pnand %p6802_p9, %p7410_p3  ;;  %p6808_p0 = por %p6807_p13, %p6806_p12 }
  0x36   : > { %p6804_p11 = pneg %p6803_p10  ;;  %p6810_p2 = por %p6809_p1, %p6808_p0 }
  0x38   : > { %p6811_p4 = pnand %p6810_p2, %p6804_p11 }
  0x3a   : > { %6814 = shalt.err (!%p6811_p4)
}
  0x3b   : > { %s6815_s25 = scalar_lea.vmem %s7443_s15, 16384  ;;  %s7271_s0 = smov [#allocation5]  }
  0x3c   : > { %p6816_p5 = scmp.ne.s32.totalorder %s7443_s15, %s6815_s25  ;;  %s6819_s19 = sshll.u32 %s7271_s0, 4  ;;  %s6820_s19 = int_to_ptr.vmem [resolvable:$false] %s6819_s19 }
  0x3d   : > { %s6821_s29 = scalar_lea.vmem %s6820_s19, 32768  ;;  %p6822_p9 = scmp.lt.s32.totalorder %s7443_s15, %s6820_s19 }
  0x3e   : > { %p6817_p6 = pnand %p6816_p5, %p7410_p3  ;;  %p6823_p10 = scmp.lt.s32.totalorder %s6821_s29, %s6815_s25 }
  0x40   : > { %p6818_p8 = pneg %p6817_p6  ;;  %p6824_p12 = por %p6823_p10, %p6822_p9 }
  0x42   : > { %p6825_p13 = pnand %p6824_p12, %p6818_p8 }
  0x44   : > { %6828 = shalt.err (!%p6825_p13)
}
  0x45   : > { %s9200_s16 = smov 1024   ;;  %s9202_s21 = smov 64  }
  0x46   : > { %6693 = dma.hbm_to_vmem [thread:$0]  (%p7410_p3), %s7439_s20, 16384, %s7443_s15, %s9199_s14, %s9200_s16, %s9200_s16, %s9202_s21  }
  0x47   : > { %s9230_s23 = sshll.u32 %s7265_s17, 14  ;;  %s7481_s29 = scalar_lea.vmem [#allocation19], %s6463_s28 }
  0x48   : > { %s7477_s19 = scalar_lea.hbm %s9183_s11, %s9230_s23  ;;  %s7485_s24 = sshll.u32 %s7427_s26, 3 }
  0x49   : > { %s7488_s30 = sshll.u32 %s7265_s17, 7  ;;  %s9231_s4 = sld [smem:[#allocation43_spill]] }
  0x4a   : > { %s531_s20 = scalar_lea.vmem [#allocation8], %s7485_s24  ;;  %s9205_s23 = scalar_lea.sflag [#allocation9], %s7430_s27 }
  0x4b   : > { %s539_s28 = sshll.u32 %s531_s20, 4  ;;  %s540_s28 = int_to_ptr.vmem [resolvable:$true] %s539_s28 }
  0x4f   : > { %s7494_s15 = scalar_lea.hbm %s9231_s4, %s7488_s30  ;;  %s6833_s14 = scalar_lea.hbm %s9231_s4, 384 }
  0x50   : > { %s6829_s25 = scalar_lea.hbm %s7494_s15, 128  ;;  %p6834_p2 = scmp.lt.u32.totalorder %s7494_s15, %s9231_s4 }
  0x51   : > { %p6830_p11 = scmp.ne.s32.totalorder %s7494_s15, %s6829_s25  ;;  %p6835_p4 = scmp.lt.u32.totalorder %s6833_s14, %s6829_s25 }
  0x52   : > { %p6837_p6 = scmp.lt.u32.totalorder %s6829_s25, %s7494_s15 }
  0x53   : > { %p6831_p0 = pnand %p6830_p11, %p7410_p3  ;;  %p6836_p5 = por %p6835_p4, %p6834_p2 }
  0x55   : > { %p6832_p1 = pneg %p6831_p0  ;;  %p6838_p8 = por %p6837_p6, %p6836_p5 }
  0x57   : > { %p6839_p9 = pnand %p6838_p8, %p6832_p1 }
  0x59   : > { %6842 = shalt.err (!%p6839_p9)
}
  0x5a   : > { %s6843_s20 = scalar_lea.vmem %s540_s28, 128  ;;  %s7274_s16 = smov [#allocation8]  }
  0x5b   : > { %p6844_p10 = scmp.ne.s32.totalorder %s540_s28, %s6843_s20  ;;  %s6847_s21 = sshll.u32 %s7274_s16, 4  ;;  %s6848_s21 = int_to_ptr.vmem [resolvable:$false] %s6847_s21 }
  0x5c   : > { %s6849_s2 = scalar_lea.vmem %s6848_s21, 256  ;;  %p6850_p11 = scmp.lt.s32.totalorder %s540_s28, %s6848_s21 }
  0x5d   : > { %p6845_p12 = pnand %p6844_p10, %p7410_p3  ;;  %p6851_p0 = scmp.lt.s32.totalorder %s6849_s2, %s6843_s20 }
  0x5f   : > { %p6846_p13 = pneg %p6845_p12  ;;  %p6852_p7 = por %p6851_p0, %p6850_p11 }
  0x61   : > { %p6853_p2 = pnand %p6852_p7, %p6846_p13 }
  0x63   : > { %6856 = shalt.err (!%p6853_p2)
}
  0x64   : > { %6695 = dma.hbm_to_vmem [thread:$0]  (%p7410_p3), %s7494_s15, 128, %s540_s28, %s9205_s23  }
  0x65   : > { %s9232_s6 = sld [smem:[#allocation44_spill]]  ;;  %s571_s21 = scalar_lea.vmem [#allocation11], %s7485_s24 }
  0x66   : > { %s579_s0 = sshll.u32 %s571_s21, 4  ;;  %s9206_s18 = scalar_lea.sflag [#allocation12], %s7430_s27  ;;  %s580_s0 = int_to_ptr.vmem [resolvable:$true] %s579_s0 }
  0x6b   : > { %s7521_s25 = scalar_lea.hbm %s9232_s6, %s7488_s30  ;;  %s6861_s2 = scalar_lea.hbm %s9232_s6, 384 }
  0x6c   : > { %s6857_s20 = scalar_lea.hbm %s7521_s25, 128  ;;  %p6862_p5 = scmp.lt.u32.totalorder %s7521_s25, %s9232_s6 }
  0x6d   : > { %p6858_p7 = scmp.ne.s32.totalorder %s7521_s25, %s6857_s20  ;;  %p6863_p6 = scmp.lt.u32.totalorder %s6861_s2, %s6857_s20 }
  0x6e   : > { %p6865_p9 = scmp.lt.u32.totalorder %s6857_s20, %s7521_s25 }
  0x6f   : > { %p6859_p1 = pnand %p6858_p7, %p7410_p3  ;;  %p6864_p8 = por %p6863_p6, %p6862_p5 }
  0x71   : > { %p6860_p4 = pneg %p6859_p1  ;;  %p6866_p10 = por %p6865_p9, %p6864_p8 }
  0x73   : > { %p6867_p12 = pnand %p6866_p10, %p6860_p4 }
  0x75   : > { %6870 = shalt.err (!%p6867_p12)
}
  0x76   : > { %s6871_s21 = scalar_lea.vmem %s580_s0, 128  ;;  %s7275_s23 = smov [#allocation11]  }
  0x77   : > { %p6872_p13 = scmp.ne.s32.totalorder %s580_s0, %s6871_s21  ;;  %s6875_s13 = sshll.u32 %s7275_s23, 4  ;;  %s6876_s13 = int_to_ptr.vmem [resolvable:$false] %s6875_s13 }
  0x78   : > { %s6877_s15 = scalar_lea.vmem %s6876_s13, 256  ;;  %p6878_p2 = scmp.lt.s32.totalorder %s580_s0, %s6876_s13 }
  0x79   : > { %p6873_p11 = pnand %p6872_p13, %p7410_p3  ;;  %p6879_p7 = scmp.lt.s32.totalorder %s6877_s15, %s6871_s21 }
  0x7b   : > { %p6874_p0 = pneg %p6873_p11  ;;  %p6880_p1 = por %p6879_p7, %p6878_p2 }
  0x7d   : > { %p6881_p5 = pnand %p6880_p1, %p6874_p0 }
  0x7f   : > { %6884 = shalt.err (!%p6881_p5)
}
  0x80   : > { %6697 = dma.hbm_to_vmem [thread:$0]  (%p7410_p3), %s7521_s25, 128, %s580_s0, %s9206_s18  }
  0x81   : > { %s6539_s20 = sshll.u32 %s7265_s17, 15  ;;  %s9233_s23 = sshll.u32 %s7427_s26, 11 }
  0x82   : > { %s7548_s28 = scalar_lea.vmem [#allocation10], %s9233_s23  ;;  %s7554_s16 = scalar_lea.hbm %s9177_s5, %s6539_s20 }
  0x83   : > { %s9234_s8 = sld [smem:[#allocation45_spill]]  ;;  %s9235_s6 = smov %s9233_s23 }
  0x84   : > { %s609_s25 = scalar_lea.vmem [#allocation14], %s9235_s6  ;;  %s9207_s23 = scalar_lea.sflag [#allocation15], %s7430_s27 }
  0x85   : > { %s616_s0 = sshll.u32 %s609_s25, 4  ;;  %s7563_s0 = int_to_ptr.vmem [resolvable:$true] %s616_s0 }
  0x89   : > { %s7559_s4 = scalar_lea.hbm %s9234_s8, %s6539_s20  ;;  %s6889_s20 = scalar_lea.hbm %s9234_s8, 98304 }
  0x8a   : > { %s6885_s18 = scalar_lea.hbm %s7559_s4, 32768  ;;  %p6890_p9 = scmp.lt.u32.totalorder %s7559_s4, %s9234_s8 }
  0x8b   : > { %p6886_p4 = scmp.ne.s32.totalorder %s7559_s4, %s6885_s18  ;;  %p6891_p10 = scmp.lt.u32.totalorder %s6889_s20, %s6885_s18 }
  0x8c   : > { %p6893_p13 = scmp.lt.u32.totalorder %s6885_s18, %s7559_s4 }
  0x8d   : > { %p6887_p6 = pnand %p6886_p4, %p7410_p3  ;;  %p6892_p12 = por %p6891_p10, %p6890_p9 }
  0x8f   : > { %p6888_p8 = pneg %p6887_p6  ;;  %p6894_p11 = por %p6893_p13, %p6892_p12 }
  0x91   : > { %p6895_p0 = pnand %p6894_p11, %p6888_p8 }
  0x93   : > { %6898 = shalt.err (!%p6895_p0)
}
  0x94   : > { %s6899_s6 = scalar_lea.vmem %s7563_s0, 32768  ;;  %s7276_s25 = smov [#allocation14]  }
  0x95   : > { %p6900_p2 = scmp.ne.s32.totalorder %s7563_s0, %s6899_s6  ;;  %s6903_s2 = sshll.u32 %s7276_s25, 4  ;;  %s6904_s2 = int_to_ptr.vmem [resolvable:$false] %s6903_s2 }
  0x96   : > { %s6905_s14 = scalar_lea.vmem %s6904_s2, 65536  ;;  %p6906_p5 = scmp.lt.s32.totalorder %s7563_s0, %s6904_s2 }
  0x97   : > { %p6901_p7 = pnand %p6900_p2, %p7410_p3  ;;  %p6907_p4 = scmp.lt.s32.totalorder %s6905_s14, %s6899_s6 }
  0x99   : > { %p6902_p1 = pneg %p6901_p7  ;;  %p6908_p6 = por %p6907_p4, %p6906_p5 }
  0x9b   : > { %p6909_p9 = pnand %p6908_p6, %p6902_p1 }
  0x9d   : > { %6912 = shalt.err (!%p6909_p9)
}
  0x9e   : > { %s9236_s18 = smov 64   ;;  %s9237_s20 = smov 1024  }
  0x9f   : > { %6699 = dma.hbm_to_vmem [thread:$0]  (%p7410_p3), %s7559_s4, 32768, %s7563_s0, %s9207_s23, %s9237_s20, %s9237_s20, %s9236_s18  }
  0xa0   : > { %s9238_s10 = sld [smem:[#allocation46_spill]]  ;;  %s649_s25 = scalar_lea.vmem [#allocation17], %s7485_s24 }
  0xa1   : > { %s657_s2 = sshll.u32 %s649_s25, 4  ;;  %s7602_s14 = sshll.u32 %s7427_s26, 2  ;;  %s7599_s2 = int_to_ptr.vmem [resolvable:$true] %s657_s2 }
  0xa2   : > { %s9208_s13 = scalar_lea.sflag [#allocation18], %s7430_s27 }
  0xa6   : > { %s7596_s6 = scalar_lea.hbm %s9238_s10, %s7488_s30  ;;  %s6917_s21 = scalar_lea.hbm %s9238_s10, 384 }
  0xa7   : > { %s6913_s8 = scalar_lea.hbm %s7596_s6, 128  ;;  %p6918_p13 = scmp.lt.u32.totalorder %s7596_s6, %s9238_s10 }
  0xa8   : > { %p6914_p8 = scmp.ne.s32.totalorder %s7596_s6, %s6913_s8  ;;  %p6919_p11 = scmp.lt.u32.totalorder %s6917_s21, %s6913_s8 }
  0xa9   : > { %p6921_p2 = scmp.lt.u32.totalorder %s6913_s8, %s7596_s6 }
  0xaa   : > { %p6915_p10 = pnand %p6914_p8, %p7410_p3  ;;  %p6920_p0 = por %p6919_p11, %p6918_p13 }
  0xac   : > { %p6916_p12 = pneg %p6915_p10  ;;  %p6922_p7 = por %p6921_p2, %p6920_p0 }
  0xae   : > { %p6923_p1 = pnand %p6922_p7, %p6916_p12 }
  0xb0   : > { %6926 = shalt.err (!%p6923_p1)
}
  0xb1   : > { %s6927_s25 = scalar_lea.vmem %s7599_s2, 128  ;;  %s7277_s4 = smov [#allocation17]  }
  0xb2   : > { %p6928_p5 = scmp.ne.s32.totalorder %s7599_s2, %s6927_s25  ;;  %s6931_s0 = sshll.u32 %s7277_s4, 4  ;;  %s6932_s0 = int_to_ptr.vmem [resolvable:$false] %s6931_s0 }
  0xb3   : > { %s6933_s23 = scalar_lea.vmem %s6932_s0, 256  ;;  %p6934_p9 = scmp.lt.s32.totalorder %s7599_s2, %s6932_s0 }
  0xb4   : > { %p6929_p4 = pnand %p6928_p5, %p7410_p3  ;;  %p6935_p8 = scmp.lt.s32.totalorder %s6933_s23, %s6927_s25 }
  0xb6   : > { %p6930_p6 = pneg %p6929_p4  ;;  %p6936_p10 = por %p6935_p8, %p6934_p9 }
  0xb8   : > { %p6937_p13 = pnand %p6936_p10, %p6930_p6 }
  0xba   : > { %6940 = shalt.err (!%p6937_p13)
}
  0xbb   : > { %6701 = dma.hbm_to_vmem [thread:$0]  (%p7410_p3), %s7596_s6, 128, %s7599_s2, %s9208_s13  }
  0xbc   : > { %s7629_s8 = sshll.u32 %s7265_s17, 6  ;;  %s689_s4 = scalar_lea.vmem [#allocation20], %s7602_s14 }
  0xbd   : > { %s7635_s25 = scalar_lea.hbm %s9184_s12, %s7629_s8  ;;  %s697_s0 = sshll.u32 %s689_s4, 4  ;;  %s698_s0 = int_to_ptr.vmem [resolvable:$true] %s697_s0 }
  0xbe   : > { %s6941_s10 = scalar_lea.hbm %s7635_s25, 64  ;;  %s6945_s13 = scalar_lea.hbm %s9184_s12, 192 }
  0xbf   : > { %p6942_p12 = scmp.ne.s32.totalorder %s7635_s25, %s6941_s10  ;;  %p6946_p2 = scmp.lt.u32.totalorder %s7635_s25, %s9184_s12 }
  0xc0   : > { %p6947_p7 = scmp.lt.u32.totalorder %s6945_s13, %s6941_s10  ;;  %p6949_p5 = scmp.lt.u32.totalorder %s6941_s10, %s7635_s25 }
  0xc1   : > { %p6943_p11 = pnand %p6942_p12, %p7410_p3 }
  0xc2   : > { %p6948_p1 = por %p6947_p7, %p6946_p2 }
  0xc3   : > { %p6944_p0 = pneg %p6943_p11 }
  0xc4   : > { %p6950_p4 = por %p6949_p5, %p6948_p1 }
  0xc6   : > { %p6951_p6 = pnand %p6950_p4, %p6944_p0 }
  0xc8   : > { %6954 = shalt.err (!%p6951_p6)
}
  0xc9   : > { %s6955_s4 = scalar_lea.vmem %s698_s0, 64  ;;  %s7278_s23 = smov [#allocation20]  }
  0xca   : > { %p6956_p9 = scmp.ne.s32.totalorder %s698_s0, %s6955_s4  ;;  %s6959_s17 = sshll.u32 %s7278_s23, 4  ;;  %s6960_s17 = int_to_ptr.vmem [resolvable:$false] %s6959_s17 }
  0xcb   : > { %s6961_s6 = scalar_lea.vmem %s6960_s17, 128  ;;  %p6962_p13 = scmp.lt.s32.totalorder %s698_s0, %s6960_s17 }
  0xcc   : > { %p6957_p8 = pnand %p6956_p9, %p7410_p3  ;;  %p6963_p12 = scmp.lt.s32.totalorder %s6961_s6, %s6955_s4 }
  0xce   : > { %p6958_p10 = pneg %p6957_p8  ;;  %p6964_p11 = por %p6963_p12, %p6962_p13 }
  0xd0   : > { %p6965_p2 = pnand %p6964_p11, %p6958_p10 }
  0xd2   : > { %6968 = shalt.err (!%p6965_p2)
}
  0xd3   : > { %s9239_s10 = scalar_lea.sflag [#allocation21], %s7430_s27  ;;  %s7662_s23 = scalar_lea.hbm %s9173_s1, %s7629_s8 }
  0xd4   : > { %6703 = dma.hbm_to_vmem [thread:$0]  (%p7410_p3), %s7635_s25, 64, %s698_s0, %s9239_s10  }
  0xd5   : > { %s472_s17 = scalar_lea.vmem [#allocation2], %s7602_s14  ;;  %s469_s15 = scalar_lea.sflag [#allocation3], %s7427_s26 }
  0xd6   : > { %s480_s21 = sshll.u32 %s472_s17, 4  ;;  %s6969_s4 = scalar_lea.hbm %s7662_s23, 64  ;;  %s481_s21 = int_to_ptr.vmem [resolvable:$true] %s480_s21 }
  0xd7   : > { %p6970_p0 = scmp.ne.s32.totalorder %s7662_s23, %s6969_s4  ;;  %s6973_s0 = scalar_lea.hbm %s9173_s1, 192 }
  0xd8   : > { %p6974_p5 = scmp.lt.u32.totalorder %s7662_s23, %s9173_s1  ;;  %p6975_p4 = scmp.lt.u32.totalorder %s6973_s0, %s6969_s4 }
  0xd9   : > { %p6971_p7 = pnand %p6970_p0, %p7410_p3  ;;  %p6977_p9 = scmp.lt.u32.totalorder %s6969_s4, %s7662_s23 }
  0xda   : > { %p6976_p6 = por %p6975_p4, %p6974_p5 }
  0xdb   : > { %p6972_p1 = pneg %p6971_p7 }
  0xdc   : > { %p6978_p8 = por %p6977_p9, %p6976_p6 }
  0xde   : > { %p6979_p10 = pnand %p6978_p8, %p6972_p1 }
  0xe0   : > { %6982 = shalt.err (!%p6979_p10)
}
  0xe1   : > { %s6983_s26 = scalar_lea.vmem %s481_s21, 64  ;;  %s7279_s2 = smov [#allocation2]  }
  0xe2   : > { %p6984_p13 = scmp.ne.s32.totalorder %s481_s21, %s6983_s26  ;;  %s6987_s17 = sshll.u32 %s7279_s2, 4  ;;  %s6988_s17 = int_to_ptr.vmem [resolvable:$false] %s6987_s17 }
  0xe3   : > { %s6989_s6 = scalar_lea.vmem %s6988_s17, 128  ;;  %p6990_p2 = scmp.lt.s32.totalorder %s481_s21, %s6988_s17 }
  0xe4   : > { %p6985_p12 = pnand %p6984_p13, %p7410_p3  ;;  %p6991_p0 = scmp.lt.s32.totalorder %s6989_s6, %s6983_s26 }
  0xe6   : > { %p6986_p11 = pneg %p6985_p12  ;;  %p6992_p7 = por %p6991_p0, %p6990_p2 }
  0xe8   : > { %p6993_p4 = pnand %p6992_p7, %p6986_p11 }
  0xea   : > { %6996 = shalt.err (!%p6993_p4)
}
  0xeb   : > { %6692 = dma.hbm_to_vmem [thread:$0]  (%p7410_p3), %s7662_s23, 64, %s481_s21, %s469_s15  }
  0xec   : > { %s7687_s0 = scalar_lea.hbm %s9175_s3, %s7488_s30  ;;  %s512_s10 = scalar_lea.vmem [#allocation7], %s7485_s24 }
  0xed   : > { %s520_s13 = sshll.u32 %s512_s10, 4  ;;  %s9240_s26 = sshll.u32 %s7548_s28, 4  ;;  %s521_s13 = int_to_ptr.vmem [resolvable:$true] %s520_s13  ;;  %s7692_s26 = int_to_ptr.vmem [resolvable:$true] %s9240_s26 }
  0xee   : > { %s6997_s2 = scalar_lea.hbm %s7687_s0, 128  ;;  %s7001_s15 = scalar_lea.hbm %s9175_s3, 384 }
  0xef   : > { %p6998_p1 = scmp.ne.s32.totalorder %s7687_s0, %s6997_s2  ;;  %p7002_p9 = scmp.lt.u32.totalorder %s7687_s0, %s9175_s3 }
  0xf0   : > { %p7003_p8 = scmp.lt.u32.totalorder %s7001_s15, %s6997_s2  ;;  %p7005_p13 = scmp.lt.u32.totalorder %s6997_s2, %s7687_s0 }
  0xf1   : > { %p6999_p5 = pnand %p6998_p1, %p7410_p3 }
  0xf2   : > { %p7004_p10 = por %p7003_p8, %p7002_p9 }
  0xf3   : > { %p7000_p6 = pneg %p6999_p5 }
  0xf4   : > { %p7006_p12 = por %p7005_p13, %p7004_p10 }
  0xf6   : > { %p7007_p11 = pnand %p7006_p12, %p7000_p6 }
  0xf8   : > { %7010 = shalt.err (!%p7007_p11)
}
  0xf9   : > { %s7011_s28 = scalar_lea.vmem %s521_s13, 128  ;;  %s7280_s4 = smov [#allocation7]  }
  0xfa   : > { %p7012_p2 = scmp.ne.s32.totalorder %s521_s13, %s7011_s28  ;;  %s7015_s25 = sshll.u32 %s7280_s4, 4  ;;  %s7016_s25 = int_to_ptr.vmem [resolvable:$false] %s7015_s25 }
  0xfb   : > { %s7017_s10 = scalar_lea.vmem %s7016_s25, 256  ;;  %p7018_p4 = scmp.lt.s32.totalorder %s521_s13, %s7016_s25 }
  0xfc   : > { %p7013_p0 = pnand %p7012_p2, %p7410_p3  ;;  %p7019_p1 = scmp.lt.s32.totalorder %s7017_s10, %s7011_s28 }
  0xfe   : > { %p7014_p7 = pneg %p7013_p0  ;;  %p7020_p5 = por %p7019_p1, %p7018_p4 }
 0x100   : > { %p7021_p8 = pnand %p7020_p5, %p7014_p7 }
 0x102   : > { %7024 = shalt.err (!%p7021_p8)
}
 0x103   : > { %s9241_s2 = scalar_lea.sflag [#allocation6], %s7430_s27  ;;  %s7025_s23 = scalar_lea.hbm %s7554_s16, 32768 }
 0x104   : > { %6694 = dma.hbm_to_vmem [thread:$0]  (%p7410_p3), %s7687_s0, 128, %s521_s13, %s9241_s2  }
 0x105   : > { %p7026_p6 = scmp.ne.s32.totalorder %s7554_s16, %s7025_s23  ;;  %s7029_s17 = scalar_lea.hbm %s9177_s5, 98304 }
 0x106   : > { %p7030_p13 = scmp.lt.u32.totalorder %s7554_s16, %s9177_s5  ;;  %p7031_p12 = scmp.lt.u32.totalorder %s7029_s17, %s7025_s23 }
 0x107   : > { %p7027_p9 = pnand %p7026_p6, %p7410_p3  ;;  %p7033_p2 = scmp.lt.u32.totalorder %s7025_s23, %s7554_s16 }
 0x108   : > { %p7032_p11 = por %p7031_p12, %p7030_p13 }
 0x109   : > { %p7028_p10 = pneg %p7027_p9 }
 0x10a   : > { %p7034_p0 = por %p7033_p2, %p7032_p11 }
 0x10c   : > { %p7035_p7 = pnand %p7034_p0, %p7028_p10 }
 0x10e   : > { %7038 = shalt.err (!%p7035_p7)
}
 0x10f   : > { %s7039_s0 = scalar_lea.vmem %s7692_s26, 32768  ;;  %s7281_s13 = smov [#allocation10]  }
 0x110   : > { %p7040_p4 = scmp.ne.s32.totalorder %s7692_s26, %s7039_s0  ;;  %s7043_s4 = sshll.u32 %s7281_s13, 4  ;;  %s7044_s4 = int_to_ptr.vmem [resolvable:$false] %s7043_s4 }
 0x111   : > { %s7045_s25 = scalar_lea.vmem %s7044_s4, 65536  ;;  %p7046_p8 = scmp.lt.s32.totalorder %s7692_s26, %s7044_s4 }
 0x112   : > { %p7041_p1 = pnand %p7040_p4, %p7410_p3  ;;  %p7047_p6 = scmp.lt.s32.totalorder %s7045_s25, %s7039_s0 }
 0x114   : > { %p7042_p5 = pneg %p7041_p1  ;;  %p7048_p9 = por %p7047_p6, %p7046_p8 }
 0x116   : > { %p7049_p13 = pnand %p7048_p9, %p7042_p5 }
 0x118   : > { %7052 = shalt.err (!%p7049_p13)
}
 0x119   : > { %s9242_s10 = scalar_lea.sflag [#allocation9], %s7430_s27  ;;  %s7743_s21 = scalar_lea.hbm %s9179_s7, %s7488_s30 }
 0x11a   : > { %6696 = dma.hbm_to_vmem [thread:$0]  (%p7410_p3), %s7554_s16, 32768, %s7692_s26, %s9242_s10, %s9237_s20, %s9237_s20, %s9236_s18  }
 0x11b   : > { %s590_s15 = scalar_lea.vmem [#allocation13], %s7485_s24  ;;  %s7750_s0 = scalar_lea.hbm %s9181_s9, %s7488_s30 }
 0x11c   : > { %s598_s17 = sshll.u32 %s590_s15, 4  ;;  %s7053_s13 = scalar_lea.hbm %s7743_s21, 128  ;;  %s599_s17 = int_to_ptr.vmem [resolvable:$true] %s598_s17 }
 0x11d   : > { %p7054_p10 = scmp.ne.s32.totalorder %s7743_s21, %s7053_s13  ;;  %s7057_s20 = scalar_lea.hbm %s9179_s7, 384 }
 0x11e   : > { %p7058_p2 = scmp.lt.u32.totalorder %s7743_s21, %s9179_s7  ;;  %p7059_p0 = scmp.lt.u32.totalorder %s7057_s20, %s7053_s13 }
 0x11f   : > { %p7055_p12 = pnand %p7054_p10, %p7410_p3  ;;  %p7061_p4 = scmp.lt.u32.totalorder %s7053_s13, %s7743_s21 }
 0x120   : > { %p7060_p7 = por %p7059_p0, %p7058_p2 }
 0x121   : > { %p7056_p11 = pneg %p7055_p12 }
 0x122   : > { %p7062_p1 = por %p7061_p4, %p7060_p7 }
 0x124   : > { %p7063_p5 = pnand %p7062_p1, %p7056_p11 }
 0x126   : > { %7066 = shalt.err (!%p7063_p5)
}
 0x127   : > { %s7067_s30 = scalar_lea.vmem %s599_s17, 128  ;;  %s7282_s25 = smov [#allocation13]  }
 0x128   : > { %p7068_p8 = scmp.ne.s32.totalorder %s599_s17, %s7067_s30  ;;  %s7071_s10 = sshll.u32 %s7282_s25, 4  ;;  %s7072_s10 = int_to_ptr.vmem [resolvable:$false] %s7071_s10 }
 0x129   : > { %s7073_s2 = scalar_lea.vmem %s7072_s10, 256  ;;  %p7074_p13 = scmp.lt.s32.totalorder %s599_s17, %s7072_s10 }
 0x12a   : > { %p7069_p6 = pnand %p7068_p8, %p7410_p3  ;;  %p7075_p10 = scmp.lt.s32.totalorder %s7073_s2, %s7067_s30 }
 0x12c   : > { %p7070_p9 = pneg %p7069_p6  ;;  %p7076_p12 = por %p7075_p10, %p7074_p13 }
 0x12e   : > { %p7077_p0 = pnand %p7076_p12, %p7070_p9 }
 0x130   : > { %7080 = shalt.err (!%p7077_p0)
}
 0x131   : > { %s9243_s23 = scalar_lea.sflag [#allocation12], %s7430_s27  ;;  %s630_s15 = scalar_lea.vmem [#allocation16], %s7485_s24 }
 0x132   : > { %6698 = dma.hbm_to_vmem [thread:$0]  (%p7410_p3), %s7743_s21, 128, %s599_s17, %s9243_s23  }
 0x133   : > { %s638_s6 = sshll.u32 %s630_s15, 4  ;;  %s9244_s28 = sshll.u32 %s7481_s29, 4  ;;  %s7774_s28 = int_to_ptr.vmem [resolvable:$true] %s9244_s28  ;;  %s639_s6 = int_to_ptr.vmem [resolvable:$true] %s638_s6 }
 0x134   : > { %s7081_s13 = scalar_lea.hbm %s7750_s0, 128  ;;  %s7085_s20 = scalar_lea.hbm %s9181_s9, 384 }
 0x135   : > { %p7082_p11 = scmp.ne.s32.totalorder %s7750_s0, %s7081_s13  ;;  %p7086_p4 = scmp.lt.u32.totalorder %s7750_s0, %s9181_s9 }
 0x136   : > { %p7087_p1 = scmp.lt.u32.totalorder %s7085_s20, %s7081_s13  ;;  %p7089_p8 = scmp.lt.u32.totalorder %s7081_s13, %s7750_s0 }
 0x137   : > { %p7083_p2 = pnand %p7082_p11, %p7410_p3 }
 0x138   : > { %p7088_p5 = por %p7087_p1, %p7086_p4 }
 0x139   : > { %p7084_p7 = pneg %p7083_p2 }
 0x13a   : > { %p7090_p6 = por %p7089_p8, %p7088_p5 }
 0x13c   : > { %p7091_p9 = pnand %p7090_p6, %p7084_p7 }
 0x13e   : > { %7094 = shalt.err (!%p7091_p9)
}
 0x13f   : > { %s7095_s24 = scalar_lea.vmem %s639_s6, 128  ;;  %s7283_s29 = smov [#allocation16]  }
 0x140   : > { %p7096_p13 = scmp.ne.s32.totalorder %s639_s6, %s7095_s24  ;;  %s7099_s21 = sshll.u32 %s7283_s29, 4  ;;  %s7100_s21 = int_to_ptr.vmem [resolvable:$false] %s7099_s21 }
 0x141   : > { %s7101_s17 = scalar_lea.vmem %s7100_s21, 256  ;;  %p7102_p0 = scmp.lt.s32.totalorder %s639_s6, %s7100_s21 }
 0x142   : > { %p7097_p10 = pnand %p7096_p13, %p7410_p3  ;;  %p7103_p11 = scmp.lt.s32.totalorder %s7101_s17, %s7095_s24 }
 0x144   : > { %p7098_p12 = pneg %p7097_p10  ;;  %p7104_p2 = por %p7103_p11, %p7102_p0 }
 0x146   : > { %p7105_p1 = pnand %p7104_p2, %p7098_p12 }
 0x148   : > { %7108 = shalt.err (!%p7105_p1)
}
 0x149   : > { %s9245_s30 = scalar_lea.sflag [#allocation15], %s7430_s27  ;;  %s7109_s25 = scalar_lea.hbm %s7477_s19, 16384 }
 0x14a   : > { %6700 = dma.hbm_to_vmem [thread:$0]  (%p7410_p3), %s7750_s0, 128, %s639_s6, %s9245_s30  }
 0x14b   : > { %p7110_p7 = scmp.ne.s32.totalorder %s7477_s19, %s7109_s25  ;;  %s7113_s23 = scalar_lea.hbm %s9183_s11, 49152 }
 0x14c   : > { %p7114_p8 = scmp.lt.u32.totalorder %s7477_s19, %s9183_s11  ;;  %p7115_p6 = scmp.lt.u32.totalorder %s7113_s23, %s7109_s25 }
 0x14d   : > { %p7111_p4 = pnand %p7110_p7, %p7410_p3  ;;  %p7117_p13 = scmp.lt.u32.totalorder %s7109_s25, %s7477_s19 }
 0x14e   : > { %p7116_p9 = por %p7115_p6, %p7114_p8 }
 0x14f   : > { %p7112_p5 = pneg %p7111_p4 }
 0x150   : > { %p7118_p10 = por %p7117_p13, %p7116_p9 }
 0x152   : > { %p7119_p12 = pnand %p7118_p10, %p7112_p5 }
 0x154   : > { %7122 = shalt.err (!%p7119_p12)
}
 0x155   : > { %s7123_s0 = scalar_lea.vmem %s7774_s28, 16384  ;;  %s7284_s6 = smov [#allocation19]  }
 0x156   : > { %p7124_p0 = scmp.ne.s32.totalorder %s7774_s28, %s7123_s0  ;;  %s7127_s16 = sshll.u32 %s7284_s6, 4  ;;  %s7128_s16 = int_to_ptr.vmem [resolvable:$false] %s7127_s16 }
 0x157   : > { %s7129_s18 = scalar_lea.vmem %s7128_s16, 32768  ;;  %p7130_p1 = scmp.lt.s32.totalorder %s7774_s28, %s7128_s16 }
 0x158   : > { %p7125_p11 = pnand %p7124_p0, %p7410_p3  ;;  %p7131_p7 = scmp.lt.s32.totalorder %s7129_s18, %s7123_s0 }
 0x15a   : > { %p7126_p2 = pneg %p7125_p11  ;;  %p7132_p4 = por %p7131_p7, %p7130_p1 }
 0x15c   : > { %p7133_p8 = pnand %p7132_p4, %p7126_p2 }
 0x15e   : > { %7136 = shalt.err (!%p7133_p8)
}
 0x15f   : > { %s7285_s20 = smov 512   ;;  %s7286_s26 = smov 32  }
 0x160   : > { %s9246_s4 = scalar_lea.sflag [#allocation18], %s7430_s27  ;;  %s9247_s21 = sld [smem:[#allocation47_spill]] }
 0x161   : > { %6702 = dma.hbm_to_vmem [thread:$0]  (%p7410_p3), %s7477_s19, 16384, %s7774_s28, %s9246_s4, %s7285_s20, %s7285_s20, %s7286_s26  }
 0x162   : > { %s708_s30 = scalar_lea.vmem [#allocation22], %s7602_s14 }
 0x163   : > { %s716_s25 = sshll.u32 %s708_s30, 4  ;;  %s717_s25 = int_to_ptr.vmem [resolvable:$true] %s716_s25 }
 0x166   : > { %s7822_s17 = scalar_lea.hbm %s9247_s21, %s7629_s8  ;;  %s7141_s19 = scalar_lea.hbm %s9247_s21, 192 }
 0x167   : > { %s7137_s10 = scalar_lea.hbm %s7822_s17, 64  ;;  %p7142_p13 = scmp.lt.u32.totalorder %s7822_s17, %s9247_s21 }
 0x168   : > { %p7138_p5 = scmp.ne.s32.totalorder %s7822_s17, %s7137_s10  ;;  %p7143_p10 = scmp.lt.u32.totalorder %s7141_s19, %s7137_s10 }
 0x169   : > { %p7145_p0 = scmp.lt.u32.totalorder %s7137_s10, %s7822_s17 }
 0x16a   : > { %p7139_p6 = pnand %p7138_p5, %p7410_p3  ;;  %p7144_p12 = por %p7143_p10, %p7142_p13 }
 0x16c   : > { %p7140_p9 = pneg %p7139_p6  ;;  %p7146_p11 = por %p7145_p0, %p7144_p12 }
 0x16e   : > { %p7147_p2 = pnand %p7146_p11, %p7140_p9 }
 0x170   : > { %7150 = shalt.err (!%p7147_p2)
}
 0x171   : > { %s7151_s14 = scalar_lea.vmem %s717_s25, 64  ;;  %s7287_s8 = smov [#allocation22]  }
 0x172   : > { %p7152_p1 = scmp.ne.s32.totalorder %s717_s25, %s7151_s14  ;;  %s7155_s13 = sshll.u32 %s7287_s8, 4  ;;  %s7156_s13 = int_to_ptr.vmem [resolvable:$false] %s7155_s13 }
 0x173   : > { %s7157_s0 = scalar_lea.vmem %s7156_s13, 128  ;;  %p7158_p8 = scmp.lt.s32.totalorder %s717_s25, %s7156_s13 }
 0x174   : > { %p7153_p7 = pnand %p7152_p1, %p7410_p3  ;;  %p7159_p5 = scmp.lt.s32.totalorder %s7157_s0, %s7151_s14 }
 0x176   : > { %p7154_p4 = pneg %p7153_p7  ;;  %p7160_p6 = por %p7159_p5, %p7158_p8 }
 0x178   : > { %p7161_p10 = pnand %p7160_p6, %p7154_p4 }
 0x17a   : > { %7164 = shalt.err (!%p7161_p10)
}
 0x17b   : > { %s9248_s6 = scalar_lea.sflag [#allocation21], %s7430_s27 }
 0x17c   : > { %6704 = dma.hbm_to_vmem [thread:$0]  (%p7410_p3), %s7822_s17, 64, %s717_s25, %s9248_s6  }
 0x17d PF: > { %s9249_s16 = sld [smem:[#allocation36_spill]] }
 0x183   : > { %p6499_p9 = scmp.ge.s32.totalorder %s9249_s16, 1  ;;  %p721_p13 = scmp.lt.s32.totalorder %s9249_s16, 4 }
 0x185   : > { %p722_p12 = pnand %p6499_p9, %p721_p13 }
 0x186   : > { %s9250_s18 = sld [smem:[#allocation32_spill]] (!%p722_p12) }
 0x187   : > { %725 = sbr.rel (%p722_p12) target bundleno = 2556 (0x9fc), region = 76  ;;  %s9251_s20 = sld [smem:[#allocation39_spill]] (!%p722_p12) }
 0x18c   : > { %s7847_s26 = sand.u32 (!%p722_p12), 1, %s9250_s18  }
 0x18d   : > { %s7850_s4 = sshll.u32 (!%p722_p12), %s7847_s26, 2  ;;  %s728_s22 = scalar_lea.sflag (!%p722_p12), [#allocation3], %s7847_s26 }
 0x18e   : > { %s731_s27 = scalar_lea.vmem [#allocation2], %s7850_s4  ;;  %p9252_p0 = scmp.ne.s32.totalorder %s9251_s20, 0 }
 0x190   : > { %7216 = dma.done.wait (%p9252_p0), %s728_s22, 64  }
 0x191   : > { %7218 = vsyncadd (%p9252_p0), %s728_s22, 4294967232  ;;  %s9253_s24 = sld [smem:[#allocation37_spill]]  ;;  %s6501_s17 = sshll.u32 %s7847_s26, 10 }
 0x192   : > { %s7863_s25 = scalar_lea.vmem [#allocation5], %s6501_s17 }
 0x197   : > { %s7859_s29 = sand.u32 1, %s9253_s24  }
 0x198   : > { %s737_s30 = scalar_lea.sflag [#allocation6], %s7859_s29 }
 0x199   : > { %7220 = dma.done.wait (%p9252_p0), %s737_s30, 16512  }
 0x19a   : > { %7222 = vsyncadd (%p9252_p0), %s737_s30, 4294950784  ;;  %s7870_s10 = sshll.u32 %s7847_s26, 3  ;;  %s755_s23 = scalar_lea.sflag [#allocation9], %s7859_s29 }
 0x19b   : > { %s749_s2 = scalar_lea.vmem [#allocation7], %s7870_s10  ;;  %s758_s19 = scalar_lea.vmem [#allocation8], %s7870_s10 }
 0x19c   : > { %7224 = dma.done.wait (%p9252_p0), %s755_s23, 32896  }
 0x19d   : > { %7226 = vsyncadd (%p9252_p0), %s755_s23, 4294934400  ;;  %s6504_s28 = sshll.u32 %s7847_s26, 11  ;;  %s773_s14 = scalar_lea.sflag [#allocation12], %s7859_s29 }
 0x19e   : > { %s7880_s15 = scalar_lea.vmem [#allocation10], %s6504_s28  ;;  %s776_s8 = scalar_lea.vmem [#allocation11], %s7870_s10 }
 0x19f   : > { %7228 = dma.done.wait (%p9252_p0), %s773_s14, 256  }
 0x1a0   : > { %7230 = vsyncadd (%p9252_p0), %s773_s14, 4294967040  ;;  %s785_s13 = scalar_lea.vmem [#allocation13], %s7870_s10  ;;  %s791_s0 = scalar_lea.sflag [#allocation15], %s7859_s29 }
 0x1a1   : > { %s7890_s6 = scalar_lea.vmem [#allocation14], %s6504_s28 }
 0x1a2   : > { %7232 = dma.done.wait (%p9252_p0), %s791_s0, 32896  }
 0x1a3   : > { %7234 = vsyncadd (%p9252_p0), %s791_s0, 4294934400  ;;  %s803_s16 = scalar_lea.vmem [#allocation16], %s7870_s10  ;;  %s809_s18 = scalar_lea.sflag [#allocation18], %s7859_s29 }
 0x1a4   : > { %s812_s26 = scalar_lea.vmem [#allocation17], %s7870_s10 }
 0x1a5   : > { %7236 = dma.done.wait (%p9252_p0), %s809_s18, 16512  }
 0x1a6   : > { %7238 = vsyncadd (%p9252_p0), %s809_s18, 4294950784  ;;  %s7903_s22 = scalar_lea.vmem [#allocation19], %s6501_s17  ;;  %s827_s24 = scalar_lea.sflag [#allocation21], %s7859_s29 }
 0x1a7   : > { %s830_s30 = scalar_lea.vmem [#allocation20], %s7850_s4 }
 0x1a8   : > { %7240 = dma.done.wait (%p9252_p0), %s827_s24, 128  }
 0x1a9   : > { %7242 = vsyncadd (%p9252_p0), %s827_s24, 4294967168  ;;  %v7288_v0 = vmov 0   ;;  %s9254_s14 = sld [smem:[#allocation41_spill]]  ;;  %v7289_v2 = vmov 1   ;;  %v1614_v3 = vld [vmem:[%s7863_s25 + $0x208] sm:$0xff]  ;;  %v1616_v4 = vld [vmem:[%s7863_s25 + $0x218] sm:$0xff] }
 0x1aa   : > { %6785 = vset.pattern.permute.xlu0 %v7288_v0  ;;  %v1678_v5 = vunpack.c.l.s8.bf16 %v1614_v3  ;;  %v1680_v6 = vunpack.c.l.s8.bf16 %v1616_v4  ;;  %v1613_v7 = vld [vmem:[%s7863_s25 + $0x200] sm:$0xff]  ;;  %v1615_v8 = vld [vmem:[%s7863_s25 + $0x210] sm:$0xff]  ;;  %v1686_v11 = vunpack.c.h.s8.bf16 %v1614_v3  ;;  %v1688_v12 = vunpack.c.h.s8.bf16 %v1616_v4  ;;  %v1622_v15 = vld [vmem:[%s7863_s25 + $0x248] sm:$0xff]  ;;  %s839_s20 = scalar_lea.vmem [#allocation22], %s7850_s4  ;;  %s9255_s4 = sld [smem:[#allocation34_spill]] }
 0x1ab   : > { %v1677_v9 = vunpack.c.l.s8.bf16 %v1613_v7  ;;  %v1679_v10 = vunpack.c.l.s8.bf16 %v1615_v8  ;;  %v1685_v13 = vunpack.c.h.s8.bf16 %v1613_v7  ;;  %v1687_v14 = vunpack.c.h.s8.bf16 %v1615_v8  ;;  %v1624_v16 = vld [vmem:[%s7863_s25 + $0x258] sm:$0xff]  ;;  %v1621_v19 = vld [vmem:[%s7863_s25 + $0x240] sm:$0xff]  ;;  %v1623_v20 = vld [vmem:[%s7863_s25 + $0x250] sm:$0xff] }
 0x1ac   : > { %1805 = vmatprep.subr.bf16.mxu0 %v1678_v5  ;;  %1846 = vmatprep.subr.bf16.mxu1 %v1680_v6  ;;  %v1694_v17 = vunpack.c.l.s8.bf16 %v1622_v15  ;;  %v1696_v18 = vunpack.c.l.s8.bf16 %v1624_v16  ;;  %v1693_v21 = vunpack.c.l.s8.bf16 %v1621_v19  ;;  %v1695_v22 = vunpack.c.l.s8.bf16 %v1623_v20  ;;  %v1630_v27 = vld [vmem:[%s7863_s25 + $0x288] sm:$0xff]  ;;  %v1632_v28 = vld [vmem:[%s7863_s25 + $0x298] sm:$0xff]  ;;  %v1629_v31 = vld [vmem:[%s7863_s25 + $0x280] sm:$0xff] }
 0x1ad   : > { %1806 = vmatpush1.bf16.msra.mxu0 %v1677_v9  ;;  %1847 = vmatpush1.bf16.msra.mxu1 %v1679_v10  ;;  %v1702_v23 = vunpack.c.h.s8.bf16 %v1622_v15  ;;  %v1704_v24 = vunpack.c.h.s8.bf16 %v1624_v16  ;;  %v1701_v25 = vunpack.c.h.s8.bf16 %v1621_v19  ;;  %v1703_v26 = vunpack.c.h.s8.bf16 %v1623_v20  ;;  %v1631_v32 = vld [vmem:[%s7863_s25 + $0x290] sm:$0xff]  ;;  %v1638_v39 = vld [vmem:[%s7863_s25 + $0x2c8] sm:$0xff]  ;;  %v1640_v40 = vld [vmem:[%s7863_s25 + $0x2d8] sm:$0xff] }
 0x1ae   : > { %1807 = vmatprep.subr.bf16.mxu0 %v1686_v11  ;;  %1848 = vmatprep.subr.bf16.mxu1 %v1688_v12  ;;  %v1710_v29 = vunpack.c.l.s8.bf16 %v1630_v27  ;;  %v1712_v30 = vunpack.c.l.s8.bf16 %v1632_v28  ;;  %v1709_v33 = vunpack.c.l.s8.bf16 %v1629_v31  ;;  %v1711_v34 = vunpack.c.l.s8.bf16 %v1631_v32  ;;  %v1637_v43 = vld [vmem:[%s7863_s25 + $0x2c0] sm:$0xff]  ;;  %v1639_v44 = vld [vmem:[%s7863_s25 + $0x2d0] sm:$0xff]  ;;  %v1646_v51 = vld [vmem:[%s7863_s25 + $0x308] sm:$0xff] }
 0x1af   : > { %v947_v1 = vld [vmem:[%s9254_s14] sm:$0xff]  ;;  %v1718_v35 = vunpack.c.h.s8.bf16 %v1630_v27  ;;  %v1720_v36 = vunpack.c.h.s8.bf16 %v1632_v28  ;;  %v1717_v37 = vunpack.c.h.s8.bf16 %v1629_v31  ;;  %v1719_v38 = vunpack.c.h.s8.bf16 %v1631_v32  ;;  %v1645_v55 = vld [vmem:[%s7863_s25 + $0x300] sm:$0xff]  ;;  %v1647_v56 = vld [vmem:[%s7863_s25 + $0x310] sm:$0xff] }
 0x1b0   : > { %951 = vperm.xlu0 %6785, %v947_v1   ;;  %v1726_v41 = vunpack.c.l.s8.bf16 %v1638_v39  ;;  %v1728_v42 = vunpack.c.l.s8.bf16 %v1640_v40  ;;  %v1725_v45 = vunpack.c.l.s8.bf16 %v1637_v43  ;;  %v1727_v46 = vunpack.c.l.s8.bf16 %v1639_v44  ;;  %v1648_v52 = vld [vmem:[%s7863_s25 + $0x318] sm:$0xff]  ;;  %v1654_v63 = vld [vmem:[%s7863_s25 + $0x348] sm:$0xff]  ;;  %v1653_v3 = vld [vmem:[%s7863_s25 + $0x340] sm:$0xff]  ;;  %p6529_p3 = scmp.ne.s32.totalorder %s9255_s4, 0 }
 0x1b1   : > { %1808 = vmatpush1.bf16.msra.mxu0 %v1685_v13  ;;  %1849 = vmatpush1.bf16.msra.mxu1 %v1687_v14  ;;  %v1734_v47 = vunpack.c.h.s8.bf16 %v1638_v39  ;;  %v1736_v48 = vunpack.c.h.s8.bf16 %v1640_v40  ;;  %v1733_v49 = vunpack.c.h.s8.bf16 %v1637_v43  ;;  %v1735_v50 = vunpack.c.h.s8.bf16 %v1639_v44  ;;  %v1656_v0 = vld [vmem:[%s7863_s25 + $0x358] sm:$0xff]  ;;  %v1655_v4 = vld [vmem:[%s7863_s25 + $0x350] sm:$0xff]  ;;  %v1662_v11 = vld [vmem:[%s7863_s25 + $0x388] sm:$0xff] }
 0x1b2   : > { %1809 = vmatprep.subr.bf16.mxu0 %v1694_v17  ;;  %1850 = vmatprep.subr.bf16.mxu1 %v1696_v18  ;;  %v1742_v53 = vunpack.c.l.s8.bf16 %v1646_v51  ;;  %v1744_v54 = vunpack.c.l.s8.bf16 %v1648_v52  ;;  %v1741_v57 = vunpack.c.l.s8.bf16 %v1645_v55  ;;  %v1743_v58 = vunpack.c.l.s8.bf16 %v1647_v56  ;;  %v1664_v12 = vld [vmem:[%s7863_s25 + $0x398] sm:$0xff]  ;;  %v1661_v13 = vld [vmem:[%s7863_s25 + $0x380] sm:$0xff]  ;;  %v1663_v16 = vld [vmem:[%s7863_s25 + $0x390] sm:$0xff] }
 0x1b3   : > { %v1750_v59 = vunpack.c.h.s8.bf16 %v1646_v51  ;;  %v1752_v60 = vunpack.c.h.s8.bf16 %v1648_v52  ;;  %v1749_v61 = vunpack.c.h.s8.bf16 %v1645_v55  ;;  %v1751_v62 = vunpack.c.h.s8.bf16 %v1647_v56  ;;  %v1669_v27 = vld [vmem:[%s7863_s25 + $0x3c0] sm:$0xff]  ;;  %v1671_v28 = vld [vmem:[%s7863_s25 + $0x3d0] sm:$0xff] }
 0x1b4   : > { %6786 = vset.pattern.permute.xlu0 %v7289_v2  ;;  %v1760_v2 = vunpack.c.l.s8.bf16 %v1656_v0  ;;  %v1757_v5 = vunpack.c.l.s8.bf16 %v1653_v3  ;;  %v1759_v6 = vunpack.c.l.s8.bf16 %v1655_v4  ;;  %v1766_v7 = vunpack.c.h.s8.bf16 %v1654_v63 }
 0x1b5   : > { %976 = vperm.xlu0 %6786, %v947_v1   ;;  %1810 = vmatpush1.bf16.msra.mxu0 %v1693_v21  ;;  %v1758_v1 = vunpack.c.l.s8.bf16 %v1654_v63  ;;  %v1768_v8 = vunpack.c.h.s8.bf16 %v1656_v0  ;;  %v1765_v9 = vunpack.c.h.s8.bf16 %v1653_v3  ;;  %v1767_v10 = vunpack.c.h.s8.bf16 %v1655_v4  ;;  %v1670_v21 = vld [vmem:[%s7863_s25 + $0x3c8] sm:$0xff] }
 0x1b6   : > { %1851 = vmatpush1.bf16.msra.mxu1 %v1695_v22  ;;  %1811 = vmatprep.subr.bf16.mxu0 %v1702_v23  ;;  %v1774_v14 = vunpack.c.l.s8.bf16 %v1662_v11  ;;  %v1776_v15 = vunpack.c.l.s8.bf16 %v1664_v12  ;;  %v1773_v17 = vunpack.c.l.s8.bf16 %v1661_v13  ;;  %v1775_v18 = vunpack.c.l.s8.bf16 %v1663_v16  ;;  %v1672_v22 = vld [vmem:[%s7863_s25 + $0x3d8] sm:$0xff] }
 0x1b7   : > { %1852 = vmatprep.subr.bf16.mxu1 %v1704_v24  ;;  %v1782_v19 = vunpack.c.h.s8.bf16 %v1662_v11  ;;  %v1784_v20 = vunpack.c.h.s8.bf16 %v1664_v12  ;;  %v1781_v23 = vunpack.c.h.s8.bf16 %v1661_v13  ;;  %v1783_v24 = vunpack.c.h.s8.bf16 %v1663_v16 }
 0x1b8   : > { %v1798_v31 = vunpack.c.h.s8.bf16 %v1670_v21  ;;  %v1800_v32 = vunpack.c.h.s8.bf16 %v1672_v22  ;;  %v955_v39 = vlaneseq }
 0x1b9   : > { %1812 = vmatpush1.bf16.msra.mxu0 %v1701_v25  ;;  %v1790_v25 = vunpack.c.l.s8.bf16 %v1670_v21 }
 0x1ba   : > { %1853 = vmatpush1.bf16.msra.mxu1 %v1703_v26  ;;  %1813 = vmatprep.subr.bf16.mxu0 %v1710_v29  ;;  %v1792_v26 = vunpack.c.l.s8.bf16 %v1672_v22  ;;  %v1789_v29 = vunpack.c.l.s8.bf16 %v1669_v27  ;;  %v7954_v40 = vshrl.u32 %v955_v39, 7  ;;  %v7295_v39 = vmov 1326507024  }
 0x1bb   : > { %1854 = vmatprep.subr.bf16.mxu1 %v1712_v30  ;;  %v1791_v30 = vunpack.c.l.s8.bf16 %v1671_v28 }
 0x1bc   : > { %v7963_v43 = vsub.s32 1, %v7954_v40  ;;  %v7966_v44 = vsub.s32 3, %v7954_v40 }
 0x1bd   : > { %1814 = vmatpush1.bf16.msra.mxu0 %v1709_v33  ;;  %v1797_v33 = vunpack.c.h.s8.bf16 %v1669_v27 }
 0x1be   : > { %1855 = vmatpush1.bf16.msra.mxu1 %v1711_v34  ;;  %1815 = vmatprep.subr.bf16.mxu0 %v1718_v35  ;;  %v1799_v34 = vunpack.c.h.s8.bf16 %v1671_v28  ;;  %v7947_v35 = vld [vmem:[%s7863_s25 + $0x228] sm:$0xff]  ;;  %v7293_v28 = vmov 2102212464  }
 0x1bf   : > { %1856 = vmatprep.subr.bf16.mxu1 %v1720_v36  ;;  %v7950_v36 = vld [vmem:[%s7863_s25 + $0x238] sm:$0xff] }
 0x1c1   : > { %1816 = vmatpush1.bf16.msra.mxu0 %v1717_v37  ;;  %v1682_v37 = vunpack.c.l.s8.bf16 %v7947_v35 }
 0x1c2   : > { %1857 = vmatpush1.bf16.msra.mxu1 %v1719_v38  ;;  %1817 = vmatprep.subr.bf16.mxu0 %v1726_v41  ;;  %v1684_v38 = vunpack.c.l.s8.bf16 %v7950_v36  ;;  %v7957_v41 = vsub.s32 0, %v7954_v40 }
 0x1c3   : > { %1858 = vmatprep.subr.bf16.mxu1 %v1728_v42  ;;  %v7960_v42 = vsub.s32 2, %v7954_v40 }
 0x1c5   : > { %1818 = vmatpush1.bf16.msra.mxu0 %v1725_v45  ;;  %v948_v45 = vld [vmem:[%s731_s27] sm:$0xf] }
 0x1c6   : > { %1859 = vmatpush1.bf16.msra.mxu1 %v1727_v46  ;;  %1819 = vmatprep.subr.bf16.mxu0 %v1734_v47  ;;  %v958_v46 = vrot.slane %v948_v45, %v7957_v41  ;;  %v962_v47 = vrot.slane %v948_v45, %v7960_v42 }
 0x1c7   : > { %1860 = vmatprep.subr.bf16.mxu1 %v1736_v48  ;;  %v982_v48 = vrot.slane %v948_v45, %v7963_v43 }
 0x1c8   : > { %v968_v51 = vrot.slane %v958_v46, %v7957_v41  ;;  %v972_v52 = vrot.slane %v962_v47, %v7957_v41 }
 0x1c9   : > { %1820 = vmatpush1.bf16.msra.mxu0 %v1733_v49  ;;  %v986_v49 = vrot.slane %v948_v45, %v7966_v44 }
 0x1ca   : > { %1861 = vmatpush1.bf16.msra.mxu1 %v1735_v50  ;;  %1821 = vmatprep.subr.bf16.mxu0 %v1742_v53  ;;  %v992_v53 = vrot.slane %v982_v48, %v7963_v43 }
 0x1cb   : > { %1862 = vmatprep.subr.bf16.mxu1 %v1744_v54  ;;  %v996_v54 = vrot.slane %v986_v49, %v7963_v43 }
 0x1cd   : > { %1822 = vmatpush1.bf16.msra.mxu0 %v1741_v57 }
 0x1ce   : > { %1863 = vmatpush1.bf16.msra.mxu1 %v1743_v58  ;;  %1823 = vmatprep.subr.bf16.mxu0 %v1750_v59 }
 0x1cf   : > { %1864 = vmatprep.subr.bf16.mxu1 %v1752_v60 }
 0x1d1   : > { %1824 = vmatpush1.bf16.msra.mxu0 %v1749_v61 }
 0x1d2   : > { %1865 = vmatpush1.bf16.msra.mxu1 %v1751_v62  ;;  %1825 = vmatprep.subr.bf16.mxu0 %v1758_v1 }
 0x1d3   : > { %1866 = vmatprep.subr.bf16.mxu1 %v1760_v2 }
 0x1d5   : > { %1826 = vmatpush1.bf16.msra.mxu0 %v1757_v5 }
 0x1d6   : > { %1867 = vmatpush1.bf16.msra.mxu1 %v1759_v6  ;;  %1827 = vmatprep.subr.bf16.mxu0 %v1766_v7 }
 0x1d7   : > { %1868 = vmatprep.subr.bf16.mxu1 %v1768_v8 }
 0x1d9   : > { %1828 = vmatpush1.bf16.msra.mxu0 %v1765_v9 }
 0x1da   : > { %1869 = vmatpush1.bf16.msra.mxu1 %v1767_v10  ;;  %1829 = vmatprep.subr.bf16.mxu0 %v1774_v14 }
 0x1db   : > { %1870 = vmatprep.subr.bf16.mxu1 %v1776_v15 }
 0x1dd   : > { %1830 = vmatpush1.bf16.msra.mxu0 %v1773_v17 }
 0x1de   : > { %1871 = vmatpush1.bf16.msra.mxu1 %v1775_v18  ;;  %1831 = vmatprep.subr.bf16.mxu0 %v1782_v19 }
 0x1df   : > { %1872 = vmatprep.subr.bf16.mxu1 %v1784_v20  ;;  %v7290_v20 = vmov 683565275  }
 0x1e1   : > { %1832 = vmatpush1.bf16.msra.mxu0 %v1781_v23 }
 0x1e2   : > { %1873 = vmatpush1.bf16.msra.mxu1 %v1783_v24  ;;  %1833 = vmatprep.subr.bf16.mxu0 %v1790_v25  ;;  %v7291_v24 = vmov 2475754826  }
 0x1e3   : > { %1874 = vmatprep.subr.bf16.mxu1 %v1792_v26  ;;  %v7292_v26 = vmov 2131351028  }
 0x1e5   : > { %1834 = vmatpush1.bf16.msra.mxu0 %v1789_v29 }
 0x1e6   : > { %1875 = vmatpush1.bf16.msra.mxu1 %v1791_v30  ;;  %1835 = vmatprep.subr.bf16.mxu0 %v1798_v31  ;;  %v7294_v30 = vmov 920167782  }
 0x1e7   : > { %1876 = vmatprep.subr.bf16.mxu1 %v1800_v32 }
 0x1e9   : > { %1836 = vmatpush1.bf16.msra.mxu0 %v1797_v33 }
 0x1ea   : > { %1877 = vmatpush1.bf16.msra.mxu1 %v1799_v34  ;;  %1887 = vmatprep.subr.bf16.mxu0 %v1682_v37 }
 0x1eb   : > { %1928 = vmatprep.subr.bf16.mxu1 %v1684_v38 }
 0x22f   : > { %v952_v50 = vpop.permute.xlu0 %951 }
 0x230   : > { %v973_v56 = vmul.f32 %v968_v51, %v952_v50  ;;  %v974_v57 = vmul.f32 %v972_v52, %v952_v50 }
 0x234   : > { %v977_v55 = vpop.permute.xlu0 %976 }
 0x235   : > { %v997_v58 = vmul.f32 %v992_v53, %v977_v55  ;;  %v998_v59 = vmul.f32 %v996_v54, %v977_v55 }
 0x237   : > { %v999_v60 = vadd.f32 %v997_v58, %v973_v56  ;;  %v1000_v61 = vadd.f32 %v998_v59, %v974_v57 }
 0x239   : > { %v7978_v62 = vmul.f32 6.2831855, %v999_v60  ;;  %v7980_v63 = vmul.f32 6.2831855, %v1000_v61 }
 0x23b   : > { %v1003_v0 = vand.u32 2147483647, %v7978_v62  ;;  %v1006_v1 = vand.u32 2139095040, %v7978_v62  ;;  %v1109_v2 = vand.u32 2139095040, %v7980_v63  ;;  %v1106_v5 = vand.u32 2147483647, %v7980_v63 }
 0x23c   : > { %vm1005_vm14 = vcmp.lt.s32.totalorder %v7978_v62, 0 }
 0x23d   : > { %v1007_v3 = vshrl.u32 %v1006_v1, 23  ;;  %v1010_v4 = vand.u32 8388607, %v1003_v0  ;;  %v1110_v6 = vshrl.u32 %v1109_v2, 23  ;;  %v7990_v11 = vand.u32 8388607, %v1106_v5 }
 0x23e   : > { %vm1004_vm15 = vcmp.le.f32.partialorder %v1003_v0, 0.7853982 }
 0x23f   : > { %v6513_v7 = vadd.s32 4294967169, %v1007_v3  ;;  %v6517_v8 = vadd.s32 4294967169, %v1110_v6  ;;  %v1011_v10 = vor.u32 8388608, %v1010_v4  ;;  %v1114_v18 = vor.u32 8388608, %v7990_v11 }
 0x241   : > { %v1013_v9 = vadd.s32 1, %v6513_v7  ;;  %v1116_v12 = vadd.s32 1, %v6517_v8  ;;  %v7992_v17 = vshll.u32 %v1011_v10, 8 }
 0x243   : > { %vm1014_vm0 = vcmp.gt.s32.totalorder %v1013_v9, 0  ;;  %vm1117_vm1 = vcmp.gt.s32.totalorder %v1116_v12, 0 }
 0x244   : > { %v1015_v13 = vsel %vm1014_vm0, %v1013_v9, 0  ;;  %v1118_v16 = vsel %vm1117_vm1, %v1116_v12, 0  ;;  %vm1108_vm0 = vcmp.lt.s32.totalorder %v7980_v63, 0  ;;  %vm1107_vm1 = vcmp.le.f32.partialorder %v1106_v5, 0.7853982 }
 0x245   : > { %v1016_v14 = vshrl.u32 %v1015_v13, 5  ;;  %v1017_v15 = vand.u32 31, %v1015_v13  ;;  %v7995_v22 = vshrl.u32 %v1118_v16, 5  ;;  %v1120_v23 = vand.u32 31, %v1118_v16 }
 0x247   : > { %v1018_v19 = vsub.s32 32, %v1017_v15  ;;  %v1020_v21 = vshll.u32 %v7290_v20, %v1017_v15  ;;  %v1023_v25 = vshll.u32 %v7291_v24, %v1017_v15  ;;  %v1026_v27 = vshll.u32 %v7292_v26, %v1017_v15 }
 0x248   : > { %v1029_v29 = vshll.u32 %v7293_v28, %v1017_v15  ;;  %v1032_v31 = vshll.u32 %v7294_v30, %v1017_v15  ;;  %vm1035_vm2 = vcmp.lt.s32.totalorder %v1016_v14, 1  ;;  %vm1036_vm3 = vcmp.lt.s32.totalorder %v1016_v14, 2 }
 0x249   : > { %v1021_v32 = vshrl.u32 %v7291_v24, %v1018_v19  ;;  %v1024_v33 = vshrl.u32 %v7292_v26, %v1018_v19  ;;  %v1027_v34 = vshrl.u32 %v7293_v28, %v1018_v19  ;;  %v1019_v37 = vshrl.u32 %v7290_v20, %v1018_v19 }
 0x24a   : > { %v1030_v38 = vshrl.u32 %v7294_v30, %v1018_v19  ;;  %v1033_v45 = vshrl.u32 %v7295_v39, %v1018_v19  ;;  %v1121_v49 = vsub.s32 32, %v1120_v23  ;;  %vm1037_vm4 = vcmp.lt.s32.totalorder %v1016_v14, 3 }
 0x24b   : > { %v1022_v46 = vor.u32 %v1021_v32, %v1020_v21  ;;  %v1025_v47 = vor.u32 %v1024_v33, %v1023_v25  ;;  %v1028_v48 = vor.u32 %v1027_v34, %v1026_v27  ;;  %vm1038_vm5 = vcmp.lt.s32.totalorder %v1016_v14, 4 }
 0x24c   : > { %v1031_v50 = vor.u32 %v1030_v38, %v1029_v29  ;;  %v1034_v51 = vor.u32 %v1033_v45, %v1032_v31  ;;  %v1123_v59 = vshll.u32 %v7290_v20, %v1120_v23  ;;  %v1124_v1 = vshrl.u32 %v7291_v24, %v1121_v49 }
 0x24d   : > { %v1039_v52 = vsel %vm1035_vm2, %v1019_v37, %v1022_v46  ;;  %v1040_v53 = vsel %vm1038_vm5, %v1028_v48, 2102212464  ;;  %v1043_v54 = vsel %vm1035_vm2, %v1022_v46, %v1025_v47  ;;  %v1047_v55 = vsel %vm1035_vm2, %v1025_v47, %v1028_v48 }
 0x24e   : > { %v1041_v56 = vsel %vm1037_vm4, %v1025_v47, %v1040_v53  ;;  %v1044_v57 = vsel %vm1038_vm5, %v1031_v50, 920167782  ;;  %v1048_v58 = vsel %vm1038_vm5, %v1034_v51, 1326507024  ;;  %v1126_v2 = vshll.u32 %v7291_v24, %v1120_v23 }
 0x24f   : > { %v1045_v60 = vsel %vm1037_vm4, %v1028_v48, %v1044_v57  ;;  %v1049_v61 = vsel %vm1037_vm4, %v1031_v50, %v1048_v58  ;;  %v1042_v3 = vsel %vm1036_vm3, %v1039_v52, %v1041_v56  ;;  %v1127_v7 = vshrl.u32 %v7292_v26, %v1121_v49 }
 0x250   : > { %v1046_v4 = vsel %vm1036_vm3, %v1043_v54, %v1045_v60  ;;  %v1050_v6 = vsel %vm1036_vm3, %v1047_v55, %v1049_v61  ;;  %v1125_v12 = vor.u32 %v1124_v1, %v1123_v59  ;;  %v1129_v15 = vshll.u32 %v7292_v26, %v1120_v23 }
 0x251   : > { %v8004_v8 = vmul.u32.u64.low %v7992_v17, %v1050_v6  ;;  %v8005_v9 = vmul.u32.u64.high %v7992_v17, %v1050_v6, %v8004_v8  ;;  %v8008_v10 = vmul.u32.u64.low %v7992_v17, %v1046_v4  ;;  %v8009_v11 = vmul.u32.u64.high %v7992_v17, %v1046_v4, %v8008_v10 }
 0x252   : > { %v1128_v13 = vor.u32 %v1127_v7, %v1126_v2  ;;  %v1130_v16 = vshrl.u32 %v7293_v28, %v1121_v49  ;;  %v1132_v19 = vshll.u32 %v7293_v28, %v1120_v23  ;;  %v1133_v21 = vshrl.u32 %v7294_v30, %v1121_v49 }
 0x253   : > { %v1136_v24 = vshrl.u32 %v7295_v39, %v1121_v49  ;;  %v1154_v25 = vshll.u32 %v1114_v18, 8  ;;  %v1058_v14 = vmul.u32 %v7992_v17, %v1042_v3  ;;  %v1122_v27 = vshrl.u32 %v7290_v20, %v1121_v49 }
 0x254   : > { %v1131_v29 = vor.u32 %v1130_v16, %v1129_v15  ;;  %v1135_v31 = vshll.u32 %v7294_v30, %v1120_v23  ;;  %vm1060_vm6 = vc.u32 %v8005_v9, %v8008_v10  ;;  %v1061_v32 = vadd.s32 1, %v8009_v11 }
 0x255   : > { %v1134_v33 = vor.u32 %v1133_v21, %v1132_v19  ;;  %vm1138_vm7 = vcmp.lt.s32.totalorder %v7995_v22, 1  ;;  %vm1140_vm8 = vcmp.lt.s32.totalorder %v7995_v22, 3  ;;  %vm1141_vm9 = vcmp.lt.s32.totalorder %v7995_v22, 4 }
 0x256   : > { %v1137_v34 = vor.u32 %v1136_v24, %v1135_v31  ;;  %v1146_v26 = vsel %vm1138_vm7, %v1125_v12, %v1128_v13  ;;  %v1062_v18 = vsel %vm1060_vm6, %v1061_v32, %v8009_v11  ;;  %v1143_v28 = vsel %vm1141_vm9, %v1131_v29, 2102212464 }
 0x257   : > { %v1147_v17 = vsel %vm1141_vm9, %v1134_v33, 920167782  ;;  %v1150_v20 = vsel %vm1138_vm7, %v1128_v13, %v1131_v29  ;;  %v1063_v37 = vadd.s32 %v1062_v18, %v1058_v14  ;;  %vm1139_vm10 = vcmp.lt.s32.totalorder %v7995_v22, 2 }
 0x258   : > { %v1148_v23 = vsel %vm1140_vm8, %v1131_v29, %v1147_v17  ;;  %v1151_v30 = vsel %vm1141_vm9, %v1137_v34, 1326507024  ;;  %v1142_v38 = vsel %vm1138_vm7, %v1122_v27, %v1125_v12  ;;  %v1144_v39 = vsel %vm1140_vm8, %v1128_v13, %v1143_v28 }
 0x259   : > { %v1149_v45 = vsel %vm1139_vm10, %v1146_v26, %v1148_v23  ;;  %v1152_v46 = vsel %vm1140_vm8, %v1134_v33, %v1151_v30  ;;  %v1064_v47 = vadd.s32 536870912, %v1063_v37  ;;  %v1145_v54 = vsel %vm1139_vm10, %v1142_v38, %v1144_v39 }
 0x25a   : > { %v1153_v48 = vsel %vm1139_vm10, %v1150_v20, %v1152_v46  ;;  %v8019_v49 = vmul.u32.u64.low %v1154_v25, %v1149_v45  ;;  %v8020_v50 = vmul.u32.u64.high %v1154_v25, %v1149_v45, %v8019_v49  ;;  %v1161_v22 = vmul.u32 %v1154_v25, %v1145_v54 }
 0x25b   : > { %v8022_v51 = vmul.u32.u64.low %v1154_v25, %v1153_v48  ;;  %v8023_v52 = vmul.u32.u64.high %v1154_v25, %v1153_v48, %v8022_v51  ;;  %v1065_v53 = vshrl.u32 %v1064_v47, 30  ;;  %v1059_v12 = vadd.s32 %v8008_v10, %v8005_v9 }
 0x25c   : > { %v1164_v56 = vadd.s32 1, %v8020_v50  ;;  %vm1095_vm7 = vweird.f32 %v7978_v62 }
 0x25d   : > { %v1066_v55 = vshll.u32 %v1065_v53, 30  ;;  %vm1163_vm11 = vc.u32 %v8023_v52, %v8019_v49  ;;  %v1162_v26 = vadd.s32 %v8019_v49, %v8023_v52  ;;  %v1089_v23 = vsub.s32 4, %v1065_v53 }
 0x25e   : > { %v1165_v58 = vsel %vm1163_vm11, %v1164_v56, %v8020_v50 }
 0x25f   : > { %v1067_v57 = vsub.s32 %v1063_v37, %v1066_v55  ;;  %v1166_v59 = vadd.s32 %v1165_v58, %v1161_v22  ;;  %v1090_v47 = vsel %vm1005_vm14, %v1089_v23, %v1065_v53 }
 0x260   : > { %v1092_v52 = vsel %vm1004_vm15, 0, %v1090_v47 }
 0x261   : > { %v1069_v60 = vsub.s32 0, %v1067_v57  ;;  %v1167_v61 = vadd.s32 536870912, %v1166_v59  ;;  %v1304_v56 = vadd.s32 3, %v1092_v52 }
 0x263   : > { %v6514_v1 = vmin.u32 %v1069_v60, %v1067_v57  ;;  %v1168_v2 = vshrl.u32 %v1167_v61, 30  ;;  %v1305_v61 = vand.u32 3, %v1304_v56  ;;  %v1635_v56 = vld [vmem:[%s7863_s25 + $0x2b0] sm:$0xff] }
 0x265   : > { %v1071_v3 = vclz %v6514_v1  ;;  %v1169_v4 = vshll.u32 %v1168_v2, 30  ;;  %v1192_v51 = vsub.s32 4, %v1168_v2  ;;  %vm1307_vm4 = vcmp.eq.s32.totalorder %v1305_v61, 0 }
 0x266   : > { %vm1310_vm5 = vcmp.eq.s32.totalorder %v1305_v61, 2  ;;  %vm1306_vm8 = vcmp.lt.s32.totalorder %v1305_v61, 2 }
 0x267   : > { %v6515_v6 = vadd.s32 4294967294, %v1071_v3  ;;  %v1170_v7 = vsub.s32 %v1166_v59, %v1169_v4  ;;  %v1193_v0 = vsel %vm1108_vm0, %v1192_v51, %v1168_v2 }
 0x268   : > { %v1195_v58 = vsel %vm1107_vm1, 0, %v1193_v0  ;;  %v1633_v0 = vld [vmem:[%s7863_s25 + $0x2a0] sm:$0xff] }
 0x269   : > { %vm6516_vm12 = vcmp.lt.s32.totalorder %v6515_v6, 0  ;;  %v1172_v11 = vsub.s32 0, %v1170_v7  ;;  %v1408_v3 = vadd.s32 3, %v1195_v58  ;;  %v1721_v61 = vunpack.c.h.s8.bf16 %v1633_v0 }
 0x26a   : > { %v1074_v8 = vsel %vm6516_vm12, 0, %v6515_v6 }
 0x26b   : > { %v1075_v13 = vsub.s32 32, %v1074_v8  ;;  %v1079_v15 = vsub.s32 4294967266, %v1074_v8  ;;  %v6518_v16 = vmin.u32 %v1172_v11, %v1170_v7  ;;  %v1076_v19 = vshll.u32 %v1067_v57, %v1074_v8 }
 0x26c   : > { %v1096_v57 = vand.u32 3, %v1092_v52  ;;  %v1409_v8 = vand.u32 3, %v1408_v3  ;;  %v1199_v11 = vand.u32 3, %v1195_v58 }
 0x26d   : > { %v1077_v21 = vshrl.u32 %v1059_v12, %v1075_v13  ;;  %v1080_v24 = vadd.s32 127, %v1079_v15  ;;  %v1174_v25 = vclz %v6518_v16 }
 0x26e   : > { %vm1101_vm2 = vcmp.eq.s32.totalorder %v1096_v57, 2  ;;  %vm1098_vm3 = vcmp.eq.s32.totalorder %v1096_v57, 0  ;;  %vm1097_vm6 = vcmp.lt.s32.totalorder %v1096_v57, 2  ;;  %vm1414_vm9 = vcmp.eq.s32.totalorder %v1409_v8, 2 }
 0x26f   : > { %v1078_v14 = vor.u32 %v1077_v21, %v1076_v19  ;;  %v1081_v27 = vshll.u32 %v1080_v24, 23  ;;  %v6519_v29 = vadd.s32 4294967294, %v1174_v25  ;;  %vm1201_vm10 = vcmp.eq.s32.totalorder %v1199_v11, 0 }
 0x270   : > { %vm1204_vm11 = vcmp.eq.s32.totalorder %v1199_v11, 2  ;;  %vm1411_vm12 = vcmp.eq.s32.totalorder %v1409_v8, 0  ;;  %v1715_v57 = vunpack.c.l.s8.bf16 %v1635_v56 }
 0x271   : > { %v1082_v31 = vor.u32 4788187, %v1081_v27  ;;  %vm6520_vm13 = vcmp.lt.s32.totalorder %v6519_v29, 0  ;;  %v1085_v33 = vcvt.s32.f32 %v1078_v14 }
 0x272   : > { %v1177_v34 = vsel %vm6520_vm13, 0, %v6519_v29  ;;  %vm1410_vm13 = vcmp.lt.s32.totalorder %v1409_v8, 2  ;;  %v1617_v29 = vld [vmem:[%s7863_s25 + $0x220] sm:$0xff] }
 0x273   : > { %v1083_v32 = vand.u32 2147483647, %v1082_v31  ;;  %v1178_v18 = vsub.s32 32, %v1177_v34  ;;  %v1182_v28 = vsub.s32 4294967266, %v1177_v34  ;;  %v1179_v10 = vshll.u32 %v1170_v7, %v1177_v34  ;;  %v1619_v31 = vld [vmem:[%s7863_s25 + $0x230] sm:$0xff] }
 0x274   : > { %v1689_v23 = vunpack.c.h.s8.bf16 %v1617_v29 }
 0x275   : > { %v1086_v9 = vmul.f32 %v1085_v33, %v1083_v32  ;;  %v1180_v17 = vshrl.u32 %v1162_v26, %v1178_v18  ;;  %v1183_v20 = vadd.s32 127, %v1182_v28 }
 0x277   : > { %v1087_v37 = vxor.u32 2147483648, %v1086_v9  ;;  %v1181_v30 = vor.u32 %v1180_v17, %v1179_v10  ;;  %v1184_v38 = vshll.u32 %v1183_v20, 23  ;;  %v1683_v10 = vunpack.c.l.s8.bf16 %v1619_v31 }
 0x278   : > { %v1690_v17 = vunpack.c.h.s8.bf16 %v7947_v35  ;;  %v1692_v20 = vunpack.c.h.s8.bf16 %v7950_v36  ;;  %v1627_v35 = vld [vmem:[%s7863_s25 + $0x270] sm:$0xff] }
 0x279   : > { %v1088_v39 = vsel %vm1005_vm14, %v1087_v37, %v1086_v9  ;;  %v1185_v46 = vor.u32 4788187, %v1184_v38  ;;  %v1188_v49 = vcvt.s32.f32 %v1181_v30  ;;  %vm1200_vm14 = vcmp.lt.s32.totalorder %v1199_v11, 2  ;;  %v1626_v37 = vld [vmem:[%s7863_s25 + $0x268] sm:$0xff] }
 0x27a   : > { %v1091_v45 = vsel %vm1004_vm15, %v7978_v62, %v1088_v39  ;;  %vm1198_vm15 = vweird.f32 %v7980_v63  ;;  %v1681_v9 = vunpack.c.l.s8.bf16 %v1617_v29  ;;  %v1691_v30 = vunpack.c.h.s8.bf16 %v1619_v31 }
 0x27b   : > { %6787 = vcosq.f32 %v1091_v45  ;;  %v1186_v48 = vand.u32 2147483647, %v1185_v46  ;;  %v1698_v38 = vunpack.c.l.s8.bf16 %v1626_v37  ;;  %v1699_v46 = vunpack.c.l.s8.bf16 %v1627_v35 }
 0x27c   : > { %6789 = vsinq.f32 %v1091_v45  ;;  %v1625_v45 = vld [vmem:[%s7863_s25 + $0x260] sm:$0xff]  ;;  %v1706_v47 = vunpack.c.h.s8.bf16 %v1626_v37  ;;  %v1707_v52 = vunpack.c.h.s8.bf16 %v1627_v35 }
 0x27d   : > { %v1189_v50 = vmul.f32 %v1188_v49, %v1186_v48  ;;  %v1697_v36 = vunpack.c.l.s8.bf16 %v1625_v45  ;;  %v1634_v49 = vld [vmem:[%s7863_s25 + $0x2a8] sm:$0xff]  ;;  %v1705_v51 = vunpack.c.h.s8.bf16 %v1625_v45 }
 0x27f   : > { %v1190_v54 = vxor.u32 2147483648, %v1189_v50 }
 0x281   : > { %v1191_v55 = vsel %vm1108_vm0, %v1190_v54, %v1189_v50  ;;  %v1636_v50 = vld [vmem:[%s7863_s25 + $0x2b8] sm:$0xff]  ;;  %v1714_v54 = vunpack.c.l.s8.bf16 %v1634_v49 }
 0x282   : > { %v1194_v22 = vsel %vm1107_vm1, %v7980_v63, %v1191_v55  ;;  %v1628_v63 = vld [vmem:[%s7863_s25 + $0x278] sm:$0xff]  ;;  %v1716_v55 = vunpack.c.l.s8.bf16 %v1636_v50  ;;  %v1724_v58 = vunpack.c.h.s8.bf16 %v1636_v50 }
 0x283   : > { %6791 = vcosq.f32 %v1194_v22  ;;  %v1700_v39 = vunpack.c.l.s8.bf16 %v1628_v63  ;;  %v1708_v48 = vunpack.c.h.s8.bf16 %v1628_v63 }
 0x284   : > { %6793 = vsinq.f32 %v1194_v22  ;;  %v1713_v22 = vunpack.c.l.s8.bf16 %v1633_v0 }
 0x285   : > { %v6788_v53 = vpop.eup %6787 }
 0x286   : > { %v6790_v59 = vpop.eup %6789  ;;  %v1102_v60 = vxor.u32 2147483648, %v6788_v53 }
 0x287   : > { %v1099_v1 = vxor.u32 2147483648, %v6790_v59 }
 0x288   : > { %v1103_v4 = vsel %vm1101_vm2, %v1102_v60, %v6790_v59  ;;  %v1312_v2 = vsel %vm1310_vm5, %v1102_v60, %v6790_v59  ;;  %v1642_v59 = vld [vmem:[%s7863_s25 + $0x2e8] sm:$0xff]  ;;  %v1644_v60 = vld [vmem:[%s7863_s25 + $0x2f8] sm:$0xff] }
 0x289   : > { %v1100_v6 = vsel %vm1098_vm3, %v6788_v53, %v1099_v1  ;;  %v1309_v5 = vsel %vm1307_vm4, %v6788_v53, %v1099_v1  ;;  %v1722_v53 = vunpack.c.h.s8.bf16 %v1634_v49  ;;  %v1723_v1 = vunpack.c.h.s8.bf16 %v1635_v56 }
 0x28a   : > { %v1104_v7 = vsel %vm1097_vm6, %v1100_v6, %v1103_v4  ;;  %v1313_v15 = vsel %vm1306_vm8, %v1309_v5, %v1312_v2  ;;  %v1730_v3 = vunpack.c.l.s8.bf16 %v1642_v59  ;;  %v1732_v4 = vunpack.c.l.s8.bf16 %v1644_v60  ;;  %v1641_v6 = vld [vmem:[%s7863_s25 + $0x2e0] sm:$0xff]  ;;  %v1643_v5 = vld [vmem:[%s7863_s25 + $0x2f0] sm:$0xff] }
 0x28b   : > { %v8041_v12 = vsel %vm1095_vm7, nan, %v1104_v7  ;;  %v1314_v25 = vsel %vm1095_vm7, nan, %v1313_v15  ;;  %v1729_v2 = vunpack.c.l.s8.bf16 %v1641_v6  ;;  %v1731_v7 = vunpack.c.l.s8.bf16 %v1643_v5  ;;  %v1652_v15 = vld [vmem:[%s7863_s25 + $0x338] sm:$0xff] }
 0x28c   : > { %v8048_v18 = vpack.c.bf16 %v1314_v25, %v1314_v25  ;;  %v1738_v8 = vunpack.c.h.s8.bf16 %v1642_v59  ;;  %v1740_v11 = vunpack.c.h.s8.bf16 %v1644_v60  ;;  %v1649_v25 = vld [vmem:[%s7863_s25 + $0x320] sm:$0xff] }
 0x28d   : > { %v6792_v13 = vpop.eup %6791 }
 0x28e   : > { %v6794_v16 = vpop.eup %6793  ;;  %v1205_v19 = vxor.u32 2147483648, %v6792_v13 }
 0x28f   : > { %v1202_v21 = vxor.u32 2147483648, %v6794_v16 }
 0x290   : > { %v1416_v24 = vsel %vm1414_vm9, %v1205_v19, %v6794_v16  ;;  %v1206_v14 = vsel %vm1204_vm11, %v1205_v19, %v6794_v16  ;;  %v1737_v16 = vunpack.c.h.s8.bf16 %v1641_v6  ;;  %v1739_v19 = vunpack.c.h.s8.bf16 %v1643_v5 }
 0x291   : > { %v1413_v27 = vsel %vm1411_vm12, %v6792_v13, %v1202_v21  ;;  %v1203_v32 = vsel %vm1201_vm10, %v6792_v13, %v1202_v21  ;;  %v1650_v13 = vld [vmem:[%s7863_s25 + $0x328] sm:$0xff] }
 0x292   : > { %v1417_v33 = vsel %vm1410_vm13, %v1413_v27, %v1416_v24  ;;  %v1207_v34 = vsel %vm1200_vm14, %v1203_v32, %v1206_v14  ;;  %v1746_v21 = vunpack.c.l.s8.bf16 %v1650_v13  ;;  %v1748_v24 = vunpack.c.l.s8.bf16 %v1652_v15  ;;  %v1651_v14 = vld [vmem:[%s7863_s25 + $0x330] sm:$0xff] }
 0x293   : > { %v1418_v26 = vsel %vm1198_vm15, nan, %v1417_v33  ;;  %v8050_v28 = vsel %vm1198_vm15, nan, %v1207_v34  ;;  %v1745_v27 = vunpack.c.l.s8.bf16 %v1649_v25  ;;  %v1747_v29 = vunpack.c.l.s8.bf16 %v1651_v14  ;;  %v1658_v33 = vld [vmem:[%s7863_s25 + $0x368] sm:$0xff]  ;;  %v1660_v34 = vld [vmem:[%s7863_s25 + $0x378] sm:$0xff] }
 0x294   : > { %v1420_v62 = vpack.c.bf16 %v1418_v26, %v1418_v26  ;;  %v1754_v31 = vunpack.c.h.s8.bf16 %v1650_v13  ;;  %v1756_v32 = vunpack.c.h.s8.bf16 %v1652_v15  ;;  %v1753_v26 = vunpack.c.h.s8.bf16 %v1649_v25  ;;  %v1432_v25 = vld [vmem:[%s7863_s25 + $0x58] sm:$0xff] }
 0x296   : > { %1837 = vmatprep.mubr.bf16.mxu0 %v1420_v62  ;;  %1878 = vmatprep.mubr.bf16.mxu1 %v1420_v62 }
 0x297   : > { %1838 = vmatmul.mubr.bf16.vlgmr.msra.gmra.mrb[0].mxu0 %v8048_v18  ;;  %1879 = vmatmul.mubr.bf16.vlgmr.msra.gmra.mrb[0].mxu1 %v8048_v18 }
 0x298   : > { %1888 = vmatpush1.bf16.msra.mxu0 %v1681_v9  ;;  %1929 = vmatpush1.bf16.msra.mxu1 %v1683_v10  ;;  %v1762_v9 = vunpack.c.l.s8.bf16 %v1658_v33  ;;  %v1764_v10 = vunpack.c.l.s8.bf16 %v1660_v34 }
 0x299   : > { %1919 = vmatprep.mubr.bf16.mxu0 %v1420_v62  ;;  %1960 = vmatprep.mubr.bf16.mxu1 %v1420_v62  ;;  %v1755_v62 = vunpack.c.h.s8.bf16 %v1651_v14 }
 0x29a   : > { %1889 = vmatprep.subr.bf16.mxu0 %v1690_v17  ;;  %1930 = vmatprep.subr.bf16.mxu1 %v1692_v20  ;;  %v1657_v17 = vld [vmem:[%s7863_s25 + $0x360] sm:$0xff]  ;;  %v1659_v20 = vld [vmem:[%s7863_s25 + $0x370] sm:$0xff] }
 0x29b   : > { %v1761_v37 = vunpack.c.l.s8.bf16 %v1657_v17  ;;  %v1763_v63 = vunpack.c.l.s8.bf16 %v1659_v20  ;;  %v1769_v45 = vunpack.c.h.s8.bf16 %v1657_v17  ;;  %v1771_v35 = vunpack.c.h.s8.bf16 %v1659_v20 }
 0x29c   : > { %1890 = vmatpush1.bf16.msra.mxu0 %v1689_v23  ;;  %1931 = vmatpush1.bf16.msra.mxu1 %v1691_v30  ;;  %v1770_v23 = vunpack.c.h.s8.bf16 %v1658_v33  ;;  %v1772_v30 = vunpack.c.h.s8.bf16 %v1660_v34 }
 0x29d   : > { %1891 = vmatprep.subr.bf16.mxu0 %v1698_v38  ;;  %1932 = vmatprep.subr.bf16.mxu1 %v1700_v39  ;;  %v1666_v38 = vld [vmem:[%s7863_s25 + $0x3a8] sm:$0xff]  ;;  %v1668_v39 = vld [vmem:[%s7863_s25 + $0x3b8] sm:$0xff] }
 0x2a0   : > { %1892 = vmatpush1.bf16.msra.mxu0 %v1697_v36  ;;  %1933 = vmatpush1.bf16.msra.mxu1 %v1699_v46  ;;  %v1778_v36 = vunpack.c.l.s8.bf16 %v1666_v38  ;;  %v1780_v46 = vunpack.c.l.s8.bf16 %v1668_v39 }
 0x2a1   : > { %1893 = vmatprep.subr.bf16.mxu0 %v1706_v47  ;;  %1934 = vmatprep.subr.bf16.mxu1 %v1708_v48  ;;  %v1665_v47 = vld [vmem:[%s7863_s25 + $0x3a0] sm:$0xff]  ;;  %v1667_v48 = vld [vmem:[%s7863_s25 + $0x3b0] sm:$0xff] }
 0x2a2   : > { %v1777_v49 = vunpack.c.l.s8.bf16 %v1665_v47  ;;  %v1779_v50 = vunpack.c.l.s8.bf16 %v1667_v48  ;;  %v1785_v0 = vunpack.c.h.s8.bf16 %v1665_v47  ;;  %v1787_v56 = vunpack.c.h.s8.bf16 %v1667_v48 }
 0x2a4   : > { %1894 = vmatpush1.bf16.msra.mxu0 %v1705_v51  ;;  %1935 = vmatpush1.bf16.msra.mxu1 %v1707_v52  ;;  %v1786_v51 = vunpack.c.h.s8.bf16 %v1666_v38  ;;  %v1788_v52 = vunpack.c.h.s8.bf16 %v1668_v39 }
 0x2a5   : > { %1895 = vmatprep.subr.bf16.mxu0 %v1714_v54  ;;  %1936 = vmatprep.subr.bf16.mxu1 %v1716_v55  ;;  %v1674_v54 = vld [vmem:[%s7863_s25 + $0x3e8] sm:$0xff]  ;;  %v1676_v55 = vld [vmem:[%s7863_s25 + $0x3f8] sm:$0xff] }
 0x2a8   : > { %1896 = vmatpush1.bf16.msra.mxu0 %v1713_v22  ;;  %1937 = vmatpush1.bf16.msra.mxu1 %v1715_v57  ;;  %v1794_v22 = vunpack.c.l.s8.bf16 %v1674_v54  ;;  %v1796_v57 = vunpack.c.l.s8.bf16 %v1676_v55 }
 0x2a9   : > { %1897 = vmatprep.subr.bf16.mxu0 %v1722_v53  ;;  %1938 = vmatprep.subr.bf16.mxu1 %v1724_v58  ;;  %v1673_v53 = vld [vmem:[%s7863_s25 + $0x3e0] sm:$0xff]  ;;  %v1675_v58 = vld [vmem:[%s7863_s25 + $0x3f0] sm:$0xff] }
 0x2aa   : > { %v1793_v59 = vunpack.c.l.s8.bf16 %v1673_v53  ;;  %v1795_v60 = vunpack.c.l.s8.bf16 %v1675_v58  ;;  %v1801_v6 = vunpack.c.h.s8.bf16 %v1673_v53  ;;  %v1803_v5 = vunpack.c.h.s8.bf16 %v1675_v58 }
 0x2ac   : > { %1898 = vmatpush1.bf16.msra.mxu0 %v1721_v61  ;;  %1939 = vmatpush1.bf16.msra.mxu1 %v1723_v1  ;;  %v1802_v61 = vunpack.c.h.s8.bf16 %v1674_v54  ;;  %v1804_v1 = vunpack.c.h.s8.bf16 %v1676_v55 }
 0x2ad   : > { %1899 = vmatprep.subr.bf16.mxu0 %v1730_v3  ;;  %1940 = vmatprep.subr.bf16.mxu1 %v1732_v4  ;;  %v1422_v3 = vld [vmem:[%s7863_s25 + $0x8] sm:$0xff]  ;;  %v1424_v4 = vld [vmem:[%s7863_s25 + $0x18] sm:$0xff] }
 0x2b0   : > { %1900 = vmatpush1.bf16.msra.mxu0 %v1729_v2  ;;  %1941 = vmatpush1.bf16.msra.mxu1 %v1731_v7  ;;  %v1486_v2 = vunpack.c.l.s8.bf16 %v1422_v3  ;;  %v1488_v7 = vunpack.c.l.s8.bf16 %v1424_v4 }
 0x2b1   : > { %1901 = vmatprep.subr.bf16.mxu0 %v1738_v8  ;;  %1942 = vmatprep.subr.bf16.mxu1 %v1740_v11  ;;  %v1421_v8 = vld [vmem:[%s7863_s25] sm:$0xff]  ;;  %v1423_v11 = vld [vmem:[%s7863_s25 + $0x10] sm:$0xff] }
 0x2b2   : > { %v1485_v13 = vunpack.c.l.s8.bf16 %v1421_v8  ;;  %v1487_v15 = vunpack.c.l.s8.bf16 %v1423_v11  ;;  %v1493_v14 = vunpack.c.h.s8.bf16 %v1421_v8 }
 0x2b4   : > { %1902 = vmatpush1.bf16.msra.mxu0 %v1737_v16  ;;  %1943 = vmatpush1.bf16.msra.mxu1 %v1739_v19  ;;  %v8090_v16 = vpack.c.bf16 %v8050_v28, %v8050_v28  ;;  %v1494_v19 = vunpack.c.h.s8.bf16 %v1422_v3 }
 0x2b5   : > { %1903 = vmatprep.subr.bf16.mxu0 %v1746_v21  ;;  %1944 = vmatprep.subr.bf16.mxu1 %v1748_v24  ;;  %v1496_v21 = vunpack.c.h.s8.bf16 %v1424_v4  ;;  %v1430_v24 = vld [vmem:[%s7863_s25 + $0x48] sm:$0xff] }
 0x2b6   : > { %v1502_v28 = vunpack.c.l.s8.bf16 %v1430_v24  ;;  %v1510_v34 = vunpack.c.h.s8.bf16 %v1430_v24 }
 0x2b8   : > { %1904 = vmatpush1.bf16.msra.mxu0 %v1745_v27  ;;  %1945 = vmatpush1.bf16.msra.mxu1 %v1747_v29  ;;  %v1495_v27 = vunpack.c.h.s8.bf16 %v1423_v11  ;;  %v1429_v29 = vld [vmem:[%s7863_s25 + $0x40] sm:$0xff] }
 0x2b9   : > { %1905 = vmatprep.subr.bf16.mxu0 %v1754_v31  ;;  %1946 = vmatprep.subr.bf16.mxu1 %v1756_v32  ;;  %v1504_v31 = vunpack.c.l.s8.bf16 %v1432_v25  ;;  %v1431_v32 = vld [vmem:[%s7863_s25 + $0x50] sm:$0xff] }
 0x2ba   : > { %v1503_v33 = vunpack.c.l.s8.bf16 %v1431_v32  ;;  %v1511_v17 = vunpack.c.h.s8.bf16 %v1431_v32 }
 0x2bc   : > { %1906 = vmatpush1.bf16.msra.mxu0 %v1753_v26  ;;  %1947 = vmatpush1.bf16.msra.mxu1 %v1755_v62  ;;  %v1512_v26 = vunpack.c.h.s8.bf16 %v1432_v25  ;;  %v1438_v62 = vld [vmem:[%s7863_s25 + $0x88] sm:$0xff] }
 0x2bd   : > { %1907 = vmatprep.subr.bf16.mxu0 %v1762_v9  ;;  %1948 = vmatprep.subr.bf16.mxu1 %v1764_v10  ;;  %v1440_v9 = vld [vmem:[%s7863_s25 + $0x98] sm:$0xff]  ;;  %v1509_v10 = vunpack.c.h.s8.bf16 %v1429_v29  ;;  %v1518_v20 = vunpack.c.l.s8.bf16 %v1438_v62  ;;  %v1526_v39 = vunpack.c.h.s8.bf16 %v1438_v62 }
 0x2c0   : > { %1908 = vmatpush1.bf16.msra.mxu0 %v1761_v37  ;;  %1949 = vmatpush1.bf16.msra.mxu1 %v1763_v63  ;;  %v1437_v37 = vld [vmem:[%s7863_s25 + $0x80] sm:$0xff]  ;;  %v1520_v63 = vunpack.c.l.s8.bf16 %v1440_v9 }
 0x2c1   : > { %1909 = vmatprep.subr.bf16.mxu0 %v1770_v23  ;;  %1950 = vmatprep.subr.bf16.mxu1 %v1772_v30  ;;  %v1439_v23 = vld [vmem:[%s7863_s25 + $0x90] sm:$0xff]  ;;  %v1517_v30 = vunpack.c.l.s8.bf16 %v1437_v37 }
 0x2c2   : > { %v1519_v38 = vunpack.c.l.s8.bf16 %v1439_v23  ;;  %v1527_v47 = vunpack.c.h.s8.bf16 %v1439_v23 }
 0x2c4   : > { %1910 = vmatpush1.bf16.msra.mxu0 %v1769_v45  ;;  %1951 = vmatpush1.bf16.msra.mxu1 %v1771_v35  ;;  %v1528_v45 = vunpack.c.h.s8.bf16 %v1440_v9  ;;  %v1446_v35 = vld [vmem:[%s7863_s25 + $0xc8] sm:$0xff] }
 0x2c5   : > { %1911 = vmatprep.subr.bf16.mxu0 %v1778_v36  ;;  %1952 = vmatprep.subr.bf16.mxu1 %v1780_v46  ;;  %v1448_v36 = vld [vmem:[%s7863_s25 + $0xd8] sm:$0xff]  ;;  %v1525_v46 = vunpack.c.h.s8.bf16 %v1437_v37  ;;  %v1534_v48 = vunpack.c.l.s8.bf16 %v1446_v35  ;;  %v1542_v55 = vunpack.c.h.s8.bf16 %v1446_v35 }
 0x2c8   : > { %1912 = vmatpush1.bf16.msra.mxu0 %v1777_v49  ;;  %1953 = vmatpush1.bf16.msra.mxu1 %v1779_v50  ;;  %v1445_v49 = vld [vmem:[%s7863_s25 + $0xc0] sm:$0xff]  ;;  %v1536_v50 = vunpack.c.l.s8.bf16 %v1448_v36 }
 0x2c9   : > { %1913 = vmatprep.subr.bf16.mxu0 %v1786_v51  ;;  %1954 = vmatprep.subr.bf16.mxu1 %v1788_v52  ;;  %v1447_v51 = vld [vmem:[%s7863_s25 + $0xd0] sm:$0xff]  ;;  %v1533_v52 = vunpack.c.l.s8.bf16 %v1445_v49 }
 0x2ca   : > { %v1535_v54 = vunpack.c.l.s8.bf16 %v1447_v51  ;;  %v1543_v53 = vunpack.c.h.s8.bf16 %v1447_v51 }
 0x2cc   : > { %1914 = vmatpush1.bf16.msra.mxu0 %v1785_v0  ;;  %1955 = vmatpush1.bf16.msra.mxu1 %v1787_v56  ;;  %v1544_v0 = vunpack.c.h.s8.bf16 %v1448_v36  ;;  %v1454_v56 = vld [vmem:[%s7863_s25 + $0x108] sm:$0xff] }
 0x2cd   : > { %1915 = vmatprep.subr.bf16.mxu0 %v1794_v22  ;;  %1956 = vmatprep.subr.bf16.mxu1 %v1796_v57  ;;  %v1456_v22 = vld [vmem:[%s7863_s25 + $0x118] sm:$0xff]  ;;  %v1541_v57 = vunpack.c.h.s8.bf16 %v1445_v49  ;;  %v1550_v58 = vunpack.c.l.s8.bf16 %v1454_v56  ;;  %v1558_v4 = vunpack.c.h.s8.bf16 %v1454_v56  ;;  %v8130_v56 = vpack.c.bf16 %v8041_v12, %v8041_v12 }
 0x2d0   : > { %1916 = vmatpush1.bf16.msra.mxu0 %v1793_v59  ;;  %1957 = vmatpush1.bf16.msra.mxu1 %v1795_v60  ;;  %v1453_v59 = vld [vmem:[%s7863_s25 + $0x100] sm:$0xff]  ;;  %v1552_v60 = vunpack.c.l.s8.bf16 %v1456_v22 }
 0x2d1   : > { %1917 = vmatprep.subr.bf16.mxu0 %v1802_v61  ;;  %1958 = vmatprep.subr.bf16.mxu1 %v1804_v1  ;;  %v1455_v61 = vld [vmem:[%s7863_s25 + $0x110] sm:$0xff]  ;;  %v1549_v1 = vunpack.c.l.s8.bf16 %v1453_v59 }
 0x2d2   : > { %v1551_v3 = vunpack.c.l.s8.bf16 %v1455_v61  ;;  %v1559_v8 = vunpack.c.h.s8.bf16 %v1455_v61 }
 0x2d4   : > { %1918 = vmatpush1.bf16.msra.mxu0 %v1801_v6  ;;  %1959 = vmatpush1.bf16.msra.mxu1 %v1803_v5  ;;  %v1560_v6 = vunpack.c.h.s8.bf16 %v1456_v22  ;;  %v1462_v5 = vld [vmem:[%s7863_s25 + $0x148] sm:$0xff] }
 0x2d5   : > { %1969 = vmatprep.subr.bf16.mxu0 %v1486_v2  ;;  %2010 = vmatprep.subr.bf16.mxu1 %v1488_v7  ;;  %v1464_v2 = vld [vmem:[%s7863_s25 + $0x158] sm:$0xff]  ;;  %v1557_v7 = vunpack.c.h.s8.bf16 %v1453_v59  ;;  %v1566_v11 = vunpack.c.l.s8.bf16 %v1462_v5  ;;  %v1574_v25 = vunpack.c.h.s8.bf16 %v1462_v5 }
 0x2d6   : > { %v1436_v59 = vld [vmem:[%s7863_s25 + $0x78] sm:$0xff] }
 0x2d7   : > { %1920 = vmatmul.mubr.bf16.vlgmr.msra.gmra.mrb[4].mxu0 %v8048_v18  ;;  %1961 = vmatmul.mubr.bf16.vlgmr.msra.gmra.mrb[4].mxu1 %v8048_v18  ;;  %v1501_v18 = vunpack.c.l.s8.bf16 %v1429_v29 }
 0x2d8   : > { %1970 = vmatpush1.bf16.msra.mxu0 %v1485_v13  ;;  %2001 = vmatprep.mubr.bf16.mxu0 %v8090_v16  ;;  %v1461_v13 = vld [vmem:[%s7863_s25 + $0x140] sm:$0xff] }
 0x2d9   : > { %2011 = vmatpush1.bf16.msra.mxu1 %v1487_v15  ;;  %2042 = vmatprep.mubr.bf16.mxu1 %v8090_v16  ;;  %v1568_v15 = vunpack.c.l.s8.bf16 %v1464_v2  ;;  %v1573_v29 = vunpack.c.h.s8.bf16 %v1461_v13 }
 0x2da   : > { %1971 = vmatprep.subr.bf16.mxu0 %v1494_v19  ;;  %2012 = vmatprep.subr.bf16.mxu1 %v1496_v21  ;;  %v1463_v19 = vld [vmem:[%s7863_s25 + $0x150] sm:$0xff]  ;;  %v1565_v21 = vunpack.c.l.s8.bf16 %v1461_v13 }
 0x2db   : > { %v1567_v24 = vunpack.c.l.s8.bf16 %v1463_v19 }
 0x2dc   : > { %1972 = vmatpush1.bf16.msra.mxu0 %v1493_v14  ;;  %v1576_v14 = vunpack.c.h.s8.bf16 %v1464_v2 }
 0x2dd   : > { %2013 = vmatpush1.bf16.msra.mxu1 %v1495_v27  ;;  %1973 = vmatprep.subr.bf16.mxu0 %v1502_v28  ;;  %v1470_v27 = vld [vmem:[%s7863_s25 + $0x188] sm:$0xff]  ;;  %v1472_v28 = vld [vmem:[%s7863_s25 + $0x198] sm:$0xff] }
 0x2de   : > { %2014 = vmatprep.subr.bf16.mxu1 %v1504_v31  ;;  %v1575_v31 = vunpack.c.h.s8.bf16 %v1463_v19  ;;  %v1582_v32 = vunpack.c.l.s8.bf16 %v1470_v27  ;;  %v1590_v9 = vunpack.c.h.s8.bf16 %v1470_v27  ;;  %v1441_v19 = vld [vmem:[%s7863_s25 + $0xa0] sm:$0xff] }
 0x2e0   : > { %1974 = vmatpush1.bf16.msra.mxu0 %v1501_v18  ;;  %v1469_v18 = vld [vmem:[%s7863_s25 + $0x180] sm:$0xff] }
 0x2e1   : > { %2015 = vmatpush1.bf16.msra.mxu1 %v1503_v33  ;;  %1975 = vmatprep.subr.bf16.mxu0 %v1510_v34  ;;  %v1584_v33 = vunpack.c.l.s8.bf16 %v1472_v28  ;;  %v1471_v34 = vld [vmem:[%s7863_s25 + $0x190] sm:$0xff]  ;;  %v1589_v37 = vunpack.c.h.s8.bf16 %v1469_v18 }
 0x2e2   : > { %2016 = vmatprep.subr.bf16.mxu1 %v1512_v26  ;;  %v1581_v26 = vunpack.c.l.s8.bf16 %v1469_v18  ;;  %v1583_v62 = vunpack.c.l.s8.bf16 %v1471_v34 }
 0x2e4   : > { %1976 = vmatpush1.bf16.msra.mxu0 %v1509_v10  ;;  %v1592_v10 = vunpack.c.h.s8.bf16 %v1472_v28 }
 0x2e5   : > { %2017 = vmatpush1.bf16.msra.mxu1 %v1511_v17  ;;  %1977 = vmatprep.subr.bf16.mxu0 %v1518_v20  ;;  %v1478_v17 = vld [vmem:[%s7863_s25 + $0x1c8] sm:$0xff]  ;;  %v1480_v20 = vld [vmem:[%s7863_s25 + $0x1d8] sm:$0xff] }
 0x2e6   : > { %2018 = vmatprep.subr.bf16.mxu1 %v1520_v63  ;;  %v1591_v63 = vunpack.c.h.s8.bf16 %v1471_v34  ;;  %v1598_v23 = vunpack.c.l.s8.bf16 %v1478_v17  ;;  %v1606_v36 = vunpack.c.h.s8.bf16 %v1478_v17  ;;  %v1449_v34 = vld [vmem:[%s7863_s25 + $0xe0] sm:$0xff] }
 0x2e8   : > { %1978 = vmatpush1.bf16.msra.mxu0 %v1517_v30  ;;  %v1477_v30 = vld [vmem:[%s7863_s25 + $0x1c0] sm:$0xff] }
 0x2e9   : > { %2019 = vmatpush1.bf16.msra.mxu1 %v1519_v38  ;;  %1979 = vmatprep.subr.bf16.mxu0 %v1526_v39  ;;  %v1600_v38 = vunpack.c.l.s8.bf16 %v1480_v20  ;;  %v1479_v39 = vld [vmem:[%s7863_s25 + $0x1d0] sm:$0xff]  ;;  %v1605_v49 = vunpack.c.h.s8.bf16 %v1477_v30 }
 0x2ea   : > { %2020 = vmatprep.subr.bf16.mxu1 %v1528_v45  ;;  %v1597_v45 = vunpack.c.l.s8.bf16 %v1477_v30  ;;  %v1599_v35 = vunpack.c.l.s8.bf16 %v1479_v39 }
 0x2ec   : > { %1980 = vmatpush1.bf16.msra.mxu0 %v1525_v46  ;;  %v1608_v46 = vunpack.c.h.s8.bf16 %v1480_v20 }
 0x2ed   : > { %2021 = vmatpush1.bf16.msra.mxu1 %v1527_v47  ;;  %1981 = vmatprep.subr.bf16.mxu0 %v1534_v48  ;;  %v1426_v47 = vld [vmem:[%s7863_s25 + $0x28] sm:$0xff]  ;;  %v1428_v48 = vld [vmem:[%s7863_s25 + $0x38] sm:$0xff] }
 0x2ee   : > { %2022 = vmatprep.subr.bf16.mxu1 %v1536_v50  ;;  %v1607_v50 = vunpack.c.h.s8.bf16 %v1479_v39  ;;  %v1490_v51 = vunpack.c.l.s8.bf16 %v1426_v47  ;;  %v1457_v39 = vld [vmem:[%s7863_s25 + $0x120] sm:$0xff] }
 0x2f0   : > { %1982 = vmatpush1.bf16.msra.mxu0 %v1533_v52  ;;  %v1425_v52 = vld [vmem:[%s7863_s25 + $0x20] sm:$0xff] }
 0x2f1   : > { %2023 = vmatpush1.bf16.msra.mxu1 %v1535_v54  ;;  %1983 = vmatprep.subr.bf16.mxu0 %v1542_v55  ;;  %v1492_v54 = vunpack.c.l.s8.bf16 %v1428_v48  ;;  %v1427_v55 = vld [vmem:[%s7863_s25 + $0x30] sm:$0xff] }
 0x2f2   : > { %2024 = vmatprep.subr.bf16.mxu1 %v1544_v0  ;;  %v1489_v0 = vunpack.c.l.s8.bf16 %v1425_v52  ;;  %v1491_v22 = vunpack.c.l.s8.bf16 %v1427_v55  ;;  %v1499_v12 = vunpack.c.h.s8.bf16 %v1427_v55  ;;  %v1465_v55 = vld [vmem:[%s7863_s25 + $0x160] sm:$0xff] }
 0x2f4   : > { %1984 = vmatpush1.bf16.msra.mxu0 %v1541_v57  ;;  %v1498_v57 = vunpack.c.h.s8.bf16 %v1426_v47 }
 0x2f5   : > { %2025 = vmatpush1.bf16.msra.mxu1 %v1543_v53  ;;  %1985 = vmatprep.subr.bf16.mxu0 %v1550_v58  ;;  %v1434_v53 = vld [vmem:[%s7863_s25 + $0x68] sm:$0xff]  ;;  %v1500_v58 = vunpack.c.h.s8.bf16 %v1428_v48 }
 0x2f6   : > { %2026 = vmatprep.subr.bf16.mxu1 %v1552_v60  ;;  %v1497_v60 = vunpack.c.h.s8.bf16 %v1425_v52  ;;  %v1506_v61 = vunpack.c.l.s8.bf16 %v1434_v53  ;;  %v1514_v2 = vunpack.c.h.s8.bf16 %v1434_v53 }
 0x2f8   : > { %1986 = vmatpush1.bf16.msra.mxu0 %v1549_v1  ;;  %v1433_v1 = vld [vmem:[%s7863_s25 + $0x60] sm:$0xff] }
 0x2f9   : > { %2027 = vmatpush1.bf16.msra.mxu1 %v1551_v3  ;;  %1987 = vmatprep.subr.bf16.mxu0 %v1558_v4  ;;  %v1508_v3 = vunpack.c.l.s8.bf16 %v1436_v59  ;;  %v1435_v4 = vld [vmem:[%s7863_s25 + $0x70] sm:$0xff]  ;;  %v1513_v13 = vunpack.c.h.s8.bf16 %v1433_v1 }
 0x2fa   : > { %2028 = vmatprep.subr.bf16.mxu1 %v1560_v6  ;;  %v1505_v6 = vunpack.c.l.s8.bf16 %v1433_v1  ;;  %v1507_v5 = vunpack.c.l.s8.bf16 %v1435_v4 }
 0x2fc   : > { %1988 = vmatpush1.bf16.msra.mxu0 %v1557_v7  ;;  %v1516_v7 = vunpack.c.h.s8.bf16 %v1436_v59 }
 0x2fd   : > { %2029 = vmatpush1.bf16.msra.mxu1 %v1559_v8  ;;  %1989 = vmatprep.subr.bf16.mxu0 %v1566_v11  ;;  %v1442_v8 = vld [vmem:[%s7863_s25 + $0xa8] sm:$0xff]  ;;  %v1444_v11 = vld [vmem:[%s7863_s25 + $0xb8] sm:$0xff] }
 0x2fe   : > { %2030 = vmatprep.subr.bf16.mxu1 %v1568_v15  ;;  %v1522_v15 = vunpack.c.l.s8.bf16 %v1442_v8  ;;  %v1530_v27 = vunpack.c.h.s8.bf16 %v1442_v8  ;;  %v1532_v28 = vunpack.c.h.s8.bf16 %v1444_v11 }
 0x300   : > { %1990 = vmatpush1.bf16.msra.mxu0 %v1565_v21  ;;  %v1524_v21 = vunpack.c.l.s8.bf16 %v1444_v11 }
 0x301   : > { %2031 = vmatpush1.bf16.msra.mxu1 %v1567_v24  ;;  %1991 = vmatprep.subr.bf16.mxu0 %v1574_v25  ;;  %v1443_v24 = vld [vmem:[%s7863_s25 + $0xb0] sm:$0xff]  ;;  %v1521_v25 = vunpack.c.l.s8.bf16 %v1441_v19 }
 0x302   : > { %2032 = vmatprep.subr.bf16.mxu1 %v1576_v14  ;;  %v1523_v14 = vunpack.c.l.s8.bf16 %v1443_v24  ;;  %v1531_v18 = vunpack.c.h.s8.bf16 %v1443_v24  ;;  %v1481_v24 = vld [vmem:[%s7863_s25 + $0x1e0] sm:$0xff] }
 0x304   : > { %1992 = vmatpush1.bf16.msra.mxu0 %v1573_v29  ;;  %v1450_v29 = vld [vmem:[%s7863_s25 + $0xe8] sm:$0xff] }
 0x305   : > { %2033 = vmatpush1.bf16.msra.mxu1 %v1575_v31  ;;  %1993 = vmatprep.subr.bf16.mxu0 %v1582_v32  ;;  %v1452_v31 = vld [vmem:[%s7863_s25 + $0xf8] sm:$0xff]  ;;  %v1529_v32 = vunpack.c.h.s8.bf16 %v1441_v19  ;;  %v1546_v17 = vunpack.c.h.s8.bf16 %v1450_v29 }
 0x306   : > { %2034 = vmatprep.subr.bf16.mxu1 %v1584_v33  ;;  %v1538_v33 = vunpack.c.l.s8.bf16 %v1450_v29  ;;  %v1548_v20 = vunpack.c.h.s8.bf16 %v1452_v31 }
 0x308   : > { %1994 = vmatpush1.bf16.msra.mxu0 %v1581_v26  ;;  %v1540_v26 = vunpack.c.l.s8.bf16 %v1452_v31 }
 0x309   : > { %2035 = vmatpush1.bf16.msra.mxu1 %v1583_v62  ;;  %1995 = vmatprep.subr.bf16.mxu0 %v1590_v9  ;;  %v1451_v62 = vld [vmem:[%s7863_s25 + $0xf0] sm:$0xff]  ;;  %v1537_v9 = vunpack.c.l.s8.bf16 %v1449_v34 }
 0x30a   : > { %2036 = vmatprep.subr.bf16.mxu1 %v1592_v10  ;;  %v1539_v10 = vunpack.c.l.s8.bf16 %v1451_v62  ;;  %v1547_v30 = vunpack.c.h.s8.bf16 %v1451_v62  ;;  %v2249_v62 = vld [vmem:[%s7880_s15] sm:$0xff] }
 0x30c   : > { %1996 = vmatpush1.bf16.msra.mxu0 %v1589_v37  ;;  %v1458_v37 = vld [vmem:[%s7863_s25 + $0x128] sm:$0xff] }
 0x30d   : > { %2037 = vmatpush1.bf16.msra.mxu1 %v1591_v63  ;;  %1997 = vmatprep.subr.bf16.mxu0 %v1598_v23  ;;  %v1460_v63 = vld [vmem:[%s7863_s25 + $0x138] sm:$0xff]  ;;  %v1545_v23 = vunpack.c.h.s8.bf16 %v1449_v34  ;;  %v1562_v47 = vunpack.c.h.s8.bf16 %v1458_v37 }
 0x30e   : > { %2038 = vmatprep.subr.bf16.mxu1 %v1600_v38  ;;  %v1554_v38 = vunpack.c.l.s8.bf16 %v1458_v37  ;;  %v1564_v48 = vunpack.c.h.s8.bf16 %v1460_v63 }
 0x310   : > { %1998 = vmatpush1.bf16.msra.mxu0 %v1597_v45  ;;  %v1556_v45 = vunpack.c.l.s8.bf16 %v1460_v63 }
 0x311   : > { %2039 = vmatpush1.bf16.msra.mxu1 %v1599_v35  ;;  %1999 = vmatprep.subr.bf16.mxu0 %v1606_v36  ;;  %v1459_v35 = vld [vmem:[%s7863_s25 + $0x130] sm:$0xff]  ;;  %v1553_v36 = vunpack.c.l.s8.bf16 %v1457_v39 }
 0x312   : > { %2040 = vmatprep.subr.bf16.mxu1 %v1608_v46  ;;  %v1555_v46 = vunpack.c.l.s8.bf16 %v1459_v35  ;;  %v1563_v52 = vunpack.c.h.s8.bf16 %v1459_v35  ;;  %v2257_v35 = vld [vmem:[%s7880_s15 + $0x40] sm:$0xff] }
 0x314   : > { %2000 = vmatpush1.bf16.msra.mxu0 %v1605_v49  ;;  %v1466_v49 = vld [vmem:[%s7863_s25 + $0x168] sm:$0xff] }
 0x315   : > { %2041 = vmatpush1.bf16.msra.mxu1 %v1607_v50  ;;  %2051 = vmatprep.subr.bf16.mxu0 %v1490_v51  ;;  %v1468_v50 = vld [vmem:[%s7863_s25 + $0x178] sm:$0xff]  ;;  %v1561_v51 = vunpack.c.h.s8.bf16 %v1457_v39 }
 0x316   : > { %2092 = vmatprep.subr.bf16.mxu1 %v1492_v54  ;;  %v1570_v54 = vunpack.c.l.s8.bf16 %v1466_v49  ;;  %v1580_v59 = vunpack.c.h.s8.bf16 %v1468_v50 }
 0x317   : > { %2002 = vmatmul.mubr.bf16.vlgmr.msra.gmra.mrb[0].mxu0 %v8130_v56 }
 0x318   : > { %2043 = vmatmul.mubr.bf16.vlgmr.msra.gmra.mrb[0].mxu1 %v8130_v56  ;;  %2052 = vmatpush1.bf16.msra.mxu0 %v1489_v0  ;;  %v1572_v0 = vunpack.c.l.s8.bf16 %v1468_v50  ;;  %v2266_v50 = vld [vmem:[%s7880_s15 + $0x88] sm:$0xff] }
 0x319   : > { %2083 = vmatprep.mubr.bf16.mxu0 %v8090_v16  ;;  %2093 = vmatpush1.bf16.msra.mxu1 %v1491_v22  ;;  %v1467_v22 = vld [vmem:[%s7863_s25 + $0x170] sm:$0xff] }
 0x31a   : > { %2124 = vmatprep.mubr.bf16.mxu1 %v8090_v16  ;;  %2053 = vmatprep.subr.bf16.mxu0 %v1498_v57  ;;  %v1515_v16 = vunpack.c.h.s8.bf16 %v1435_v4  ;;  %v1569_v57 = vunpack.c.l.s8.bf16 %v1465_v55  ;;  %v1571_v53 = vunpack.c.l.s8.bf16 %v1467_v22  ;;  %v1579_v1 = vunpack.c.h.s8.bf16 %v1467_v22  ;;  %v1473_v4 = vld [vmem:[%s7863_s25 + $0x1a0] sm:$0xff] }
 0x31b   : > { %2094 = vmatprep.subr.bf16.mxu1 %v1500_v58  ;;  %v1578_v58 = vunpack.c.h.s8.bf16 %v1466_v49 }
 0x31c   : > { %2054 = vmatpush1.bf16.msra.mxu0 %v1497_v60  ;;  %v1474_v60 = vld [vmem:[%s7863_s25 + $0x1a8] sm:$0xff] }
 0x31d   : > { %2095 = vmatpush1.bf16.msra.mxu1 %v1499_v12  ;;  %2055 = vmatprep.subr.bf16.mxu0 %v1506_v61  ;;  %v1476_v12 = vld [vmem:[%s7863_s25 + $0x1b8] sm:$0xff]  ;;  %v1577_v61 = vunpack.c.h.s8.bf16 %v1465_v55  ;;  %v1594_v8 = vunpack.c.h.s8.bf16 %v1474_v60  ;;  %v2538_v55 = vunpack.c.l.s8.bf16 %v2266_v50 }
 0x31e   : > { %2096 = vmatprep.subr.bf16.mxu1 %v1508_v3  ;;  %v1586_v3 = vunpack.c.l.s8.bf16 %v1474_v60  ;;  %v1596_v11 = vunpack.c.h.s8.bf16 %v1476_v12 }
 0x320   : > { %2056 = vmatpush1.bf16.msra.mxu0 %v1505_v6  ;;  %v1588_v6 = vunpack.c.l.s8.bf16 %v1476_v12  ;;  %v2274_v12 = vld [vmem:[%s7880_s15 + $0xc8] sm:$0xff] }
 0x321   : > { %2097 = vmatpush1.bf16.msra.mxu1 %v1507_v5  ;;  %2057 = vmatprep.subr.bf16.mxu0 %v1514_v2  ;;  %v1475_v5 = vld [vmem:[%s7863_s25 + $0x1b0] sm:$0xff]  ;;  %v1585_v2 = vunpack.c.l.s8.bf16 %v1473_v4 }
 0x322   : > { %2098 = vmatprep.subr.bf16.mxu1 %v1516_v7  ;;  %v1587_v7 = vunpack.c.l.s8.bf16 %v1475_v5  ;;  %v1595_v19 = vunpack.c.h.s8.bf16 %v1475_v5 }
 0x324   : > { %2058 = vmatpush1.bf16.msra.mxu0 %v1513_v13  ;;  %v1482_v13 = vld [vmem:[%s7863_s25 + $0x1e8] sm:$0xff] }
 0x325   : > { %2099 = vmatpush1.bf16.msra.mxu1 %v1515_v16  ;;  %2059 = vmatprep.subr.bf16.mxu0 %v1522_v15  ;;  %v1484_v16 = vld [vmem:[%s7863_s25 + $0x1f8] sm:$0xff]  ;;  %v1593_v15 = vunpack.c.h.s8.bf16 %v1473_v4  ;;  %v1610_v29 = vunpack.c.h.s8.bf16 %v1482_v13  ;;  %v2554_v4 = vunpack.c.l.s8.bf16 %v2274_v12 }
 0x326   : > { %2100 = vmatprep.subr.bf16.mxu1 %v1524_v21  ;;  %v1602_v21 = vunpack.c.l.s8.bf16 %v1482_v13  ;;  %v1612_v31 = vunpack.c.h.s8.bf16 %v1484_v16 }
 0x328   : > { %2060 = vmatpush1.bf16.msra.mxu0 %v1521_v25  ;;  %v1604_v25 = vunpack.c.l.s8.bf16 %v1484_v16  ;;  %v2282_v16 = vld [vmem:[%s7880_s15 + $0x108] sm:$0xff] }
 0x329   : > { %2101 = vmatpush1.bf16.msra.mxu1 %v1523_v14  ;;  %2061 = vmatprep.subr.bf16.mxu0 %v1530_v27  ;;  %v1483_v14 = vld [vmem:[%s7863_s25 + $0x1f0] sm:$0xff]  ;;  %v1601_v27 = vunpack.c.l.s8.bf16 %v1481_v24 }
 0x32a   : > { %2102 = vmatprep.subr.bf16.mxu1 %v1532_v28  ;;  %v1603_v28 = vunpack.c.l.s8.bf16 %v1483_v14  ;;  %v1611_v34 = vunpack.c.h.s8.bf16 %v1483_v14 }
 0x32c   : > { %2062 = vmatpush1.bf16.msra.mxu0 %v1529_v32  ;;  %v2250_v32 = vld [vmem:[%s7880_s15 + $0x8] sm:$0xff] }
 0x32d   : > { %2103 = vmatpush1.bf16.msra.mxu1 %v1531_v18  ;;  %2063 = vmatprep.subr.bf16.mxu0 %v1538_v33  ;;  %v2252_v18 = vld [vmem:[%s7880_s15 + $0x18] sm:$0xff]  ;;  %v1609_v33 = vunpack.c.h.s8.bf16 %v1481_v24  ;;  %v2514_v37 = vunpack.c.h.s8.bf16 %v2250_v32  ;;  %v2570_v24 = vunpack.c.l.s8.bf16 %v2282_v16 }
 0x32e   : > { %2104 = vmatprep.subr.bf16.mxu1 %v1540_v26  ;;  %v2506_v26 = vunpack.c.l.s8.bf16 %v2250_v32  ;;  %v2516_v63 = vunpack.c.h.s8.bf16 %v2252_v18 }
 0x330   : > { %2064 = vmatpush1.bf16.msra.mxu0 %v1537_v9  ;;  %v2508_v9 = vunpack.c.l.s8.bf16 %v2252_v18  ;;  %v2290_v18 = vld [vmem:[%s7880_s15 + $0x148] sm:$0xff] }
 0x331   : > { %2105 = vmatpush1.bf16.msra.mxu1 %v1539_v10  ;;  %2065 = vmatprep.subr.bf16.mxu0 %v1546_v17  ;;  %v2251_v10 = vld [vmem:[%s7880_s15 + $0x10] sm:$0xff]  ;;  %v2505_v17 = vunpack.c.l.s8.bf16 %v2249_v62 }
 0x332   : > { %2106 = vmatprep.subr.bf16.mxu1 %v1548_v20  ;;  %v2507_v20 = vunpack.c.l.s8.bf16 %v2251_v10  ;;  %v2515_v39 = vunpack.c.h.s8.bf16 %v2251_v10 }
 0x334   : > { %2066 = vmatpush1.bf16.msra.mxu0 %v1545_v23  ;;  %v2258_v23 = vld [vmem:[%s7880_s15 + $0x48] sm:$0xff] }
 0x335   : > { %2107 = vmatpush1.bf16.msra.mxu1 %v1547_v30  ;;  %2067 = vmatprep.subr.bf16.mxu0 %v1554_v38  ;;  %v2260_v30 = vld [vmem:[%s7880_s15 + $0x58] sm:$0xff]  ;;  %v2513_v38 = vunpack.c.h.s8.bf16 %v2249_v62  ;;  %v2586_v62 = vunpack.c.l.s8.bf16 %v2290_v18 }
 0x336   : > { %2108 = vmatprep.subr.bf16.mxu1 %v1556_v45  ;;  %v2522_v45 = vunpack.c.l.s8.bf16 %v2258_v23  ;;  %v2532_v49 = vunpack.c.h.s8.bf16 %v2260_v30 }
 0x338   : > { %2068 = vmatpush1.bf16.msra.mxu0 %v1553_v36  ;;  %v2524_v36 = vunpack.c.l.s8.bf16 %v2260_v30  ;;  %v2298_v30 = vld [vmem:[%s7880_s15 + $0x188] sm:$0xff] }
 0x339   : > { %2109 = vmatpush1.bf16.msra.mxu1 %v1555_v46  ;;  %2069 = vmatprep.subr.bf16.mxu0 %v1562_v47  ;;  %v2259_v46 = vld [vmem:[%s7880_s15 + $0x50] sm:$0xff]  ;;  %v2521_v47 = vunpack.c.l.s8.bf16 %v2257_v35 }
 0x33a   : > { %2110 = vmatprep.subr.bf16.mxu1 %v1564_v48  ;;  %v2523_v48 = vunpack.c.l.s8.bf16 %v2259_v46 }
 0x33c   : > { %2070 = vmatpush1.bf16.msra.mxu0 %v1561_v51  ;;  %v2268_v51 = vld [vmem:[%s7880_s15 + $0x98] sm:$0xff] }
 0x33d   : > { %2111 = vmatpush1.bf16.msra.mxu1 %v1563_v52  ;;  %2071 = vmatprep.subr.bf16.mxu0 %v1570_v54  ;;  %v2529_v52 = vunpack.c.h.s8.bf16 %v2257_v35  ;;  %v2531_v54 = vunpack.c.h.s8.bf16 %v2259_v46  ;;  %v2540_v22 = vunpack.c.l.s8.bf16 %v2268_v51  ;;  %v2548_v60 = vunpack.c.h.s8.bf16 %v2268_v51  ;;  %v2306_v51 = vld [vmem:[%s7880_s15 + $0x1c8] sm:$0xff] }
 0x33e   : > { %2112 = vmatprep.subr.bf16.mxu1 %v1572_v0  ;;  %v2265_v0 = vld [vmem:[%s7880_s15 + $0x80] sm:$0xff]  ;;  %v2602_v35 = vunpack.c.l.s8.bf16 %v2298_v30 }
 0x340   : > { %2072 = vmatpush1.bf16.msra.mxu0 %v1569_v57  ;;  %v2267_v57 = vld [vmem:[%s7880_s15 + $0x90] sm:$0xff] }
 0x341   : > { %2113 = vmatpush1.bf16.msra.mxu1 %v1571_v53  ;;  %2073 = vmatprep.subr.bf16.mxu0 %v1578_v58  ;;  %v2537_v53 = vunpack.c.l.s8.bf16 %v2265_v0  ;;  %v2539_v58 = vunpack.c.l.s8.bf16 %v2267_v57 }
 0x342   : > { %2114 = vmatprep.subr.bf16.mxu1 %v1580_v59  ;;  %v2546_v59 = vunpack.c.h.s8.bf16 %v2266_v50 }
 0x344   : > { %2074 = vmatpush1.bf16.msra.mxu0 %v1577_v61  ;;  %v2276_v61 = vld [vmem:[%s7880_s15 + $0xd8] sm:$0xff] }
 0x345   : > { %2115 = vmatpush1.bf16.msra.mxu1 %v1579_v1  ;;  %2075 = vmatprep.subr.bf16.mxu0 %v1586_v3  ;;  %v2545_v1 = vunpack.c.h.s8.bf16 %v2265_v0  ;;  %v2547_v3 = vunpack.c.h.s8.bf16 %v2267_v57  ;;  %v2556_v5 = vunpack.c.l.s8.bf16 %v2276_v61  ;;  %v2564_v13 = vunpack.c.h.s8.bf16 %v2276_v61  ;;  %v8199_v61 = vld [vmem:[%s7880_s15 + $0x208] sm:$0xff] }
 0x346   : > { %2116 = vmatprep.subr.bf16.mxu1 %v1588_v6  ;;  %v2273_v6 = vld [vmem:[%s7880_s15 + $0xc0] sm:$0xff]  ;;  %v2618_v0 = vunpack.c.l.s8.bf16 %v2306_v51 }
 0x348   : > { %2076 = vmatpush1.bf16.msra.mxu0 %v1585_v2  ;;  %v2275_v2 = vld [vmem:[%s7880_s15 + $0xd0] sm:$0xff] }
 0x349   : > { %2117 = vmatpush1.bf16.msra.mxu1 %v1587_v7  ;;  %2077 = vmatprep.subr.bf16.mxu0 %v1594_v8  ;;  %v2553_v7 = vunpack.c.l.s8.bf16 %v2273_v6  ;;  %v2555_v8 = vunpack.c.l.s8.bf16 %v2275_v2 }
 0x34a   : > { %2118 = vmatprep.subr.bf16.mxu1 %v1596_v11  ;;  %v2562_v11 = vunpack.c.h.s8.bf16 %v2274_v12 }
 0x34c   : > { %2078 = vmatpush1.bf16.msra.mxu0 %v1593_v15  ;;  %v2284_v15 = vld [vmem:[%s7880_s15 + $0x118] sm:$0xff] }
 0x34d   : > { %2119 = vmatpush1.bf16.msra.mxu1 %v1595_v19  ;;  %2079 = vmatprep.subr.bf16.mxu0 %v1602_v21  ;;  %v2561_v19 = vunpack.c.h.s8.bf16 %v2273_v6  ;;  %v2563_v21 = vunpack.c.h.s8.bf16 %v2275_v2  ;;  %v2572_v14 = vunpack.c.l.s8.bf16 %v2284_v15  ;;  %v2580_v32 = vunpack.c.h.s8.bf16 %v2284_v15  ;;  %v8208_v2 = vld [vmem:[%s749_s2] sm:$0xff] }
 0x34e   : > { %2120 = vmatprep.subr.bf16.mxu1 %v1604_v25  ;;  %v2281_v25 = vld [vmem:[%s7880_s15 + $0x100] sm:$0xff]  ;;  %v2634_v6 = vunpack.c.l.s8.bf16 %v8199_v61 }
 0x350   : > { %2080 = vmatpush1.bf16.msra.mxu0 %v1601_v27  ;;  %v2283_v27 = vld [vmem:[%s7880_s15 + $0x110] sm:$0xff] }
 0x351   : > { %2121 = vmatpush1.bf16.msra.mxu1 %v1603_v28  ;;  %2081 = vmatprep.subr.bf16.mxu0 %v1610_v29  ;;  %v2569_v28 = vunpack.c.l.s8.bf16 %v2281_v25  ;;  %v2571_v29 = vunpack.c.l.s8.bf16 %v2283_v27 }
 0x352   : > { %2122 = vmatprep.subr.bf16.mxu1 %v1612_v31  ;;  %v2578_v31 = vunpack.c.h.s8.bf16 %v2282_v16  ;;  %v2150_v16 = vrot.slane %v8208_v2, %v7966_v44 }
 0x354   : > { %2082 = vmatpush1.bf16.msra.mxu0 %v1609_v33  ;;  %v2292_v33 = vld [vmem:[%s7880_s15 + $0x158] sm:$0xff] }
 0x355   : > { %2123 = vmatpush1.bf16.msra.mxu1 %v1611_v34  ;;  %3017 = vmatprep.subr.bf16.mxu0 %v2506_v26  ;;  %v2577_v34 = vunpack.c.h.s8.bf16 %v2281_v25  ;;  %v2579_v26 = vunpack.c.h.s8.bf16 %v2283_v27  ;;  %v2588_v10 = vunpack.c.l.s8.bf16 %v2292_v33 }
 0x356   : > { %3181 = vmatprep.subr.bf16.mxu1 %v2508_v9  ;;  %v2289_v9 = vld [vmem:[%s7880_s15 + $0x140] sm:$0xff] }
 0x357   : > { %2084 = vmatmul.mubr.bf16.vlgmr.msra.gmra.mrb[4].mxu0 %v8130_v56 }
 0x358   : > { %2125 = vmatmul.mubr.bf16.vlgmr.msra.gmra.mrb[4].mxu1 %v8130_v56  ;;  %3018 = vmatpush1.bf16.msra.mxu0 %v2505_v17  ;;  %v2530_v56 = vunpack.c.h.s8.bf16 %v2258_v23  ;;  %v2291_v17 = vld [vmem:[%s7880_s15 + $0x150] sm:$0xff]  ;;  %v2596_v23 = vunpack.c.h.s8.bf16 %v2292_v33 }
 0x359   : > { %3182 = vmatpush1.bf16.msra.mxu1 %v2507_v20  ;;  %3019 = vmatprep.subr.bf16.mxu0 %v2514_v37  ;;  %v2585_v20 = vunpack.c.l.s8.bf16 %v2289_v9  ;;  %v2587_v37 = vunpack.c.l.s8.bf16 %v2291_v17 }
 0x35a   : > { %3183 = vmatprep.subr.bf16.mxu1 %v2516_v63  ;;  %v2594_v63 = vunpack.c.h.s8.bf16 %v2290_v18 }
 0x35c   : > { %3020 = vmatpush1.bf16.msra.mxu0 %v2513_v38  ;;  %v2300_v38 = vld [vmem:[%s7880_s15 + $0x198] sm:$0xff] }
 0x35d   : > { %3184 = vmatpush1.bf16.msra.mxu1 %v2515_v39  ;;  %3021 = vmatprep.subr.bf16.mxu0 %v2522_v45  ;;  %v2593_v39 = vunpack.c.h.s8.bf16 %v2289_v9  ;;  %v2595_v45 = vunpack.c.h.s8.bf16 %v2291_v17  ;;  %v2604_v46 = vunpack.c.l.s8.bf16 %v2300_v38  ;;  %v2612_v50 = vunpack.c.h.s8.bf16 %v2300_v38  ;;  %v2315_v17 = vld [vmem:[%s7880_s15 + $0x210] sm:$0xff] }
 0x35e   : > { %3185 = vmatprep.subr.bf16.mxu1 %v2524_v36  ;;  %v2297_v36 = vld [vmem:[%s7880_s15 + $0x180] sm:$0xff] }
 0x360   : > { %3022 = vmatpush1.bf16.msra.mxu0 %v2521_v47  ;;  %v2299_v47 = vld [vmem:[%s7880_s15 + $0x190] sm:$0xff] }
 0x361   : > { %3186 = vmatpush1.bf16.msra.mxu1 %v2523_v48  ;;  %3023 = vmatprep.subr.bf16.mxu0 %v2530_v56  ;;  %v2601_v48 = vunpack.c.l.s8.bf16 %v2297_v36  ;;  %v2603_v56 = vunpack.c.l.s8.bf16 %v2299_v47 }
 0x362   : > { %3187 = vmatprep.subr.bf16.mxu1 %v2532_v49  ;;  %v2610_v49 = vunpack.c.h.s8.bf16 %v2298_v30  ;;  %v2635_v30 = vunpack.c.l.s8.bf16 %v2315_v17 }
 0x364   : > { %3024 = vmatpush1.bf16.msra.mxu0 %v2529_v52  ;;  %v2308_v52 = vld [vmem:[%s7880_s15 + $0x1d8] sm:$0xff] }
 0x365   : > { %3188 = vmatpush1.bf16.msra.mxu1 %v2531_v54  ;;  %3025 = vmatprep.subr.bf16.mxu0 %v2538_v55  ;;  %v2609_v54 = vunpack.c.h.s8.bf16 %v2297_v36  ;;  %v2611_v55 = vunpack.c.h.s8.bf16 %v2299_v47  ;;  %v2620_v57 = vunpack.c.l.s8.bf16 %v2308_v52  ;;  %v2628_v12 = vunpack.c.h.s8.bf16 %v2308_v52  ;;  %v2324_v36 = vld [vmem:[%s7880_s15 + $0x258] sm:$0xff] }
 0x366   : > { %3189 = vmatprep.subr.bf16.mxu1 %v2540_v22  ;;  %v2305_v22 = vld [vmem:[%s7880_s15 + $0x1c0] sm:$0xff] }
 0x368   : > { %3026 = vmatpush1.bf16.msra.mxu0 %v2537_v53  ;;  %v2307_v53 = vld [vmem:[%s7880_s15 + $0x1d0] sm:$0xff] }
 0x369   : > { %3190 = vmatpush1.bf16.msra.mxu1 %v2539_v58  ;;  %3027 = vmatprep.subr.bf16.mxu0 %v2546_v59  ;;  %v2617_v58 = vunpack.c.l.s8.bf16 %v2305_v22  ;;  %v2619_v59 = vunpack.c.l.s8.bf16 %v2307_v53 }
 0x36a   : > { %3191 = vmatprep.subr.bf16.mxu1 %v2548_v60  ;;  %v2626_v60 = vunpack.c.h.s8.bf16 %v2306_v51  ;;  %v2323_v51 = vld [vmem:[%s7880_s15 + $0x250] sm:$0xff] }
 0x36c   : > { %3028 = vmatpush1.bf16.msra.mxu0 %v2545_v1  ;;  %v8202_v1 = vld [vmem:[%s7880_s15 + $0x218] sm:$0xff] }
 0x36d   : > { %3192 = vmatpush1.bf16.msra.mxu1 %v2547_v3  ;;  %3029 = vmatprep.subr.bf16.mxu0 %v2554_v4  ;;  %v2625_v3 = vunpack.c.h.s8.bf16 %v2305_v22  ;;  %v2627_v4 = vunpack.c.h.s8.bf16 %v2307_v53  ;;  %v2330_v22 = vld [vmem:[%s7880_s15 + $0x288] sm:$0xff] }
 0x36e   : > { %3193 = vmatprep.subr.bf16.mxu1 %v2556_v5  ;;  %v2636_v5 = vunpack.c.l.s8.bf16 %v8202_v1 }
 0x370   : > { %3030 = vmatpush1.bf16.msra.mxu0 %v2553_v7  ;;  %v8212_v7 = vld [vmem:[%s758_s19] sm:$0xff] }
 0x371   : > { %3194 = vmatpush1.bf16.msra.mxu1 %v2555_v8  ;;  %3031 = vmatprep.subr.bf16.mxu0 %v2562_v11  ;;  %v2138_v8 = vrot.slane %v8208_v2, %v7957_v41  ;;  %v2142_v11 = vrot.slane %v8208_v2, %v7963_v43 }
 0x372   : > { %3195 = vmatprep.subr.bf16.mxu1 %v2564_v13  ;;  %v2188_v13 = vrot.slane %v8212_v7, %v7957_v41 }
 0x374   : > { %3032 = vmatpush1.bf16.msra.mxu0 %v2561_v19  ;;  %v2192_v19 = vrot.slane %v8212_v7, %v7963_v43 }
 0x375   : > { %3196 = vmatpush1.bf16.msra.mxu1 %v2563_v21  ;;  %3033 = vmatprep.subr.bf16.mxu0 %v2570_v24 }
 0x376   : > { %3197 = vmatprep.subr.bf16.mxu1 %v2572_v14  ;;  %v2200_v14 = vrot.slane %v8212_v7, %v7966_v44 }
 0x378   : > { %3034 = vmatpush1.bf16.msra.mxu0 %v2569_v28 }
 0x379   : > { %3198 = vmatpush1.bf16.msra.mxu1 %v2571_v29  ;;  %3035 = vmatprep.subr.bf16.mxu0 %v2578_v31 }
 0x37a   : > { %3199 = vmatprep.subr.bf16.mxu1 %v2580_v32 }
 0x37c   : > { %3036 = vmatpush1.bf16.msra.mxu0 %v2577_v34 }
 0x37d   : > { %3200 = vmatpush1.bf16.msra.mxu1 %v2579_v26  ;;  %3037 = vmatprep.subr.bf16.mxu0 %v2586_v62 }
 0x37e   : > { %3201 = vmatprep.subr.bf16.mxu1 %v2588_v10  ;;  %v2313_v10 = vld [vmem:[%s7880_s15 + $0x200] sm:$0xff] }
 0x37f   : > { %v2641_v47 = vunpack.c.h.s8.bf16 %v2313_v10 }
 0x380   : > { %3038 = vmatpush1.bf16.msra.mxu0 %v2585_v20 }
 0x381   : > { %3202 = vmatpush1.bf16.msra.mxu1 %v2587_v37  ;;  %3039 = vmatprep.subr.bf16.mxu0 %v2594_v63 }
 0x382   : > { %3203 = vmatprep.subr.bf16.mxu1 %v2596_v23  ;;  %v2633_v23 = vunpack.c.l.s8.bf16 %v2313_v10 }
 0x384   : > { %3040 = vmatpush1.bf16.msra.mxu0 %v2593_v39  ;;  %v2642_v39 = vunpack.c.h.s8.bf16 %v8199_v61  ;;  %v2331_v61 = vld [vmem:[%s7880_s15 + $0x290] sm:$0xff] }
 0x385   : > { %3204 = vmatpush1.bf16.msra.mxu1 %v2595_v45  ;;  %3041 = vmatprep.subr.bf16.mxu0 %v2602_v35  ;;  %v2644_v45 = vunpack.c.h.s8.bf16 %v8202_v1  ;;  %v2322_v35 = vld [vmem:[%s7880_s15 + $0x248] sm:$0xff] }
 0x386   : > { %3205 = vmatprep.subr.bf16.mxu1 %v2604_v46 }
 0x388   : > { %3042 = vmatpush1.bf16.msra.mxu0 %v2601_v48  ;;  %v2643_v48 = vunpack.c.h.s8.bf16 %v2315_v17 }
 0x389   : > { %3206 = vmatpush1.bf16.msra.mxu1 %v2603_v56  ;;  %3043 = vmatprep.subr.bf16.mxu0 %v2610_v49  ;;  %v2650_v56 = vunpack.c.l.s8.bf16 %v2322_v35  ;;  %v2652_v49 = vunpack.c.l.s8.bf16 %v2324_v36 }
 0x38a   : > { %3207 = vmatprep.subr.bf16.mxu1 %v2612_v50  ;;  %v2321_v50 = vld [vmem:[%s7880_s15 + $0x240] sm:$0xff] }
 0x38b   : > { %v2649_v52 = vunpack.c.l.s8.bf16 %v2321_v50  ;;  %v2657_v53 = vunpack.c.h.s8.bf16 %v2321_v50 }
 0x38c   : > { %3044 = vmatpush1.bf16.msra.mxu0 %v2609_v54  ;;  %v2651_v54 = vunpack.c.l.s8.bf16 %v2323_v51 }
 0x38d   : > { %3208 = vmatpush1.bf16.msra.mxu1 %v2611_v55  ;;  %3045 = vmatprep.subr.bf16.mxu0 %v2618_v0  ;;  %v2658_v55 = vunpack.c.h.s8.bf16 %v2322_v35  ;;  %v2660_v0 = vunpack.c.h.s8.bf16 %v2324_v36  ;;  %v2353_v36 = vld [vmem:[%s7880_s15 + $0x340] sm:$0xff] }
 0x38e   : > { %3209 = vmatprep.subr.bf16.mxu1 %v2620_v57  ;;  %v2332_v57 = vld [vmem:[%s7880_s15 + $0x298] sm:$0xff] }
 0x390   : > { %3046 = vmatpush1.bf16.msra.mxu0 %v2617_v58  ;;  %v2659_v58 = vunpack.c.h.s8.bf16 %v2323_v51  ;;  %v2362_v51 = vld [vmem:[%s7880_s15 + $0x388] sm:$0xff] }
 0x391   : > { %3210 = vmatpush1.bf16.msra.mxu1 %v2619_v59  ;;  %3047 = vmatprep.subr.bf16.mxu0 %v2626_v60  ;;  %v2666_v59 = vunpack.c.l.s8.bf16 %v2330_v22  ;;  %v2668_v60 = vunpack.c.l.s8.bf16 %v2332_v57 }
 0x392   : > { %3211 = vmatprep.subr.bf16.mxu1 %v2628_v12  ;;  %v2329_v12 = vld [vmem:[%s7880_s15 + $0x280] sm:$0xff] }
 0x393   : > { %v2665_v1 = vunpack.c.l.s8.bf16 %v2329_v12 }
 0x394   : > { %3048 = vmatpush1.bf16.msra.mxu0 %v2625_v3  ;;  %v2667_v3 = vunpack.c.l.s8.bf16 %v2331_v61 }
 0x395   : > { %3212 = vmatpush1.bf16.msra.mxu1 %v2627_v4  ;;  %3058 = vmatprep.subr.bf16.mxu0 %v2634_v6  ;;  %v2674_v4 = vunpack.c.h.s8.bf16 %v2330_v22  ;;  %v2676_v6 = vunpack.c.h.s8.bf16 %v2332_v57  ;;  %v2361_v57 = vld [vmem:[%s7880_s15 + $0x380] sm:$0xff] }
 0x396   : > { %3222 = vmatprep.subr.bf16.mxu1 %v2636_v5  ;;  %v2338_v5 = vld [vmem:[%s7880_s15 + $0x2c8] sm:$0xff] }
 0x3ea   : > { %v2003_v15 = vpop.f32.mrb[0].mxu0 }
 0x3eb   : > { %v2175_v21 = vmul.f32 %v2138_v8, %v2003_v15  ;;  %v8224_v24 = vpop.f32.mrb[0].mxu1  ;;  %v2005_v25 = vpop.f32.mrb[1].mxu0  ;;  %v2340_v8 = vld [vmem:[%s7880_s15 + $0x2d8] sm:$0xff] }
 0x3ec   : > { %v2176_v27 = vmul.f32 %v2142_v11, %v2005_v25  ;;  %v2046_v28 = vpop.f32.mrb[1].mxu1  ;;  %v2007_v29 = vpop.f32.mrb[2].mxu0  ;;  %v2673_v11 = vunpack.c.h.s8.bf16 %v2329_v12  ;;  %v2684_v15 = vunpack.c.l.s8.bf16 %v2340_v8  ;;  %v2738_v12 = vunpack.c.h.s8.bf16 %v2362_v51 }
 0x3ed   : > { %v2225_v31 = vadd.f32 %v2188_v13, %v2175_v21  ;;  %v2178_v32 = vmul.f32 %v2150_v16, %v2046_v28  ;;  %v2048_v18 = vpop.f32.mrb[2].mxu1  ;;  %v2008_v33 = vpop.f32.mrb[3].mxu0  ;;  %v2675_v13 = vunpack.c.h.s8.bf16 %v2331_v61  ;;  %v2682_v16 = vunpack.c.l.s8.bf16 %v2338_v5  ;;  %v2339_v21 = vld [vmem:[%s7880_s15 + $0x2d0] sm:$0xff]  ;;  %v2346_v29 = vld [vmem:[%s7880_s15 + $0x308] sm:$0xff] }
 0x3ee   : > { %v2226_v34 = vadd.f32 %v2192_v19, %v2176_v27  ;;  %v2049_v26 = vpop.f32.mrb[3].mxu1  ;;  %v2337_v19 = vld [vmem:[%s7880_s15 + $0x2c0] sm:$0xff]  ;;  %v2690_v27 = vunpack.c.h.s8.bf16 %v2338_v5  ;;  %v2692_v28 = vunpack.c.h.s8.bf16 %v2340_v8  ;;  %v2691_v18 = vunpack.c.h.s8.bf16 %v2339_v21 }
 0x3ef   : > { %v2233_v62 = vmax.f32 %v2225_v31, 0.0  ;;  %v2228_v9 = vadd.f32 %v2200_v14, %v2178_v32  ;;  %v2681_v25 = vunpack.c.l.s8.bf16 %v2337_v19  ;;  %v2683_v14 = vunpack.c.l.s8.bf16 %v2339_v21  ;;  %v2348_v31 = vld [vmem:[%s7880_s15 + $0x318] sm:$0xff]  ;;  %v2345_v26 = vld [vmem:[%s7880_s15 + $0x300] sm:$0xff] }
 0x3f0   : > { %v2234_v20 = vmax.f32 %v2226_v34, 0.0  ;;  %v2689_v32 = vunpack.c.h.s8.bf16 %v2337_v19  ;;  %v2698_v33 = vunpack.c.l.s8.bf16 %v2346_v29  ;;  %v2700_v34 = vunpack.c.l.s8.bf16 %v2348_v31  ;;  %v2371_v19 = vld [vmem:[%s7880_s15 + $0x3d0] sm:$0xff] }
 0x3f1   : > { %v2236_v37 = vmax.f32 %v2228_v9, 0.0  ;;  %v8232_v38 = vpack.c.bf16 %v2233_v62, %v2233_v62  ;;  %v2347_v62 = vld [vmem:[%s7880_s15 + $0x310] sm:$0xff]  ;;  %v2697_v9 = vunpack.c.l.s8.bf16 %v2345_v26  ;;  %v2706_v17 = vunpack.c.h.s8.bf16 %v2346_v29 }
 0x3f2   : > { %v8230_v63 = vpack.c.bf16 %v2234_v20, %v2234_v20  ;;  %v2699_v10 = vunpack.c.l.s8.bf16 %v2347_v62  ;;  %v2708_v20 = vunpack.c.h.s8.bf16 %v2348_v31 }
 0x3f3   : > { %v8240_v46 = vpack.c.bf16 %v2236_v37, %v2236_v37  ;;  %v2354_v37 = vld [vmem:[%s7880_s15 + $0x348] sm:$0xff] }
 0x3f4   : > { %3049 = vmatprep.mubr.bf16.mxu0 %v8230_v63  ;;  %3213 = vmatprep.mubr.bf16.mxu1 %v8230_v63 }
 0x3f5   : > { %3050 = vmatmul.mubr.bf16.vlgmr.msra.gmra.mrb[8].mxu0 %v8232_v38  ;;  %3214 = vmatmul.mubr.bf16.vlgmr.msra.gmra.mrb[8].mxu1 %v8232_v38 }
 0x3f6   : > { %3059 = vmatpush1.bf16.msra.mxu0 %v2633_v23  ;;  %3223 = vmatpush1.bf16.msra.mxu1 %v2635_v30  ;;  %v2356_v23 = vld [vmem:[%s7880_s15 + $0x358] sm:$0xff]  ;;  %v2705_v30 = vunpack.c.h.s8.bf16 %v2345_v26 }
 0x3f7   : > { %3090 = vmatprep.mubr.bf16.mxu0 %v8240_v46  ;;  %3254 = vmatprep.mubr.bf16.mxu1 %v8240_v46  ;;  %v2716_v35 = vunpack.c.l.s8.bf16 %v2356_v23  ;;  %v2724_v50 = vunpack.c.h.s8.bf16 %v2356_v23 }
 0x3f8   : > { %3060 = vmatprep.subr.bf16.mxu0 %v2642_v39  ;;  %3224 = vmatprep.subr.bf16.mxu1 %v2644_v45  ;;  %v2707_v39 = vunpack.c.h.s8.bf16 %v2347_v62  ;;  %v2714_v45 = vunpack.c.l.s8.bf16 %v2354_v37  ;;  %v2378_v62 = vld [vmem:[%s7880_s15 + $0x408] sm:$0xff] }
 0x3fa   : > { %3061 = vmatpush1.bf16.msra.mxu0 %v2641_v47  ;;  %3225 = vmatpush1.bf16.msra.mxu1 %v2643_v48  ;;  %v2355_v47 = vld [vmem:[%s7880_s15 + $0x350] sm:$0xff]  ;;  %v2713_v48 = vunpack.c.l.s8.bf16 %v2353_v36 }
 0x3fb   : > { %3062 = vmatprep.subr.bf16.mxu0 %v2650_v56  ;;  %3226 = vmatprep.subr.bf16.mxu1 %v2652_v49  ;;  %v2715_v56 = vunpack.c.l.s8.bf16 %v2355_v47  ;;  %v2722_v49 = vunpack.c.h.s8.bf16 %v2354_v37 }
 0x3fe   : > { %3063 = vmatpush1.bf16.msra.mxu0 %v2649_v52  ;;  %3227 = vmatpush1.bf16.msra.mxu1 %v2651_v54  ;;  %v2364_v52 = vld [vmem:[%s7880_s15 + $0x398] sm:$0xff]  ;;  %v2721_v54 = vunpack.c.h.s8.bf16 %v2353_v36  ;;  %v2377_v36 = vld [vmem:[%s7880_s15 + $0x400] sm:$0xff] }
 0x3ff   : > { %3064 = vmatprep.subr.bf16.mxu0 %v2658_v55  ;;  %3228 = vmatprep.subr.bf16.mxu1 %v2660_v0  ;;  %v2723_v55 = vunpack.c.h.s8.bf16 %v2355_v47  ;;  %v2730_v0 = vunpack.c.l.s8.bf16 %v2362_v51  ;;  %v2732_v22 = vunpack.c.l.s8.bf16 %v2364_v52  ;;  %v2740_v61 = vunpack.c.h.s8.bf16 %v2364_v52 }
 0x400   : > { %v2770_v52 = vunpack.c.h.s8.bf16 %v2378_v62 }
 0x402   : > { %3065 = vmatpush1.bf16.msra.mxu0 %v2657_v53  ;;  %3229 = vmatpush1.bf16.msra.mxu1 %v2659_v58  ;;  %v2363_v53 = vld [vmem:[%s7880_s15 + $0x390] sm:$0xff]  ;;  %v2729_v58 = vunpack.c.l.s8.bf16 %v2361_v57 }
 0x403   : > { %3066 = vmatprep.subr.bf16.mxu0 %v2666_v59  ;;  %3230 = vmatprep.subr.bf16.mxu1 %v2668_v60  ;;  %v2731_v59 = vunpack.c.l.s8.bf16 %v2363_v53  ;;  %v2146_v60 = vrot.slane %v8208_v2, %v7960_v42  ;;  %v2739_v5 = vunpack.c.h.s8.bf16 %v2363_v53 }
 0x405   : > { %v2177_v8 = vmul.f32 %v2146_v60, %v8224_v24  ;;  %v2387_v60 = vld [vmem:[%s7880_s15 + $0x450] sm:$0xff] }
 0x406   : > { %3067 = vmatpush1.bf16.msra.mxu0 %v2665_v1  ;;  %3231 = vmatpush1.bf16.msra.mxu1 %v2667_v3  ;;  %v8271_v1 = vsub.s32 5, %v7954_v40  ;;  %v2370_v3 = vld [vmem:[%s7880_s15 + $0x3c8] sm:$0xff] }
 0x407   : > { %3068 = vmatprep.subr.bf16.mxu0 %v2674_v4  ;;  %3232 = vmatprep.subr.bf16.mxu1 %v2676_v6  ;;  %v2372_v4 = vld [vmem:[%s7880_s15 + $0x3d8] sm:$0xff]  ;;  %v2737_v6 = vunpack.c.h.s8.bf16 %v2361_v57 }
 0x408   : > { %v2158_v21 = vrot.slane %v8208_v2, %v8271_v1  ;;  %v2208_v24 = vrot.slane %v8212_v7, %v8271_v1 }
 0x40a   : > { %3069 = vmatpush1.bf16.msra.mxu0 %v2673_v11  ;;  %3233 = vmatpush1.bf16.msra.mxu1 %v2675_v13  ;;  %v2196_v11 = vrot.slane %v8212_v7, %v7960_v42  ;;  %v2746_v13 = vunpack.c.l.s8.bf16 %v2370_v3 }
 0x40b   : > { %3070 = vmatprep.subr.bf16.mxu0 %v2682_v16  ;;  %3234 = vmatprep.subr.bf16.mxu1 %v2684_v15  ;;  %v2748_v16 = vunpack.c.l.s8.bf16 %v2372_v4  ;;  %v2369_v15 = vld [vmem:[%s7880_s15 + $0x3c0] sm:$0xff] }
 0x40c   : > { %v2753_v23 = vunpack.c.h.s8.bf16 %v2369_v15 }
 0x40e   : > { %3071 = vmatpush1.bf16.msra.mxu0 %v2681_v25  ;;  %3235 = vmatpush1.bf16.msra.mxu1 %v2683_v14  ;;  %v2745_v14 = vunpack.c.l.s8.bf16 %v2369_v15 }
 0x40f   : > { %3072 = vmatprep.subr.bf16.mxu0 %v2690_v27  ;;  %3236 = vmatprep.subr.bf16.mxu1 %v2692_v28  ;;  %v2747_v27 = vunpack.c.l.s8.bf16 %v2371_v19  ;;  %v2227_v28 = vadd.f32 %v2196_v11, %v2177_v8  ;;  %v2787_v11 = vunpack.c.h.s8.bf16 %v2387_v60 }
 0x412   : > { %3073 = vmatpush1.bf16.msra.mxu0 %v2689_v32  ;;  %3237 = vmatpush1.bf16.msra.mxu1 %v2691_v18  ;;  %v2754_v32 = vunpack.c.h.s8.bf16 %v2370_v3  ;;  %v2756_v18 = vunpack.c.h.s8.bf16 %v2372_v4 }
 0x413   : > { %3074 = vmatprep.subr.bf16.mxu0 %v2698_v33  ;;  %3238 = vmatprep.subr.bf16.mxu1 %v2700_v34 }
 0x416   : > { %3075 = vmatpush1.bf16.msra.mxu0 %v2697_v9  ;;  %3239 = vmatpush1.bf16.msra.mxu1 %v2699_v10  ;;  %v2380_v9 = vld [vmem:[%s7880_s15 + $0x418] sm:$0xff] }
 0x417   : > { %3076 = vmatprep.subr.bf16.mxu0 %v2706_v17  ;;  %3240 = vmatprep.subr.bf16.mxu1 %v2708_v20 }
 0x41a   : > { %3077 = vmatpush1.bf16.msra.mxu0 %v2705_v30  ;;  %3241 = vmatpush1.bf16.msra.mxu1 %v2707_v39  ;;  %v2755_v30 = vunpack.c.h.s8.bf16 %v2371_v19  ;;  %v2235_v39 = vmax.f32 %v2227_v28, 0.0  ;;  %v2395_v19 = vld [vmem:[%s7880_s15 + $0x490] sm:$0xff]  ;;  %v2402_v28 = vld [vmem:[%s7880_s15 + $0x4c8] sm:$0xff] }
 0x41b   : > { %3078 = vmatprep.subr.bf16.mxu0 %v2714_v45  ;;  %3242 = vmatprep.subr.bf16.mxu1 %v2716_v35  ;;  %v2762_v45 = vunpack.c.l.s8.bf16 %v2378_v62  ;;  %v2764_v35 = vunpack.c.l.s8.bf16 %v2380_v9 }
 0x41e   : > { %3079 = vmatpush1.bf16.msra.mxu0 %v2713_v48  ;;  %3243 = vmatpush1.bf16.msra.mxu1 %v2715_v56  ;;  %v2379_v48 = vld [vmem:[%s7880_s15 + $0x410] sm:$0xff] }
 0x41f   : > { %3080 = vmatprep.subr.bf16.mxu0 %v2722_v49  ;;  %3244 = vmatprep.subr.bf16.mxu1 %v2724_v50  ;;  %v2761_v49 = vunpack.c.l.s8.bf16 %v2377_v36  ;;  %v8296_v50 = vpack.c.bf16 %v2235_v39, %v2235_v39  ;;  %v2763_v51 = vunpack.c.l.s8.bf16 %v2379_v48  ;;  %v2771_v57 = vunpack.c.h.s8.bf16 %v2379_v48  ;;  %v2411_v48 = vld [vmem:[%s7880_s15 + $0x510] sm:$0xff] }
 0x422   : > { %3081 = vmatpush1.bf16.msra.mxu0 %v2721_v54  ;;  %3245 = vmatpush1.bf16.msra.mxu1 %v2723_v55  ;;  %v2772_v54 = vunpack.c.h.s8.bf16 %v2380_v9  ;;  %v2386_v55 = vld [vmem:[%s7880_s15 + $0x448] sm:$0xff]  ;;  %v2403_v9 = vld [vmem:[%s7880_s15 + $0x4d0] sm:$0xff] }
 0x423   : > { %3082 = vmatprep.subr.bf16.mxu0 %v2730_v0  ;;  %3246 = vmatprep.subr.bf16.mxu1 %v2732_v22  ;;  %v2388_v0 = vld [vmem:[%s7880_s15 + $0x458] sm:$0xff]  ;;  %v2769_v22 = vunpack.c.h.s8.bf16 %v2377_v36  ;;  %v2778_v53 = vunpack.c.l.s8.bf16 %v2386_v55  ;;  %v2786_v3 = vunpack.c.h.s8.bf16 %v2386_v55  ;;  %v2409_v36 = vld [vmem:[%s7880_s15 + $0x500] sm:$0xff]  ;;  %v2418_v55 = vld [vmem:[%s7880_s15 + $0x548] sm:$0xff] }
 0x424   : > { %v2788_v4 = vunpack.c.h.s8.bf16 %v2388_v0 }
 0x426   : > { %3083 = vmatpush1.bf16.msra.mxu0 %v2729_v58  ;;  %3247 = vmatpush1.bf16.msra.mxu1 %v2731_v59  ;;  %v2385_v58 = vld [vmem:[%s7880_s15 + $0x440] sm:$0xff]  ;;  %v2780_v59 = vunpack.c.l.s8.bf16 %v2388_v0  ;;  %v2420_v0 = vld [vmem:[%s7880_s15 + $0x558] sm:$0xff] }
 0x427   : > { %3084 = vmatprep.subr.bf16.mxu0 %v2738_v12  ;;  %3248 = vmatprep.subr.bf16.mxu1 %v2740_v61  ;;  %v2777_v12 = vunpack.c.l.s8.bf16 %v2385_v58  ;;  %v2779_v61 = vunpack.c.l.s8.bf16 %v2387_v60  ;;  %v2785_v8 = vunpack.c.h.s8.bf16 %v2385_v58  ;;  %v2417_v58 = vld [vmem:[%s7880_s15 + $0x540] sm:$0xff]  ;;  %v2419_v60 = vld [vmem:[%s7880_s15 + $0x550] sm:$0xff] }
 0x42a   : > { %3085 = vmatpush1.bf16.msra.mxu0 %v2737_v6  ;;  %3249 = vmatpush1.bf16.msra.mxu1 %v2739_v5  ;;  %v8282_v25 = vpop.f32.mrb[4].mxu0  ;;  %v2394_v6 = vld [vmem:[%s7880_s15 + $0x488] sm:$0xff]  ;;  %v2396_v5 = vld [vmem:[%s7880_s15 + $0x498] sm:$0xff] }
 0x42b   : > { %v8286_v29 = vpop.f32.mrb[4].mxu1  ;;  %v2087_v31 = vpop.f32.mrb[5].mxu0  ;;  %3086 = vmatprep.subr.bf16.mxu0 %v2746_v13  ;;  %3250 = vmatprep.subr.bf16.mxu1 %v2748_v16  ;;  %v2794_v13 = vunpack.c.l.s8.bf16 %v2394_v6  ;;  %v2393_v16 = vld [vmem:[%s7880_s15 + $0x480] sm:$0xff]  ;;  %v2796_v15 = vunpack.c.l.s8.bf16 %v2396_v5 }
 0x42c   : > { %v2180_v33 = vmul.f32 %v2158_v21, %v2087_v31  ;;  %v8288_v34 = vpop.f32.mrb[5].mxu1  ;;  %v2089_v26 = vpop.f32.mrb[6].mxu0  ;;  %v2793_v21 = vunpack.c.l.s8.bf16 %v2393_v16  ;;  %v2404_v31 = vld [vmem:[%s7880_s15 + $0x4d8] sm:$0xff] }
 0x42d   : > { %v2130_v10 = vpop.f32.mrb[6].mxu1  ;;  %v2090_v17 = vpop.f32.mrb[7].mxu0  ;;  %v2401_v26 = vld [vmem:[%s7880_s15 + $0x4c0] sm:$0xff]  ;;  %v2812_v62 = vunpack.c.l.s8.bf16 %v2404_v31 }
 0x42e   : > { %v2230_v20 = vadd.f32 %v2208_v24, %v2180_v33  ;;  %v2131_v37 = vpop.f32.mrb[7].mxu1  ;;  %3087 = vmatpush1.bf16.msra.mxu0 %v2745_v14  ;;  %3251 = vmatpush1.bf16.msra.mxu1 %v2747_v27  ;;  %v2795_v24 = vunpack.c.l.s8.bf16 %v2395_v19  ;;  %v2802_v14 = vunpack.c.h.s8.bf16 %v2394_v6  ;;  %v2804_v27 = vunpack.c.h.s8.bf16 %v2396_v5  ;;  %v2426_v6 = vld [vmem:[%s7880_s15 + $0x588] sm:$0xff]  ;;  %v2428_v5 = vld [vmem:[%s7880_s15 + $0x598] sm:$0xff] }
 0x42f   : > { %3088 = vmatprep.subr.bf16.mxu0 %v2754_v32  ;;  %3252 = vmatprep.subr.bf16.mxu1 %v2756_v18  ;;  %v2801_v32 = vunpack.c.h.s8.bf16 %v2393_v16  ;;  %v2803_v18 = vunpack.c.h.s8.bf16 %v2395_v19  ;;  %v2810_v33 = vunpack.c.l.s8.bf16 %v2402_v28  ;;  %v2809_v10 = vunpack.c.l.s8.bf16 %v2401_v26 }
 0x430   : > { %v2238_v47 = vmax.f32 %v2230_v20, 0.0  ;;  %v2811_v17 = vunpack.c.l.s8.bf16 %v2403_v9  ;;  %v2818_v20 = vunpack.c.h.s8.bf16 %v2402_v28  ;;  %v2820_v37 = vunpack.c.h.s8.bf16 %v2404_v31 }
 0x431   : > { %v2817_v39 = vunpack.c.h.s8.bf16 %v2401_v26  ;;  %v2858_v16 = vunpack.c.l.s8.bf16 %v2426_v6  ;;  %v2860_v19 = vunpack.c.l.s8.bf16 %v2428_v5  ;;  %v2866_v31 = vunpack.c.h.s8.bf16 %v2426_v6  ;;  %v2436_v26 = vld [vmem:[%s7880_s15 + $0x5d8] sm:$0xff] }
 0x432   : > { %v8294_v56 = vpack.c.bf16 %v2238_v47, %v2238_v47  ;;  %3089 = vmatpush1.bf16.msra.mxu0 %v2753_v23  ;;  %3253 = vmatpush1.bf16.msra.mxu1 %v2755_v30  ;;  %v2410_v23 = vld [vmem:[%s7880_s15 + $0x508] sm:$0xff]  ;;  %v2412_v30 = vld [vmem:[%s7880_s15 + $0x518] sm:$0xff] }
 0x433   : > { %3099 = vmatprep.subr.bf16.mxu0 %v2762_v45  ;;  %3263 = vmatprep.subr.bf16.mxu1 %v2764_v35  ;;  %v2819_v45 = vunpack.c.h.s8.bf16 %v2403_v9  ;;  %v2826_v35 = vunpack.c.l.s8.bf16 %v2410_v23  ;;  %v2828_v47 = vunpack.c.l.s8.bf16 %v2412_v30 }
 0x435   : > { %3091 = vmatmul.mubr.bf16.vlgmr.msra.gmra.mrb[8].mxu0 %v8296_v50  ;;  %3255 = vmatmul.mubr.bf16.vlgmr.msra.gmra.mrb[8].mxu1 %v8296_v50 }
 0x436   : > { %3100 = vmatpush1.bf16.msra.mxu0 %v2761_v49  ;;  %3131 = vmatprep.mubr.bf16.mxu0 %v8294_v56  ;;  %v2825_v49 = vunpack.c.l.s8.bf16 %v2409_v36 }
 0x437   : > { %3264 = vmatpush1.bf16.msra.mxu1 %v2763_v51  ;;  %3295 = vmatprep.mubr.bf16.mxu1 %v8294_v56  ;;  %v2827_v51 = vunpack.c.l.s8.bf16 %v2411_v48 }
 0x438   : > { %3101 = vmatprep.subr.bf16.mxu0 %v2770_v52  ;;  %3265 = vmatprep.subr.bf16.mxu1 %v2772_v54  ;;  %v2834_v52 = vunpack.c.h.s8.bf16 %v2410_v23  ;;  %v2836_v54 = vunpack.c.h.s8.bf16 %v2412_v30  ;;  %v2876_v23 = vunpack.c.l.s8.bf16 %v2436_v26  ;;  %v2435_v30 = vld [vmem:[%s7880_s15 + $0x5d0] sm:$0xff] }
 0x43a   : > { %3102 = vmatpush1.bf16.msra.mxu0 %v2769_v22  ;;  %v2833_v22 = vunpack.c.h.s8.bf16 %v2409_v36 }
 0x43b   : > { %3266 = vmatpush1.bf16.msra.mxu1 %v2771_v57  ;;  %3103 = vmatprep.subr.bf16.mxu0 %v2778_v53  ;;  %v2835_v57 = vunpack.c.h.s8.bf16 %v2411_v48  ;;  %v2842_v53 = vunpack.c.l.s8.bf16 %v2418_v55  ;;  %v2442_v48 = vld [vmem:[%s7880_s15 + $0x608] sm:$0xff] }
 0x43c   : > { %3267 = vmatprep.subr.bf16.mxu1 %v2780_v59  ;;  %v2844_v59 = vunpack.c.l.s8.bf16 %v2420_v0 }
 0x43e   : > { %3104 = vmatpush1.bf16.msra.mxu0 %v2777_v12  ;;  %v2841_v12 = vunpack.c.l.s8.bf16 %v2417_v58 }
 0x43f   : > { %3268 = vmatpush1.bf16.msra.mxu1 %v2779_v61  ;;  %3105 = vmatprep.subr.bf16.mxu0 %v2786_v3  ;;  %v2843_v61 = vunpack.c.l.s8.bf16 %v2419_v60  ;;  %v2850_v3 = vunpack.c.h.s8.bf16 %v2418_v55  ;;  %v2441_v55 = vld [vmem:[%s7880_s15 + $0x600] sm:$0xff] }
 0x440   : > { %3269 = vmatprep.subr.bf16.mxu1 %v2788_v4  ;;  %v2852_v4 = vunpack.c.h.s8.bf16 %v2420_v0  ;;  %v2897_v6 = vunpack.c.h.s8.bf16 %v2441_v55 }
 0x442   : > { %3106 = vmatpush1.bf16.msra.mxu0 %v2785_v8  ;;  %v2849_v8 = vunpack.c.h.s8.bf16 %v2417_v58 }
 0x443   : > { %3270 = vmatpush1.bf16.msra.mxu1 %v2787_v11  ;;  %3107 = vmatprep.subr.bf16.mxu0 %v2794_v13  ;;  %v8325_v11 = vsub.s32 4, %v7954_v40  ;;  %v2851_v13 = vunpack.c.h.s8.bf16 %v2419_v60  ;;  %v2898_v60 = vunpack.c.h.s8.bf16 %v2442_v48 }
 0x444   : > { %3271 = vmatprep.subr.bf16.mxu1 %v2796_v15  ;;  %v2425_v15 = vld [vmem:[%s7880_s15 + $0x580] sm:$0xff] }
 0x446   : > { %3108 = vmatpush1.bf16.msra.mxu0 %v2793_v21  ;;  %v2427_v21 = vld [vmem:[%s7880_s15 + $0x590] sm:$0xff] }
 0x447   : > { %3272 = vmatpush1.bf16.msra.mxu1 %v2795_v24  ;;  %3109 = vmatprep.subr.bf16.mxu0 %v2802_v14  ;;  %v8330_v24 = vsub.s32 7, %v7954_v40  ;;  %v2857_v14 = vunpack.c.l.s8.bf16 %v2425_v15  ;;  %v2859_v28 = vunpack.c.l.s8.bf16 %v2427_v21 }
 0x448   : > { %3273 = vmatprep.subr.bf16.mxu1 %v2804_v27  ;;  %v2154_v27 = vrot.slane %v8208_v2, %v8325_v11 }
 0x44a   : > { %3110 = vmatpush1.bf16.msra.mxu0 %v2801_v32  ;;  %v2868_v32 = vunpack.c.h.s8.bf16 %v2428_v5  ;;  %v2179_v9 = vmul.f32 %v2154_v27, %v8282_v25 }
 0x44b   : > { %3274 = vmatpush1.bf16.msra.mxu1 %v2803_v18  ;;  %3111 = vmatprep.subr.bf16.mxu0 %v2810_v33  ;;  %v2434_v18 = vld [vmem:[%s7880_s15 + $0x5c8] sm:$0xff]  ;;  %v2166_v33 = vrot.slane %v8208_v2, %v8330_v24 }
 0x44c   : > { %3275 = vmatprep.subr.bf16.mxu1 %v2812_v62  ;;  %v2865_v62 = vunpack.c.h.s8.bf16 %v2425_v15  ;;  %v2882_v36 = vunpack.c.h.s8.bf16 %v2434_v18  ;;  %v2451_v15 = vld [vmem:[%s7880_s15 + $0x650] sm:$0xff] }
 0x44d   : > { %v2182_v2 = vmul.f32 %v2166_v33, %v8288_v34 }
 0x44e   : > { %3112 = vmatpush1.bf16.msra.mxu0 %v2809_v10  ;;  %v2204_v10 = vrot.slane %v8212_v7, %v8325_v11 }
 0x44f   : > { %3276 = vmatpush1.bf16.msra.mxu1 %v2811_v17  ;;  %3113 = vmatprep.subr.bf16.mxu0 %v2818_v20  ;;  %v2867_v17 = vunpack.c.h.s8.bf16 %v2427_v21  ;;  %v2874_v20 = vunpack.c.l.s8.bf16 %v2434_v18  ;;  %v2907_v21 = vunpack.c.l.s8.bf16 %v2451_v15  ;;  %v2915_v18 = vunpack.c.h.s8.bf16 %v2451_v15  ;;  %v2483_v15 = vld [vmem:[%s7880_s15 + $0x750] sm:$0xff] }
 0x450   : > { %3277 = vmatprep.subr.bf16.mxu1 %v2820_v37  ;;  %v2433_v37 = vld [vmem:[%s7880_s15 + $0x5c0] sm:$0xff] }
 0x451   : > { %v2873_v25 = vunpack.c.l.s8.bf16 %v2433_v37 }
 0x452   : > { %3114 = vmatpush1.bf16.msra.mxu0 %v2817_v39  ;;  %v2216_v39 = vrot.slane %v8212_v7, %v8330_v24  ;;  %v2883_v7 = vunpack.c.h.s8.bf16 %v2435_v30 }
 0x453   : > { %3278 = vmatpush1.bf16.msra.mxu1 %v2819_v45  ;;  %3115 = vmatprep.subr.bf16.mxu0 %v2826_v35  ;;  %v2229_v45 = vadd.f32 %v2204_v10, %v2179_v9  ;;  %v2875_v35 = vunpack.c.l.s8.bf16 %v2435_v30  ;;  %v2459_v9 = vld [vmem:[%s7880_s15 + $0x690] sm:$0xff]  ;;  %v2468_v30 = vld [vmem:[%s7880_s15 + $0x6d8] sm:$0xff] }
 0x454   : > { %3279 = vmatprep.subr.bf16.mxu1 %v2828_v47  ;;  %v2884_v47 = vunpack.c.h.s8.bf16 %v2436_v26  ;;  %v2457_v26 = vld [vmem:[%s7880_s15 + $0x680] sm:$0xff] }
 0x455   : > { %v2237_v34 = vmax.f32 %v2229_v45, 0.0  ;;  %v2921_v10 = vunpack.c.l.s8.bf16 %v2457_v26  ;;  %v2465_v45 = vld [vmem:[%s7880_s15 + $0x6c0] sm:$0xff] }
 0x456   : > { %3116 = vmatpush1.bf16.msra.mxu0 %v2825_v49  ;;  %v2232_v49 = vadd.f32 %v2216_v39, %v2182_v2  ;;  %v2929_v2 = vunpack.c.h.s8.bf16 %v2457_v26  ;;  %v2931_v39 = vunpack.c.h.s8.bf16 %v2459_v9 }
 0x457   : > { %3280 = vmatpush1.bf16.msra.mxu1 %v2827_v51  ;;  %3117 = vmatprep.subr.bf16.mxu0 %v2834_v52  ;;  %v2444_v51 = vld [vmem:[%s7880_s15 + $0x618] sm:$0xff]  ;;  %v2881_v52 = vunpack.c.h.s8.bf16 %v2433_v37  ;;  %v8350_v58 = vpack.c.bf16 %v2237_v34, %v2237_v34 }
 0x458   : > { %3281 = vmatprep.subr.bf16.mxu1 %v2836_v54  ;;  %v2890_v54 = vunpack.c.l.s8.bf16 %v2442_v48  ;;  %v2892_v0 = vunpack.c.l.s8.bf16 %v2444_v51  ;;  %v2476_v34 = vld [vmem:[%s7880_s15 + $0x718] sm:$0xff] }
 0x45a   : > { %3118 = vmatpush1.bf16.msra.mxu0 %v2833_v22  ;;  %v2443_v22 = vld [vmem:[%s7880_s15 + $0x610] sm:$0xff] }
 0x45b   : > { %3282 = vmatpush1.bf16.msra.mxu1 %v2835_v57  ;;  %3119 = vmatprep.subr.bf16.mxu0 %v2842_v53  ;;  %v2240_v57 = vmax.f32 %v2232_v49, 0.0  ;;  %v2889_v53 = vunpack.c.l.s8.bf16 %v2441_v55  ;;  %v2899_v5 = vunpack.c.h.s8.bf16 %v2443_v22 }
 0x45c   : > { %3283 = vmatprep.subr.bf16.mxu1 %v2844_v59  ;;  %v2891_v59 = vunpack.c.l.s8.bf16 %v2443_v22  ;;  %v2956_v22 = vunpack.c.l.s8.bf16 %v2476_v34 }
 0x45e   : > { %3120 = vmatpush1.bf16.msra.mxu0 %v2841_v12  ;;  %v2450_v12 = vld [vmem:[%s7880_s15 + $0x648] sm:$0xff] }
 0x45f   : > { %3284 = vmatpush1.bf16.msra.mxu1 %v2843_v61  ;;  %3121 = vmatprep.subr.bf16.mxu0 %v2850_v3  ;;  %v8353_v61 = vpack.c.bf16 %v2240_v57, %v2240_v57  ;;  %v2900_v3 = vunpack.c.h.s8.bf16 %v2444_v51  ;;  %v2948_v51 = vunpack.c.h.s8.bf16 %v2468_v30  ;;  %v2475_v57 = vld [vmem:[%s7880_s15 + $0x710] sm:$0xff] }
 0x460   : > { %3285 = vmatprep.subr.bf16.mxu1 %v2852_v4  ;;  %v2452_v4 = vld [vmem:[%s7880_s15 + $0x658] sm:$0xff] }
 0x461   : > { %v2916_v27 = vunpack.c.h.s8.bf16 %v2452_v4 }
 0x462   : > { %3122 = vmatpush1.bf16.msra.mxu0 %v2849_v8  ;;  %v2906_v8 = vunpack.c.l.s8.bf16 %v2450_v12 }
 0x463   : > { %3286 = vmatpush1.bf16.msra.mxu1 %v2851_v13  ;;  %3123 = vmatprep.subr.bf16.mxu0 %v2858_v16  ;;  %v2449_v13 = vld [vmem:[%s7880_s15 + $0x640] sm:$0xff]  ;;  %v2908_v16 = vunpack.c.l.s8.bf16 %v2452_v4  ;;  %v2484_v4 = vld [vmem:[%s7880_s15 + $0x758] sm:$0xff] }
 0x464   : > { %3287 = vmatprep.subr.bf16.mxu1 %v2860_v19  ;;  %v2905_v19 = vunpack.c.l.s8.bf16 %v2449_v13 }
 0x466   : > { %3124 = vmatpush1.bf16.msra.mxu0 %v2857_v14  ;;  %v2914_v14 = vunpack.c.h.s8.bf16 %v2450_v12  ;;  %v2964_v12 = vunpack.c.h.s8.bf16 %v2476_v34 }
 0x467   : > { %3288 = vmatpush1.bf16.msra.mxu1 %v2859_v28  ;;  %3125 = vmatprep.subr.bf16.mxu0 %v2866_v31  ;;  %v2458_v28 = vld [vmem:[%s7880_s15 + $0x688] sm:$0xff]  ;;  %v2460_v31 = vld [vmem:[%s7880_s15 + $0x698] sm:$0xff] }
 0x468   : > { %3289 = vmatprep.subr.bf16.mxu1 %v2868_v32  ;;  %v2913_v32 = vunpack.c.h.s8.bf16 %v2449_v13  ;;  %v2922_v33 = vunpack.c.l.s8.bf16 %v2458_v28  ;;  %v2932_v37 = vunpack.c.h.s8.bf16 %v2460_v31  ;;  %v2481_v13 = vld [vmem:[%s7880_s15 + $0x740] sm:$0xff] }
 0x46a   : > { %3126 = vmatpush1.bf16.msra.mxu0 %v2865_v62  ;;  %v2924_v62 = vunpack.c.l.s8.bf16 %v2460_v31  ;;  %v2492_v31 = vld [vmem:[%s7880_s15 + $0x798] sm:$0xff] }
 0x46b   : > { %3290 = vmatpush1.bf16.msra.mxu1 %v2867_v17  ;;  %3127 = vmatprep.subr.bf16.mxu0 %v2874_v20  ;;  %v2923_v17 = vunpack.c.l.s8.bf16 %v2459_v9  ;;  %v2930_v20 = vunpack.c.h.s8.bf16 %v2458_v28  ;;  %v2490_v28 = vld [vmem:[%s7880_s15 + $0x788] sm:$0xff]  ;;  %v2988_v9 = vunpack.c.l.s8.bf16 %v2492_v31 }
 0x46c   : > { %3291 = vmatprep.subr.bf16.mxu1 %v2876_v23  ;;  %v2466_v23 = vld [vmem:[%s7880_s15 + $0x6c8] sm:$0xff]  ;;  %v2986_v26 = vunpack.c.l.s8.bf16 %v2490_v28 }
 0x46d   : > { %v2946_v49 = vunpack.c.h.s8.bf16 %v2466_v23 }
 0x46e   : > { %3128 = vmatpush1.bf16.msra.mxu0 %v2873_v25  ;;  %v2938_v25 = vunpack.c.l.s8.bf16 %v2466_v23  ;;  %v2994_v23 = vunpack.c.h.s8.bf16 %v2490_v28  ;;  %v2261_v28 = vld [vmem:[%s7880_s15 + $0x60] sm:$0xff] }
 0x46f   : > { %3292 = vmatpush1.bf16.msra.mxu1 %v2875_v35  ;;  %3129 = vmatprep.subr.bf16.mxu0 %v2882_v36  ;;  %v2940_v35 = vunpack.c.l.s8.bf16 %v2468_v30  ;;  %v2467_v36 = vld [vmem:[%s7880_s15 + $0x6d0] sm:$0xff]  ;;  %v2996_v30 = vunpack.c.h.s8.bf16 %v2492_v31 }
 0x470   : > { %3293 = vmatprep.subr.bf16.mxu1 %v2884_v47  ;;  %v2937_v47 = vunpack.c.l.s8.bf16 %v2465_v45  ;;  %v2939_v48 = vunpack.c.l.s8.bf16 %v2467_v36 }
 0x472   : > { %3130 = vmatpush1.bf16.msra.mxu0 %v2881_v52  ;;  %v2474_v52 = vld [vmem:[%s7880_s15 + $0x708] sm:$0xff] }
 0x473   : > { %3294 = vmatpush1.bf16.msra.mxu1 %v2883_v7  ;;  %3140 = vmatprep.subr.bf16.mxu0 %v2890_v54  ;;  %v2945_v7 = vunpack.c.h.s8.bf16 %v2465_v45  ;;  %v2947_v54 = vunpack.c.h.s8.bf16 %v2467_v36  ;;  %v2954_v55 = vunpack.c.l.s8.bf16 %v2474_v52 }
 0x474   : > { %3304 = vmatprep.subr.bf16.mxu1 %v2892_v0  ;;  %v2473_v0 = vld [vmem:[%s7880_s15 + $0x700] sm:$0xff] }
 0x475   : > { %3132 = vmatmul.mubr.bf16.vlgmr.msra.gmra.mrb[8].mxu0 %v8350_v58 }
 0x476   : > { %3296 = vmatmul.mubr.bf16.vlgmr.msra.gmra.mrb[8].mxu1 %v8350_v58  ;;  %3141 = vmatpush1.bf16.msra.mxu0 %v2889_v53  ;;  %v2953_v53 = vunpack.c.l.s8.bf16 %v2473_v0 }
 0x477   : > { %3172 = vmatprep.mubr.bf16.mxu0 %v8353_v61  ;;  %3305 = vmatpush1.bf16.msra.mxu1 %v2891_v59  ;;  %v2955_v59 = vunpack.c.l.s8.bf16 %v2475_v57 }
 0x478   : > { %3336 = vmatprep.mubr.bf16.mxu1 %v8353_v61  ;;  %3142 = vmatprep.subr.bf16.mxu0 %v2898_v60  ;;  %v2962_v60 = vunpack.c.h.s8.bf16 %v2474_v52  ;;  %v2499_v52 = vld [vmem:[%s7880_s15 + $0x7d0] sm:$0xff] }
 0x479   : > { %3306 = vmatprep.subr.bf16.mxu1 %v2900_v3  ;;  %v2482_v3 = vld [vmem:[%s7880_s15 + $0x748] sm:$0xff] }
 0x47a   : > { %3143 = vmatpush1.bf16.msra.mxu0 %v2897_v6  ;;  %v2961_v6 = vunpack.c.h.s8.bf16 %v2473_v0  ;;  %v2254_v0 = vld [vmem:[%s7880_s15 + $0x28] sm:$0xff] }
 0x47b   : > { %3307 = vmatpush1.bf16.msra.mxu1 %v2899_v5  ;;  %3144 = vmatprep.subr.bf16.mxu0 %v2906_v8  ;;  %v2963_v5 = vunpack.c.h.s8.bf16 %v2475_v57  ;;  %v2970_v8 = vunpack.c.l.s8.bf16 %v2482_v3 }
 0x47c   : > { %3308 = vmatprep.subr.bf16.mxu1 %v2908_v16  ;;  %v2972_v16 = vunpack.c.l.s8.bf16 %v2484_v4 }
 0x47e   : > { %3145 = vmatpush1.bf16.msra.mxu0 %v2905_v19  ;;  %v2969_v19 = vunpack.c.l.s8.bf16 %v2481_v13 }
 0x47f   : > { %3309 = vmatpush1.bf16.msra.mxu1 %v2907_v21  ;;  %3146 = vmatprep.subr.bf16.mxu0 %v2914_v14  ;;  %v2971_v21 = vunpack.c.l.s8.bf16 %v2483_v15  ;;  %v2978_v14 = vunpack.c.h.s8.bf16 %v2482_v3 }
 0x480   : > { %3310 = vmatprep.subr.bf16.mxu1 %v2916_v27  ;;  %v2980_v27 = vunpack.c.h.s8.bf16 %v2484_v4  ;;  %v2255_v4 = vld [vmem:[%s7880_s15 + $0x30] sm:$0xff] }
 0x482   : > { %3147 = vmatpush1.bf16.msra.mxu0 %v2913_v32  ;;  %v2977_v32 = vunpack.c.h.s8.bf16 %v2481_v13  ;;  %v2518_v13 = vunpack.c.h.s8.bf16 %v2254_v0 }
 0x483   : > { %3311 = vmatpush1.bf16.msra.mxu1 %v2915_v18  ;;  %3148 = vmatprep.subr.bf16.mxu0 %v2922_v33  ;;  %v8381_v18 = vsub.s32 6, %v7954_v40  ;;  %v2979_v33 = vunpack.c.h.s8.bf16 %v2483_v15 }
 0x484   : > { %3312 = vmatprep.subr.bf16.mxu1 %v2924_v62  ;;  %v2489_v62 = vld [vmem:[%s7880_s15 + $0x780] sm:$0xff] }
 0x486   : > { %3149 = vmatpush1.bf16.msra.mxu0 %v2921_v10  ;;  %v2491_v10 = vld [vmem:[%s7880_s15 + $0x790] sm:$0xff] }
 0x487   : > { %3313 = vmatpush1.bf16.msra.mxu1 %v2923_v17  ;;  %3150 = vmatprep.subr.bf16.mxu0 %v2930_v20  ;;  %v2985_v17 = vunpack.c.l.s8.bf16 %v2489_v62  ;;  %v6795_v20 = vld [vmem:[%s749_s2] sm:$0xff]  ;;  %v2987_v40 = vunpack.c.l.s8.bf16 %v2491_v10 }
 0x488   : > { %3314 = vmatprep.subr.bf16.mxu1 %v2932_v37  ;;  %v2162_v37 = vrot.slane %v6795_v20, %v8381_v18  ;;  %v2533_v20 = vunpack.c.h.s8.bf16 %v2261_v28 }
 0x48a   : > { %3151 = vmatpush1.bf16.msra.mxu0 %v2929_v2  ;;  %v2498_v2 = vld [vmem:[%s7880_s15 + $0x7c8] sm:$0xff]  ;;  %v2181_v45 = vmul.f32 %v2162_v37, %v8286_v29  ;;  %v3003_v29 = vunpack.c.l.s8.bf16 %v2499_v52 }
 0x48b   : > { %3315 = vmatpush1.bf16.msra.mxu1 %v2931_v39  ;;  %3152 = vmatprep.subr.bf16.mxu0 %v2938_v25  ;;  %v2500_v39 = vld [vmem:[%s7880_s15 + $0x7d8] sm:$0xff]  ;;  %v2993_v25 = vunpack.c.h.s8.bf16 %v2489_v62 }
 0x48c   : > { %3316 = vmatprep.subr.bf16.mxu1 %v2940_v35  ;;  %v6796_v35 = vld [vmem:[%s758_s19] sm:$0xff] }
 0x48d   : > { %v2212_v36 = vrot.slane %v6796_v35, %v8381_v18  ;;  %v2278_v35 = vld [vmem:[%s7880_s15 + $0xe8] sm:$0xff] }
 0x48e   : > { %3153 = vmatpush1.bf16.msra.mxu0 %v2937_v47  ;;  %v2995_v47 = vunpack.c.h.s8.bf16 %v2491_v10  ;;  %v2270_v10 = vld [vmem:[%s7880_s15 + $0xa8] sm:$0xff] }
 0x48f   : > { %3317 = vmatpush1.bf16.msra.mxu1 %v2939_v48  ;;  %3154 = vmatprep.subr.bf16.mxu0 %v2946_v49  ;;  %v3002_v48 = vunpack.c.l.s8.bf16 %v2498_v2  ;;  %v2497_v49 = vld [vmem:[%s7880_s15 + $0x7c0] sm:$0xff]  ;;  %v2542_v37 = vunpack.c.l.s8.bf16 %v2270_v10 }
 0x490   : > { %3318 = vmatprep.subr.bf16.mxu1 %v2948_v51  ;;  %v3004_v51 = vunpack.c.l.s8.bf16 %v2500_v39  ;;  %v3001_v34 = vunpack.c.l.s8.bf16 %v2497_v49  ;;  %v3009_v57 = vunpack.c.h.s8.bf16 %v2497_v49  ;;  %v2558_v49 = vunpack.c.l.s8.bf16 %v2278_v35 }
 0x492   : > { %3155 = vmatpush1.bf16.msra.mxu0 %v2945_v7  ;;  %v2231_v7 = vadd.f32 %v2212_v36, %v2181_v45  ;;  %v2280_v36 = vld [vmem:[%s7880_s15 + $0xf8] sm:$0xff] }
 0x493   : > { %3319 = vmatpush1.bf16.msra.mxu1 %v2947_v54  ;;  %3156 = vmatprep.subr.bf16.mxu0 %v2954_v55  ;;  %v3010_v54 = vunpack.c.h.s8.bf16 %v2498_v2  ;;  %v3012_v55 = vunpack.c.h.s8.bf16 %v2500_v39 }
 0x494   : > { %3320 = vmatprep.subr.bf16.mxu1 %v2956_v22  ;;  %v2256_v22 = vld [vmem:[%s7880_s15 + $0x38] sm:$0xff] }
 0x495   : > { %v2512_v3 = vunpack.c.l.s8.bf16 %v2256_v22  ;;  %v2520_v15 = vunpack.c.h.s8.bf16 %v2256_v22  ;;  %v2288_v22 = vld [vmem:[%s7880_s15 + $0x138] sm:$0xff] }
 0x496   : > { %3157 = vmatpush1.bf16.msra.mxu0 %v2953_v53  ;;  %v2239_v53 = vmax.f32 %v2231_v7, 0.0 }
 0x497   : > { %3321 = vmatpush1.bf16.msra.mxu1 %v2955_v59  ;;  %3158 = vmatprep.subr.bf16.mxu0 %v2962_v60  ;;  %v3011_v59 = vunpack.c.h.s8.bf16 %v2499_v52  ;;  %v2510_v60 = vunpack.c.l.s8.bf16 %v2254_v0  ;;  %v2560_v52 = vunpack.c.l.s8.bf16 %v2280_v36  ;;  %v2286_v0 = vld [vmem:[%s7880_s15 + $0x128] sm:$0xff] }
 0x498   : > { %3322 = vmatprep.subr.bf16.mxu1 %v2964_v12  ;;  %v2253_v12 = vld [vmem:[%s7880_s15 + $0x20] sm:$0xff] }
 0x49a   : > { %3159 = vmatpush1.bf16.msra.mxu0 %v2961_v6  ;;  %v2509_v6 = vunpack.c.l.s8.bf16 %v2253_v12 }
 0x49b   : > { %3323 = vmatpush1.bf16.msra.mxu1 %v2963_v5  ;;  %3160 = vmatprep.subr.bf16.mxu0 %v2970_v8  ;;  %v8400_v5 = vpack.c.bf16 %v2239_v53, %v2239_v53  ;;  %v2511_v8 = vunpack.c.l.s8.bf16 %v2255_v4 }
 0x49c   : > { %3324 = vmatprep.subr.bf16.mxu1 %v2972_v16  ;;  %v2262_v16 = vld [vmem:[%s7880_s15 + $0x68] sm:$0xff] }
 0x49d   : > { %v2534_v62 = vunpack.c.h.s8.bf16 %v2262_v16 }
 0x49e   : > { %3161 = vmatpush1.bf16.msra.mxu0 %v2969_v19  ;;  %v2264_v19 = vld [vmem:[%s7880_s15 + $0x78] sm:$0xff] }
 0x49f   : > { %3325 = vmatpush1.bf16.msra.mxu1 %v2971_v21  ;;  %3162 = vmatprep.subr.bf16.mxu0 %v2978_v14  ;;  %v2517_v21 = vunpack.c.h.s8.bf16 %v2253_v12  ;;  %v2519_v14 = vunpack.c.h.s8.bf16 %v2255_v4  ;;  %v2528_v31 = vunpack.c.l.s8.bf16 %v2264_v19  ;;  %v2576_v12 = vunpack.c.l.s8.bf16 %v2288_v22 }
 0x4a0   : > { %3326 = vmatprep.subr.bf16.mxu1 %v2980_v27  ;;  %v2526_v27 = vunpack.c.l.s8.bf16 %v2262_v16  ;;  %v2294_v16 = vld [vmem:[%s7880_s15 + $0x168] sm:$0xff] }
 0x4a2   : > { %3163 = vmatpush1.bf16.msra.mxu0 %v2977_v32  ;;  %v2263_v32 = vld [vmem:[%s7880_s15 + $0x70] sm:$0xff] }
 0x4a3   : > { %3327 = vmatpush1.bf16.msra.mxu1 %v2979_v33  ;;  %3164 = vmatprep.subr.bf16.mxu0 %v2986_v26  ;;  %v2525_v33 = vunpack.c.l.s8.bf16 %v2261_v28  ;;  %v2527_v26 = vunpack.c.l.s8.bf16 %v2263_v32 }
 0x4a4   : > { %3328 = vmatprep.subr.bf16.mxu1 %v2988_v9  ;;  %v2536_v9 = vunpack.c.h.s8.bf16 %v2264_v19 }
 0x4a6   : > { %3165 = vmatpush1.bf16.msra.mxu0 %v2985_v17  ;;  %v2272_v17 = vld [vmem:[%s7880_s15 + $0xb8] sm:$0xff] }
 0x4a7   : > { %3329 = vmatpush1.bf16.msra.mxu1 %v2987_v40  ;;  %3166 = vmatprep.subr.bf16.mxu0 %v2994_v23  ;;  %v2269_v40 = vld [vmem:[%s7880_s15 + $0xa0] sm:$0xff]  ;;  %v2544_v23 = vunpack.c.l.s8.bf16 %v2272_v17  ;;  %v2552_v45 = vunpack.c.h.s8.bf16 %v2272_v17 }
 0x4a8   : > { %3330 = vmatprep.subr.bf16.mxu1 %v2996_v30  ;;  %v2271_v30 = vld [vmem:[%s7880_s15 + $0xb0] sm:$0xff]  ;;  %v2541_v2 = vunpack.c.l.s8.bf16 %v2269_v40 }
 0x4a9   : > { %v2543_v39 = vunpack.c.l.s8.bf16 %v2271_v30 }
 0x4aa   : > { %3167 = vmatpush1.bf16.msra.mxu0 %v2993_v25  ;;  %v2550_v25 = vunpack.c.h.s8.bf16 %v2270_v10  ;;  %v2304_v10 = vld [vmem:[%s7880_s15 + $0x1b8] sm:$0xff] }
 0x4ab   : > { %3331 = vmatpush1.bf16.msra.mxu1 %v2995_v47  ;;  %3168 = vmatprep.subr.bf16.mxu0 %v3002_v48  ;;  %v2549_v47 = vunpack.c.h.s8.bf16 %v2269_v40  ;;  %v2551_v48 = vunpack.c.h.s8.bf16 %v2271_v30  ;;  %v2608_v40 = vunpack.c.l.s8.bf16 %v2304_v10 }
 0x4ac   : > { %3332 = vmatprep.subr.bf16.mxu1 %v3004_v51  ;;  %v2277_v51 = vld [vmem:[%s7880_s15 + $0xe0] sm:$0xff] }
 0x4ad   : > { %v2557_v7 = vunpack.c.l.s8.bf16 %v2277_v51 }
 0x4ae   : > { %3169 = vmatpush1.bf16.msra.mxu0 %v3001_v34  ;;  %v2279_v34 = vld [vmem:[%s7880_s15 + $0xf0] sm:$0xff] }
 0x4af   : > { %3333 = vmatpush1.bf16.msra.mxu1 %v3003_v29  ;;  %3170 = vmatprep.subr.bf16.mxu0 %v3010_v54  ;;  %v2559_v29 = vunpack.c.l.s8.bf16 %v2279_v34  ;;  %v2566_v54 = vunpack.c.h.s8.bf16 %v2278_v35  ;;  %v2567_v53 = vunpack.c.h.s8.bf16 %v2279_v34  ;;  %v2312_v35 = vld [vmem:[%s7880_s15 + $0x1f8] sm:$0xff] }
 0x4b0   : > { %3334 = vmatprep.subr.bf16.mxu1 %v3012_v55  ;;  %v2568_v55 = vunpack.c.h.s8.bf16 %v2280_v36 }
 0x4b2   : > { %3171 = vmatpush1.bf16.msra.mxu0 %v3009_v57  ;;  %v2565_v57 = vunpack.c.h.s8.bf16 %v2277_v51  ;;  %v2624_v51 = vunpack.c.l.s8.bf16 %v2312_v35 }
 0x4b3   : > { %3335 = vmatpush1.bf16.msra.mxu1 %v3011_v59  ;;  %3345 = vmatprep.subr.bf16.mxu0 %v2510_v60  ;;  %v2574_v59 = vunpack.c.l.s8.bf16 %v2286_v0  ;;  %v2285_v60 = vld [vmem:[%s7880_s15 + $0x120] sm:$0xff] }
 0x4b4   : > { %3509 = vmatprep.subr.bf16.mxu1 %v2512_v3  ;;  %v2287_v3 = vld [vmem:[%s7880_s15 + $0x130] sm:$0xff]  ;;  %v2573_v4 = vunpack.c.l.s8.bf16 %v2285_v60  ;;  %v2581_v19 = vunpack.c.h.s8.bf16 %v2285_v60 }
 0x4b5   : > { %3173 = vmatmul.mubr.bf16.vlgmr.msra.gmra.mrb[8].mxu0 %v8400_v5 }
 0x4b6   : > { %3337 = vmatmul.mubr.bf16.vlgmr.msra.gmra.mrb[8].mxu1 %v8400_v5  ;;  %3346 = vmatpush1.bf16.msra.mxu0 %v2509_v6  ;;  %v2575_v6 = vunpack.c.l.s8.bf16 %v2287_v3 }
 0x4b7   : > { %3377 = vmatprep.mubr.bf16.mxu0 %v8230_v63  ;;  %3510 = vmatpush1.bf16.msra.mxu1 %v2511_v8  ;;  %v2582_v8 = vunpack.c.h.s8.bf16 %v2286_v0  ;;  %v2320_v0 = vld [vmem:[%s7880_s15 + $0x238] sm:$0xff] }
 0x4b8   : > { %3541 = vmatprep.mubr.bf16.mxu1 %v8230_v63  ;;  %3347 = vmatprep.subr.bf16.mxu0 %v2518_v13  ;;  %v2535_v63 = vunpack.c.h.s8.bf16 %v2263_v32  ;;  %v2584_v13 = vunpack.c.h.s8.bf16 %v2288_v22  ;;  %v2640_v60 = vunpack.c.l.s8.bf16 %v2320_v0 }
 0x4b9   : > { %3511 = vmatprep.subr.bf16.mxu1 %v2520_v15  ;;  %v2296_v15 = vld [vmem:[%s7880_s15 + $0x178] sm:$0xff] }
 0x4ba   : > { %3348 = vmatpush1.bf16.msra.mxu0 %v2517_v21  ;;  %v2583_v21 = vunpack.c.h.s8.bf16 %v2287_v3  ;;  %v2592_v28 = vunpack.c.l.s8.bf16 %v2296_v15 }
 0x4bb   : > { %3512 = vmatpush1.bf16.msra.mxu1 %v2519_v14  ;;  %3349 = vmatprep.subr.bf16.mxu0 %v2526_v27  ;;  %v2590_v14 = vunpack.c.l.s8.bf16 %v2294_v16  ;;  %v2293_v27 = vld [vmem:[%s7880_s15 + $0x160] sm:$0xff] }
 0x4bc   : > { %3513 = vmatprep.subr.bf16.mxu1 %v2528_v31  ;;  %v2295_v31 = vld [vmem:[%s7880_s15 + $0x170] sm:$0xff]  ;;  %v2589_v32 = vunpack.c.l.s8.bf16 %v2293_v27  ;;  %v2597_v17 = vunpack.c.h.s8.bf16 %v2293_v27 }
 0x4be   : > { %3350 = vmatpush1.bf16.msra.mxu0 %v2525_v33  ;;  %v2591_v33 = vunpack.c.l.s8.bf16 %v2295_v31 }
 0x4bf   : > { %3514 = vmatpush1.bf16.msra.mxu1 %v2527_v26  ;;  %3351 = vmatprep.subr.bf16.mxu0 %v2534_v62  ;;  %v2598_v26 = vunpack.c.h.s8.bf16 %v2294_v16  ;;  %v2600_v62 = vunpack.c.h.s8.bf16 %v2296_v15  ;;  %v2328_v16 = vld [vmem:[%s7880_s15 + $0x278] sm:$0xff] }
 0x4c0   : > { %3515 = vmatprep.subr.bf16.mxu1 %v2536_v9  ;;  %v2302_v9 = vld [vmem:[%s7880_s15 + $0x1a8] sm:$0xff]  ;;  %v2656_v27 = vunpack.c.l.s8.bf16 %v2328_v16 }
 0x4c2   : > { %3352 = vmatpush1.bf16.msra.mxu0 %v2533_v20  ;;  %v2599_v20 = vunpack.c.h.s8.bf16 %v2295_v31 }
 0x4c3   : > { %3516 = vmatpush1.bf16.msra.mxu1 %v2535_v63  ;;  %3353 = vmatprep.subr.bf16.mxu0 %v2542_v37  ;;  %v2606_v63 = vunpack.c.l.s8.bf16 %v2302_v9  ;;  %v2301_v37 = vld [vmem:[%s7880_s15 + $0x1a0] sm:$0xff] }
 0x4c4   : > { %3517 = vmatprep.subr.bf16.mxu1 %v2544_v23  ;;  %v2303_v23 = vld [vmem:[%s7880_s15 + $0x1b0] sm:$0xff]  ;;  %v2605_v30 = vunpack.c.l.s8.bf16 %v2301_v37  ;;  %v2613_v36 = vunpack.c.h.s8.bf16 %v2301_v37 }
 0x4c6   : > { %3354 = vmatpush1.bf16.msra.mxu0 %v2541_v2  ;;  %v2607_v2 = vunpack.c.l.s8.bf16 %v2303_v23 }
 0x4c7   : > { %3518 = vmatpush1.bf16.msra.mxu1 %v2543_v39  ;;  %3355 = vmatprep.subr.bf16.mxu0 %v2550_v25  ;;  %v2614_v39 = vunpack.c.h.s8.bf16 %v2302_v9  ;;  %v2616_v25 = vunpack.c.h.s8.bf16 %v2304_v10 }
 0x4c8   : > { %3519 = vmatprep.subr.bf16.mxu1 %v2552_v45  ;;  %v2310_v45 = vld [vmem:[%s7880_s15 + $0x1e8] sm:$0xff] }
 0x4ca   : > { %3356 = vmatpush1.bf16.msra.mxu0 %v2549_v47  ;;  %v2615_v47 = vunpack.c.h.s8.bf16 %v2303_v23 }
 0x4cb   : > { %3520 = vmatpush1.bf16.msra.mxu1 %v2551_v48  ;;  %3357 = vmatprep.subr.bf16.mxu0 %v2558_v49  ;;  %v2622_v48 = vunpack.c.l.s8.bf16 %v2310_v45  ;;  %v2309_v49 = vld [vmem:[%s7880_s15 + $0x1e0] sm:$0xff] }
 0x4cc   : > { %3521 = vmatprep.subr.bf16.mxu1 %v2560_v52  ;;  %v2311_v52 = vld [vmem:[%s7880_s15 + $0x1f0] sm:$0xff]  ;;  %v2621_v34 = vunpack.c.l.s8.bf16 %v2309_v49  ;;  %v2629_v22 = vunpack.c.h.s8.bf16 %v2309_v49 }
 0x4ce   : > { %3358 = vmatpush1.bf16.msra.mxu0 %v2557_v7  ;;  %v2623_v7 = vunpack.c.l.s8.bf16 %v2311_v52 }
 0x4cf   : > { %3522 = vmatpush1.bf16.msra.mxu1 %v2559_v29  ;;  %3359 = vmatprep.subr.bf16.mxu0 %v2566_v54  ;;  %v2630_v29 = vunpack.c.h.s8.bf16 %v2310_v45  ;;  %v2632_v54 = vunpack.c.h.s8.bf16 %v2312_v35 }
 0x4d0   : > { %3523 = vmatprep.subr.bf16.mxu1 %v2568_v55  ;;  %v2318_v55 = vld [vmem:[%s7880_s15 + $0x228] sm:$0xff] }
 0x4d2   : > { %3360 = vmatpush1.bf16.msra.mxu0 %v2565_v57  ;;  %v2631_v57 = vunpack.c.h.s8.bf16 %v2311_v52 }
 0x4d3   : > { %3524 = vmatpush1.bf16.msra.mxu1 %v2567_v53  ;;  %3361 = vmatprep.subr.bf16.mxu0 %v2574_v59  ;;  %v2638_v53 = vunpack.c.l.s8.bf16 %v2318_v55  ;;  %v2317_v59 = vld [vmem:[%s7880_s15 + $0x220] sm:$0xff] }
 0x4d4   : > { %3525 = vmatprep.subr.bf16.mxu1 %v2576_v12  ;;  %v2319_v12 = vld [vmem:[%s7880_s15 + $0x230] sm:$0xff]  ;;  %v2637_v3 = vunpack.c.l.s8.bf16 %v2317_v59  ;;  %v2645_v15 = vunpack.c.h.s8.bf16 %v2317_v59 }
 0x4d6   : > { %3362 = vmatpush1.bf16.msra.mxu0 %v2573_v4  ;;  %v2639_v4 = vunpack.c.l.s8.bf16 %v2319_v12 }
 0x4d7   : > { %3526 = vmatpush1.bf16.msra.mxu1 %v2575_v6  ;;  %3363 = vmatprep.subr.bf16.mxu0 %v2582_v8  ;;  %v2646_v6 = vunpack.c.h.s8.bf16 %v2318_v55  ;;  %v2326_v8 = vld [vmem:[%s7880_s15 + $0x268] sm:$0xff] }
 0x4d8   : > { %3527 = vmatprep.subr.bf16.mxu1 %v2584_v13  ;;  %v2648_v13 = vunpack.c.h.s8.bf16 %v2320_v0 }
 0x4da   : > { %3364 = vmatpush1.bf16.msra.mxu0 %v2581_v19  ;;  %v2647_v19 = vunpack.c.h.s8.bf16 %v2319_v12 }
 0x4db   : > { %3528 = vmatpush1.bf16.msra.mxu1 %v2583_v21  ;;  %3365 = vmatprep.subr.bf16.mxu0 %v2590_v14  ;;  %v2654_v21 = vunpack.c.l.s8.bf16 %v2326_v8  ;;  %v2325_v14 = vld [vmem:[%s7880_s15 + $0x260] sm:$0xff] }
 0x4dc   : > { %3529 = vmatprep.subr.bf16.mxu1 %v2592_v28  ;;  %v2327_v28 = vld [vmem:[%s7880_s15 + $0x270] sm:$0xff]  ;;  %v2653_v31 = vunpack.c.l.s8.bf16 %v2325_v14  ;;  %v2661_v9 = vunpack.c.h.s8.bf16 %v2325_v14 }
 0x4de   : > { %3366 = vmatpush1.bf16.msra.mxu0 %v2589_v32  ;;  %v2662_v32 = vunpack.c.h.s8.bf16 %v2326_v8 }
 0x4df   : > { %3530 = vmatpush1.bf16.msra.mxu1 %v2591_v33  ;;  %3367 = vmatprep.subr.bf16.mxu0 %v2598_v26  ;;  %v2664_v33 = vunpack.c.h.s8.bf16 %v2328_v16  ;;  %v2334_v26 = vld [vmem:[%s7880_s15 + $0x2a8] sm:$0xff] }
 0x4e0   : > { %3531 = vmatprep.subr.bf16.mxu1 %v2600_v62  ;;  %v2336_v62 = vld [vmem:[%s7880_s15 + $0x2b8] sm:$0xff]  ;;  %v2670_v10 = vunpack.c.l.s8.bf16 %v2334_v26  ;;  %v2678_v23 = vunpack.c.h.s8.bf16 %v2334_v26 }
 0x4e2   : > { %3368 = vmatpush1.bf16.msra.mxu0 %v2597_v17  ;;  %v2333_v17 = vld [vmem:[%s7880_s15 + $0x2a0] sm:$0xff] }
 0x4e3   : > { %3532 = vmatpush1.bf16.msra.mxu1 %v2599_v20  ;;  %3369 = vmatprep.subr.bf16.mxu0 %v2606_v63  ;;  %v2672_v20 = vunpack.c.l.s8.bf16 %v2336_v62  ;;  %v2335_v63 = vld [vmem:[%s7880_s15 + $0x2b0] sm:$0xff]  ;;  %v2669_v37 = vunpack.c.l.s8.bf16 %v2333_v17 }
 0x4e4   : > { %3533 = vmatprep.subr.bf16.mxu1 %v2608_v40  ;;  %v2671_v40 = vunpack.c.l.s8.bf16 %v2335_v63  ;;  %v2679_v45 = vunpack.c.h.s8.bf16 %v2335_v63 }
 0x4e6   : > { %3370 = vmatpush1.bf16.msra.mxu0 %v2605_v30  ;;  %v2680_v30 = vunpack.c.h.s8.bf16 %v2336_v62 }
 0x4e7   : > { %3534 = vmatpush1.bf16.msra.mxu1 %v2607_v2  ;;  %3371 = vmatprep.subr.bf16.mxu0 %v2614_v39  ;;  %v2342_v2 = vld [vmem:[%s7880_s15 + $0x2e8] sm:$0xff]  ;;  %v2344_v39 = vld [vmem:[%s7880_s15 + $0x2f8] sm:$0xff] }
 0x4e8   : > { %3535 = vmatprep.subr.bf16.mxu1 %v2616_v25  ;;  %v2677_v25 = vunpack.c.h.s8.bf16 %v2333_v17  ;;  %v2686_v35 = vunpack.c.l.s8.bf16 %v2342_v2  ;;  %v2694_v52 = vunpack.c.h.s8.bf16 %v2342_v2 }
 0x4ea   : > { %3372 = vmatpush1.bf16.msra.mxu0 %v2613_v36  ;;  %v2341_v36 = vld [vmem:[%s7880_s15 + $0x2e0] sm:$0xff] }
 0x4eb   : > { %3536 = vmatpush1.bf16.msra.mxu1 %v2615_v47  ;;  %3373 = vmatprep.subr.bf16.mxu0 %v2622_v48  ;;  %v2688_v47 = vunpack.c.l.s8.bf16 %v2344_v39  ;;  %v2343_v48 = vld [vmem:[%s7880_s15 + $0x2f0] sm:$0xff]  ;;  %v2685_v49 = vunpack.c.l.s8.bf16 %v2341_v36 }
 0x4ec   : > { %3537 = vmatprep.subr.bf16.mxu1 %v2624_v51  ;;  %v2687_v51 = vunpack.c.l.s8.bf16 %v2343_v48  ;;  %v2695_v55 = vunpack.c.h.s8.bf16 %v2343_v48 }
 0x4ee   : > { %3374 = vmatpush1.bf16.msra.mxu0 %v2621_v34  ;;  %v2696_v34 = vunpack.c.h.s8.bf16 %v2344_v39 }
 0x4ef   : > { %3538 = vmatpush1.bf16.msra.mxu1 %v2623_v7  ;;  %3375 = vmatprep.subr.bf16.mxu0 %v2630_v29  ;;  %v2350_v7 = vld [vmem:[%s7880_s15 + $0x328] sm:$0xff]  ;;  %v2352_v29 = vld [vmem:[%s7880_s15 + $0x338] sm:$0xff] }
 0x4f0   : > { %3539 = vmatprep.subr.bf16.mxu1 %v2632_v54  ;;  %v2693_v54 = vunpack.c.h.s8.bf16 %v2341_v36  ;;  %v2702_v0 = vunpack.c.l.s8.bf16 %v2350_v7  ;;  %v2710_v12 = vunpack.c.h.s8.bf16 %v2350_v7 }
 0x4f2   : > { %3376 = vmatpush1.bf16.msra.mxu0 %v2629_v22  ;;  %v2349_v22 = vld [vmem:[%s7880_s15 + $0x320] sm:$0xff] }
 0x4f3   : > { %3540 = vmatpush1.bf16.msra.mxu1 %v2631_v57  ;;  %3386 = vmatprep.subr.bf16.mxu0 %v2638_v53  ;;  %v2704_v57 = vunpack.c.l.s8.bf16 %v2352_v29  ;;  %v2351_v53 = vld [vmem:[%s7880_s15 + $0x330] sm:$0xff]  ;;  %v2701_v59 = vunpack.c.l.s8.bf16 %v2349_v22  ;;  %v2709_v8 = vunpack.c.h.s8.bf16 %v2349_v22 }
 0x4f4   : > { %3550 = vmatprep.subr.bf16.mxu1 %v2640_v60  ;;  %v2703_v60 = vunpack.c.l.s8.bf16 %v2351_v53 }
 0x4f5   : > { %3378 = vmatmul.mubr.bf16.vlgmr.msra.gmra.mrb[12].mxu0 %v8232_v38 }
 0x4f6   : > { %3542 = vmatmul.mubr.bf16.vlgmr.msra.gmra.mrb[12].mxu1 %v8232_v38  ;;  %3387 = vmatpush1.bf16.msra.mxu0 %v2637_v3  ;;  %v2655_v38 = vunpack.c.l.s8.bf16 %v2327_v28  ;;  %v2712_v3 = vunpack.c.h.s8.bf16 %v2352_v29 }
 0x4f7   : > { %3418 = vmatprep.mubr.bf16.mxu0 %v8240_v46  ;;  %3551 = vmatpush1.bf16.msra.mxu1 %v2639_v4  ;;  %v2358_v4 = vld [vmem:[%s7880_s15 + $0x368] sm:$0xff] }
 0x4f8   : > { %3582 = vmatprep.mubr.bf16.mxu1 %v8240_v46  ;;  %3388 = vmatprep.subr.bf16.mxu0 %v2646_v6  ;;  %v2663_v46 = vunpack.c.h.s8.bf16 %v2327_v28  ;;  %v2360_v6 = vld [vmem:[%s7880_s15 + $0x378] sm:$0xff]  ;;  %v2718_v16 = vunpack.c.l.s8.bf16 %v2358_v4  ;;  %v2726_v28 = vunpack.c.h.s8.bf16 %v2358_v4 }
 0x4f9   : > { %3552 = vmatprep.subr.bf16.mxu1 %v2648_v13  ;;  %v2711_v13 = vunpack.c.h.s8.bf16 %v2351_v53 }
 0x4fa   : > { %3389 = vmatpush1.bf16.msra.mxu0 %v2645_v15  ;;  %v2357_v15 = vld [vmem:[%s7880_s15 + $0x360] sm:$0xff] }
 0x4fb   : > { %3553 = vmatpush1.bf16.msra.mxu1 %v2647_v19  ;;  %3390 = vmatprep.subr.bf16.mxu0 %v2654_v21  ;;  %v2720_v19 = vunpack.c.l.s8.bf16 %v2360_v6  ;;  %v2359_v21 = vld [vmem:[%s7880_s15 + $0x370] sm:$0xff]  ;;  %v2717_v14 = vunpack.c.l.s8.bf16 %v2357_v15 }
 0x4fc   : > { %3554 = vmatprep.subr.bf16.mxu1 %v2656_v27  ;;  %v2719_v27 = vunpack.c.l.s8.bf16 %v2359_v21  ;;  %v2727_v26 = vunpack.c.h.s8.bf16 %v2359_v21 }
 0x4fe   : > { %3391 = vmatpush1.bf16.msra.mxu0 %v2653_v31  ;;  %v2728_v31 = vunpack.c.h.s8.bf16 %v2360_v6 }
 0x4ff   : > { %3555 = vmatpush1.bf16.msra.mxu1 %v2655_v38  ;;  %3392 = vmatprep.subr.bf16.mxu0 %v2662_v32  ;;  %v2366_v38 = vld [vmem:[%s7880_s15 + $0x3a8] sm:$0xff]  ;;  %v2368_v32 = vld [vmem:[%s7880_s15 + $0x3b8] sm:$0xff] }
 0x500   : > { %3556 = vmatprep.subr.bf16.mxu1 %v2664_v33  ;;  %v2725_v33 = vunpack.c.h.s8.bf16 %v2357_v15  ;;  %v2734_v62 = vunpack.c.l.s8.bf16 %v2366_v38  ;;  %v2742_v63 = vunpack.c.h.s8.bf16 %v2366_v38  ;;  %v2397_v38 = vld [vmem:[%s7880_s15 + $0x4a0] sm:$0xff] }
 0x502   : > { %3393 = vmatpush1.bf16.msra.mxu0 %v2661_v9  ;;  %v2365_v9 = vld [vmem:[%s7880_s15 + $0x3a0] sm:$0xff] }
 0x503   : > { %3557 = vmatpush1.bf16.msra.mxu1 %v2663_v46  ;;  %3394 = vmatprep.subr.bf16.mxu0 %v2670_v10  ;;  %v2736_v46 = vunpack.c.l.s8.bf16 %v2368_v32  ;;  %v2367_v10 = vld [vmem:[%s7880_s15 + $0x3b0] sm:$0xff]  ;;  %v2733_v17 = vunpack.c.l.s8.bf16 %v2365_v9 }
 0x504   : > { %3558 = vmatprep.subr.bf16.mxu1 %v2672_v20  ;;  %v2735_v20 = vunpack.c.l.s8.bf16 %v2367_v10  ;;  %v2743_v2 = vunpack.c.h.s8.bf16 %v2367_v10  ;;  %v2406_v10 = vld [vmem:[%s7880_s15 + $0x4e8] sm:$0xff] }
 0x506   : > { %3395 = vmatpush1.bf16.msra.mxu0 %v2669_v37  ;;  %v2744_v37 = vunpack.c.h.s8.bf16 %v2368_v32 }
 0x507   : > { %3559 = vmatpush1.bf16.msra.mxu1 %v2671_v40  ;;  %3396 = vmatprep.subr.bf16.mxu0 %v2678_v23  ;;  %v2374_v40 = vld [vmem:[%s7880_s15 + $0x3e8] sm:$0xff]  ;;  %v2376_v23 = vld [vmem:[%s7880_s15 + $0x3f8] sm:$0xff] }
 0x508   : > { %3560 = vmatprep.subr.bf16.mxu1 %v2680_v30  ;;  %v2741_v30 = vunpack.c.h.s8.bf16 %v2365_v9  ;;  %v2750_v39 = vunpack.c.l.s8.bf16 %v2374_v40  ;;  %v2758_v48 = vunpack.c.h.s8.bf16 %v2374_v40  ;;  %v2405_v40 = vld [vmem:[%s7880_s15 + $0x4e0] sm:$0xff] }
 0x50a   : > { %3397 = vmatpush1.bf16.msra.mxu0 %v2677_v25  ;;  %v2373_v25 = vld [vmem:[%s7880_s15 + $0x3e0] sm:$0xff] }
 0x50b   : > { %3561 = vmatpush1.bf16.msra.mxu1 %v2679_v45  ;;  %3398 = vmatprep.subr.bf16.mxu0 %v2686_v35  ;;  %v2752_v45 = vunpack.c.l.s8.bf16 %v2376_v23  ;;  %v2375_v35 = vld [vmem:[%s7880_s15 + $0x3f0] sm:$0xff]  ;;  %v2749_v36 = vunpack.c.l.s8.bf16 %v2373_v25 }
 0x50c   : > { %3562 = vmatprep.subr.bf16.mxu1 %v2688_v47  ;;  %v2751_v47 = vunpack.c.l.s8.bf16 %v2375_v35  ;;  %v2759_v7 = vunpack.c.h.s8.bf16 %v2375_v35  ;;  %v2414_v35 = vld [vmem:[%s7880_s15 + $0x528] sm:$0xff] }
 0x50e   : > { %3399 = vmatpush1.bf16.msra.mxu0 %v2685_v49  ;;  %v2760_v49 = vunpack.c.h.s8.bf16 %v2376_v23 }
 0x50f   : > { %3563 = vmatpush1.bf16.msra.mxu1 %v2687_v51  ;;  %3400 = vmatprep.subr.bf16.mxu0 %v2694_v52  ;;  %v2382_v51 = vld [vmem:[%s7880_s15 + $0x428] sm:$0xff]  ;;  %v2384_v52 = vld [vmem:[%s7880_s15 + $0x438] sm:$0xff] }
 0x510   : > { %3564 = vmatprep.subr.bf16.mxu1 %v2696_v34  ;;  %v2757_v34 = vunpack.c.h.s8.bf16 %v2373_v25  ;;  %v2766_v29 = vunpack.c.l.s8.bf16 %v2382_v51  ;;  %v2774_v53 = vunpack.c.h.s8.bf16 %v2382_v51  ;;  %v2822_v25 = vunpack.c.h.s8.bf16 %v2406_v10  ;;  %v2413_v51 = vld [vmem:[%s7880_s15 + $0x520] sm:$0xff] }
 0x512   : > { %3401 = vmatpush1.bf16.msra.mxu0 %v2693_v54  ;;  %v2381_v54 = vld [vmem:[%s7880_s15 + $0x420] sm:$0xff] }
 0x513   : > { %3565 = vmatpush1.bf16.msra.mxu1 %v2695_v55  ;;  %3402 = vmatprep.subr.bf16.mxu0 %v2702_v0  ;;  %v2768_v55 = vunpack.c.l.s8.bf16 %v2384_v52  ;;  %v2383_v0 = vld [vmem:[%s7880_s15 + $0x430] sm:$0xff]  ;;  %v2765_v22 = vunpack.c.l.s8.bf16 %v2381_v54 }
 0x514   : > { %3566 = vmatprep.subr.bf16.mxu1 %v2704_v57  ;;  %v2767_v57 = vunpack.c.l.s8.bf16 %v2383_v0  ;;  %v2775_v4 = vunpack.c.h.s8.bf16 %v2383_v0  ;;  %v2422_v0 = vld [vmem:[%s7880_s15 + $0x568] sm:$0xff] }
 0x516   : > { %3403 = vmatpush1.bf16.msra.mxu0 %v2701_v59  ;;  %v2390_v59 = vld [vmem:[%s7880_s15 + $0x468] sm:$0xff] }
 0x517   : > { %3567 = vmatpush1.bf16.msra.mxu1 %v2703_v60  ;;  %3404 = vmatprep.subr.bf16.mxu0 %v2710_v12  ;;  %v2776_v60 = vunpack.c.h.s8.bf16 %v2384_v52  ;;  %v2392_v12 = vld [vmem:[%s7880_s15 + $0x478] sm:$0xff]  ;;  %v2782_v6 = vunpack.c.l.s8.bf16 %v2390_v59 }
 0x518   : > { %3568 = vmatprep.subr.bf16.mxu1 %v2712_v3  ;;  %v2773_v3 = vunpack.c.h.s8.bf16 %v2381_v54  ;;  %v2792_v21 = vunpack.c.h.s8.bf16 %v2392_v12  ;;  %v2838_v54 = vunpack.c.h.s8.bf16 %v2414_v35 }
 0x51a   : > { %3405 = vmatpush1.bf16.msra.mxu0 %v2709_v8  ;;  %v2389_v8 = vld [vmem:[%s7880_s15 + $0x460] sm:$0xff] }
 0x51b   : > { %3569 = vmatpush1.bf16.msra.mxu1 %v2711_v13  ;;  %3406 = vmatprep.subr.bf16.mxu0 %v2718_v16  ;;  %v2784_v13 = vunpack.c.l.s8.bf16 %v2392_v12  ;;  %v2391_v16 = vld [vmem:[%s7880_s15 + $0x470] sm:$0xff]  ;;  %v2781_v15 = vunpack.c.l.s8.bf16 %v2389_v8 }
 0x51c   : > { %3570 = vmatprep.subr.bf16.mxu1 %v2720_v19  ;;  %v2790_v19 = vunpack.c.h.s8.bf16 %v2390_v59  ;;  %v2846_v59 = vunpack.c.l.s8.bf16 %v2422_v0 }
 0x51e   : > { %3407 = vmatpush1.bf16.msra.mxu0 %v2717_v14  ;;  %v2398_v14 = vld [vmem:[%s7880_s15 + $0x4a8] sm:$0xff] }
 0x51f   : > { %3571 = vmatpush1.bf16.msra.mxu1 %v2719_v27  ;;  %3408 = vmatprep.subr.bf16.mxu0 %v2726_v28  ;;  %v2400_v27 = vld [vmem:[%s7880_s15 + $0x4b8] sm:$0xff]  ;;  %v2789_v28 = vunpack.c.h.s8.bf16 %v2389_v8  ;;  %v2806_v9 = vunpack.c.h.s8.bf16 %v2398_v14  ;;  %v2854_v8 = vunpack.c.h.s8.bf16 %v2422_v0  ;;  %v2453_v0 = vld [vmem:[%s7880_s15 + $0x660] sm:$0xff] }
 0x520   : > { %3572 = vmatprep.subr.bf16.mxu1 %v2728_v31  ;;  %v2798_v31 = vunpack.c.l.s8.bf16 %v2398_v14  ;;  %v2800_v32 = vunpack.c.l.s8.bf16 %v2400_v27  ;;  %v2429_v14 = vld [vmem:[%s7880_s15 + $0x5a0] sm:$0xff] }
 0x522   : > { %3409 = vmatpush1.bf16.msra.mxu0 %v2725_v33  ;;  %v2399_v33 = vld [vmem:[%s7880_s15 + $0x4b0] sm:$0xff] }
 0x523   : > { %3573 = vmatpush1.bf16.msra.mxu1 %v2727_v26  ;;  %3410 = vmatprep.subr.bf16.mxu0 %v2734_v62  ;;  %v2797_v26 = vunpack.c.l.s8.bf16 %v2397_v38  ;;  %v2799_v62 = vunpack.c.l.s8.bf16 %v2399_v33 }
 0x524   : > { %3574 = vmatprep.subr.bf16.mxu1 %v2736_v46  ;;  %v2808_v46 = vunpack.c.h.s8.bf16 %v2400_v27 }
 0x526   : > { %3411 = vmatpush1.bf16.msra.mxu0 %v2733_v17  ;;  %v2408_v17 = vld [vmem:[%s7880_s15 + $0x4f8] sm:$0xff] }
 0x527   : > { %3575 = vmatpush1.bf16.msra.mxu1 %v2735_v20  ;;  %3412 = vmatprep.subr.bf16.mxu0 %v2742_v63  ;;  %v2805_v20 = vunpack.c.h.s8.bf16 %v2397_v38  ;;  %v2807_v63 = vunpack.c.h.s8.bf16 %v2399_v33  ;;  %v2816_v23 = vunpack.c.l.s8.bf16 %v2408_v17  ;;  %v2438_v33 = vld [vmem:[%s7880_s15 + $0x5e8] sm:$0xff] }
 0x528   : > { %3576 = vmatprep.subr.bf16.mxu1 %v2744_v37  ;;  %v2814_v37 = vunpack.c.l.s8.bf16 %v2406_v10  ;;  %v2437_v10 = vld [vmem:[%s7880_s15 + $0x5e0] sm:$0xff] }
 0x52a   : > { %3413 = vmatpush1.bf16.msra.mxu0 %v2741_v30  ;;  %v2407_v30 = vld [vmem:[%s7880_s15 + $0x4f0] sm:$0xff] }
 0x52b   : > { %3577 = vmatpush1.bf16.msra.mxu1 %v2743_v2  ;;  %3414 = vmatprep.subr.bf16.mxu0 %v2750_v39  ;;  %v2813_v2 = vunpack.c.l.s8.bf16 %v2405_v40  ;;  %v2815_v39 = vunpack.c.l.s8.bf16 %v2407_v30 }
 0x52c   : > { %3578 = vmatprep.subr.bf16.mxu1 %v2752_v45  ;;  %v2824_v45 = vunpack.c.h.s8.bf16 %v2408_v17 }
 0x52e   : > { %3415 = vmatpush1.bf16.msra.mxu0 %v2749_v36  ;;  %v2416_v36 = vld [vmem:[%s7880_s15 + $0x538] sm:$0xff] }
 0x52f   : > { %3579 = vmatpush1.bf16.msra.mxu1 %v2751_v47  ;;  %3416 = vmatprep.subr.bf16.mxu0 %v2758_v48  ;;  %v2821_v47 = vunpack.c.h.s8.bf16 %v2405_v40  ;;  %v2823_v48 = vunpack.c.h.s8.bf16 %v2407_v30  ;;  %v2832_v52 = vunpack.c.l.s8.bf16 %v2416_v36  ;;  %v2886_v40 = vunpack.c.h.s8.bf16 %v2438_v33  ;;  %v2446_v30 = vld [vmem:[%s7880_s15 + $0x628] sm:$0xff] }
 0x530   : > { %3580 = vmatprep.subr.bf16.mxu1 %v2760_v49  ;;  %v2830_v49 = vunpack.c.l.s8.bf16 %v2414_v35  ;;  %v2445_v35 = vld [vmem:[%s7880_s15 + $0x620] sm:$0xff] }
 0x532   : > { %3417 = vmatpush1.bf16.msra.mxu0 %v2757_v34  ;;  %v2415_v34 = vld [vmem:[%s7880_s15 + $0x530] sm:$0xff] }
 0x533   : > { %3581 = vmatpush1.bf16.msra.mxu1 %v2759_v7  ;;  %3427 = vmatprep.subr.bf16.mxu0 %v2766_v29  ;;  %v2829_v7 = vunpack.c.l.s8.bf16 %v2413_v51  ;;  %v2831_v29 = vunpack.c.l.s8.bf16 %v2415_v34 }
 0x534   : > { %3591 = vmatprep.subr.bf16.mxu1 %v2768_v55  ;;  %v2840_v55 = vunpack.c.h.s8.bf16 %v2416_v36 }
 0x535   : > { %3419 = vmatmul.mubr.bf16.vlgmr.msra.gmra.mrb[12].mxu0 %v8296_v50 }
 0x536   : > { %3583 = vmatmul.mubr.bf16.vlgmr.msra.gmra.mrb[12].mxu1 %v8296_v50  ;;  %3428 = vmatpush1.bf16.msra.mxu0 %v2765_v22  ;;  %v2783_v50 = vunpack.c.l.s8.bf16 %v2391_v16  ;;  %v2424_v22 = vld [vmem:[%s7880_s15 + $0x578] sm:$0xff] }
 0x537   : > { %3459 = vmatprep.mubr.bf16.mxu0 %v8294_v56  ;;  %3592 = vmatpush1.bf16.msra.mxu1 %v2767_v57  ;;  %v2837_v57 = vunpack.c.h.s8.bf16 %v2413_v51  ;;  %v2848_v12 = vunpack.c.l.s8.bf16 %v2424_v22  ;;  %v2902_v51 = vunpack.c.h.s8.bf16 %v2446_v30 }
 0x538   : > { %3623 = vmatprep.mubr.bf16.mxu1 %v8294_v56  ;;  %3429 = vmatprep.subr.bf16.mxu0 %v2774_v53  ;;  %v2791_v56 = vunpack.c.h.s8.bf16 %v2391_v16  ;;  %v2839_v53 = vunpack.c.h.s8.bf16 %v2415_v34  ;;  %v2430_v16 = vld [vmem:[%s7880_s15 + $0x5a8] sm:$0xff] }
 0x539   : > { %3593 = vmatprep.subr.bf16.mxu1 %v2776_v60  ;;  %v2421_v60 = vld [vmem:[%s7880_s15 + $0x560] sm:$0xff]  ;;  %v2870_v38 = vunpack.c.h.s8.bf16 %v2430_v16 }
 0x53a   : > { %3430 = vmatpush1.bf16.msra.mxu0 %v2773_v3  ;;  %v2423_v3 = vld [vmem:[%s7880_s15 + $0x570] sm:$0xff] }
 0x53b   : > { %3594 = vmatpush1.bf16.msra.mxu1 %v2775_v4  ;;  %3431 = vmatprep.subr.bf16.mxu0 %v2782_v6  ;;  %v2845_v4 = vunpack.c.l.s8.bf16 %v2421_v60  ;;  %v2847_v6 = vunpack.c.l.s8.bf16 %v2423_v3 }
 0x53c   : > { %3595 = vmatprep.subr.bf16.mxu1 %v2784_v13  ;;  %v2856_v13 = vunpack.c.h.s8.bf16 %v2424_v22 }
 0x53e   : > { %3432 = vmatpush1.bf16.msra.mxu0 %v2781_v15  ;;  %v2432_v15 = vld [vmem:[%s7880_s15 + $0x5b8] sm:$0xff] }
 0x53f   : > { %3596 = vmatpush1.bf16.msra.mxu1 %v2783_v50  ;;  %3433 = vmatprep.subr.bf16.mxu0 %v2790_v19  ;;  %v2853_v50 = vunpack.c.h.s8.bf16 %v2421_v60  ;;  %v2855_v19 = vunpack.c.h.s8.bf16 %v2423_v3  ;;  %v2864_v27 = vunpack.c.l.s8.bf16 %v2432_v15  ;;  %v2464_v3 = vld [vmem:[%s7880_s15 + $0x6b8] sm:$0xff] }
 0x540   : > { %3597 = vmatprep.subr.bf16.mxu1 %v2792_v21  ;;  %v2862_v21 = vunpack.c.l.s8.bf16 %v2430_v16  ;;  %v2463_v16 = vld [vmem:[%s7880_s15 + $0x6b0] sm:$0xff] }
 0x542   : > { %3434 = vmatpush1.bf16.msra.mxu0 %v2789_v28  ;;  %v2431_v28 = vld [vmem:[%s7880_s15 + $0x5b0] sm:$0xff] }
 0x543   : > { %3598 = vmatpush1.bf16.msra.mxu1 %v2791_v56  ;;  %3435 = vmatprep.subr.bf16.mxu0 %v2798_v31  ;;  %v2861_v56 = vunpack.c.l.s8.bf16 %v2429_v14  ;;  %v2863_v31 = vunpack.c.l.s8.bf16 %v2431_v28 }
 0x544   : > { %3599 = vmatprep.subr.bf16.mxu1 %v2800_v32  ;;  %v2872_v32 = vunpack.c.h.s8.bf16 %v2432_v15 }
 0x546   : > { %3436 = vmatpush1.bf16.msra.mxu0 %v2797_v26  ;;  %v2440_v26 = vld [vmem:[%s7880_s15 + $0x5f8] sm:$0xff] }
 0x547   : > { %3600 = vmatpush1.bf16.msra.mxu1 %v2799_v62  ;;  %3437 = vmatprep.subr.bf16.mxu0 %v2806_v9  ;;  %v2869_v62 = vunpack.c.h.s8.bf16 %v2429_v14  ;;  %v2871_v9 = vunpack.c.h.s8.bf16 %v2431_v28  ;;  %v2880_v17 = vunpack.c.l.s8.bf16 %v2440_v26  ;;  %v2470_v14 = vld [vmem:[%s7880_s15 + $0x6e8] sm:$0xff] }
 0x548   : > { %3601 = vmatprep.subr.bf16.mxu1 %v2808_v46  ;;  %v2878_v46 = vunpack.c.l.s8.bf16 %v2438_v33 }
 0x54a   : > { %3438 = vmatpush1.bf16.msra.mxu0 %v2805_v20  ;;  %v2439_v20 = vld [vmem:[%s7880_s15 + $0x5f0] sm:$0xff] }
 0x54b   : > { %3602 = vmatpush1.bf16.msra.mxu1 %v2807_v63  ;;  %3439 = vmatprep.subr.bf16.mxu0 %v2814_v37  ;;  %v2877_v63 = vunpack.c.l.s8.bf16 %v2437_v10  ;;  %v2879_v37 = vunpack.c.l.s8.bf16 %v2439_v20 }
 0x54c   : > { %3603 = vmatprep.subr.bf16.mxu1 %v2816_v23  ;;  %v2888_v23 = vunpack.c.h.s8.bf16 %v2440_v26  ;;  %v2471_v26 = vld [vmem:[%s7880_s15 + $0x6f0] sm:$0xff] }
 0x54e   : > { %3440 = vmatpush1.bf16.msra.mxu0 %v2813_v2  ;;  %v2448_v2 = vld [vmem:[%s7880_s15 + $0x638] sm:$0xff] }
 0x54f   : > { %3604 = vmatpush1.bf16.msra.mxu1 %v2815_v39  ;;  %3441 = vmatprep.subr.bf16.mxu0 %v2822_v25  ;;  %v2885_v39 = vunpack.c.h.s8.bf16 %v2437_v10  ;;  %v2887_v25 = vunpack.c.h.s8.bf16 %v2439_v20  ;;  %v2896_v36 = vunpack.c.l.s8.bf16 %v2448_v2  ;;  %v2904_v34 = vunpack.c.h.s8.bf16 %v2448_v2  ;;  %v2478_v2 = vld [vmem:[%s7880_s15 + $0x728] sm:$0xff] }
 0x550   : > { %3605 = vmatprep.subr.bf16.mxu1 %v2824_v45  ;;  %v2894_v45 = vunpack.c.l.s8.bf16 %v2446_v30 }
 0x552   : > { %3442 = vmatpush1.bf16.msra.mxu0 %v2821_v47  ;;  %v2447_v47 = vld [vmem:[%s7880_s15 + $0x630] sm:$0xff] }
 0x553   : > { %3606 = vmatpush1.bf16.msra.mxu1 %v2823_v48  ;;  %3443 = vmatprep.subr.bf16.mxu0 %v2830_v49  ;;  %v2893_v48 = vunpack.c.l.s8.bf16 %v2445_v35  ;;  %v2895_v49 = vunpack.c.l.s8.bf16 %v2447_v47 }
 0x554   : > { %3607 = vmatprep.subr.bf16.mxu1 %v2832_v52  ;;  %v2454_v52 = vld [vmem:[%s7880_s15 + $0x668] sm:$0xff] }
 0x556   : > { %3444 = vmatpush1.bf16.msra.mxu0 %v2829_v7  ;;  %v2456_v7 = vld [vmem:[%s7880_s15 + $0x678] sm:$0xff] }
 0x557   : > { %3608 = vmatpush1.bf16.msra.mxu1 %v2831_v29  ;;  %3445 = vmatprep.subr.bf16.mxu0 %v2838_v54  ;;  %v2901_v29 = vunpack.c.h.s8.bf16 %v2445_v35  ;;  %v2903_v54 = vunpack.c.h.s8.bf16 %v2447_v47  ;;  %v2912_v22 = vunpack.c.l.s8.bf16 %v2456_v7  ;;  %v2920_v60 = vunpack.c.h.s8.bf16 %v2456_v7  ;;  %v2486_v7 = vld [vmem:[%s7880_s15 + $0x768] sm:$0xff] }
 0x558   : > { %3609 = vmatprep.subr.bf16.mxu1 %v2840_v55  ;;  %v2910_v55 = vunpack.c.l.s8.bf16 %v2454_v52  ;;  %v2958_v35 = vunpack.c.l.s8.bf16 %v2478_v2 }
 0x55a   : > { %3446 = vmatpush1.bf16.msra.mxu0 %v2837_v57  ;;  %v2455_v57 = vld [vmem:[%s7880_s15 + $0x670] sm:$0xff] }
 0x55b   : > { %3610 = vmatpush1.bf16.msra.mxu1 %v2839_v53  ;;  %3447 = vmatprep.subr.bf16.mxu0 %v2846_v59  ;;  %v2909_v53 = vunpack.c.l.s8.bf16 %v2453_v0  ;;  %v2918_v59 = vunpack.c.h.s8.bf16 %v2454_v52  ;;  %v2966_v52 = vunpack.c.h.s8.bf16 %v2478_v2 }
 0x55c   : > { %3611 = vmatprep.subr.bf16.mxu1 %v2848_v12  ;;  %v2462_v12 = vld [vmem:[%s7880_s15 + $0x6a8] sm:$0xff] }
 0x55e   : > { %3448 = vmatpush1.bf16.msra.mxu0 %v2845_v4  ;;  %v2917_v4 = vunpack.c.h.s8.bf16 %v2453_v0  ;;  %v2974_v0 = vunpack.c.l.s8.bf16 %v2486_v7 }
 0x55f   : > { %3612 = vmatpush1.bf16.msra.mxu1 %v2847_v6  ;;  %3449 = vmatprep.subr.bf16.mxu0 %v2854_v8  ;;  %v2926_v6 = vunpack.c.l.s8.bf16 %v2462_v12  ;;  %v2461_v8 = vld [vmem:[%s7880_s15 + $0x6a0] sm:$0xff] }
 0x560   : > { %3613 = vmatprep.subr.bf16.mxu1 %v2856_v13  ;;  %v2928_v13 = vunpack.c.l.s8.bf16 %v2464_v3  ;;  %v2925_v15 = vunpack.c.l.s8.bf16 %v2461_v8  ;;  %v2933_v28 = vunpack.c.h.s8.bf16 %v2461_v8 }
 0x562   : > { %3450 = vmatpush1.bf16.msra.mxu0 %v2853_v50  ;;  %v2927_v50 = vunpack.c.l.s8.bf16 %v2463_v16 }
 0x563   : > { %3614 = vmatpush1.bf16.msra.mxu1 %v2855_v19  ;;  %3451 = vmatprep.subr.bf16.mxu0 %v2862_v21  ;;  %v2934_v19 = vunpack.c.h.s8.bf16 %v2462_v12  ;;  %v2936_v21 = vunpack.c.h.s8.bf16 %v2464_v3  ;;  %v2494_v3 = vld [vmem:[%s7880_s15 + $0x7a8] sm:$0xff] }
 0x564   : > { %3615 = vmatprep.subr.bf16.mxu1 %v2864_v27  ;;  %v2472_v27 = vld [vmem:[%s7880_s15 + $0x6f8] sm:$0xff]  ;;  %v2990_v8 = vunpack.c.l.s8.bf16 %v2494_v3 }
 0x565   : > { %v2944_v33 = vunpack.c.l.s8.bf16 %v2472_v27  ;;  %v2952_v30 = vunpack.c.h.s8.bf16 %v2472_v27 }
 0x566   : > { %3452 = vmatpush1.bf16.msra.mxu0 %v2861_v56  ;;  %v2935_v56 = vunpack.c.h.s8.bf16 %v2463_v16 }
 0x567   : > { %3616 = vmatpush1.bf16.msra.mxu1 %v2863_v31  ;;  %3453 = vmatprep.subr.bf16.mxu0 %v2870_v38  ;;  %v2942_v31 = vunpack.c.l.s8.bf16 %v2470_v14  ;;  %v2469_v38 = vld [vmem:[%s7880_s15 + $0x6e0] sm:$0xff] }
 0x568   : > { %3617 = vmatprep.subr.bf16.mxu1 %v2872_v32 }
 0x56a   : > { %3454 = vmatpush1.bf16.msra.mxu0 %v2869_v62 }
 0x56b   : > { %3618 = vmatpush1.bf16.msra.mxu1 %v2871_v9  ;;  %3455 = vmatprep.subr.bf16.mxu0 %v2878_v46 }
 0x56c   : > { %3619 = vmatprep.subr.bf16.mxu1 %v2880_v17  ;;  %v2941_v17 = vunpack.c.l.s8.bf16 %v2469_v38 }
 0x56e   : > { %3456 = vmatpush1.bf16.msra.mxu0 %v2877_v63 }
 0x56f   : > { %3620 = vmatpush1.bf16.msra.mxu1 %v2879_v37  ;;  %3457 = vmatprep.subr.bf16.mxu0 %v2886_v40  ;;  %v2943_v37 = vunpack.c.l.s8.bf16 %v2471_v26  ;;  %v2950_v40 = vunpack.c.h.s8.bf16 %v2470_v14  ;;  %v2998_v14 = vunpack.c.h.s8.bf16 %v2494_v3 }
 0x570   : > { %3621 = vmatprep.subr.bf16.mxu1 %v2888_v23 }
 0x572   : > { %3458 = vmatpush1.bf16.msra.mxu0 %v2885_v39  ;;  %v2480_v39 = vld [vmem:[%s7880_s15 + $0x738] sm:$0xff] }
 0x573   : > { %3622 = vmatpush1.bf16.msra.mxu1 %v2887_v25  ;;  %3468 = vmatprep.subr.bf16.mxu0 %v2894_v45  ;;  %v2949_v25 = vunpack.c.h.s8.bf16 %v2469_v38  ;;  %v2951_v45 = vunpack.c.h.s8.bf16 %v2471_v26  ;;  %v2960_v47 = vunpack.c.l.s8.bf16 %v2480_v39  ;;  %v8556_v38 = vld [vmem:[%s785_s13] sm:$0xff] }
 0x574   : > { %3632 = vmatprep.subr.bf16.mxu1 %v2896_v36  ;;  %v2477_v36 = vld [vmem:[%s7880_s15 + $0x720] sm:$0xff] }
 0x575   : > { %3460 = vmatmul.mubr.bf16.vlgmr.msra.gmra.mrb[12].mxu0 %v8350_v58 }
 0x576   : > { %3624 = vmatmul.mubr.bf16.vlgmr.msra.gmra.mrb[12].mxu1 %v8350_v58  ;;  %3469 = vmatpush1.bf16.msra.mxu0 %v2893_v48  ;;  %v2911_v58 = vunpack.c.l.s8.bf16 %v2455_v57  ;;  %v2479_v48 = vld [vmem:[%s7880_s15 + $0x730] sm:$0xff] }
 0x577   : > { %3500 = vmatprep.mubr.bf16.mxu0 %v8353_v61  ;;  %3633 = vmatpush1.bf16.msra.mxu1 %v2895_v49  ;;  %v2957_v49 = vunpack.c.l.s8.bf16 %v2477_v36 }
 0x578   : > { %3664 = vmatprep.mubr.bf16.mxu1 %v8353_v61  ;;  %3470 = vmatprep.subr.bf16.mxu0 %v2902_v51  ;;  %v2919_v61 = vunpack.c.h.s8.bf16 %v2455_v57  ;;  %v2959_v51 = vunpack.c.l.s8.bf16 %v2479_v48 }
 0x579   : > { %3634 = vmatprep.subr.bf16.mxu1 %v2904_v34  ;;  %v2968_v34 = vunpack.c.h.s8.bf16 %v2480_v39 }
 0x57a   : > { %3471 = vmatpush1.bf16.msra.mxu0 %v2901_v29  ;;  %v2488_v29 = vld [vmem:[%s7880_s15 + $0x778] sm:$0xff] }
 0x57b   : > { %3635 = vmatpush1.bf16.msra.mxu1 %v2903_v54  ;;  %3472 = vmatprep.subr.bf16.mxu0 %v2910_v55  ;;  %v2965_v54 = vunpack.c.h.s8.bf16 %v2477_v36  ;;  %v2967_v55 = vunpack.c.h.s8.bf16 %v2479_v48  ;;  %v2976_v57 = vunpack.c.l.s8.bf16 %v2488_v29  ;;  %v2984_v12 = vunpack.c.h.s8.bf16 %v2488_v29  ;;  %v3789_v48 = vld [vmem:[%s7890_s6] sm:$0xff] }
 0x57c   : > { %3636 = vmatprep.subr.bf16.mxu1 %v2912_v22  ;;  %v2485_v22 = vld [vmem:[%s7880_s15 + $0x760] sm:$0xff] }
 0x57e   : > { %3473 = vmatpush1.bf16.msra.mxu0 %v2909_v53  ;;  %v2487_v53 = vld [vmem:[%s7880_s15 + $0x770] sm:$0xff] }
 0x57f   : > { %3637 = vmatpush1.bf16.msra.mxu1 %v2911_v58  ;;  %3474 = vmatprep.subr.bf16.mxu0 %v2918_v59  ;;  %v2973_v58 = vunpack.c.l.s8.bf16 %v2485_v22  ;;  %v2975_v59 = vunpack.c.l.s8.bf16 %v2487_v53 }
 0x580   : > { %3638 = vmatprep.subr.bf16.mxu1 %v2920_v60  ;;  %v2982_v60 = vunpack.c.h.s8.bf16 %v2486_v7 }
 0x582   : > { %3475 = vmatpush1.bf16.msra.mxu0 %v2917_v4  ;;  %v2496_v4 = vld [vmem:[%s7880_s15 + $0x7b8] sm:$0xff] }
 0x583   : > { %3639 = vmatpush1.bf16.msra.mxu1 %v2919_v61  ;;  %3476 = vmatprep.subr.bf16.mxu0 %v2926_v6  ;;  %v2981_v61 = vunpack.c.h.s8.bf16 %v2485_v22  ;;  %v2983_v6 = vunpack.c.h.s8.bf16 %v2487_v53  ;;  %v2992_v16 = vunpack.c.l.s8.bf16 %v2496_v4  ;;  %v3000_v27 = vunpack.c.h.s8.bf16 %v2496_v4  ;;  %v3800_v22 = vld [vmem:[%s7890_s6 + $0x58] sm:$0xff] }
 0x584   : > { %3640 = vmatprep.subr.bf16.mxu1 %v2928_v13  ;;  %v2493_v13 = vld [vmem:[%s7880_s15 + $0x7a0] sm:$0xff] }
 0x586   : > { %3477 = vmatpush1.bf16.msra.mxu0 %v2925_v15  ;;  %v2495_v15 = vld [vmem:[%s7880_s15 + $0x7b0] sm:$0xff] }
 0x587   : > { %3641 = vmatpush1.bf16.msra.mxu1 %v2927_v50  ;;  %3478 = vmatprep.subr.bf16.mxu0 %v2934_v19  ;;  %v8548_v50 = vld [vmem:[%s776_s8] sm:$0xff]  ;;  %v2989_v19 = vunpack.c.l.s8.bf16 %v2493_v13  ;;  %v2999_v26 = vunpack.c.h.s8.bf16 %v2495_v15 }
 0x588   : > { %v8525_v32 = vpop.f32.mrb[8].mxu0  ;;  %3642 = vmatprep.subr.bf16.mxu1 %v2936_v21  ;;  %v2991_v21 = vunpack.c.l.s8.bf16 %v2495_v15 }
 0x589   : > { %v8528_v62 = vpop.f32.mrb[8].mxu1  ;;  %v8530_v9 = vpop.f32.mrb[9].mxu0 }
 0x58a   : > { %v8532_v46 = vpop.f32.mrb[9].mxu1  ;;  %v3178_v10 = vpop.f32.mrb[10].mxu0  ;;  %3479 = vmatpush1.bf16.msra.mxu0 %v2933_v28  ;;  %v2502_v28 = vld [vmem:[%s7880_s15 + $0x7e8] sm:$0xff] }
 0x58b   : > { %v3342_v20 = vpop.f32.mrb[10].mxu1  ;;  %3643 = vmatpush1.bf16.msra.mxu1 %v2935_v56  ;;  %v3179_v63 = vpop.f32.mrb[11].mxu0  ;;  %3480 = vmatprep.subr.bf16.mxu0 %v2942_v31  ;;  %v3682_v56 = vrot.slane %v8548_v50, %v7963_v43  ;;  %v2504_v31 = vld [vmem:[%s7880_s15 + $0x7f8] sm:$0xff]  ;;  %v3006_v10 = vunpack.c.l.s8.bf16 %v2502_v28  ;;  %v3014_v2 = vunpack.c.h.s8.bf16 %v2502_v28 }
 0x58c   : > { %v3343_v23 = vpop.f32.mrb[11].mxu1  ;;  %3644 = vmatprep.subr.bf16.mxu1 %v2944_v33  ;;  %v2997_v33 = vunpack.c.h.s8.bf16 %v2493_v13  ;;  %v3008_v20 = vunpack.c.l.s8.bf16 %v2504_v31  ;;  %v2503_v63 = vld [vmem:[%s7880_s15 + $0x7f0] sm:$0xff]  ;;  %v3016_v39 = vunpack.c.h.s8.bf16 %v2504_v31 }
 0x58e   : > { %3481 = vmatpush1.bf16.msra.mxu0 %v2941_v17  ;;  %v2501_v17 = vld [vmem:[%s7880_s15 + $0x7e0] sm:$0xff] }
 0x58f   : > { %3645 = vmatpush1.bf16.msra.mxu1 %v2943_v37  ;;  %3482 = vmatprep.subr.bf16.mxu0 %v2950_v40  ;;  %v3716_v37 = vmul.f32 %v3682_v56, %v8530_v9  ;;  %v3732_v40 = vrot.slane %v8556_v38, %v7963_v43  ;;  %v3005_v23 = vunpack.c.l.s8.bf16 %v2501_v17  ;;  %v3013_v36 = vunpack.c.h.s8.bf16 %v2501_v17 }
 0x590   : > { %3646 = vmatprep.subr.bf16.mxu1 %v2952_v30  ;;  %v3007_v30 = vunpack.c.l.s8.bf16 %v2503_v63  ;;  %v3015_v9 = vunpack.c.h.s8.bf16 %v2503_v63  ;;  %v3813_v63 = vld [vmem:[%s7890_s6 + $0xc0] sm:$0xff] }
 0x592   : > { %3483 = vmatpush1.bf16.msra.mxu0 %v2949_v25  ;;  %v3790_v25 = vld [vmem:[%s7890_s6 + $0x8] sm:$0xff] }
 0x593   : > { %3647 = vmatpush1.bf16.msra.mxu1 %v2951_v45  ;;  %3484 = vmatprep.subr.bf16.mxu0 %v2958_v35  ;;  %v3766_v45 = vadd.f32 %v3732_v40, %v3716_v37  ;;  %v3792_v35 = vld [vmem:[%s7890_s6 + $0x18] sm:$0xff]  ;;  %v4054_v29 = vunpack.c.h.s8.bf16 %v3790_v25  ;;  %v3815_v40 = vld [vmem:[%s7890_s6 + $0xd0] sm:$0xff] }
 0x594   : > { %3648 = vmatprep.subr.bf16.mxu1 %v2960_v47  ;;  %v4046_v47 = vunpack.c.l.s8.bf16 %v3790_v25  ;;  %v3822_v25 = vld [vmem:[%s7890_s6 + $0x108] sm:$0xff] }
 0x596   : > { %3485 = vmatpush1.bf16.msra.mxu0 %v2957_v49  ;;  %v4048_v49 = vunpack.c.l.s8.bf16 %v3792_v35 }
 0x597   : > { %3649 = vmatpush1.bf16.msra.mxu1 %v2959_v51  ;;  %3486 = vmatprep.subr.bf16.mxu0 %v2966_v52  ;;  %v3791_v51 = vld [vmem:[%s7890_s6 + $0x10] sm:$0xff]  ;;  %v3774_v52 = vmax.f32 %v3766_v45, 0.0  ;;  %v3824_v45 = vld [vmem:[%s7890_s6 + $0x118] sm:$0xff] }
 0x598   : > { %3650 = vmatprep.subr.bf16.mxu1 %v2968_v34  ;;  %v4045_v34 = vunpack.c.l.s8.bf16 %v3789_v48  ;;  %v4047_v7 = vunpack.c.l.s8.bf16 %v3791_v51  ;;  %v4055_v53 = vunpack.c.h.s8.bf16 %v3791_v51 }
 0x59a   : > { %3487 = vmatpush1.bf16.msra.mxu0 %v2965_v54  ;;  %v3798_v54 = vld [vmem:[%s7890_s6 + $0x48] sm:$0xff] }
 0x59b   : > { %3651 = vmatpush1.bf16.msra.mxu1 %v2967_v55  ;;  %3488 = vmatprep.subr.bf16.mxu0 %v2974_v0  ;;  %v8568_v55 = vpack.c.bf16 %v3774_v52, %v3774_v52  ;;  %v4056_v0 = vunpack.c.h.s8.bf16 %v3792_v35  ;;  %v4070_v4 = vunpack.c.h.s8.bf16 %v3798_v54  ;;  %v4101_v35 = vunpack.c.h.s8.bf16 %v3813_v63 }
 0x59c   : > { %3652 = vmatprep.subr.bf16.mxu1 %v2976_v57  ;;  %v4053_v57 = vunpack.c.h.s8.bf16 %v3789_v48  ;;  %v4112_v48 = vunpack.c.l.s8.bf16 %v3824_v45 }
 0x59e   : > { %3489 = vmatpush1.bf16.msra.mxu0 %v2973_v58  ;;  %v4062_v58 = vunpack.c.l.s8.bf16 %v3798_v54  ;;  %v3832_v54 = vld [vmem:[%s7890_s6 + $0x158] sm:$0xff] }
 0x59f   : > { %3653 = vmatpush1.bf16.msra.mxu1 %v2975_v59  ;;  %3490 = vmatprep.subr.bf16.mxu0 %v2982_v60  ;;  %v3797_v59 = vld [vmem:[%s7890_s6 + $0x40] sm:$0xff]  ;;  %v4064_v60 = vunpack.c.l.s8.bf16 %v3800_v22 }
 0x5a0   : > { %3654 = vmatprep.subr.bf16.mxu1 %v2984_v12  ;;  %v3799_v12 = vld [vmem:[%s7890_s6 + $0x50] sm:$0xff]  ;;  %v4061_v3 = vunpack.c.l.s8.bf16 %v3797_v59  ;;  %v4069_v13 = vunpack.c.h.s8.bf16 %v3797_v59 }
 0x5a1   : > { %v3831_v59 = vld [vmem:[%s7890_s6 + $0x150] sm:$0xff] }
 0x5a2   : > { %3491 = vmatpush1.bf16.msra.mxu0 %v2981_v61  ;;  %v4072_v61 = vunpack.c.h.s8.bf16 %v3800_v22 }
 0x5a3   : > { %3655 = vmatpush1.bf16.msra.mxu1 %v2983_v6  ;;  %3492 = vmatprep.subr.bf16.mxu0 %v2990_v8  ;;  %v3806_v6 = vld [vmem:[%s7890_s6 + $0x88] sm:$0xff]  ;;  %v3808_v8 = vld [vmem:[%s7890_s6 + $0x98] sm:$0xff] }
 0x5a4   : > { %3656 = vmatprep.subr.bf16.mxu1 %v2992_v16  ;;  %v4071_v16 = vunpack.c.h.s8.bf16 %v3799_v12  ;;  %v4078_v15 = vunpack.c.l.s8.bf16 %v3806_v6  ;;  %v4086_v56 = vunpack.c.h.s8.bf16 %v3806_v6  ;;  %v4088_v31 = vunpack.c.h.s8.bf16 %v3808_v8 }
 0x5a6   : > { %3493 = vmatpush1.bf16.msra.mxu0 %v2989_v19  ;;  %v3805_v19 = vld [vmem:[%s7890_s6 + $0x80] sm:$0xff] }
 0x5a7   : > { %3657 = vmatpush1.bf16.msra.mxu1 %v2991_v21  ;;  %3494 = vmatprep.subr.bf16.mxu0 %v2998_v14  ;;  %v4080_v21 = vunpack.c.l.s8.bf16 %v3808_v8  ;;  %v3807_v14 = vld [vmem:[%s7890_s6 + $0x90] sm:$0xff]  ;;  %v4135_v8 = vunpack.c.h.s8.bf16 %v3831_v59 }
 0x5a8   : > { %3658 = vmatprep.subr.bf16.mxu1 %v3000_v27  ;;  %v4077_v27 = vunpack.c.l.s8.bf16 %v3805_v19  ;;  %v4079_v28 = vunpack.c.l.s8.bf16 %v3807_v14  ;;  %v4087_v17 = vunpack.c.h.s8.bf16 %v3807_v14  ;;  %v3678_v14 = vrot.slane %v8548_v50, %v7957_v41 }
 0x5aa   : > { %3495 = vmatpush1.bf16.msra.mxu0 %v2997_v33  ;;  %v3814_v33 = vld [vmem:[%s7890_s6 + $0xc8] sm:$0xff] }
 0x5ab   : > { %3659 = vmatpush1.bf16.msra.mxu1 %v2999_v26  ;;  %3496 = vmatprep.subr.bf16.mxu0 %v3006_v10  ;;  %v3816_v26 = vld [vmem:[%s7890_s6 + $0xd8] sm:$0xff]  ;;  %v4085_v10 = vunpack.c.h.s8.bf16 %v3805_v19  ;;  %v3839_v19 = vld [vmem:[%s7890_s6 + $0x190] sm:$0xff] }
 0x5ac   : > { %3660 = vmatprep.subr.bf16.mxu1 %v3008_v20  ;;  %v4094_v20 = vunpack.c.l.s8.bf16 %v3814_v33  ;;  %v4096_v37 = vunpack.c.l.s8.bf16 %v3816_v26 }
 0x5ae   : > { %3497 = vmatpush1.bf16.msra.mxu0 %v3005_v23  ;;  %v4093_v23 = vunpack.c.l.s8.bf16 %v3813_v63  ;;  %v4151_v63 = vunpack.c.h.s8.bf16 %v3839_v19 }
 0x5af   : > { %3661 = vmatpush1.bf16.msra.mxu1 %v3007_v30  ;;  %3498 = vmatprep.subr.bf16.mxu0 %v3014_v2  ;;  %v4095_v30 = vunpack.c.l.s8.bf16 %v3815_v40  ;;  %v4102_v2 = vunpack.c.h.s8.bf16 %v3814_v33  ;;  %v3690_v33 = vrot.slane %v8548_v50, %v7966_v44 }
 0x5b0   : > { %3662 = vmatprep.subr.bf16.mxu1 %v3016_v39  ;;  %v4104_v39 = vunpack.c.h.s8.bf16 %v3816_v26  ;;  %v3848_v26 = vld [vmem:[%s7890_s6 + $0x1d8] sm:$0xff] }
 0x5b2   : > { %3499 = vmatpush1.bf16.msra.mxu0 %v3013_v36  ;;  %v4103_v36 = vunpack.c.h.s8.bf16 %v3815_v40  ;;  %v3845_v40 = vld [vmem:[%s7890_s6 + $0x1c0] sm:$0xff] }
 0x5b3   : > { %3663 = vmatpush1.bf16.msra.mxu1 %v3015_v9  ;;  %4557 = vmatprep.subr.bf16.mxu0 %v4046_v47  ;;  %v4110_v9 = vunpack.c.l.s8.bf16 %v3822_v25  ;;  %v3821_v47 = vld [vmem:[%s7890_s6 + $0x100] sm:$0xff] }
 0x5b4   : > { %4721 = vmatprep.subr.bf16.mxu1 %v4048_v49  ;;  %v3823_v49 = vld [vmem:[%s7890_s6 + $0x110] sm:$0xff]  ;;  %v4109_v51 = vunpack.c.l.s8.bf16 %v3821_v47 }
 0x5b5   : > { %3501 = vmatmul.mubr.bf16.vlgmr.msra.gmra.mrb[12].mxu0 %v8400_v5  ;;  %v4111_v52 = vunpack.c.l.s8.bf16 %v3823_v49  ;;  %v4119_v22 = vunpack.c.h.s8.bf16 %v3823_v49  ;;  %v4165_v49 = vunpack.c.h.s8.bf16 %v3845_v40 }
 0x5b6   : > { %3665 = vmatmul.mubr.bf16.vlgmr.msra.gmra.mrb[12].mxu1 %v8400_v5  ;;  %4558 = vmatpush1.bf16.msra.mxu0 %v4045_v34  ;;  %v4063_v5 = vunpack.c.l.s8.bf16 %v3799_v12  ;;  %v4118_v34 = vunpack.c.h.s8.bf16 %v3822_v25  ;;  %v4127_v12 = vunpack.c.l.s8.bf16 %v3831_v59 }
 0x5b7   : > { %4589 = vmatprep.mubr.bf16.mxu0 %v8568_v55  ;;  %4722 = vmatpush1.bf16.msra.mxu1 %v4047_v7  ;;  %v4120_v7 = vunpack.c.h.s8.bf16 %v3824_v45 }
 0x5b8   : > { %4753 = vmatprep.mubr.bf16.mxu1 %v8568_v55  ;;  %4559 = vmatprep.subr.bf16.mxu0 %v4054_v29  ;;  %v3830_v29 = vld [vmem:[%s7890_s6 + $0x148] sm:$0xff] }
 0x5b9   : > { %4723 = vmatprep.subr.bf16.mxu1 %v4056_v0  ;;  %v4117_v0 = vunpack.c.h.s8.bf16 %v3821_v47 }
 0x5ba   : > { %4560 = vmatpush1.bf16.msra.mxu0 %v4053_v57  ;;  %v4126_v57 = vunpack.c.l.s8.bf16 %v3830_v29 }
 0x5bb   : > { %4724 = vmatpush1.bf16.msra.mxu1 %v4055_v53  ;;  %4561 = vmatprep.subr.bf16.mxu0 %v4062_v58  ;;  %v3829_v53 = vld [vmem:[%s7890_s6 + $0x140] sm:$0xff]  ;;  %v4128_v58 = vunpack.c.l.s8.bf16 %v3832_v54 }
 0x5bc   : > { %4725 = vmatprep.subr.bf16.mxu1 %v4064_v60  ;;  %v4125_v60 = vunpack.c.l.s8.bf16 %v3829_v53  ;;  %v4133_v6 = vunpack.c.h.s8.bf16 %v3829_v53 }
 0x5be   : > { %4562 = vmatpush1.bf16.msra.mxu0 %v4061_v3  ;;  %v4134_v3 = vunpack.c.h.s8.bf16 %v3830_v29  ;;  %v3855_v29 = vld [vmem:[%s7890_s6 + $0x210] sm:$0xff] }
 0x5bf   : > { %4726 = vmatpush1.bf16.msra.mxu1 %v4063_v5  ;;  %4563 = vmatprep.subr.bf16.mxu0 %v4070_v4  ;;  %v4136_v5 = vunpack.c.h.s8.bf16 %v3832_v54  ;;  %v3838_v4 = vld [vmem:[%s7890_s6 + $0x188] sm:$0xff] }
 0x5c0   : > { %4727 = vmatprep.subr.bf16.mxu1 %v4072_v61  ;;  %v3840_v61 = vld [vmem:[%s7890_s6 + $0x198] sm:$0xff] }
 0x5c2   : > { %4564 = vmatpush1.bf16.msra.mxu0 %v4069_v13  ;;  %v4142_v13 = vunpack.c.l.s8.bf16 %v3838_v4 }
 0x5c3   : > { %4728 = vmatpush1.bf16.msra.mxu1 %v4071_v16  ;;  %4565 = vmatprep.subr.bf16.mxu0 %v4078_v15  ;;  %v3837_v16 = vld [vmem:[%s7890_s6 + $0x180] sm:$0xff]  ;;  %v4144_v15 = vunpack.c.l.s8.bf16 %v3840_v61 }
 0x5c4   : > { %4729 = vmatprep.subr.bf16.mxu1 %v4080_v21  ;;  %v4141_v21 = vunpack.c.l.s8.bf16 %v3837_v16 }
 0x5c6   : > { %4566 = vmatpush1.bf16.msra.mxu0 %v4077_v27  ;;  %v4143_v27 = vunpack.c.l.s8.bf16 %v3839_v19 }
 0x5c7   : > { %4730 = vmatpush1.bf16.msra.mxu1 %v4079_v28  ;;  %4567 = vmatprep.subr.bf16.mxu0 %v4086_v56  ;;  %v4150_v28 = vunpack.c.h.s8.bf16 %v3838_v4  ;;  %v4152_v56 = vunpack.c.h.s8.bf16 %v3840_v61  ;;  %v3861_v61 = vld [vmem:[%s7890_s6 + $0x240] sm:$0xff] }
 0x5c8   : > { %4731 = vmatprep.subr.bf16.mxu1 %v4088_v31  ;;  %v3846_v31 = vld [vmem:[%s7890_s6 + $0x1c8] sm:$0xff] }
 0x5ca   : > { %4568 = vmatpush1.bf16.msra.mxu0 %v4085_v10  ;;  %v4149_v10 = vunpack.c.h.s8.bf16 %v3837_v16 }
 0x5cb   : > { %4732 = vmatpush1.bf16.msra.mxu1 %v4087_v17  ;;  %4569 = vmatprep.subr.bf16.mxu0 %v4094_v20  ;;  %v3715_v17 = vmul.f32 %v3678_v14, %v8525_v32  ;;  %v3728_v20 = vrot.slane %v8556_v38, %v7957_v41  ;;  %v4157_v32 = vunpack.c.l.s8.bf16 %v3845_v40  ;;  %v3872_v14 = vld [vmem:[%s7890_s6 + $0x298] sm:$0xff] }
 0x5cc   : > { %4733 = vmatprep.subr.bf16.mxu1 %v4096_v37  ;;  %v4158_v37 = vunpack.c.l.s8.bf16 %v3846_v31  ;;  %v3880_v40 = vld [vmem:[%s7890_s6 + $0x2d8] sm:$0xff] }
 0x5cd   : > { %v3765_v25 = vadd.f32 %v3728_v20, %v3715_v17 }
 0x5ce   : > { %4570 = vmatpush1.bf16.msra.mxu0 %v4093_v23  ;;  %v4160_v23 = vunpack.c.l.s8.bf16 %v3848_v26 }
 0x5cf   : > { %4734 = vmatpush1.bf16.msra.mxu1 %v4095_v30  ;;  %4571 = vmatprep.subr.bf16.mxu0 %v4102_v2  ;;  %v3847_v30 = vld [vmem:[%s7890_s6 + $0x1d0] sm:$0xff]  ;;  %v3718_v2 = vmul.f32 %v3690_v33, %v8532_v46  ;;  %v3773_v46 = vmax.f32 %v3765_v25, 0.0  ;;  %v4208_v33 = vunpack.c.l.s8.bf16 %v3872_v14 }
 0x5d0   : > { %4735 = vmatprep.subr.bf16.mxu1 %v4104_v39  ;;  %v3740_v39 = vrot.slane %v8556_v38, %v7966_v44  ;;  %v4159_v45 = vunpack.c.l.s8.bf16 %v3847_v30  ;;  %v3879_v25 = vld [vmem:[%s7890_s6 + $0x2d0] sm:$0xff] }
 0x5d2   : > { %4572 = vmatpush1.bf16.msra.mxu0 %v4101_v35  ;;  %v4166_v35 = vunpack.c.h.s8.bf16 %v3846_v31  ;;  %v3768_v47 = vadd.f32 %v3740_v39, %v3718_v2  ;;  %v3869_v31 = vld [vmem:[%s7890_s6 + $0x280] sm:$0xff] }
 0x5d3   : > { %4736 = vmatpush1.bf16.msra.mxu1 %v4103_v36  ;;  %4573 = vmatprep.subr.bf16.mxu0 %v4110_v9  ;;  %v4168_v36 = vunpack.c.h.s8.bf16 %v3848_v26  ;;  %v3854_v9 = vld [vmem:[%s7890_s6 + $0x208] sm:$0xff]  ;;  %v3871_v26 = vld [vmem:[%s7890_s6 + $0x290] sm:$0xff]  ;;  %v3877_v39 = vld [vmem:[%s7890_s6 + $0x2c0] sm:$0xff] }
 0x5d4   : > { %4737 = vmatprep.subr.bf16.mxu1 %v4112_v48  ;;  %v3856_v48 = vld [vmem:[%s7890_s6 + $0x218] sm:$0xff]  ;;  %v3776_v54 = vmax.f32 %v3768_v47, 0.0  ;;  %v4182_v53 = vunpack.c.h.s8.bf16 %v3854_v9  ;;  %v4207_v17 = vunpack.c.l.s8.bf16 %v3871_v26  ;;  %v3886_v47 = vld [vmem:[%s7890_s6 + $0x308] sm:$0xff] }
 0x5d6   : > { %4574 = vmatpush1.bf16.msra.mxu0 %v4109_v51  ;;  %v4167_v51 = vunpack.c.h.s8.bf16 %v3847_v30  ;;  %v8618_v59 = vpack.c.bf16 %v3776_v54, %v3776_v54  ;;  %v4215_v30 = vunpack.c.h.s8.bf16 %v3871_v26  ;;  %v3686_v26 = vrot.slane %v8548_v50, %v7960_v42 }
 0x5d7   : > { %4738 = vmatpush1.bf16.msra.mxu1 %v4111_v52  ;;  %4575 = vmatprep.subr.bf16.mxu0 %v4118_v34  ;;  %v4174_v52 = vunpack.c.l.s8.bf16 %v3854_v9  ;;  %v3853_v34 = vld [vmem:[%s7890_s6 + $0x200] sm:$0xff]  ;;  %v4232_v9 = vunpack.c.h.s8.bf16 %v3880_v40 }
 0x5d8   : > { %4739 = vmatprep.subr.bf16.mxu1 %v4120_v7  ;;  %v4176_v7 = vunpack.c.l.s8.bf16 %v3856_v48 }
 0x5da   : > { %4576 = vmatpush1.bf16.msra.mxu0 %v4117_v0  ;;  %v4173_v0 = vunpack.c.l.s8.bf16 %v3853_v34 }
 0x5db   : > { %4740 = vmatpush1.bf16.msra.mxu1 %v4119_v22  ;;  %4577 = vmatprep.subr.bf16.mxu0 %v4126_v57  ;;  %v8615_v22 = vpack.c.bf16 %v3773_v46, %v3773_v46  ;;  %v4175_v57 = vunpack.c.l.s8.bf16 %v3855_v29  ;;  %v4231_v46 = vunpack.c.h.s8.bf16 %v3879_v25 }
 0x5dc   : > { %4741 = vmatprep.subr.bf16.mxu1 %v4128_v58  ;;  %v3862_v58 = vld [vmem:[%s7890_s6 + $0x248] sm:$0xff] }
 0x5dd   : > { %v4190_v4 = vunpack.c.l.s8.bf16 %v3862_v58 }
 0x5de   : > { %4578 = vmatpush1.bf16.msra.mxu0 %v4125_v60  ;;  %v4184_v60 = vunpack.c.h.s8.bf16 %v3856_v48  ;;  %v3888_v48 = vld [vmem:[%s7890_s6 + $0x318] sm:$0xff] }
 0x5df   : > { %4742 = vmatpush1.bf16.msra.mxu1 %v4127_v12  ;;  %4579 = vmatprep.subr.bf16.mxu0 %v4134_v3  ;;  %v3864_v12 = vld [vmem:[%s7890_s6 + $0x258] sm:$0xff]  ;;  %v4181_v3 = vunpack.c.h.s8.bf16 %v3853_v34  ;;  %v4240_v34 = vunpack.c.l.s8.bf16 %v3888_v48 }
 0x5e0   : > { %4743 = vmatprep.subr.bf16.mxu1 %v4136_v5  ;;  %v4183_v5 = vunpack.c.h.s8.bf16 %v3855_v29  ;;  %v4200_v19 = vunpack.c.h.s8.bf16 %v3864_v12 }
 0x5e2   : > { %4580 = vmatpush1.bf16.msra.mxu0 %v4133_v6  ;;  %v4192_v6 = vunpack.c.l.s8.bf16 %v3864_v12 }
 0x5e3   : > { %4744 = vmatpush1.bf16.msra.mxu1 %v4135_v8  ;;  %4581 = vmatprep.subr.bf16.mxu0 %v4142_v13  ;;  %v3863_v8 = vld [vmem:[%s7890_s6 + $0x250] sm:$0xff]  ;;  %v4189_v13 = vunpack.c.l.s8.bf16 %v3861_v61 }
 0x5e4   : > { %4745 = vmatprep.subr.bf16.mxu1 %v4144_v15  ;;  %v4191_v16 = vunpack.c.l.s8.bf16 %v3863_v8  ;;  %v4198_v15 = vunpack.c.h.s8.bf16 %v3862_v58  ;;  %v3896_v58 = vld [vmem:[%s7890_s6 + $0x358] sm:$0xff] }
 0x5e6   : > { %4582 = vmatpush1.bf16.msra.mxu0 %v4141_v21  ;;  %v3870_v21 = vld [vmem:[%s7890_s6 + $0x288] sm:$0xff] }
 0x5e7   : > { %4746 = vmatpush1.bf16.msra.mxu1 %v4143_v27  ;;  %4583 = vmatprep.subr.bf16.mxu0 %v4150_v28  ;;  %v4197_v27 = vunpack.c.h.s8.bf16 %v3861_v61  ;;  %v4199_v28 = vunpack.c.h.s8.bf16 %v3863_v8  ;;  %v4214_v20 = vunpack.c.h.s8.bf16 %v3870_v21  ;;  %v3895_v61 = vld [vmem:[%s7890_s6 + $0x350] sm:$0xff] }
 0x5e8   : > { %4747 = vmatprep.subr.bf16.mxu1 %v4152_v56  ;;  %v4206_v56 = vunpack.c.l.s8.bf16 %v3870_v21  ;;  %v4255_v8 = vunpack.c.l.s8.bf16 %v3895_v61 }
 0x5ea   : > { %4584 = vmatpush1.bf16.msra.mxu0 %v4149_v10  ;;  %v4205_v10 = vunpack.c.l.s8.bf16 %v3869_v31 }
 0x5eb   : > { %4748 = vmatpush1.bf16.msra.mxu1 %v4151_v63  ;;  %4585 = vmatprep.subr.bf16.mxu0 %v4158_v37  ;;  %v4216_v63 = vunpack.c.h.s8.bf16 %v3872_v14  ;;  %v3878_v37 = vld [vmem:[%s7890_s6 + $0x2c8] sm:$0xff]  ;;  %v4263_v14 = vunpack.c.h.s8.bf16 %v3895_v61 }
 0x5ec   : > { %4749 = vmatprep.subr.bf16.mxu1 %v4160_v23  ;;  %v4213_v23 = vunpack.c.h.s8.bf16 %v3869_v31  ;;  %v4222_v2 = vunpack.c.l.s8.bf16 %v3878_v37  ;;  %v3903_v31 = vld [vmem:[%s7890_s6 + $0x390] sm:$0xff] }
 0x5ed   : > { %v4279_v50 = vunpack.c.h.s8.bf16 %v3903_v31 }
 0x5ee   : > { %4586 = vmatpush1.bf16.msra.mxu0 %v4157_v32  ;;  %v4224_v32 = vunpack.c.l.s8.bf16 %v3880_v40 }
 0x5ef   : > { %4750 = vmatpush1.bf16.msra.mxu1 %v4159_v45  ;;  %4587 = vmatprep.subr.bf16.mxu0 %v4166_v35  ;;  %v4221_v45 = vunpack.c.l.s8.bf16 %v3877_v39  ;;  %v4223_v35 = vunpack.c.l.s8.bf16 %v3879_v25  ;;  %v3911_v25 = vld [vmem:[%s7890_s6 + $0x3d0] sm:$0xff] }
 0x5f0   : > { %4751 = vmatprep.subr.bf16.mxu1 %v4168_v36  ;;  %v4230_v36 = vunpack.c.h.s8.bf16 %v3878_v37  ;;  %v3912_v37 = vld [vmem:[%s7890_s6 + $0x3d8] sm:$0xff] }
 0x5f2   : > { %4588 = vmatpush1.bf16.msra.mxu0 %v4165_v49  ;;  %v4229_v49 = vunpack.c.h.s8.bf16 %v3877_v39  ;;  %v3909_v39 = vld [vmem:[%s7890_s6 + $0x3c0] sm:$0xff] }
 0x5f3   : > { %4752 = vmatpush1.bf16.msra.mxu1 %v4167_v51  ;;  %4598 = vmatprep.subr.bf16.mxu0 %v4174_v52  ;;  %v4238_v51 = vunpack.c.l.s8.bf16 %v3886_v47  ;;  %v3885_v52 = vld [vmem:[%s7890_s6 + $0x300] sm:$0xff] }
 0x5f4   : > { %4762 = vmatprep.subr.bf16.mxu1 %v4176_v7  ;;  %v3887_v7 = vld [vmem:[%s7890_s6 + $0x310] sm:$0xff]  ;;  %v4237_v29 = vunpack.c.l.s8.bf16 %v3885_v52 }
 0x5f5   : > { %4590 = vmatmul.mubr.bf16.vlgmr.msra.gmra.mrb[16].mxu0 %v8615_v22  ;;  %v4239_v54 = vunpack.c.l.s8.bf16 %v3887_v7  ;;  %v4247_v12 = vunpack.c.h.s8.bf16 %v3887_v7  ;;  %v3919_v7 = vld [vmem:[%s7890_s6 + $0x410] sm:$0xff] }
 0x5f6   : > { %4754 = vmatmul.mubr.bf16.vlgmr.msra.gmra.mrb[16].mxu1 %v8615_v22  ;;  %4599 = vmatpush1.bf16.msra.mxu0 %v4173_v0  ;;  %v4246_v0 = vunpack.c.h.s8.bf16 %v3886_v47  ;;  %v3920_v47 = vld [vmem:[%s7890_s6 + $0x418] sm:$0xff] }
 0x5f7   : > { %4630 = vmatprep.mubr.bf16.mxu0 %v8618_v59  ;;  %4763 = vmatpush1.bf16.msra.mxu1 %v4175_v57  ;;  %v4248_v57 = vunpack.c.h.s8.bf16 %v3888_v48  ;;  %v4293_v48 = vunpack.c.h.s8.bf16 %v3909_v39 }
 0x5f8   : > { %4794 = vmatprep.mubr.bf16.mxu1 %v8618_v59  ;;  %4600 = vmatprep.subr.bf16.mxu0 %v4182_v53  ;;  %v3894_v53 = vld [vmem:[%s7890_s6 + $0x348] sm:$0xff] }
 0x5f9   : > { %4764 = vmatprep.subr.bf16.mxu1 %v4184_v60  ;;  %v4245_v60 = vunpack.c.h.s8.bf16 %v3885_v52  ;;  %v3917_v52 = vld [vmem:[%s7890_s6 + $0x400] sm:$0xff] }
 0x5fa   : > { %4601 = vmatpush1.bf16.msra.mxu0 %v4181_v3  ;;  %v4254_v3 = vunpack.c.l.s8.bf16 %v3894_v53 }
 0x5fb   : > { %4765 = vmatpush1.bf16.msra.mxu1 %v4183_v5  ;;  %4602 = vmatprep.subr.bf16.mxu0 %v4190_v4  ;;  %v3893_v5 = vld [vmem:[%s7890_s6 + $0x340] sm:$0xff]  ;;  %v4256_v4 = vunpack.c.l.s8.bf16 %v3896_v58 }
 0x5fc   : > { %4766 = vmatprep.subr.bf16.mxu1 %v4192_v6  ;;  %v4253_v6 = vunpack.c.l.s8.bf16 %v3893_v5  ;;  %v4261_v21 = vunpack.c.h.s8.bf16 %v3893_v5 }
 0x5fe   : > { %4603 = vmatpush1.bf16.msra.mxu0 %v4189_v13  ;;  %v4262_v13 = vunpack.c.h.s8.bf16 %v3894_v53  ;;  %v4312_v53 = vunpack.c.h.s8.bf16 %v3920_v47 }
 0x5ff   : > { %4767 = vmatpush1.bf16.msra.mxu1 %v4191_v16  ;;  %4604 = vmatprep.subr.bf16.mxu0 %v4198_v15  ;;  %v4264_v16 = vunpack.c.h.s8.bf16 %v3896_v58  ;;  %v3902_v15 = vld [vmem:[%s7890_s6 + $0x388] sm:$0xff] }
 0x600   : > { %4768 = vmatprep.subr.bf16.mxu1 %v4200_v19  ;;  %v3904_v19 = vld [vmem:[%s7890_s6 + $0x398] sm:$0xff]  ;;  %v3926_v58 = vld [vmem:[%s7890_s6 + $0x448] sm:$0xff] }
 0x601   : > { %v4318_v5 = vunpack.c.l.s8.bf16 %v3926_v58 }
 0x602   : > { %4605 = vmatpush1.bf16.msra.mxu0 %v4197_v27  ;;  %v4270_v27 = vunpack.c.l.s8.bf16 %v3902_v15 }
 0x603   : > { %4769 = vmatpush1.bf16.msra.mxu1 %v4199_v28  ;;  %4606 = vmatprep.subr.bf16.mxu0 %v4206_v56  ;;  %v3901_v28 = vld [vmem:[%s7890_s6 + $0x380] sm:$0xff]  ;;  %v4272_v56 = vunpack.c.l.s8.bf16 %v3904_v19 }
 0x604   : > { %4770 = vmatprep.subr.bf16.mxu1 %v4208_v33  ;;  %v4269_v33 = vunpack.c.l.s8.bf16 %v3901_v28  ;;  %v4277_v40 = vunpack.c.h.s8.bf16 %v3901_v28 }
 0x606   : > { %4607 = vmatpush1.bf16.msra.mxu0 %v4205_v10  ;;  %v4271_v10 = vunpack.c.l.s8.bf16 %v3903_v31 }
 0x607   : > { %4771 = vmatpush1.bf16.msra.mxu1 %v4207_v17  ;;  %4608 = vmatprep.subr.bf16.mxu0 %v4214_v20  ;;  %v4278_v17 = vunpack.c.h.s8.bf16 %v3902_v15  ;;  %v4280_v20 = vunpack.c.h.s8.bf16 %v3904_v19  ;;  %v3934_v19 = vld [vmem:[%s7890_s6 + $0x488] sm:$0xff] }
 0x608   : > { %4772 = vmatprep.subr.bf16.mxu1 %v4216_v63  ;;  %v3910_v63 = vld [vmem:[%s7890_s6 + $0x3c8] sm:$0xff]  ;;  %v4334_v28 = vunpack.c.l.s8.bf16 %v3934_v19 }
 0x60a   : > { %4609 = vmatpush1.bf16.msra.mxu0 %v4213_v23  ;;  %v3717_v23 = vmul.f32 %v3686_v26, %v8528_v62  ;;  %v4287_v62 = vunpack.c.l.s8.bf16 %v3911_v25 }
 0x60b   : > { %4773 = vmatpush1.bf16.msra.mxu1 %v4215_v30  ;;  %4610 = vmatprep.subr.bf16.mxu0 %v4222_v2  ;;  %v3736_v30 = vrot.slane %v8556_v38, %v7960_v42  ;;  %v4286_v2 = vunpack.c.l.s8.bf16 %v3910_v63  ;;  %v4296_v38 = vunpack.c.h.s8.bf16 %v3912_v37 }
 0x60c   : > { %4774 = vmatprep.subr.bf16.mxu1 %v4224_v32  ;;  %v4288_v32 = vunpack.c.l.s8.bf16 %v3912_v37  ;;  %v3944_v37 = vld [vmem:[%s7890_s6 + $0x4d8] sm:$0xff] }
 0x60e   : > { %4611 = vmatpush1.bf16.msra.mxu0 %v4221_v45  ;;  %v4285_v45 = vunpack.c.l.s8.bf16 %v3909_v39  ;;  %v3943_v39 = vld [vmem:[%s7890_s6 + $0x4d0] sm:$0xff] }
 0x60f   : > { %4775 = vmatpush1.bf16.msra.mxu1 %v4223_v35  ;;  %4612 = vmatprep.subr.bf16.mxu0 %v4230_v36  ;;  %v3767_v35 = vadd.f32 %v3736_v30, %v3717_v23  ;;  %v4294_v36 = vunpack.c.h.s8.bf16 %v3910_v63  ;;  %v3942_v63 = vld [vmem:[%s7890_s6 + $0x4c8] sm:$0xff] }
 0x610   : > { %4776 = vmatprep.subr.bf16.mxu1 %v4232_v9  ;;  %v3918_v9 = vld [vmem:[%s7890_s6 + $0x408] sm:$0xff]  ;;  %v4350_v30 = vunpack.c.l.s8.bf16 %v3942_v63 }
 0x612   : > { %4613 = vmatpush1.bf16.msra.mxu0 %v4229_v49  ;;  %v3775_v49 = vmax.f32 %v3767_v35, 0.0  ;;  %v4360_v35 = vunpack.c.h.s8.bf16 %v3944_v37 }
 0x613   : > { %4777 = vmatpush1.bf16.msra.mxu1 %v4231_v46  ;;  %4614 = vmatprep.subr.bf16.mxu0 %v4238_v51  ;;  %v4295_v46 = vunpack.c.h.s8.bf16 %v3911_v25  ;;  %v4302_v51 = vunpack.c.l.s8.bf16 %v3918_v9  ;;  %v4351_v25 = vunpack.c.l.s8.bf16 %v3943_v39 }
 0x614   : > { %4778 = vmatprep.subr.bf16.mxu1 %v4240_v34  ;;  %v4304_v34 = vunpack.c.l.s8.bf16 %v3920_v47 }
 0x616   : > { %4615 = vmatpush1.bf16.msra.mxu0 %v4237_v29  ;;  %v4301_v29 = vunpack.c.l.s8.bf16 %v3917_v52 }
 0x617   : > { %4779 = vmatpush1.bf16.msra.mxu1 %v4239_v54  ;;  %4616 = vmatprep.subr.bf16.mxu0 %v4246_v0  ;;  %v8660_v54 = vpack.c.bf16 %v3775_v49, %v3775_v49  ;;  %v4303_v0 = vunpack.c.l.s8.bf16 %v3919_v7 }
 0x618   : > { %4780 = vmatprep.subr.bf16.mxu1 %v4248_v57  ;;  %v4310_v57 = vunpack.c.h.s8.bf16 %v3918_v9  ;;  %v4359_v9 = vunpack.c.h.s8.bf16 %v3943_v39 }
 0x61a   : > { %4617 = vmatpush1.bf16.msra.mxu0 %v4245_v60  ;;  %v3928_v60 = vld [vmem:[%s7890_s6 + $0x458] sm:$0xff] }
 0x61b   : > { %4781 = vmatpush1.bf16.msra.mxu1 %v4247_v12  ;;  %4618 = vmatprep.subr.bf16.mxu0 %v4254_v3  ;;  %v4309_v12 = vunpack.c.h.s8.bf16 %v3917_v52  ;;  %v4311_v3 = vunpack.c.h.s8.bf16 %v3919_v7  ;;  %v4320_v61 = vunpack.c.l.s8.bf16 %v3928_v60  ;;  %v4328_v15 = vunpack.c.h.s8.bf16 %v3928_v60  ;;  %v3957_v60 = vld [vmem:[%s7890_s6 + $0x540] sm:$0xff] }
 0x61c   : > { %4782 = vmatprep.subr.bf16.mxu1 %v4256_v4  ;;  %v3925_v4 = vld [vmem:[%s7890_s6 + $0x440] sm:$0xff] }
 0x61e   : > { %4619 = vmatpush1.bf16.msra.mxu0 %v4253_v6  ;;  %v3927_v6 = vld [vmem:[%s7890_s6 + $0x450] sm:$0xff] }
 0x61f   : > { %4783 = vmatpush1.bf16.msra.mxu1 %v4255_v8  ;;  %4620 = vmatprep.subr.bf16.mxu0 %v4262_v13  ;;  %v4317_v8 = vunpack.c.l.s8.bf16 %v3925_v4  ;;  %v4319_v13 = vunpack.c.l.s8.bf16 %v3927_v6 }
 0x620   : > { %4784 = vmatprep.subr.bf16.mxu1 %v4264_v16  ;;  %v4326_v16 = vunpack.c.h.s8.bf16 %v3926_v58 }
 0x622   : > { %4621 = vmatpush1.bf16.msra.mxu0 %v4261_v21  ;;  %v3936_v21 = vld [vmem:[%s7890_s6 + $0x498] sm:$0xff] }
 0x623   : > { %4785 = vmatpush1.bf16.msra.mxu1 %v4263_v14  ;;  %4622 = vmatprep.subr.bf16.mxu0 %v4270_v27  ;;  %v4325_v14 = vunpack.c.h.s8.bf16 %v3925_v4  ;;  %v4327_v27 = vunpack.c.h.s8.bf16 %v3927_v6  ;;  %v4336_v31 = vunpack.c.l.s8.bf16 %v3936_v21 }
 0x624   : > { %4786 = vmatprep.subr.bf16.mxu1 %v4272_v56  ;;  %v3933_v56 = vld [vmem:[%s7890_s6 + $0x480] sm:$0xff] }
 0x625   : > { %v4333_v26 = vunpack.c.l.s8.bf16 %v3933_v56 }
 0x626   : > { %4623 = vmatpush1.bf16.msra.mxu0 %v4269_v33  ;;  %v3935_v33 = vld [vmem:[%s7890_s6 + $0x490] sm:$0xff] }
 0x627   : > { %4787 = vmatpush1.bf16.msra.mxu1 %v4271_v10  ;;  %4624 = vmatprep.subr.bf16.mxu0 %v4278_v17  ;;  %v4335_v10 = vunpack.c.l.s8.bf16 %v3935_v33  ;;  %v4342_v17 = vunpack.c.h.s8.bf16 %v3934_v19  ;;  %v4343_v23 = vunpack.c.h.s8.bf16 %v3935_v33 }
 0x628   : > { %4788 = vmatprep.subr.bf16.mxu1 %v4280_v20  ;;  %v4344_v20 = vunpack.c.h.s8.bf16 %v3936_v21  ;;  %v3965_v21 = vld [vmem:[%s7890_s6 + $0x580] sm:$0xff] }
 0x62a   : > { %4625 = vmatpush1.bf16.msra.mxu0 %v4277_v40  ;;  %v4341_v40 = vunpack.c.h.s8.bf16 %v3933_v56 }
 0x62b   : > { %4789 = vmatpush1.bf16.msra.mxu1 %v4279_v50  ;;  %4626 = vmatprep.subr.bf16.mxu0 %v4286_v2  ;;  %v3941_v50 = vld [vmem:[%s7890_s6 + $0x4c0] sm:$0xff]  ;;  %v4352_v2 = vunpack.c.l.s8.bf16 %v3944_v37 }
 0x62c   : > { %4790 = vmatprep.subr.bf16.mxu1 %v4288_v32  ;;  %v4349_v32 = vunpack.c.l.s8.bf16 %v3941_v50  ;;  %v3973_v37 = vld [vmem:[%s7890_s6 + $0x5c0] sm:$0xff] }
 0x62e   : > { %4627 = vmatpush1.bf16.msra.mxu0 %v4285_v45  ;;  %v4358_v45 = vunpack.c.h.s8.bf16 %v3942_v63 }
 0x62f   : > { %4791 = vmatpush1.bf16.msra.mxu1 %v4287_v62  ;;  %4628 = vmatprep.subr.bf16.mxu0 %v4294_v36  ;;  %v3950_v62 = vld [vmem:[%s7890_s6 + $0x508] sm:$0xff]  ;;  %v3952_v36 = vld [vmem:[%s7890_s6 + $0x518] sm:$0xff] }
 0x630   : > { %4792 = vmatprep.subr.bf16.mxu1 %v4296_v38  ;;  %v4357_v38 = vunpack.c.h.s8.bf16 %v3941_v50  ;;  %v4366_v47 = vunpack.c.l.s8.bf16 %v3950_v62  ;;  %v4368_v49 = vunpack.c.l.s8.bf16 %v3952_v36  ;;  %v4376_v7 = vunpack.c.h.s8.bf16 %v3952_v36 }
 0x632   : > { %4629 = vmatpush1.bf16.msra.mxu0 %v4293_v48  ;;  %v3949_v48 = vld [vmem:[%s7890_s6 + $0x500] sm:$0xff] }
 0x633   : > { %4793 = vmatpush1.bf16.msra.mxu1 %v4295_v46  ;;  %4639 = vmatprep.subr.bf16.mxu0 %v4302_v51  ;;  %v3951_v46 = vld [vmem:[%s7890_s6 + $0x510] sm:$0xff]  ;;  %v4365_v51 = vunpack.c.l.s8.bf16 %v3949_v48 }
 0x634   : > { %4803 = vmatprep.subr.bf16.mxu1 %v4304_v34  ;;  %v4367_v52 = vunpack.c.l.s8.bf16 %v3951_v46  ;;  %v4374_v34 = vunpack.c.h.s8.bf16 %v3950_v62 }
 0x635   : > { %4631 = vmatmul.mubr.bf16.vlgmr.msra.gmra.mrb[16].mxu0 %v8660_v54 }
 0x636   : > { %4795 = vmatmul.mubr.bf16.vlgmr.msra.gmra.mrb[16].mxu1 %v8660_v54  ;;  %4640 = vmatpush1.bf16.msra.mxu0 %v4301_v29  ;;  %v3958_v29 = vld [vmem:[%s7890_s6 + $0x548] sm:$0xff] }
 0x637   : > { %4804 = vmatpush1.bf16.msra.mxu1 %v4303_v0  ;;  %4641 = vmatprep.subr.bf16.mxu0 %v4310_v57  ;;  %v3960_v0 = vld [vmem:[%s7890_s6 + $0x558] sm:$0xff]  ;;  %v4373_v57 = vunpack.c.h.s8.bf16 %v3949_v48  ;;  %v4382_v58 = vunpack.c.l.s8.bf16 %v3958_v29 }
 0x638   : > { %4805 = vmatprep.subr.bf16.mxu1 %v4312_v53  ;;  %v4375_v53 = vunpack.c.h.s8.bf16 %v3951_v46  ;;  %v4392_v6 = vunpack.c.h.s8.bf16 %v3960_v0  ;;  %v8710_v48 = vld [vmem:[%s785_s13] sm:$0xff] }
 0x63a   : > { %4642 = vmatpush1.bf16.msra.mxu0 %v4309_v12  ;;  %v4384_v12 = vunpack.c.l.s8.bf16 %v3960_v0  ;;  %v3756_v0 = vrot.slane %v8710_v48, %v8330_v24 }
 0x63b   : > { %4806 = vmatpush1.bf16.msra.mxu1 %v4311_v3  ;;  %4643 = vmatprep.subr.bf16.mxu0 %v4318_v5  ;;  %v3959_v3 = vld [vmem:[%s7890_s6 + $0x550] sm:$0xff]  ;;  %v4381_v5 = vunpack.c.l.s8.bf16 %v3957_v60 }
 0x63c   : > { %4807 = vmatprep.subr.bf16.mxu1 %v4320_v61  ;;  %v4383_v4 = vunpack.c.l.s8.bf16 %v3959_v3  ;;  %v4390_v61 = vunpack.c.h.s8.bf16 %v3958_v29 }
 0x63e   : > { %4644 = vmatpush1.bf16.msra.mxu0 %v4317_v8  ;;  %v3966_v8 = vld [vmem:[%s7890_s6 + $0x588] sm:$0xff] }
 0x63f   : > { %4808 = vmatpush1.bf16.msra.mxu1 %v4319_v13  ;;  %4645 = vmatprep.subr.bf16.mxu0 %v4326_v16  ;;  %v3968_v13 = vld [vmem:[%s7890_s6 + $0x598] sm:$0xff]  ;;  %v4389_v16 = vunpack.c.h.s8.bf16 %v3957_v60  ;;  %v4398_v19 = vunpack.c.l.s8.bf16 %v3966_v8 }
 0x640   : > { %4809 = vmatprep.subr.bf16.mxu1 %v4328_v15  ;;  %v4391_v15 = vunpack.c.h.s8.bf16 %v3959_v3  ;;  %v4408_v33 = vunpack.c.h.s8.bf16 %v3968_v13 }
 0x642   : > { %4646 = vmatpush1.bf16.msra.mxu0 %v4325_v14  ;;  %v4400_v14 = vunpack.c.l.s8.bf16 %v3968_v13  ;;  %v3981_v13 = vld [vmem:[%s7890_s6 + $0x600] sm:$0xff] }
 0x643   : > { %4810 = vmatpush1.bf16.msra.mxu1 %v4327_v27  ;;  %4647 = vmatprep.subr.bf16.mxu0 %v4334_v28  ;;  %v3967_v27 = vld [vmem:[%s7890_s6 + $0x590] sm:$0xff]  ;;  %v4397_v28 = vunpack.c.l.s8.bf16 %v3965_v21 }
 0x644   : > { %4811 = vmatprep.subr.bf16.mxu1 %v4336_v31  ;;  %v4399_v56 = vunpack.c.l.s8.bf16 %v3967_v27  ;;  %v4406_v31 = vunpack.c.h.s8.bf16 %v3966_v8 }
 0x646   : > { %4648 = vmatpush1.bf16.msra.mxu0 %v4333_v26  ;;  %v3974_v26 = vld [vmem:[%s7890_s6 + $0x5c8] sm:$0xff] }
 0x647   : > { %4812 = vmatpush1.bf16.msra.mxu1 %v4335_v10  ;;  %4649 = vmatprep.subr.bf16.mxu0 %v4342_v17  ;;  %v3976_v10 = vld [vmem:[%s7890_s6 + $0x5d8] sm:$0xff]  ;;  %v4405_v17 = vunpack.c.h.s8.bf16 %v3965_v21  ;;  %v4414_v63 = vunpack.c.l.s8.bf16 %v3974_v26 }
 0x648   : > { %4813 = vmatprep.subr.bf16.mxu1 %v4344_v20  ;;  %v4407_v20 = vunpack.c.h.s8.bf16 %v3967_v27  ;;  %v4424_v39 = vunpack.c.h.s8.bf16 %v3976_v10 }
 0x64a   : > { %4650 = vmatpush1.bf16.msra.mxu0 %v4341_v40  ;;  %v4416_v40 = vunpack.c.l.s8.bf16 %v3976_v10 }
 0x64b   : > { %4814 = vmatpush1.bf16.msra.mxu1 %v4343_v23  ;;  %4651 = vmatprep.subr.bf16.mxu0 %v4350_v30  ;;  %v3975_v23 = vld [vmem:[%s7890_s6 + $0x5d0] sm:$0xff]  ;;  %v4413_v30 = vunpack.c.l.s8.bf16 %v3973_v37 }
 0x64c   : > { %4815 = vmatprep.subr.bf16.mxu1 %v4352_v2  ;;  %v4415_v50 = vunpack.c.l.s8.bf16 %v3975_v23  ;;  %v4422_v2 = vunpack.c.h.s8.bf16 %v3974_v26  ;;  %v3992_v26 = vld [vmem:[%s7890_s6 + $0x658] sm:$0xff] }
 0x64e   : > { %4652 = vmatpush1.bf16.msra.mxu0 %v4349_v32  ;;  %v8693_v32 = vld [vmem:[%s7890_s6 + $0x608] sm:$0xff] }
 0x64f   : > { %4816 = vmatpush1.bf16.msra.mxu1 %v4351_v25  ;;  %4653 = vmatprep.subr.bf16.mxu0 %v4358_v45  ;;  %v8696_v25 = vld [vmem:[%s7890_s6 + $0x618] sm:$0xff]  ;;  %v4421_v45 = vunpack.c.h.s8.bf16 %v3973_v37  ;;  %v4430_v62 = vunpack.c.l.s8.bf16 %v8693_v32  ;;  %v4448_v37 = vunpack.c.l.s8.bf16 %v3992_v26 }
 0x650   : > { %4817 = vmatprep.subr.bf16.mxu1 %v4360_v35  ;;  %v4423_v35 = vunpack.c.h.s8.bf16 %v3975_v23  ;;  %v4432_v36 = vunpack.c.l.s8.bf16 %v8696_v25  ;;  %v3991_v23 = vld [vmem:[%s7890_s6 + $0x650] sm:$0xff] }
 0x652   : > { %4654 = vmatpush1.bf16.msra.mxu0 %v4357_v38  ;;  %v8702_v38 = vld [vmem:[%s776_s8] sm:$0xff] }
 0x653   : > { %4818 = vmatpush1.bf16.msra.mxu1 %v4359_v9  ;;  %4655 = vmatprep.subr.bf16.mxu0 %v4366_v47  ;;  %v3694_v9 = vrot.slane %v8702_v38, %v8325_v11  ;;  %v3698_v47 = vrot.slane %v8702_v38, %v8271_v1  ;;  %v3706_v46 = vrot.slane %v8702_v38, %v8330_v24 }
 0x654   : > { %4819 = vmatprep.subr.bf16.mxu1 %v4368_v49  ;;  %v3744_v49 = vrot.slane %v8710_v48, %v8325_v11 }
 0x656   : > { %4656 = vmatpush1.bf16.msra.mxu0 %v4365_v51 }
 0x657   : > { %4820 = vmatpush1.bf16.msra.mxu1 %v4367_v52  ;;  %4657 = vmatprep.subr.bf16.mxu0 %v4374_v34  ;;  %v3748_v52 = vrot.slane %v8710_v48, %v8271_v1 }
 0x658   : > { %4821 = vmatprep.subr.bf16.mxu1 %v4376_v7 }
 0x65a   : > { %4658 = vmatpush1.bf16.msra.mxu0 %v4373_v57 }
 0x65b   : > { %4822 = vmatpush1.bf16.msra.mxu1 %v4375_v53  ;;  %4659 = vmatprep.subr.bf16.mxu0 %v4382_v58 }
 0x65c   : > { %4823 = vmatprep.subr.bf16.mxu1 %v4384_v12 }
 0x65e   : > { %4660 = vmatpush1.bf16.msra.mxu0 %v4381_v5 }
 0x65f   : > { %4824 = vmatpush1.bf16.msra.mxu1 %v4383_v4  ;;  %4661 = vmatprep.subr.bf16.mxu0 %v4390_v61 }
 0x660   : > { %4825 = vmatprep.subr.bf16.mxu1 %v4392_v6 }
 0x662   : > { %4662 = vmatpush1.bf16.msra.mxu0 %v4389_v16  ;;  %v3983_v16 = vld [vmem:[%s7890_s6 + $0x610] sm:$0xff] }
 0x663   : > { %4826 = vmatpush1.bf16.msra.mxu1 %v4391_v15  ;;  %4663 = vmatprep.subr.bf16.mxu0 %v4398_v19  ;;  %v4431_v27 = vunpack.c.l.s8.bf16 %v3983_v16 }
 0x664   : > { %4827 = vmatprep.subr.bf16.mxu1 %v4400_v14  ;;  %v4429_v14 = vunpack.c.l.s8.bf16 %v3981_v13 }
 0x666   : > { %4664 = vmatpush1.bf16.msra.mxu0 %v4397_v28 }
 0x667   : > { %4828 = vmatpush1.bf16.msra.mxu1 %v4399_v56  ;;  %4665 = vmatprep.subr.bf16.mxu0 %v4406_v31  ;;  %v4438_v56 = vunpack.c.h.s8.bf16 %v8693_v32  ;;  %v4440_v31 = vunpack.c.h.s8.bf16 %v8696_v25  ;;  %v3998_v32 = vld [vmem:[%s7890_s6 + $0x688] sm:$0xff]  ;;  %v4000_v25 = vld [vmem:[%s7890_s6 + $0x698] sm:$0xff] }
 0x668   : > { %4829 = vmatprep.subr.bf16.mxu1 %v4408_v33  ;;  %v3990_v33 = vld [vmem:[%s7890_s6 + $0x648] sm:$0xff] }
 0x66a   : > { %4666 = vmatpush1.bf16.msra.mxu0 %v4405_v17  ;;  %v4437_v17 = vunpack.c.h.s8.bf16 %v3981_v13 }
 0x66b   : > { %4830 = vmatpush1.bf16.msra.mxu1 %v4407_v20  ;;  %4667 = vmatprep.subr.bf16.mxu0 %v4414_v63  ;;  %v4439_v20 = vunpack.c.h.s8.bf16 %v3983_v16  ;;  %v4446_v63 = vunpack.c.l.s8.bf16 %v3990_v33 }
 0x66c   : > { %4831 = vmatprep.subr.bf16.mxu1 %v4416_v40  ;;  %v3989_v40 = vld [vmem:[%s7890_s6 + $0x640] sm:$0xff] }
 0x66e   : > { %4668 = vmatpush1.bf16.msra.mxu0 %v4413_v30  ;;  %v4445_v30 = vunpack.c.l.s8.bf16 %v3989_v40 }
 0x66f   : > { %4832 = vmatpush1.bf16.msra.mxu1 %v4415_v50  ;;  %4669 = vmatprep.subr.bf16.mxu0 %v4422_v2  ;;  %v4447_v50 = vunpack.c.l.s8.bf16 %v3991_v23  ;;  %v4454_v2 = vunpack.c.h.s8.bf16 %v3990_v33 }
 0x670   : > { %4833 = vmatprep.subr.bf16.mxu1 %v4424_v39  ;;  %v4456_v39 = vunpack.c.h.s8.bf16 %v3992_v26 }
 0x672   : > { %4670 = vmatpush1.bf16.msra.mxu0 %v4421_v45  ;;  %v4453_v45 = vunpack.c.h.s8.bf16 %v3989_v40 }
 0x673   : > { %4834 = vmatpush1.bf16.msra.mxu1 %v4423_v35  ;;  %4680 = vmatprep.subr.bf16.mxu0 %v4430_v62  ;;  %v4455_v35 = vunpack.c.h.s8.bf16 %v3991_v23  ;;  %v4462_v62 = vunpack.c.l.s8.bf16 %v3998_v32 }
 0x674   : > { %4844 = vmatprep.subr.bf16.mxu1 %v4432_v36  ;;  %v4464_v36 = vunpack.c.l.s8.bf16 %v4000_v25 }
 0x688   : > { %v3502_v51 = vpop.f32.mrb[12].mxu0 }
 0x689   : > { %v3719_v34 = vmul.f32 %v3694_v9, %v3502_v51  ;;  %v8718_v7 = vpop.f32.mrb[12].mxu1  ;;  %v3504_v29 = vpop.f32.mrb[13].mxu0  ;;  %v3997_v9 = vld [vmem:[%s7890_s6 + $0x680] sm:$0xff]  ;;  %v4470_v51 = vunpack.c.h.s8.bf16 %v3998_v32 }
 0x68a   : > { %v3720_v57 = vmul.f32 %v3698_v47, %v3504_v29  ;;  %v3668_v53 = vpop.f32.mrb[13].mxu1  ;;  %v3506_v58 = vpop.f32.mrb[14].mxu0  ;;  %v3999_v47 = vld [vmem:[%s7890_s6 + $0x690] sm:$0xff]  ;;  %v4008_v29 = vld [vmem:[%s7890_s6 + $0x6d8] sm:$0xff] }
 0x68b   : > { %v3769_v60 = vadd.f32 %v3744_v49, %v3719_v34  ;;  %v3722_v12 = vmul.f32 %v3706_v46, %v3668_v53  ;;  %v3670_v3 = vpop.f32.mrb[14].mxu1  ;;  %v3507_v5 = vpop.f32.mrb[15].mxu0  ;;  %v4461_v49 = vunpack.c.l.s8.bf16 %v3997_v9  ;;  %v4463_v46 = vunpack.c.l.s8.bf16 %v3999_v47  ;;  %v4006_v34 = vld [vmem:[%s7890_s6 + $0x6c8] sm:$0xff] }
 0x68c   : > { %v3770_v4 = vadd.f32 %v3748_v52, %v3720_v57  ;;  %v3671_v61 = vpop.f32.mrb[15].mxu1  ;;  %v4472_v52 = vunpack.c.h.s8.bf16 %v4000_v25  ;;  %v4471_v57 = vunpack.c.h.s8.bf16 %v3999_v47  ;;  %v4478_v53 = vunpack.c.l.s8.bf16 %v4006_v34 }
 0x68d   : > { %v3777_v6 = vmax.f32 %v3769_v60, 0.0  ;;  %v3772_v8 = vadd.f32 %v3756_v0, %v3722_v12  ;;  %v4469_v0 = vunpack.c.h.s8.bf16 %v3997_v9  ;;  %v4480_v58 = vunpack.c.l.s8.bf16 %v4008_v29  ;;  %v4005_v60 = vld [vmem:[%s7890_s6 + $0x6c0] sm:$0xff]  ;;  %v4007_v12 = vld [vmem:[%s7890_s6 + $0x6d0] sm:$0xff] }
 0x68e   : > { %v3778_v15 = vmax.f32 %v3770_v4, 0.0  ;;  %v4477_v3 = vunpack.c.l.s8.bf16 %v4005_v60  ;;  %v4479_v5 = vunpack.c.l.s8.bf16 %v4007_v12  ;;  %v4486_v4 = vunpack.c.h.s8.bf16 %v4006_v34 }
 0x68f   : > { %v3780_v19 = vmax.f32 %v3772_v8, 0.0  ;;  %v8726_v28 = vpack.c.bf16 %v3777_v6, %v3777_v6  ;;  %v4488_v61 = vunpack.c.h.s8.bf16 %v4008_v29  ;;  %v4014_v6 = vld [vmem:[%s7890_s6 + $0x708] sm:$0xff]  ;;  %v4016_v8 = vld [vmem:[%s7890_s6 + $0x718] sm:$0xff]  ;;  %v4485_v13 = vunpack.c.h.s8.bf16 %v4005_v60 }
 0x690   : > { %v8724_v21 = vpack.c.bf16 %v3778_v15, %v3778_v15  ;;  %v4487_v16 = vunpack.c.h.s8.bf16 %v4007_v12  ;;  %v4494_v15 = vunpack.c.l.s8.bf16 %v4014_v6  ;;  %v4502_v33 = vunpack.c.h.s8.bf16 %v4014_v6 }
 0x691   : > { %v8734_v10 = vpack.c.bf16 %v3780_v19, %v3780_v19  ;;  %v4496_v19 = vunpack.c.l.s8.bf16 %v4016_v8  ;;  %v4504_v26 = vunpack.c.h.s8.bf16 %v4016_v8  ;;  %v3702_v34 = vrot.slane %v8702_v38, %v8381_v18 }
 0x692   : > { %4671 = vmatprep.mubr.bf16.mxu0 %v8724_v21  ;;  %4835 = vmatprep.mubr.bf16.mxu1 %v8724_v21 }
 0x693   : > { %4672 = vmatmul.mubr.bf16.vlgmr.msra.gmra.mrb[16].mxu0 %v8726_v28  ;;  %4836 = vmatmul.mubr.bf16.vlgmr.msra.gmra.mrb[16].mxu1 %v8726_v28  ;;  %v3721_v12 = vmul.f32 %v3702_v34, %v8718_v7 }
 0x694   : > { %4681 = vmatpush1.bf16.msra.mxu0 %v4429_v14  ;;  %4845 = vmatpush1.bf16.msra.mxu1 %v4431_v27  ;;  %v4013_v14 = vld [vmem:[%s7890_s6 + $0x700] sm:$0xff]  ;;  %v4015_v27 = vld [vmem:[%s7890_s6 + $0x710] sm:$0xff] }
 0x695   : > { %4712 = vmatprep.mubr.bf16.mxu0 %v8734_v10  ;;  %4876 = vmatprep.mubr.bf16.mxu1 %v8734_v10 }
 0x696   : > { %4682 = vmatprep.subr.bf16.mxu0 %v4438_v56  ;;  %4846 = vmatprep.subr.bf16.mxu1 %v4440_v31  ;;  %v4493_v56 = vunpack.c.l.s8.bf16 %v4013_v14  ;;  %v4495_v31 = vunpack.c.l.s8.bf16 %v4015_v27 }
 0x698   : > { %4683 = vmatpush1.bf16.msra.mxu0 %v4437_v17  ;;  %4847 = vmatpush1.bf16.msra.mxu1 %v4439_v20  ;;  %v4022_v17 = vld [vmem:[%s7890_s6 + $0x748] sm:$0xff]  ;;  %v4024_v20 = vld [vmem:[%s7890_s6 + $0x758] sm:$0xff] }
 0x699   : > { %4684 = vmatprep.subr.bf16.mxu0 %v4446_v63  ;;  %4848 = vmatprep.subr.bf16.mxu1 %v4448_v37  ;;  %v4501_v63 = vunpack.c.h.s8.bf16 %v4013_v14  ;;  %v4503_v37 = vunpack.c.h.s8.bf16 %v4015_v27  ;;  %v4510_v40 = vunpack.c.l.s8.bf16 %v4022_v17  ;;  %v4512_v23 = vunpack.c.l.s8.bf16 %v4024_v20 }
 0x69a   : > { %v4518_v32 = vunpack.c.h.s8.bf16 %v4022_v17  ;;  %v4520_v25 = vunpack.c.h.s8.bf16 %v4024_v20 }
 0x69c   : > { %4685 = vmatpush1.bf16.msra.mxu0 %v4445_v30  ;;  %4849 = vmatpush1.bf16.msra.mxu1 %v4447_v50  ;;  %v4021_v30 = vld [vmem:[%s7890_s6 + $0x740] sm:$0xff]  ;;  %v4023_v50 = vld [vmem:[%s7890_s6 + $0x750] sm:$0xff] }
 0x69d   : > { %4686 = vmatprep.subr.bf16.mxu0 %v4454_v2  ;;  %4850 = vmatprep.subr.bf16.mxu1 %v4456_v39  ;;  %v4509_v2 = vunpack.c.l.s8.bf16 %v4021_v30  ;;  %v4511_v39 = vunpack.c.l.s8.bf16 %v4023_v50 }
 0x6a0   : > { %4687 = vmatpush1.bf16.msra.mxu0 %v4453_v45  ;;  %4851 = vmatpush1.bf16.msra.mxu1 %v4455_v35  ;;  %v4030_v45 = vld [vmem:[%s7890_s6 + $0x788] sm:$0xff]  ;;  %v4032_v35 = vld [vmem:[%s7890_s6 + $0x798] sm:$0xff] }
 0x6a1   : > { %4688 = vmatprep.subr.bf16.mxu0 %v4462_v62  ;;  %4852 = vmatprep.subr.bf16.mxu1 %v4464_v36  ;;  %v4517_v62 = vunpack.c.h.s8.bf16 %v4021_v30  ;;  %v4519_v36 = vunpack.c.h.s8.bf16 %v4023_v50  ;;  %v4526_v9 = vunpack.c.l.s8.bf16 %v4030_v45  ;;  %v4528_v47 = vunpack.c.l.s8.bf16 %v4032_v35  ;;  %v3804_v30 = vld [vmem:[%s7890_s6 + $0x78] sm:$0xff] }
 0x6a2   : > { %v4534_v29 = vunpack.c.h.s8.bf16 %v4030_v45  ;;  %v3803_v45 = vld [vmem:[%s7890_s6 + $0x70] sm:$0xff] }
 0x6a4   : > { %4689 = vmatpush1.bf16.msra.mxu0 %v4461_v49  ;;  %4853 = vmatpush1.bf16.msra.mxu1 %v4463_v46  ;;  %v4029_v49 = vld [vmem:[%s7890_s6 + $0x780] sm:$0xff]  ;;  %v4031_v46 = vld [vmem:[%s7890_s6 + $0x790] sm:$0xff] }
 0x6a5   : > { %4690 = vmatprep.subr.bf16.mxu0 %v4470_v51  ;;  %4854 = vmatprep.subr.bf16.mxu1 %v4472_v52  ;;  %v4525_v51 = vunpack.c.l.s8.bf16 %v4029_v49  ;;  %v4527_v52 = vunpack.c.l.s8.bf16 %v4031_v46  ;;  %v4535_v60 = vunpack.c.h.s8.bf16 %v4031_v46  ;;  %v4075_v46 = vunpack.c.h.s8.bf16 %v3803_v45 }
 0x6a8   : > { %4691 = vmatpush1.bf16.msra.mxu0 %v4469_v0  ;;  %4855 = vmatpush1.bf16.msra.mxu1 %v4471_v57  ;;  %v4536_v0 = vunpack.c.h.s8.bf16 %v4032_v35  ;;  %v4038_v57 = vld [vmem:[%s7890_s6 + $0x7c8] sm:$0xff] }
 0x6a9   : > { %4692 = vmatprep.subr.bf16.mxu0 %v4478_v53  ;;  %4856 = vmatprep.subr.bf16.mxu1 %v4480_v58  ;;  %v4040_v53 = vld [vmem:[%s7890_s6 + $0x7d8] sm:$0xff]  ;;  %v4533_v58 = vunpack.c.h.s8.bf16 %v4029_v49  ;;  %v4542_v38 = vunpack.c.l.s8.bf16 %v4038_v57  ;;  %v4550_v7 = vunpack.c.h.s8.bf16 %v4038_v57 }
 0x6ac   : > { %4693 = vmatpush1.bf16.msra.mxu0 %v4477_v3  ;;  %4857 = vmatpush1.bf16.msra.mxu1 %v4479_v5  ;;  %v3752_v3 = vrot.slane %v8710_v48, %v8381_v18  ;;  %v4544_v5 = vunpack.c.l.s8.bf16 %v4040_v53  ;;  %v3794_v48 = vld [vmem:[%s7890_s6 + $0x28] sm:$0xff] }
 0x6ad   : > { %4694 = vmatprep.subr.bf16.mxu0 %v4486_v4  ;;  %4858 = vmatprep.subr.bf16.mxu1 %v4488_v61  ;;  %v4037_v4 = vld [vmem:[%s7890_s6 + $0x7c0] sm:$0xff]  ;;  %v4039_v61 = vld [vmem:[%s7890_s6 + $0x7d0] sm:$0xff] }
 0x6ae   : > { %v4541_v6 = vunpack.c.l.s8.bf16 %v4037_v4  ;;  %v4543_v8 = vunpack.c.l.s8.bf16 %v4039_v61  ;;  %v4551_v14 = vunpack.c.h.s8.bf16 %v4039_v61 }
 0x6b0   : > { %4695 = vmatpush1.bf16.msra.mxu0 %v4485_v13  ;;  %4859 = vmatpush1.bf16.msra.mxu1 %v4487_v16  ;;  %v3771_v13 = vadd.f32 %v3752_v3, %v3721_v12  ;;  %v4552_v16 = vunpack.c.h.s8.bf16 %v4040_v53  ;;  %v3820_v12 = vld [vmem:[%s7890_s6 + $0xf8] sm:$0xff] }
 0x6b1   : > { %4696 = vmatprep.subr.bf16.mxu0 %v4494_v15  ;;  %4860 = vmatprep.subr.bf16.mxu1 %v4496_v19  ;;  %v3796_v15 = vld [vmem:[%s7890_s6 + $0x38] sm:$0xff]  ;;  %v4549_v19 = vunpack.c.h.s8.bf16 %v4037_v4  ;;  %v3817_v4 = vld [vmem:[%s7890_s6 + $0xe0] sm:$0xff]  ;;  %v4100_v61 = vunpack.c.l.s8.bf16 %v3820_v12 }
 0x6b2   : > { %v3779_v27 = vmax.f32 %v3771_v13, 0.0 }
 0x6b4   : > { %4697 = vmatpush1.bf16.msra.mxu0 %v4493_v56  ;;  %4861 = vmatpush1.bf16.msra.mxu1 %v4495_v31  ;;  %v4050_v56 = vunpack.c.l.s8.bf16 %v3794_v48  ;;  %v4052_v31 = vunpack.c.l.s8.bf16 %v3796_v15  ;;  %v8775_v20 = vpack.c.bf16 %v3779_v27, %v3779_v27 }
 0x6b5   : > { %4698 = vmatprep.subr.bf16.mxu0 %v4502_v33  ;;  %4862 = vmatprep.subr.bf16.mxu1 %v4504_v26  ;;  %v3793_v33 = vld [vmem:[%s7890_s6 + $0x20] sm:$0xff]  ;;  %v3795_v26 = vld [vmem:[%s7890_s6 + $0x30] sm:$0xff] }
 0x6b6   : > { %v4049_v17 = vunpack.c.l.s8.bf16 %v3793_v33  ;;  %v4057_v50 = vunpack.c.h.s8.bf16 %v3793_v33  ;;  %v3827_v33 = vld [vmem:[%s7890_s6 + $0x130] sm:$0xff] }
 0x6b8   : > { %4699 = vmatpush1.bf16.msra.mxu0 %v4501_v63  ;;  %4863 = vmatpush1.bf16.msra.mxu1 %v4503_v37  ;;  %v4051_v63 = vunpack.c.l.s8.bf16 %v3795_v26  ;;  %v4058_v37 = vunpack.c.h.s8.bf16 %v3794_v48  ;;  %v3826_v48 = vld [vmem:[%s7890_s6 + $0x128] sm:$0xff] }
 0x6b9   : > { %4700 = vmatprep.subr.bf16.mxu0 %v4510_v40  ;;  %4864 = vmatprep.subr.bf16.mxu1 %v4512_v23  ;;  %v4060_v40 = vunpack.c.h.s8.bf16 %v3796_v15  ;;  %v3802_v23 = vld [vmem:[%s7890_s6 + $0x68] sm:$0xff]  ;;  %v3828_v15 = vld [vmem:[%s7890_s6 + $0x138] sm:$0xff]  ;;  %v4114_v27 = vunpack.c.l.s8.bf16 %v3826_v48 }
 0x6bc   : > { %4701 = vmatpush1.bf16.msra.mxu0 %v4509_v2  ;;  %4865 = vmatpush1.bf16.msra.mxu1 %v4511_v39  ;;  %v4059_v2 = vunpack.c.h.s8.bf16 %v3795_v26  ;;  %v4066_v39 = vunpack.c.l.s8.bf16 %v3802_v23 }
 0x6bd   : > { %4702 = vmatprep.subr.bf16.mxu0 %v4518_v32  ;;  %4866 = vmatprep.subr.bf16.mxu1 %v4520_v25  ;;  %v3801_v32 = vld [vmem:[%s7890_s6 + $0x60] sm:$0xff]  ;;  %v4068_v25 = vunpack.c.l.s8.bf16 %v3804_v30 }
 0x6be   : > { %v4065_v35 = vunpack.c.l.s8.bf16 %v3801_v32  ;;  %v4073_v49 = vunpack.c.h.s8.bf16 %v3801_v32 }
 0x6c0   : > { %4703 = vmatpush1.bf16.msra.mxu0 %v4517_v62  ;;  %4867 = vmatpush1.bf16.msra.mxu1 %v4519_v36  ;;  %v4067_v62 = vunpack.c.l.s8.bf16 %v3803_v45  ;;  %v4074_v36 = vunpack.c.h.s8.bf16 %v3802_v23  ;;  %v3836_v23 = vld [vmem:[%s7890_s6 + $0x178] sm:$0xff] }
 0x6c1   : > { %4704 = vmatprep.subr.bf16.mxu0 %v4526_v9  ;;  %4868 = vmatprep.subr.bf16.mxu1 %v4528_v47  ;;  %v4076_v9 = vunpack.c.h.s8.bf16 %v3804_v30  ;;  %v3812_v47 = vld [vmem:[%s7890_s6 + $0xb8] sm:$0xff]  ;;  %v4132_v32 = vunpack.c.l.s8.bf16 %v3836_v23 }
 0x6c2   : > { %v4084_v34 = vunpack.c.l.s8.bf16 %v3812_v47 }
 0x6c4   : > { %4705 = vmatpush1.bf16.msra.mxu0 %v4525_v51  ;;  %4869 = vmatpush1.bf16.msra.mxu1 %v4527_v52  ;;  %v3809_v52 = vld [vmem:[%s7890_s6 + $0xa0] sm:$0xff] }
 0x6c5   : > { %4706 = vmatprep.subr.bf16.mxu0 %v4534_v29  ;;  %4870 = vmatprep.subr.bf16.mxu1 %v4536_v0  ;;  %v3811_v29 = vld [vmem:[%s7890_s6 + $0xb0] sm:$0xff]  ;;  %v4081_v0 = vunpack.c.l.s8.bf16 %v3809_v52  ;;  %v4089_v3 = vunpack.c.h.s8.bf16 %v3809_v52 }
 0x6c6   : > { %v4083_v57 = vunpack.c.l.s8.bf16 %v3811_v29 }
 0x6c8   : > { %4707 = vmatpush1.bf16.msra.mxu0 %v4533_v58  ;;  %4871 = vmatpush1.bf16.msra.mxu1 %v4535_v60  ;;  %v4092_v58 = vunpack.c.h.s8.bf16 %v3812_v47  ;;  %v3818_v60 = vld [vmem:[%s7890_s6 + $0xe8] sm:$0xff] }
 0x6c9   : > { %4708 = vmatprep.subr.bf16.mxu0 %v4542_v38  ;;  %4872 = vmatprep.subr.bf16.mxu1 %v4544_v5  ;;  %v4091_v38 = vunpack.c.h.s8.bf16 %v3811_v29  ;;  %v4098_v5 = vunpack.c.l.s8.bf16 %v3818_v60 }
 0x6cc   : > { %4709 = vmatpush1.bf16.msra.mxu0 %v4541_v6  ;;  %4873 = vmatpush1.bf16.msra.mxu1 %v4543_v8  ;;  %v3819_v6 = vld [vmem:[%s7890_s6 + $0xf0] sm:$0xff]  ;;  %v4097_v8 = vunpack.c.l.s8.bf16 %v3817_v4 }
 0x6cd   : > { %4710 = vmatprep.subr.bf16.mxu0 %v4550_v7  ;;  %4874 = vmatprep.subr.bf16.mxu1 %v4552_v16  ;;  %v4099_v13 = vunpack.c.l.s8.bf16 %v3819_v6  ;;  %v4106_v7 = vunpack.c.h.s8.bf16 %v3818_v60  ;;  %v4108_v16 = vunpack.c.h.s8.bf16 %v3820_v12  ;;  %v3852_v60 = vld [vmem:[%s7890_s6 + $0x1f8] sm:$0xff] }
 0x6d0   : > { %4711 = vmatpush1.bf16.msra.mxu0 %v4549_v19  ;;  %4875 = vmatpush1.bf16.msra.mxu1 %v4551_v14  ;;  %v4105_v19 = vunpack.c.h.s8.bf16 %v3817_v4  ;;  %v4107_v14 = vunpack.c.h.s8.bf16 %v3819_v6  ;;  %v4164_v4 = vunpack.c.l.s8.bf16 %v3852_v60 }
 0x6d1   : > { %4885 = vmatprep.subr.bf16.mxu0 %v4050_v56  ;;  %5049 = vmatprep.subr.bf16.mxu1 %v4052_v31  ;;  %v3825_v56 = vld [vmem:[%s7890_s6 + $0x120] sm:$0xff]  ;;  %v4116_v31 = vunpack.c.l.s8.bf16 %v3828_v15 }
 0x6d2   : > { %v4113_v26 = vunpack.c.l.s8.bf16 %v3825_v56  ;;  %v4121_v30 = vunpack.c.h.s8.bf16 %v3825_v56 }
 0x6d3   : > { %4713 = vmatmul.mubr.bf16.vlgmr.msra.gmra.mrb[16].mxu0 %v8775_v20  ;;  %4877 = vmatmul.mubr.bf16.vlgmr.msra.gmra.mrb[16].mxu1 %v8775_v20 }
 0x6d4   : > { %4886 = vmatpush1.bf16.msra.mxu0 %v4049_v17  ;;  %4917 = vmatprep.mubr.bf16.mxu0 %v8568_v55  ;;  %v4115_v17 = vunpack.c.l.s8.bf16 %v3827_v33 }
 0x6d5   : > { %5050 = vmatpush1.bf16.msra.mxu1 %v4051_v63  ;;  %5081 = vmatprep.mubr.bf16.mxu1 %v8568_v55  ;;  %v3810_v55 = vld [vmem:[%s7890_s6 + $0xa8] sm:$0xff]  ;;  %v4122_v63 = vunpack.c.h.s8.bf16 %v3826_v48  ;;  %v3860_v48 = vld [vmem:[%s7890_s6 + $0x238] sm:$0xff] }
 0x6d6   : > { %4887 = vmatprep.subr.bf16.mxu0 %v4058_v37  ;;  %5051 = vmatprep.subr.bf16.mxu1 %v4060_v40  ;;  %v4082_v51 = vunpack.c.l.s8.bf16 %v3810_v55  ;;  %v4090_v53 = vunpack.c.h.s8.bf16 %v3810_v55  ;;  %v4124_v37 = vunpack.c.h.s8.bf16 %v3828_v15  ;;  %v3834_v40 = vld [vmem:[%s7890_s6 + $0x168] sm:$0xff]  ;;  %v3844_v55 = vld [vmem:[%s7890_s6 + $0x1b8] sm:$0xff]  ;;  %v4180_v56 = vunpack.c.l.s8.bf16 %v3860_v48 }
 0x6d7   : > { %v4148_v52 = vunpack.c.l.s8.bf16 %v3844_v55 }
 0x6d8   : > { %4888 = vmatpush1.bf16.msra.mxu0 %v4057_v50  ;;  %v4123_v50 = vunpack.c.h.s8.bf16 %v3827_v33 }
 0x6d9   : > { %5052 = vmatpush1.bf16.msra.mxu1 %v4059_v2  ;;  %4889 = vmatprep.subr.bf16.mxu0 %v4066_v39  ;;  %v4130_v2 = vunpack.c.l.s8.bf16 %v3834_v40  ;;  %v3833_v39 = vld [vmem:[%s7890_s6 + $0x160] sm:$0xff] }
 0x6da   : > { %5053 = vmatprep.subr.bf16.mxu1 %v4068_v25  ;;  %v3835_v25 = vld [vmem:[%s7890_s6 + $0x170] sm:$0xff]  ;;  %v4129_v45 = vunpack.c.l.s8.bf16 %v3833_v39  ;;  %v4137_v47 = vunpack.c.h.s8.bf16 %v3833_v39 }
 0x6dc   : > { %4890 = vmatpush1.bf16.msra.mxu0 %v4065_v35  ;;  %v4131_v35 = vunpack.c.l.s8.bf16 %v3835_v25 }
 0x6dd   : > { %5054 = vmatpush1.bf16.msra.mxu1 %v4067_v62  ;;  %4891 = vmatprep.subr.bf16.mxu0 %v4074_v36  ;;  %v4138_v62 = vunpack.c.h.s8.bf16 %v3834_v40  ;;  %v4140_v36 = vunpack.c.h.s8.bf16 %v3836_v23  ;;  %v3868_v40 = vld [vmem:[%s7890_s6 + $0x278] sm:$0xff] }
 0x6de   : > { %5055 = vmatprep.subr.bf16.mxu1 %v4076_v9  ;;  %v3842_v9 = vld [vmem:[%s7890_s6 + $0x1a8] sm:$0xff]  ;;  %v4196_v39 = vunpack.c.l.s8.bf16 %v3868_v40 }
 0x6e0   : > { %4892 = vmatpush1.bf16.msra.mxu0 %v4073_v49  ;;  %v4139_v49 = vunpack.c.h.s8.bf16 %v3835_v25 }
 0x6e1   : > { %5056 = vmatpush1.bf16.msra.mxu1 %v4075_v46  ;;  %4893 = vmatprep.subr.bf16.mxu0 %v4082_v51  ;;  %v4146_v46 = vunpack.c.l.s8.bf16 %v3842_v9  ;;  %v3841_v51 = vld [vmem:[%s7890_s6 + $0x1a0] sm:$0xff] }
 0x6e2   : > { %5057 = vmatprep.subr.bf16.mxu1 %v4084_v34  ;;  %v3843_v34 = vld [vmem:[%s7890_s6 + $0x1b0] sm:$0xff]  ;;  %v4145_v29 = vunpack.c.l.s8.bf16 %v3841_v51  ;;  %v4153_v12 = vunpack.c.h.s8.bf16 %v3841_v51 }
 0x6e4   : > { %4894 = vmatpush1.bf16.msra.mxu0 %v4081_v0  ;;  %v4147_v0 = vunpack.c.l.s8.bf16 %v3843_v34 }
 0x6e5   : > { %5058 = vmatpush1.bf16.msra.mxu1 %v4083_v57  ;;  %4895 = vmatprep.subr.bf16.mxu0 %v4090_v53  ;;  %v4154_v57 = vunpack.c.h.s8.bf16 %v3842_v9  ;;  %v4156_v53 = vunpack.c.h.s8.bf16 %v3844_v55 }
 0x6e6   : > { %5059 = vmatprep.subr.bf16.mxu1 %v4092_v58  ;;  %v3850_v58 = vld [vmem:[%s7890_s6 + $0x1e8] sm:$0xff] }
 0x6e8   : > { %4896 = vmatpush1.bf16.msra.mxu0 %v4089_v3  ;;  %v4155_v3 = vunpack.c.h.s8.bf16 %v3843_v34 }
 0x6e9   : > { %5060 = vmatpush1.bf16.msra.mxu1 %v4091_v38  ;;  %4897 = vmatprep.subr.bf16.mxu0 %v4098_v5  ;;  %v4162_v38 = vunpack.c.l.s8.bf16 %v3850_v58  ;;  %v3849_v5 = vld [vmem:[%s7890_s6 + $0x1e0] sm:$0xff] }
 0x6ea   : > { %5061 = vmatprep.subr.bf16.mxu1 %v4100_v61  ;;  %v3851_v61 = vld [vmem:[%s7890_s6 + $0x1f0] sm:$0xff]  ;;  %v4161_v6 = vunpack.c.l.s8.bf16 %v3849_v5  ;;  %v4169_v15 = vunpack.c.h.s8.bf16 %v3849_v5 }
 0x6ec   : > { %4898 = vmatpush1.bf16.msra.mxu0 %v4097_v8  ;;  %v4163_v8 = vunpack.c.l.s8.bf16 %v3851_v61 }
 0x6ed   : > { %5062 = vmatpush1.bf16.msra.mxu1 %v4099_v13  ;;  %4899 = vmatprep.subr.bf16.mxu0 %v4106_v7  ;;  %v4170_v13 = vunpack.c.h.s8.bf16 %v3850_v58  ;;  %v4172_v7 = vunpack.c.h.s8.bf16 %v3852_v60 }
 0x6ee   : > { %5063 = vmatprep.subr.bf16.mxu1 %v4108_v16  ;;  %v3858_v16 = vld [vmem:[%s7890_s6 + $0x228] sm:$0xff] }
 0x6f0   : > { %4900 = vmatpush1.bf16.msra.mxu0 %v4105_v19  ;;  %v4171_v19 = vunpack.c.h.s8.bf16 %v3851_v61 }
 0x6f1   : > { %5064 = vmatpush1.bf16.msra.mxu1 %v4107_v14  ;;  %4901 = vmatprep.subr.bf16.mxu0 %v4114_v27  ;;  %v4178_v14 = vunpack.c.l.s8.bf16 %v3858_v16  ;;  %v3857_v27 = vld [vmem:[%s7890_s6 + $0x220] sm:$0xff] }
 0x6f2   : > { %5065 = vmatprep.subr.bf16.mxu1 %v4116_v31  ;;  %v3859_v31 = vld [vmem:[%s7890_s6 + $0x230] sm:$0xff]  ;;  %v4177_v33 = vunpack.c.l.s8.bf16 %v3857_v27  ;;  %v4185_v23 = vunpack.c.h.s8.bf16 %v3857_v27 }
 0x6f4   : > { %4902 = vmatpush1.bf16.msra.mxu0 %v4113_v26  ;;  %v4179_v26 = vunpack.c.l.s8.bf16 %v3859_v31 }
 0x6f5   : > { %5066 = vmatpush1.bf16.msra.mxu1 %v4115_v17  ;;  %4903 = vmatprep.subr.bf16.mxu0 %v4122_v63  ;;  %v4186_v17 = vunpack.c.h.s8.bf16 %v3858_v16  ;;  %v3866_v63 = vld [vmem:[%s7890_s6 + $0x268] sm:$0xff] }
 0x6f6   : > { %5067 = vmatprep.subr.bf16.mxu1 %v4124_v37  ;;  %v4188_v37 = vunpack.c.h.s8.bf16 %v3860_v48 }
 0x6f8   : > { %4904 = vmatpush1.bf16.msra.mxu0 %v4121_v30  ;;  %v4187_v30 = vunpack.c.h.s8.bf16 %v3859_v31 }
 0x6f9   : > { %5068 = vmatpush1.bf16.msra.mxu1 %v4123_v50  ;;  %4905 = vmatprep.subr.bf16.mxu0 %v4130_v2  ;;  %v4194_v50 = vunpack.c.l.s8.bf16 %v3866_v63  ;;  %v3865_v2 = vld [vmem:[%s7890_s6 + $0x260] sm:$0xff] }
 0x6fa   : > { %5069 = vmatprep.subr.bf16.mxu1 %v4132_v32  ;;  %v3867_v32 = vld [vmem:[%s7890_s6 + $0x270] sm:$0xff]  ;;  %v4193_v25 = vunpack.c.l.s8.bf16 %v3865_v2  ;;  %v4201_v9 = vunpack.c.h.s8.bf16 %v3865_v2 }
 0x6fc   : > { %4906 = vmatpush1.bf16.msra.mxu0 %v4129_v45  ;;  %v4202_v45 = vunpack.c.h.s8.bf16 %v3866_v63 }
 0x6fd   : > { %5070 = vmatpush1.bf16.msra.mxu1 %v4131_v35  ;;  %4907 = vmatprep.subr.bf16.mxu0 %v4138_v62  ;;  %v4204_v35 = vunpack.c.h.s8.bf16 %v3868_v40  ;;  %v3874_v62 = vld [vmem:[%s7890_s6 + $0x2a8] sm:$0xff] }
 0x6fe   : > { %5071 = vmatprep.subr.bf16.mxu1 %v4140_v36  ;;  %v3876_v36 = vld [vmem:[%s7890_s6 + $0x2b8] sm:$0xff]  ;;  %v4210_v55 = vunpack.c.l.s8.bf16 %v3874_v62  ;;  %v4218_v34 = vunpack.c.h.s8.bf16 %v3874_v62 }
 0x700   : > { %4908 = vmatpush1.bf16.msra.mxu0 %v4137_v47  ;;  %v3873_v47 = vld [vmem:[%s7890_s6 + $0x2a0] sm:$0xff] }
 0x701   : > { %5072 = vmatpush1.bf16.msra.mxu1 %v4139_v49  ;;  %4909 = vmatprep.subr.bf16.mxu0 %v4146_v46  ;;  %v4212_v49 = vunpack.c.l.s8.bf16 %v3876_v36  ;;  %v3875_v46 = vld [vmem:[%s7890_s6 + $0x2b0] sm:$0xff]  ;;  %v4209_v51 = vunpack.c.l.s8.bf16 %v3873_v47 }
 0x702   : > { %5073 = vmatprep.subr.bf16.mxu1 %v4148_v52  ;;  %v4211_v52 = vunpack.c.l.s8.bf16 %v3875_v46  ;;  %v4219_v58 = vunpack.c.h.s8.bf16 %v3875_v46 }
 0x704   : > { %4910 = vmatpush1.bf16.msra.mxu0 %v4145_v29  ;;  %v4220_v29 = vunpack.c.h.s8.bf16 %v3876_v36 }
 0x705   : > { %5074 = vmatpush1.bf16.msra.mxu1 %v4147_v0  ;;  %4911 = vmatprep.subr.bf16.mxu0 %v4154_v57  ;;  %v3882_v0 = vld [vmem:[%s7890_s6 + $0x2e8] sm:$0xff]  ;;  %v3884_v57 = vld [vmem:[%s7890_s6 + $0x2f8] sm:$0xff] }
 0x706   : > { %5075 = vmatprep.subr.bf16.mxu1 %v4156_v53  ;;  %v4217_v53 = vunpack.c.h.s8.bf16 %v3873_v47  ;;  %v4226_v60 = vunpack.c.l.s8.bf16 %v3882_v0  ;;  %v4234_v61 = vunpack.c.h.s8.bf16 %v3882_v0 }
 0x708   : > { %4912 = vmatpush1.bf16.msra.mxu0 %v4153_v12  ;;  %v3881_v12 = vld [vmem:[%s7890_s6 + $0x2e0] sm:$0xff] }
 0x709   : > { %5076 = vmatpush1.bf16.msra.mxu1 %v4155_v3  ;;  %4913 = vmatprep.subr.bf16.mxu0 %v4162_v38  ;;  %v4228_v3 = vunpack.c.l.s8.bf16 %v3884_v57  ;;  %v3883_v38 = vld [vmem:[%s7890_s6 + $0x2f0] sm:$0xff]  ;;  %v4225_v5 = vunpack.c.l.s8.bf16 %v3881_v12 }
 0x70a   : > { %5077 = vmatprep.subr.bf16.mxu1 %v4164_v4  ;;  %v4227_v4 = vunpack.c.l.s8.bf16 %v3883_v38  ;;  %v4235_v16 = vunpack.c.h.s8.bf16 %v3883_v38 }
 0x70c   : > { %4914 = vmatpush1.bf16.msra.mxu0 %v4161_v6  ;;  %v4236_v6 = vunpack.c.h.s8.bf16 %v3884_v57 }
 0x70d   : > { %5078 = vmatpush1.bf16.msra.mxu1 %v4163_v8  ;;  %4915 = vmatprep.subr.bf16.mxu0 %v4170_v13  ;;  %v3890_v8 = vld [vmem:[%s7890_s6 + $0x328] sm:$0xff]  ;;  %v3892_v13 = vld [vmem:[%s7890_s6 + $0x338] sm:$0xff] }
 0x70e   : > { %5079 = vmatprep.subr.bf16.mxu1 %v4172_v7  ;;  %v4233_v7 = vunpack.c.h.s8.bf16 %v3881_v12  ;;  %v4242_v48 = vunpack.c.l.s8.bf16 %v3890_v8  ;;  %v4250_v31 = vunpack.c.h.s8.bf16 %v3890_v8 }
 0x710   : > { %4916 = vmatpush1.bf16.msra.mxu0 %v4169_v15  ;;  %v3889_v15 = vld [vmem:[%s7890_s6 + $0x320] sm:$0xff] }
 0x711   : > { %5080 = vmatpush1.bf16.msra.mxu1 %v4171_v19  ;;  %4926 = vmatprep.subr.bf16.mxu0 %v4178_v14  ;;  %v4244_v19 = vunpack.c.l.s8.bf16 %v3892_v13  ;;  %v3891_v14 = vld [vmem:[%s7890_s6 + $0x330] sm:$0xff]  ;;  %v4241_v27 = vunpack.c.l.s8.bf16 %v3889_v15  ;;  %v4249_v63 = vunpack.c.h.s8.bf16 %v3889_v15 }
 0x712   : > { %5090 = vmatprep.subr.bf16.mxu1 %v4180_v56  ;;  %v4243_v56 = vunpack.c.l.s8.bf16 %v3891_v14 }
 0x713   : > { %4918 = vmatmul.mubr.bf16.vlgmr.msra.gmra.mrb[20].mxu0 %v8615_v22 }
 0x714   : > { %5082 = vmatmul.mubr.bf16.vlgmr.msra.gmra.mrb[20].mxu1 %v8615_v22  ;;  %4927 = vmatpush1.bf16.msra.mxu0 %v4177_v33  ;;  %v4195_v22 = vunpack.c.l.s8.bf16 %v3867_v32  ;;  %v4252_v33 = vunpack.c.h.s8.bf16 %v3892_v13 }
 0x715   : > { %4958 = vmatprep.mubr.bf16.mxu0 %v8618_v59  ;;  %5091 = vmatpush1.bf16.msra.mxu1 %v4179_v26  ;;  %v3898_v26 = vld [vmem:[%s7890_s6 + $0x368] sm:$0xff] }
 0x716   : > { %5122 = vmatprep.mubr.bf16.mxu1 %v8618_v59  ;;  %4928 = vmatprep.subr.bf16.mxu0 %v4186_v17  ;;  %v4203_v59 = vunpack.c.h.s8.bf16 %v3867_v32  ;;  %v3900_v17 = vld [vmem:[%s7890_s6 + $0x378] sm:$0xff]  ;;  %v4258_v40 = vunpack.c.l.s8.bf16 %v3898_v26  ;;  %v4266_v32 = vunpack.c.h.s8.bf16 %v3898_v26 }
 0x717   : > { %5092 = vmatprep.subr.bf16.mxu1 %v4188_v37  ;;  %v4251_v37 = vunpack.c.h.s8.bf16 %v3891_v14 }
 0x718   : > { %4929 = vmatpush1.bf16.msra.mxu0 %v4185_v23  ;;  %v3897_v23 = vld [vmem:[%s7890_s6 + $0x360] sm:$0xff] }
 0x719   : > { %5093 = vmatpush1.bf16.msra.mxu1 %v4187_v30  ;;  %4930 = vmatprep.subr.bf16.mxu0 %v4194_v50  ;;  %v4260_v30 = vunpack.c.l.s8.bf16 %v3900_v17  ;;  %v3899_v50 = vld [vmem:[%s7890_s6 + $0x370] sm:$0xff]  ;;  %v4257_v2 = vunpack.c.l.s8.bf16 %v3897_v23 }
 0x71a   : > { %5094 = vmatprep.subr.bf16.mxu1 %v4196_v39  ;;  %v4259_v39 = vunpack.c.l.s8.bf16 %v3899_v50  ;;  %v4267_v62 = vunpack.c.h.s8.bf16 %v3899_v50 }
 0x71c   : > { %4931 = vmatpush1.bf16.msra.mxu0 %v4193_v25  ;;  %v4268_v25 = vunpack.c.h.s8.bf16 %v3900_v17 }
 0x71d   : > { %5095 = vmatpush1.bf16.msra.mxu1 %v4195_v22  ;;  %4932 = vmatprep.subr.bf16.mxu0 %v4202_v45  ;;  %v3906_v22 = vld [vmem:[%s7890_s6 + $0x3a8] sm:$0xff]  ;;  %v3908_v45 = vld [vmem:[%s7890_s6 + $0x3b8] sm:$0xff] }
 0x71e   : > { %5096 = vmatprep.subr.bf16.mxu1 %v4204_v35  ;;  %v4265_v35 = vunpack.c.h.s8.bf16 %v3897_v23  ;;  %v4274_v36 = vunpack.c.l.s8.bf16 %v3906_v22  ;;  %v4282_v46 = vunpack.c.h.s8.bf16 %v3906_v22  ;;  %v3937_v22 = vld [vmem:[%s7890_s6 + $0x4a0] sm:$0xff] }
 0x720   : > { %4933 = vmatpush1.bf16.msra.mxu0 %v4201_v9  ;;  %v3905_v9 = vld [vmem:[%s7890_s6 + $0x3a0] sm:$0xff] }
 0x721   : > { %5097 = vmatpush1.bf16.msra.mxu1 %v4203_v59  ;;  %4934 = vmatprep.subr.bf16.mxu0 %v4210_v55  ;;  %v4276_v59 = vunpack.c.l.s8.bf16 %v3908_v45  ;;  %v3907_v55 = vld [vmem:[%s7890_s6 + $0x3b0] sm:$0xff]  ;;  %v4273_v47 = vunpack.c.l.s8.bf16 %v3905_v9 }
 0x722   : > { %5098 = vmatprep.subr.bf16.mxu1 %v4212_v49  ;;  %v4275_v49 = vunpack.c.l.s8.bf16 %v3907_v55  ;;  %v4283_v0 = vunpack.c.h.s8.bf16 %v3907_v55  ;;  %v3946_v55 = vld [vmem:[%s7890_s6 + $0x4e8] sm:$0xff] }
 0x724   : > { %4935 = vmatpush1.bf16.msra.mxu0 %v4209_v51  ;;  %v4284_v51 = vunpack.c.h.s8.bf16 %v3908_v45 }
 0x725   : > { %5099 = vmatpush1.bf16.msra.mxu1 %v4211_v52  ;;  %4936 = vmatprep.subr.bf16.mxu0 %v4218_v34  ;;  %v3914_v52 = vld [vmem:[%s7890_s6 + $0x3e8] sm:$0xff]  ;;  %v3916_v34 = vld [vmem:[%s7890_s6 + $0x3f8] sm:$0xff] }
 0x726   : > { %5100 = vmatprep.subr.bf16.mxu1 %v4220_v29  ;;  %v4281_v29 = vunpack.c.h.s8.bf16 %v3905_v9  ;;  %v4290_v57 = vunpack.c.l.s8.bf16 %v3914_v52  ;;  %v4298_v38 = vunpack.c.h.s8.bf16 %v3914_v52  ;;  %v3945_v52 = vld [vmem:[%s7890_s6 + $0x4e0] sm:$0xff] }
 0x728   : > { %4937 = vmatpush1.bf16.msra.mxu0 %v4217_v53  ;;  %v3913_v53 = vld [vmem:[%s7890_s6 + $0x3e0] sm:$0xff] }
 0x729   : > { %5101 = vmatpush1.bf16.msra.mxu1 %v4219_v58  ;;  %4938 = vmatprep.subr.bf16.mxu0 %v4226_v60  ;;  %v4292_v58 = vunpack.c.l.s8.bf16 %v3916_v34  ;;  %v3915_v60 = vld [vmem:[%s7890_s6 + $0x3f0] sm:$0xff]  ;;  %v4289_v12 = vunpack.c.l.s8.bf16 %v3913_v53 }
 0x72a   : > { %5102 = vmatprep.subr.bf16.mxu1 %v4228_v3  ;;  %v4291_v3 = vunpack.c.l.s8.bf16 %v3915_v60  ;;  %v4299_v8 = vunpack.c.h.s8.bf16 %v3915_v60  ;;  %v3954_v60 = vld [vmem:[%s7890_s6 + $0x528] sm:$0xff] }
 0x72c   : > { %4939 = vmatpush1.bf16.msra.mxu0 %v4225_v5  ;;  %v4300_v5 = vunpack.c.h.s8.bf16 %v3916_v34 }
 0x72d   : > { %5103 = vmatpush1.bf16.msra.mxu1 %v4227_v4  ;;  %4940 = vmatprep.subr.bf16.mxu0 %v4234_v61  ;;  %v3922_v4 = vld [vmem:[%s7890_s6 + $0x428] sm:$0xff]  ;;  %v3924_v61 = vld [vmem:[%s7890_s6 + $0x438] sm:$0xff] }
 0x72e   : > { %5104 = vmatprep.subr.bf16.mxu1 %v4236_v6  ;;  %v4297_v6 = vunpack.c.h.s8.bf16 %v3913_v53  ;;  %v4306_v13 = vunpack.c.l.s8.bf16 %v3922_v4  ;;  %v4314_v14 = vunpack.c.h.s8.bf16 %v3922_v4  ;;  %v4362_v53 = vunpack.c.h.s8.bf16 %v3946_v55  ;;  %v3953_v4 = vld [vmem:[%s7890_s6 + $0x520] sm:$0xff] }
 0x730   : > { %4941 = vmatpush1.bf16.msra.mxu0 %v4233_v7  ;;  %v3921_v7 = vld [vmem:[%s7890_s6 + $0x420] sm:$0xff] }
 0x731   : > { %5105 = vmatpush1.bf16.msra.mxu1 %v4235_v16  ;;  %4942 = vmatprep.subr.bf16.mxu0 %v4242_v48  ;;  %v4308_v16 = vunpack.c.l.s8.bf16 %v3924_v61  ;;  %v3923_v48 = vld [vmem:[%s7890_s6 + $0x430] sm:$0xff]  ;;  %v4305_v15 = vunpack.c.l.s8.bf16 %v3921_v7 }
 0x732   : > { %5106 = vmatprep.subr.bf16.mxu1 %v4244_v19  ;;  %v4307_v19 = vunpack.c.l.s8.bf16 %v3923_v48  ;;  %v4315_v26 = vunpack.c.h.s8.bf16 %v3923_v48  ;;  %v3962_v48 = vld [vmem:[%s7890_s6 + $0x568] sm:$0xff] }
 0x734   : > { %4943 = vmatpush1.bf16.msra.mxu0 %v4241_v27  ;;  %v3930_v27 = vld [vmem:[%s7890_s6 + $0x468] sm:$0xff] }
 0x735   : > { %5107 = vmatpush1.bf16.msra.mxu1 %v4243_v56  ;;  %4944 = vmatprep.subr.bf16.mxu0 %v4250_v31  ;;  %v4316_v56 = vunpack.c.h.s8.bf16 %v3924_v61  ;;  %v3932_v31 = vld [vmem:[%s7890_s6 + $0x478] sm:$0xff]  ;;  %v4322_v17 = vunpack.c.l.s8.bf16 %v3930_v27 }
 0x736   : > { %5108 = vmatprep.subr.bf16.mxu1 %v4252_v33  ;;  %v4313_v33 = vunpack.c.h.s8.bf16 %v3921_v7  ;;  %v4332_v50 = vunpack.c.h.s8.bf16 %v3932_v31  ;;  %v4378_v7 = vunpack.c.h.s8.bf16 %v3954_v60 }
 0x738   : > { %4945 = vmatpush1.bf16.msra.mxu0 %v4249_v63  ;;  %v3929_v63 = vld [vmem:[%s7890_s6 + $0x460] sm:$0xff] }
 0x739   : > { %5109 = vmatpush1.bf16.msra.mxu1 %v4251_v37  ;;  %4946 = vmatprep.subr.bf16.mxu0 %v4258_v40  ;;  %v4324_v37 = vunpack.c.l.s8.bf16 %v3932_v31  ;;  %v3931_v40 = vld [vmem:[%s7890_s6 + $0x470] sm:$0xff]  ;;  %v4321_v23 = vunpack.c.l.s8.bf16 %v3929_v63 }
 0x73a   : > { %5110 = vmatprep.subr.bf16.mxu1 %v4260_v30  ;;  %v4330_v30 = vunpack.c.h.s8.bf16 %v3930_v27  ;;  %v4386_v27 = vunpack.c.l.s8.bf16 %v3962_v48 }
 0x73c   : > { %4947 = vmatpush1.bf16.msra.mxu0 %v4257_v2  ;;  %v3938_v2 = vld [vmem:[%s7890_s6 + $0x4a8] sm:$0xff] }
 0x73d   : > { %5111 = vmatpush1.bf16.msra.mxu1 %v4259_v39  ;;  %4948 = vmatprep.subr.bf16.mxu0 %v4266_v32  ;;  %v3940_v39 = vld [vmem:[%s7890_s6 + $0x4b8] sm:$0xff]  ;;  %v4329_v32 = vunpack.c.h.s8.bf16 %v3929_v63  ;;  %v4346_v9 = vunpack.c.h.s8.bf16 %v3938_v2  ;;  %v4394_v63 = vunpack.c.h.s8.bf16 %v3962_v48  ;;  %v3993_v48 = vld [vmem:[%s7890_s6 + $0x660] sm:$0xff] }
 0x73e   : > { %5112 = vmatprep.subr.bf16.mxu1 %v4268_v25  ;;  %v4338_v25 = vunpack.c.l.s8.bf16 %v3938_v2  ;;  %v4340_v45 = vunpack.c.l.s8.bf16 %v3940_v39  ;;  %v3969_v2 = vld [vmem:[%s7890_s6 + $0x5a0] sm:$0xff] }
 0x740   : > { %4949 = vmatpush1.bf16.msra.mxu0 %v4265_v35  ;;  %v3939_v35 = vld [vmem:[%s7890_s6 + $0x4b0] sm:$0xff] }
 0x741   : > { %5113 = vmatpush1.bf16.msra.mxu1 %v4267_v62  ;;  %4950 = vmatprep.subr.bf16.mxu0 %v4274_v36  ;;  %v4337_v62 = vunpack.c.l.s8.bf16 %v3937_v22  ;;  %v4339_v36 = vunpack.c.l.s8.bf16 %v3939_v35 }
 0x742   : > { %5114 = vmatprep.subr.bf16.mxu1 %v4276_v59  ;;  %v4348_v59 = vunpack.c.h.s8.bf16 %v3940_v39 }
 0x744   : > { %4951 = vmatpush1.bf16.msra.mxu0 %v4273_v47  ;;  %v3948_v47 = vld [vmem:[%s7890_s6 + $0x4f8] sm:$0xff] }
 0x745   : > { %5115 = vmatpush1.bf16.msra.mxu1 %v4275_v49  ;;  %4952 = vmatprep.subr.bf16.mxu0 %v4282_v46  ;;  %v4345_v49 = vunpack.c.h.s8.bf16 %v3937_v22  ;;  %v4347_v46 = vunpack.c.h.s8.bf16 %v3939_v35  ;;  %v4356_v34 = vunpack.c.l.s8.bf16 %v3948_v47  ;;  %v3978_v35 = vld [vmem:[%s7890_s6 + $0x5e8] sm:$0xff] }
 0x746   : > { %5116 = vmatprep.subr.bf16.mxu1 %v4284_v51  ;;  %v4354_v51 = vunpack.c.l.s8.bf16 %v3946_v55  ;;  %v3977_v55 = vld [vmem:[%s7890_s6 + $0x5e0] sm:$0xff] }
 0x748   : > { %4953 = vmatpush1.bf16.msra.mxu0 %v4281_v29  ;;  %v3947_v29 = vld [vmem:[%s7890_s6 + $0x4f0] sm:$0xff] }
 0x749   : > { %5117 = vmatpush1.bf16.msra.mxu1 %v4283_v0  ;;  %4954 = vmatprep.subr.bf16.mxu0 %v4290_v57  ;;  %v4353_v0 = vunpack.c.l.s8.bf16 %v3945_v52  ;;  %v4355_v57 = vunpack.c.l.s8.bf16 %v3947_v29 }
 0x74a   : > { %5118 = vmatprep.subr.bf16.mxu1 %v4292_v58  ;;  %v4364_v58 = vunpack.c.h.s8.bf16 %v3948_v47 }
 0x74c   : > { %4955 = vmatpush1.bf16.msra.mxu0 %v4289_v12  ;;  %v3956_v12 = vld [vmem:[%s7890_s6 + $0x538] sm:$0xff] }
 0x74d   : > { %5119 = vmatpush1.bf16.msra.mxu1 %v4291_v3  ;;  %4956 = vmatprep.subr.bf16.mxu0 %v4298_v38  ;;  %v4361_v3 = vunpack.c.h.s8.bf16 %v3945_v52  ;;  %v4363_v38 = vunpack.c.h.s8.bf16 %v3947_v29  ;;  %v4372_v61 = vunpack.c.l.s8.bf16 %v3956_v12  ;;  %v4426_v52 = vunpack.c.h.s8.bf16 %v3978_v35  ;;  %v3986_v29 = vld [vmem:[%s7890_s6 + $0x628] sm:$0xff] }
 0x74e   : > { %5120 = vmatprep.subr.bf16.mxu1 %v4300_v5  ;;  %v4370_v5 = vunpack.c.l.s8.bf16 %v3954_v60  ;;  %v3985_v60 = vld [vmem:[%s7890_s6 + $0x620] sm:$0xff] }
 0x750   : > { %4957 = vmatpush1.bf16.msra.mxu0 %v4297_v6  ;;  %v3955_v6 = vld [vmem:[%s7890_s6 + $0x530] sm:$0xff] }
 0x751   : > { %5121 = vmatpush1.bf16.msra.mxu1 %v4299_v8  ;;  %4967 = vmatprep.subr.bf16.mxu0 %v4306_v13  ;;  %v4369_v8 = vunpack.c.l.s8.bf16 %v3953_v4  ;;  %v4371_v13 = vunpack.c.l.s8.bf16 %v3955_v6 }
 0x752   : > { %5131 = vmatprep.subr.bf16.mxu1 %v4308_v16  ;;  %v4380_v16 = vunpack.c.h.s8.bf16 %v3956_v12 }
 0x753   : > { %4959 = vmatmul.mubr.bf16.vlgmr.msra.gmra.mrb[20].mxu0 %v8660_v54 }
 0x754   : > { %5123 = vmatmul.mubr.bf16.vlgmr.msra.gmra.mrb[20].mxu1 %v8660_v54  ;;  %4968 = vmatpush1.bf16.msra.mxu0 %v4305_v15  ;;  %v4323_v54 = vunpack.c.l.s8.bf16 %v3931_v40  ;;  %v3964_v15 = vld [vmem:[%s7890_s6 + $0x578] sm:$0xff] }
 0x755   : > { %4999 = vmatprep.mubr.bf16.mxu0 %v8724_v21  ;;  %5132 = vmatpush1.bf16.msra.mxu1 %v4307_v19  ;;  %v4377_v19 = vunpack.c.h.s8.bf16 %v3953_v4  ;;  %v4388_v31 = vunpack.c.l.s8.bf16 %v3964_v15  ;;  %v4442_v4 = vunpack.c.h.s8.bf16 %v3986_v29 }
 0x756   : > { %5163 = vmatprep.mubr.bf16.mxu1 %v8724_v21  ;;  %4969 = vmatprep.subr.bf16.mxu0 %v4314_v14  ;;  %v4331_v21 = vunpack.c.h.s8.bf16 %v3931_v40  ;;  %v4379_v14 = vunpack.c.h.s8.bf16 %v3955_v6  ;;  %v3970_v40 = vld [vmem:[%s7890_s6 + $0x5a8] sm:$0xff] }
 0x757   : > { %5133 = vmatprep.subr.bf16.mxu1 %v4316_v56  ;;  %v3961_v56 = vld [vmem:[%s7890_s6 + $0x560] sm:$0xff]  ;;  %v4410_v22 = vunpack.c.h.s8.bf16 %v3970_v40 }
 0x758   : > { %4970 = vmatpush1.bf16.msra.mxu0 %v4313_v33  ;;  %v3963_v33 = vld [vmem:[%s7890_s6 + $0x570] sm:$0xff] }
 0x759   : > { %5134 = vmatpush1.bf16.msra.mxu1 %v4315_v26  ;;  %4971 = vmatprep.subr.bf16.mxu0 %v4322_v17  ;;  %v4385_v26 = vunpack.c.l.s8.bf16 %v3961_v56  ;;  %v4387_v17 = vunpack.c.l.s8.bf16 %v3963_v33 }
 0x75a   : > { %5135 = vmatprep.subr.bf16.mxu1 %v4324_v37  ;;  %v4396_v37 = vunpack.c.h.s8.bf16 %v3964_v15 }
 0x75c   : > { %4972 = vmatpush1.bf16.msra.mxu0 %v4321_v23  ;;  %v3972_v23 = vld [vmem:[%s7890_s6 + $0x5b8] sm:$0xff] }
 0x75d   : > { %5136 = vmatpush1.bf16.msra.mxu1 %v4323_v54  ;;  %4973 = vmatprep.subr.bf16.mxu0 %v4330_v30  ;;  %v4393_v54 = vunpack.c.h.s8.bf16 %v3961_v56  ;;  %v4395_v30 = vunpack.c.h.s8.bf16 %v3963_v33  ;;  %v4404_v39 = vunpack.c.l.s8.bf16 %v3972_v23  ;;  %v4004_v33 = vld [vmem:[%s7890_s6 + $0x6b8] sm:$0xff] }
 0x75e   : > { %5137 = vmatprep.subr.bf16.mxu1 %v4332_v50  ;;  %v4402_v50 = vunpack.c.l.s8.bf16 %v3970_v40  ;;  %v4003_v40 = vld [vmem:[%s7890_s6 + $0x6b0] sm:$0xff] }
 0x760   : > { %4974 = vmatpush1.bf16.msra.mxu0 %v4329_v32  ;;  %v3971_v32 = vld [vmem:[%s7890_s6 + $0x5b0] sm:$0xff] }
 0x761   : > { %5138 = vmatpush1.bf16.msra.mxu1 %v4331_v21  ;;  %4975 = vmatprep.subr.bf16.mxu0 %v4338_v25  ;;  %v4401_v21 = vunpack.c.l.s8.bf16 %v3969_v2  ;;  %v4403_v25 = vunpack.c.l.s8.bf16 %v3971_v32 }
 0x762   : > { %5139 = vmatprep.subr.bf16.mxu1 %v4340_v45  ;;  %v4412_v45 = vunpack.c.h.s8.bf16 %v3972_v23 }
 0x764   : > { %4976 = vmatpush1.bf16.msra.mxu0 %v4337_v62  ;;  %v3980_v62 = vld [vmem:[%s7890_s6 + $0x5f8] sm:$0xff] }
 0x765   : > { %5140 = vmatpush1.bf16.msra.mxu1 %v4339_v36  ;;  %4977 = vmatprep.subr.bf16.mxu0 %v4346_v9  ;;  %v4409_v36 = vunpack.c.h.s8.bf16 %v3969_v2  ;;  %v4411_v9 = vunpack.c.h.s8.bf16 %v3971_v32  ;;  %v4420_v47 = vunpack.c.l.s8.bf16 %v3980_v62  ;;  %v4010_v2 = vld [vmem:[%s7890_s6 + $0x6e8] sm:$0xff] }
 0x766   : > { %5141 = vmatprep.subr.bf16.mxu1 %v4348_v59  ;;  %v4418_v59 = vunpack.c.l.s8.bf16 %v3978_v35 }
 0x768   : > { %4978 = vmatpush1.bf16.msra.mxu0 %v4345_v49  ;;  %v3979_v49 = vld [vmem:[%s7890_s6 + $0x5f0] sm:$0xff] }
 0x769   : > { %5142 = vmatpush1.bf16.msra.mxu1 %v4347_v46  ;;  %4979 = vmatprep.subr.bf16.mxu0 %v4354_v51  ;;  %v4417_v46 = vunpack.c.l.s8.bf16 %v3977_v55  ;;  %v4419_v51 = vunpack.c.l.s8.bf16 %v3979_v49 }
 0x76a   : > { %5143 = vmatprep.subr.bf16.mxu1 %v4356_v34  ;;  %v4428_v34 = vunpack.c.h.s8.bf16 %v3980_v62 }
 0x76c   : > { %4980 = vmatpush1.bf16.msra.mxu0 %v4353_v0  ;;  %v3988_v0 = vld [vmem:[%s7890_s6 + $0x638] sm:$0xff] }
 0x76d   : > { %5144 = vmatpush1.bf16.msra.mxu1 %v4355_v57  ;;  %4981 = vmatprep.subr.bf16.mxu0 %v4362_v53  ;;  %v4425_v57 = vunpack.c.h.s8.bf16 %v3977_v55  ;;  %v4427_v53 = vunpack.c.h.s8.bf16 %v3979_v49  ;;  %v4436_v12 = vunpack.c.l.s8.bf16 %v3988_v0  ;;  %v4444_v6 = vunpack.c.h.s8.bf16 %v3988_v0  ;;  %v4018_v0 = vld [vmem:[%s7890_s6 + $0x728] sm:$0xff] }
 0x76e   : > { %5145 = vmatprep.subr.bf16.mxu1 %v4364_v58  ;;  %v4434_v58 = vunpack.c.l.s8.bf16 %v3986_v29 }
 0x770   : > { %4982 = vmatpush1.bf16.msra.mxu0 %v4361_v3  ;;  %v3987_v3 = vld [vmem:[%s7890_s6 + $0x630] sm:$0xff] }
 0x771   : > { %5146 = vmatpush1.bf16.msra.mxu1 %v4363_v38  ;;  %4983 = vmatprep.subr.bf16.mxu0 %v4370_v5  ;;  %v4433_v38 = vunpack.c.l.s8.bf16 %v3985_v60  ;;  %v4435_v5 = vunpack.c.l.s8.bf16 %v3987_v3 }
 0x772   : > { %5147 = vmatprep.subr.bf16.mxu1 %v4372_v61  ;;  %v3994_v61 = vld [vmem:[%s7890_s6 + $0x668] sm:$0xff] }
 0x774   : > { %4984 = vmatpush1.bf16.msra.mxu0 %v4369_v8  ;;  %v3996_v8 = vld [vmem:[%s7890_s6 + $0x678] sm:$0xff] }
 0x775   : > { %5148 = vmatpush1.bf16.msra.mxu1 %v4371_v13  ;;  %4985 = vmatprep.subr.bf16.mxu0 %v4378_v7  ;;  %v4441_v13 = vunpack.c.h.s8.bf16 %v3985_v60  ;;  %v4443_v7 = vunpack.c.h.s8.bf16 %v3987_v3  ;;  %v4452_v15 = vunpack.c.l.s8.bf16 %v3996_v8  ;;  %v4460_v56 = vunpack.c.h.s8.bf16 %v3996_v8  ;;  %v4026_v8 = vld [vmem:[%s7890_s6 + $0x768] sm:$0xff] }
 0x776   : > { %5149 = vmatprep.subr.bf16.mxu1 %v4380_v16  ;;  %v4450_v16 = vunpack.c.l.s8.bf16 %v3994_v61  ;;  %v4498_v60 = vunpack.c.l.s8.bf16 %v4018_v0 }
 0x778   : > { %4986 = vmatpush1.bf16.msra.mxu0 %v4377_v19  ;;  %v3995_v19 = vld [vmem:[%s7890_s6 + $0x670] sm:$0xff] }
 0x779   : > { %5150 = vmatpush1.bf16.msra.mxu1 %v4379_v14  ;;  %4987 = vmatprep.subr.bf16.mxu0 %v4386_v27  ;;  %v4449_v14 = vunpack.c.l.s8.bf16 %v3993_v48  ;;  %v4458_v27 = vunpack.c.h.s8.bf16 %v3994_v61  ;;  %v4506_v61 = vunpack.c.h.s8.bf16 %v4018_v0 }
 0x77a   : > { %5151 = vmatprep.subr.bf16.mxu1 %v4388_v31  ;;  %v4002_v31 = vld [vmem:[%s7890_s6 + $0x6a8] sm:$0xff] }
 0x77c   : > { %4988 = vmatpush1.bf16.msra.mxu0 %v4385_v26  ;;  %v4457_v26 = vunpack.c.h.s8.bf16 %v3993_v48  ;;  %v4514_v48 = vunpack.c.l.s8.bf16 %v4026_v8 }
 0x77d   : > { %5152 = vmatpush1.bf16.msra.mxu1 %v4387_v17  ;;  %4989 = vmatprep.subr.bf16.mxu0 %v4394_v63  ;;  %v4466_v17 = vunpack.c.l.s8.bf16 %v4002_v31  ;;  %v4001_v63 = vld [vmem:[%s7890_s6 + $0x6a0] sm:$0xff] }
 0x77e   : > { %5153 = vmatprep.subr.bf16.mxu1 %v4396_v37  ;;  %v4468_v37 = vunpack.c.l.s8.bf16 %v4004_v33  ;;  %v4465_v23 = vunpack.c.l.s8.bf16 %v4001_v63  ;;  %v4473_v32 = vunpack.c.h.s8.bf16 %v4001_v63 }
 0x780   : > { %4990 = vmatpush1.bf16.msra.mxu0 %v4393_v54  ;;  %v4467_v54 = vunpack.c.l.s8.bf16 %v4003_v40 }
 0x781   : > { %5154 = vmatpush1.bf16.msra.mxu1 %v4395_v30  ;;  %4991 = vmatprep.subr.bf16.mxu0 %v4402_v50  ;;  %v4474_v30 = vunpack.c.h.s8.bf16 %v4002_v31  ;;  %v4476_v50 = vunpack.c.h.s8.bf16 %v4004_v33  ;;  %v4034_v33 = vld [vmem:[%s7890_s6 + $0x7a8] sm:$0xff] }
 0x782   : > { %5155 = vmatprep.subr.bf16.mxu1 %v4404_v39  ;;  %v4012_v39 = vld [vmem:[%s7890_s6 + $0x6f8] sm:$0xff]  ;;  %v4530_v63 = vunpack.c.l.s8.bf16 %v4034_v33 }
 0x783   : > { %v4484_v62 = vunpack.c.l.s8.bf16 %v4012_v39  ;;  %v4492_v29 = vunpack.c.h.s8.bf16 %v4012_v39 }
 0x784   : > { %4992 = vmatpush1.bf16.msra.mxu0 %v4401_v21  ;;  %v4475_v21 = vunpack.c.h.s8.bf16 %v4003_v40 }
 0x785   : > { %5156 = vmatpush1.bf16.msra.mxu1 %v4403_v25  ;;  %4993 = vmatprep.subr.bf16.mxu0 %v4410_v22  ;;  %v4482_v25 = vunpack.c.l.s8.bf16 %v4010_v2  ;;  %v4009_v22 = vld [vmem:[%s7890_s6 + $0x6e0] sm:$0xff] }
 0x786   : > { %5157 = vmatprep.subr.bf16.mxu1 %v4412_v45  ;;  %v4481_v49 = vunpack.c.l.s8.bf16 %v4009_v22 }
 0x788   : > { %4994 = vmatpush1.bf16.msra.mxu0 %v4409_v36  ;;  %v4011_v36 = vld [vmem:[%s7890_s6 + $0x6f0] sm:$0xff] }
 0x789   : > { %5158 = vmatpush1.bf16.msra.mxu1 %v4411_v9  ;;  %4995 = vmatprep.subr.bf16.mxu0 %v4418_v59 }
 0x78a   : > { %5159 = vmatprep.subr.bf16.mxu1 %v4420_v47 }
 0x78c   : > { %4996 = vmatpush1.bf16.msra.mxu0 %v4417_v46 }
 0x78d   : > { %5160 = vmatpush1.bf16.msra.mxu1 %v4419_v51  ;;  %4997 = vmatprep.subr.bf16.mxu0 %v4426_v52  ;;  %v4483_v52 = vunpack.c.l.s8.bf16 %v4011_v36 }
 0x78e   : > { %5161 = vmatprep.subr.bf16.mxu1 %v4428_v34  ;;  %v4490_v34 = vunpack.c.h.s8.bf16 %v4010_v2  ;;  %v4538_v2 = vunpack.c.h.s8.bf16 %v4034_v33 }
 0x790   : > { %4998 = vmatpush1.bf16.msra.mxu0 %v4425_v57  ;;  %v4020_v57 = vld [vmem:[%s7890_s6 + $0x738] sm:$0xff] }
 0x791   : > { %5162 = vmatpush1.bf16.msra.mxu1 %v4427_v53  ;;  %5008 = vmatprep.subr.bf16.mxu0 %v4434_v58  ;;  %v4489_v53 = vunpack.c.h.s8.bf16 %v4009_v22  ;;  %v4491_v58 = vunpack.c.h.s8.bf16 %v4011_v36  ;;  %v4500_v3 = vunpack.c.l.s8.bf16 %v4020_v57  ;;  %v8931_v22 = vld [vmem:[%s812_s26] sm:$0xff] }
 0x792   : > { %5172 = vmatprep.subr.bf16.mxu1 %v4436_v12  ;;  %v4017_v12 = vld [vmem:[%s7890_s6 + $0x720] sm:$0xff] }
 0x793   : > { %5000 = vmatmul.mubr.bf16.vlgmr.msra.gmra.mrb[20].mxu0 %v8726_v28 }
 0x794   : > { %5164 = vmatmul.mubr.bf16.vlgmr.msra.gmra.mrb[20].mxu1 %v8726_v28  ;;  %5009 = vmatpush1.bf16.msra.mxu0 %v4433_v38  ;;  %v4451_v28 = vunpack.c.l.s8.bf16 %v3995_v19  ;;  %v4019_v38 = vld [vmem:[%s7890_s6 + $0x730] sm:$0xff] }
 0x795   : > { %5040 = vmatprep.mubr.bf16.mxu0 %v8734_v10  ;;  %5173 = vmatpush1.bf16.msra.mxu1 %v4435_v5  ;;  %v4497_v5 = vunpack.c.l.s8.bf16 %v4017_v12 }
 0x796   : > { %5204 = vmatprep.mubr.bf16.mxu1 %v8734_v10  ;;  %5010 = vmatprep.subr.bf16.mxu0 %v4442_v4  ;;  %v4459_v10 = vunpack.c.h.s8.bf16 %v3995_v19  ;;  %v4499_v4 = vunpack.c.l.s8.bf16 %v4019_v38 }
 0x797   : > { %5174 = vmatprep.subr.bf16.mxu1 %v4444_v6  ;;  %v4508_v6 = vunpack.c.h.s8.bf16 %v4020_v57 }
 0x798   : > { %5011 = vmatpush1.bf16.msra.mxu0 %v4441_v13  ;;  %v4028_v13 = vld [vmem:[%s7890_s6 + $0x778] sm:$0xff] }
 0x799   : > { %5175 = vmatpush1.bf16.msra.mxu1 %v4443_v7  ;;  %5012 = vmatprep.subr.bf16.mxu0 %v4450_v16  ;;  %v4505_v7 = vunpack.c.h.s8.bf16 %v4017_v12  ;;  %v4507_v16 = vunpack.c.h.s8.bf16 %v4019_v38  ;;  %v4516_v19 = vunpack.c.l.s8.bf16 %v4028_v13  ;;  %v4524_v31 = vunpack.c.h.s8.bf16 %v4028_v13  ;;  %v5329_v38 = vld [vmem:[%s7903_s22] sm:$0xff] }
 0x79a   : > { %5176 = vmatprep.subr.bf16.mxu1 %v4452_v15  ;;  %v4025_v15 = vld [vmem:[%s7890_s6 + $0x760] sm:$0xff] }
 0x79c   : > { %5013 = vmatpush1.bf16.msra.mxu0 %v4449_v14  ;;  %v4027_v14 = vld [vmem:[%s7890_s6 + $0x770] sm:$0xff] }
 0x79d   : > { %5177 = vmatpush1.bf16.msra.mxu1 %v4451_v28  ;;  %5014 = vmatprep.subr.bf16.mxu0 %v4458_v27  ;;  %v4513_v28 = vunpack.c.l.s8.bf16 %v4025_v15  ;;  %v4515_v27 = vunpack.c.l.s8.bf16 %v4027_v14 }
 0x79e   : > { %5178 = vmatprep.subr.bf16.mxu1 %v4460_v56  ;;  %v4522_v56 = vunpack.c.h.s8.bf16 %v4026_v8 }
 0x7a0   : > { %5015 = vmatpush1.bf16.msra.mxu0 %v4457_v26  ;;  %v4036_v26 = vld [vmem:[%s7890_s6 + $0x7b8] sm:$0xff] }
 0x7a1   : > { %5179 = vmatpush1.bf16.msra.mxu1 %v4459_v10  ;;  %5016 = vmatprep.subr.bf16.mxu0 %v4466_v17  ;;  %v4521_v10 = vunpack.c.h.s8.bf16 %v4025_v15  ;;  %v4523_v17 = vunpack.c.h.s8.bf16 %v4027_v14  ;;  %v4532_v40 = vunpack.c.l.s8.bf16 %v4036_v26  ;;  %v4540_v39 = vunpack.c.h.s8.bf16 %v4036_v26  ;;  %v5336_v15 = vld [vmem:[%s7903_s22 + $0x38] sm:$0xff] }
 0x7a2   : > { %5180 = vmatprep.subr.bf16.mxu1 %v4468_v37  ;;  %v4033_v37 = vld [vmem:[%s7890_s6 + $0x7a0] sm:$0xff] }
 0x7a4   : > { %5017 = vmatpush1.bf16.msra.mxu0 %v4465_v23  ;;  %v4035_v23 = vld [vmem:[%s7890_s6 + $0x7b0] sm:$0xff] }
 0x7a5   : > { %5181 = vmatpush1.bf16.msra.mxu1 %v4467_v54  ;;  %5018 = vmatprep.subr.bf16.mxu0 %v4474_v30  ;;  %v8923_v54 = vld [vmem:[%s803_s16] sm:$0xff]  ;;  %v4529_v30 = vunpack.c.l.s8.bf16 %v4033_v37  ;;  %v4539_v36 = vunpack.c.h.s8.bf16 %v4035_v23 }
 0x7a6   : > { %v8900_v45 = vpop.f32.mrb[16].mxu0  ;;  %v8902_v35 = vpop.f32.mrb[16].mxu1  ;;  %5182 = vmatprep.subr.bf16.mxu1 %v4476_v50  ;;  %v4531_v50 = vunpack.c.l.s8.bf16 %v4035_v23 }
 0x7a7   : > { %v8905_v9 = vpop.f32.mrb[17].mxu0  ;;  %v8907_v59 = vpop.f32.mrb[17].mxu1 }
 0x7a8   : > { %v4718_v55 = vpop.f32.mrb[18].mxu0  ;;  %v4882_v47 = vpop.f32.mrb[18].mxu1  ;;  %5019 = vmatpush1.bf16.msra.mxu0 %v4473_v32  ;;  %v4042_v32 = vld [vmem:[%s7890_s6 + $0x7e8] sm:$0xff] }
 0x7a9   : > { %5183 = vmatpush1.bf16.msra.mxu1 %v4475_v21  ;;  %v4719_v46 = vpop.f32.mrb[19].mxu0  ;;  %v4883_v51 = vpop.f32.mrb[19].mxu1  ;;  %5020 = vmatprep.subr.bf16.mxu0 %v4482_v25  ;;  %v5222_v21 = vrot.slane %v8923_v54, %v7963_v43  ;;  %v4044_v25 = vld [vmem:[%s7890_s6 + $0x7f8] sm:$0xff]  ;;  %v4546_v55 = vunpack.c.l.s8.bf16 %v4042_v32  ;;  %v4041_v47 = vld [vmem:[%s7890_s6 + $0x7e0] sm:$0xff]  ;;  %v4554_v0 = vunpack.c.h.s8.bf16 %v4042_v32 }
 0x7aa   : > { %5184 = vmatprep.subr.bf16.mxu1 %v4484_v62  ;;  %v4537_v62 = vunpack.c.h.s8.bf16 %v4033_v37  ;;  %v4043_v46 = vld [vmem:[%s7890_s6 + $0x7f0] sm:$0xff]  ;;  %v4556_v57 = vunpack.c.h.s8.bf16 %v4044_v25  ;;  %v4553_v12 = vunpack.c.h.s8.bf16 %v4041_v47 }
 0x7ab   : > { %v5256_v51 = vmul.f32 %v5222_v21, %v8905_v9  ;;  %v4555_v9 = vunpack.c.h.s8.bf16 %v4043_v46 }
 0x7ac   : > { %5021 = vmatpush1.bf16.msra.mxu0 %v4481_v49  ;;  %v4548_v49 = vunpack.c.l.s8.bf16 %v4044_v25 }
 0x7ad   : > { %5185 = vmatpush1.bf16.msra.mxu1 %v4483_v52  ;;  %5022 = vmatprep.subr.bf16.mxu0 %v4490_v34  ;;  %v5272_v52 = vrot.slane %v8931_v22, %v7963_v43  ;;  %v4545_v34 = vunpack.c.l.s8.bf16 %v4041_v47 }
 0x7ae   : > { %5186 = vmatprep.subr.bf16.mxu1 %v4492_v29  ;;  %v4547_v29 = vunpack.c.l.s8.bf16 %v4043_v46  ;;  %v5341_v46 = vld [vmem:[%s7903_s22 + $0x60] sm:$0xff] }
 0x7b0   : > { %5023 = vmatpush1.bf16.msra.mxu0 %v4489_v53  ;;  %v5330_v53 = vld [vmem:[%s7903_s22 + $0x8] sm:$0xff] }
 0x7b1   : > { %5187 = vmatpush1.bf16.msra.mxu1 %v4491_v58  ;;  %5024 = vmatprep.subr.bf16.mxu0 %v4498_v60  ;;  %v5306_v58 = vadd.f32 %v5272_v52, %v5256_v51  ;;  %v5332_v60 = vld [vmem:[%s7903_s22 + $0x18] sm:$0xff]  ;;  %v5462_v13 = vunpack.c.h.s8.bf16 %v5330_v53  ;;  %v5343_v52 = vld [vmem:[%s7903_s22 + $0x70] sm:$0xff] }
 0x7b2   : > { %5188 = vmatprep.subr.bf16.mxu1 %v4500_v3  ;;  %v5458_v3 = vunpack.c.l.s8.bf16 %v5330_v53  ;;  %v5346_v53 = vld [vmem:[%s7903_s22 + $0x88] sm:$0xff] }
 0x7b4   : > { %5025 = vmatpush1.bf16.msra.mxu0 %v4497_v5  ;;  %v5460_v5 = vunpack.c.l.s8.bf16 %v5332_v60 }
 0x7b5   : > { %5189 = vmatpush1.bf16.msra.mxu1 %v4499_v4  ;;  %5026 = vmatprep.subr.bf16.mxu0 %v4506_v61  ;;  %v5331_v4 = vld [vmem:[%s7903_s22 + $0x10] sm:$0xff]  ;;  %v5314_v61 = vmax.f32 %v5306_v58, 0.0  ;;  %v5348_v58 = vld [vmem:[%s7903_s22 + $0x98] sm:$0xff] }
 0x7b6   : > { %5190 = vmatprep.subr.bf16.mxu1 %v4508_v6  ;;  %v5457_v6 = vunpack.c.l.s8.bf16 %v5329_v38  ;;  %v5459_v8 = vunpack.c.l.s8.bf16 %v5331_v4  ;;  %v5463_v14 = vunpack.c.h.s8.bf16 %v5331_v4 }
 0x7b8   : > { %5027 = vmatpush1.bf16.msra.mxu0 %v4505_v7  ;;  %v5334_v7 = vld [vmem:[%s7903_s22 + $0x28] sm:$0xff] }
 0x7b9   : > { %5191 = vmatpush1.bf16.msra.mxu1 %v4507_v16  ;;  %5028 = vmatprep.subr.bf16.mxu0 %v4514_v48  ;;  %v5322_v16 = vpack.c.bf16 %v5314_v61, %v5314_v61  ;;  %v5464_v48 = vunpack.c.h.s8.bf16 %v5332_v60  ;;  %v5470_v26 = vunpack.c.h.s8.bf16 %v5334_v7  ;;  %v5485_v60 = vunpack.c.h.s8.bf16 %v5341_v46 }
 0x7ba   : > { %5192 = vmatprep.subr.bf16.mxu1 %v4516_v19  ;;  %v5461_v19 = vunpack.c.h.s8.bf16 %v5329_v38  ;;  %v5492_v38 = vunpack.c.l.s8.bf16 %v5348_v58 }
 0x7bc   : > { %5029 = vmatpush1.bf16.msra.mxu0 %v4513_v28  ;;  %v5466_v28 = vunpack.c.l.s8.bf16 %v5334_v7  ;;  %v5352_v7 = vld [vmem:[%s7903_s22 + $0xb8] sm:$0xff] }
 0x7bd   : > { %5193 = vmatpush1.bf16.msra.mxu1 %v4515_v27  ;;  %5030 = vmatprep.subr.bf16.mxu0 %v4522_v56  ;;  %v5333_v27 = vld [vmem:[%s7903_s22 + $0x20] sm:$0xff]  ;;  %v5468_v56 = vunpack.c.l.s8.bf16 %v5336_v15 }
 0x7be   : > { %5194 = vmatprep.subr.bf16.mxu1 %v4524_v31  ;;  %v5335_v31 = vld [vmem:[%s7903_s22 + $0x30] sm:$0xff]  ;;  %v5465_v33 = vunpack.c.l.s8.bf16 %v5333_v27  ;;  %v5469_v37 = vunpack.c.h.s8.bf16 %v5333_v27 }
 0x7c0   : > { %5031 = vmatpush1.bf16.msra.mxu0 %v4521_v10  ;;  %v5472_v10 = vunpack.c.h.s8.bf16 %v5336_v15 }
 0x7c1   : > { %5195 = vmatpush1.bf16.msra.mxu1 %v4523_v17  ;;  %5032 = vmatprep.subr.bf16.mxu0 %v4530_v63  ;;  %v5338_v17 = vld [vmem:[%s7903_s22 + $0x48] sm:$0xff]  ;;  %v5340_v63 = vld [vmem:[%s7903_s22 + $0x58] sm:$0xff] }
 0x7c2   : > { %5196 = vmatprep.subr.bf16.mxu1 %v4532_v40  ;;  %v5471_v40 = vunpack.c.h.s8.bf16 %v5335_v31  ;;  %v5474_v23 = vunpack.c.l.s8.bf16 %v5338_v17  ;;  %v5478_v21 = vunpack.c.h.s8.bf16 %v5338_v17  ;;  %v5480_v25 = vunpack.c.h.s8.bf16 %v5340_v63 }
 0x7c4   : > { %5033 = vmatpush1.bf16.msra.mxu0 %v4529_v30  ;;  %v5337_v30 = vld [vmem:[%s7903_s22 + $0x40] sm:$0xff] }
 0x7c5   : > { %5197 = vmatpush1.bf16.msra.mxu1 %v4531_v50  ;;  %5034 = vmatprep.subr.bf16.mxu0 %v4538_v2  ;;  %v5476_v50 = vunpack.c.l.s8.bf16 %v5340_v63  ;;  %v5339_v2 = vld [vmem:[%s7903_s22 + $0x50] sm:$0xff] }
 0x7c6   : > { %5198 = vmatprep.subr.bf16.mxu1 %v4540_v39  ;;  %v5473_v39 = vunpack.c.l.s8.bf16 %v5337_v30  ;;  %v5475_v32 = vunpack.c.l.s8.bf16 %v5339_v2  ;;  %v5479_v47 = vunpack.c.h.s8.bf16 %v5339_v2 }
 0x7c8   : > { %5035 = vmatpush1.bf16.msra.mxu0 %v4537_v62  ;;  %v5342_v62 = vld [vmem:[%s7903_s22 + $0x68] sm:$0xff] }
 0x7c9   : > { %5199 = vmatpush1.bf16.msra.mxu1 %v4539_v36  ;;  %5036 = vmatprep.subr.bf16.mxu0 %v4546_v55  ;;  %v5344_v36 = vld [vmem:[%s7903_s22 + $0x78] sm:$0xff]  ;;  %v5477_v55 = vunpack.c.h.s8.bf16 %v5337_v30 }
 0x7ca   : > { %5200 = vmatprep.subr.bf16.mxu1 %v4548_v49  ;;  %v5482_v49 = vunpack.c.l.s8.bf16 %v5342_v62  ;;  %v5484_v51 = vunpack.c.l.s8.bf16 %v5344_v36 }
 0x7cc   : > { %5037 = vmatpush1.bf16.msra.mxu0 %v4545_v34  ;;  %v5481_v34 = vunpack.c.l.s8.bf16 %v5341_v46 }
 0x7cd   : > { %5201 = vmatpush1.bf16.msra.mxu1 %v4547_v29  ;;  %5038 = vmatprep.subr.bf16.mxu0 %v4554_v0  ;;  %v5483_v29 = vunpack.c.l.s8.bf16 %v5343_v52  ;;  %v5486_v0 = vunpack.c.h.s8.bf16 %v5342_v62  ;;  %v5360_v62 = vld [vmem:[%s7903_s22 + $0xf8] sm:$0xff] }
 0x7ce   : > { %5202 = vmatprep.subr.bf16.mxu1 %v4556_v57  ;;  %v5488_v57 = vunpack.c.h.s8.bf16 %v5344_v36 }
 0x7d0   : > { %5039 = vmatpush1.bf16.msra.mxu0 %v4553_v12  ;;  %v5487_v12 = vunpack.c.h.s8.bf16 %v5343_v52  ;;  %v5516_v52 = vunpack.c.l.s8.bf16 %v5360_v62 }
 0x7d1   : > { %5203 = vmatpush1.bf16.msra.mxu1 %v4555_v9  ;;  %5713 = vmatprep.subr.bf16.mxu0 %v5458_v3  ;;  %v5490_v9 = vunpack.c.l.s8.bf16 %v5346_v53  ;;  %v5345_v3 = vld [vmem:[%s7903_s22 + $0x80] sm:$0xff] }
 0x7d2   : > { %5877 = vmatprep.subr.bf16.mxu1 %v5460_v5  ;;  %v5347_v5 = vld [vmem:[%s7903_s22 + $0x90] sm:$0xff]  ;;  %v5489_v4 = vunpack.c.l.s8.bf16 %v5345_v3 }
 0x7d3   : > { %5041 = vmatmul.mubr.bf16.vlgmr.msra.gmra.mrb[20].mxu0 %v8775_v20  ;;  %v5491_v61 = vunpack.c.l.s8.bf16 %v5347_v5 }
 0x7d4   : > { %5205 = vmatmul.mubr.bf16.vlgmr.msra.gmra.mrb[20].mxu1 %v8775_v20  ;;  %5714 = vmatpush1.bf16.msra.mxu0 %v5457_v6  ;;  %v5467_v20 = vunpack.c.l.s8.bf16 %v5335_v31  ;;  %v5494_v6 = vunpack.c.h.s8.bf16 %v5346_v53 }
 0x7d5   : > { %5745 = vmatprep.mubr.bf16.mxu0 %v5322_v16  ;;  %5878 = vmatpush1.bf16.msra.mxu1 %v5459_v8  ;;  %v5496_v8 = vunpack.c.h.s8.bf16 %v5348_v58 }
 0x7d6   : > { %5909 = vmatprep.mubr.bf16.mxu1 %v5322_v16  ;;  %5715 = vmatprep.subr.bf16.mxu0 %v5462_v13  ;;  %v5350_v13 = vld [vmem:[%s7903_s22 + $0xa8] sm:$0xff]  ;;  %v5493_v16 = vunpack.c.h.s8.bf16 %v5345_v3  ;;  %v5364_v3 = vld [vmem:[%s7903_s22 + $0x118] sm:$0xff] }
 0x7d7   : > { %5879 = vmatprep.subr.bf16.mxu1 %v5464_v48  ;;  %v5495_v48 = vunpack.c.h.s8.bf16 %v5347_v5  ;;  %v5498_v15 = vunpack.c.l.s8.bf16 %v5350_v13  ;;  %v5502_v31 = vunpack.c.h.s8.bf16 %v5350_v13 }
 0x7d8   : > { %5716 = vmatpush1.bf16.msra.mxu0 %v5461_v19  ;;  %v5349_v19 = vld [vmem:[%s7903_s22 + $0xa0] sm:$0xff] }
 0x7d9   : > { %5880 = vmatpush1.bf16.msra.mxu1 %v5463_v14  ;;  %5717 = vmatprep.subr.bf16.mxu0 %v5466_v28  ;;  %v5500_v14 = vunpack.c.l.s8.bf16 %v5352_v7  ;;  %v5351_v28 = vld [vmem:[%s7903_s22 + $0xb0] sm:$0xff]  ;;  %v5497_v27 = vunpack.c.l.s8.bf16 %v5349_v19 }
 0x7da   : > { %5881 = vmatprep.subr.bf16.mxu1 %v5468_v56  ;;  %v5499_v56 = vunpack.c.l.s8.bf16 %v5351_v28  ;;  %v5503_v17 = vunpack.c.h.s8.bf16 %v5351_v28  ;;  %v5528_v28 = vunpack.c.h.s8.bf16 %v5364_v3 }
 0x7dc   : > { %5718 = vmatpush1.bf16.msra.mxu0 %v5465_v33  ;;  %v5504_v33 = vunpack.c.h.s8.bf16 %v5352_v7 }
 0x7dd   : > { %5882 = vmatpush1.bf16.msra.mxu1 %v5467_v20  ;;  %5719 = vmatprep.subr.bf16.mxu0 %v5470_v26  ;;  %v5354_v20 = vld [vmem:[%s7903_s22 + $0xc8] sm:$0xff]  ;;  %v5356_v26 = vld [vmem:[%s7903_s22 + $0xd8] sm:$0xff] }
 0x7de   : > { %5883 = vmatprep.subr.bf16.mxu1 %v5472_v10  ;;  %v5501_v10 = vunpack.c.h.s8.bf16 %v5349_v19  ;;  %v5506_v63 = vunpack.c.l.s8.bf16 %v5354_v20  ;;  %v5366_v19 = vld [vmem:[%s7903_s22 + $0x128] sm:$0xff] }
 0x7e0   : > { %5720 = vmatpush1.bf16.msra.mxu0 %v5469_v37  ;;  %v5353_v37 = vld [vmem:[%s7903_s22 + $0xc0] sm:$0xff] }
 0x7e1   : > { %5884 = vmatpush1.bf16.msra.mxu1 %v5471_v40  ;;  %5721 = vmatprep.subr.bf16.mxu0 %v5474_v23  ;;  %v5508_v40 = vunpack.c.l.s8.bf16 %v5356_v26  ;;  %v5355_v23 = vld [vmem:[%s7903_s22 + $0xd0] sm:$0xff]  ;;  %v5505_v30 = vunpack.c.l.s8.bf16 %v5353_v37  ;;  %v5509_v36 = vunpack.c.h.s8.bf16 %v5353_v37  ;;  %v5534_v37 = vunpack.c.h.s8.bf16 %v5366_v19 }
 0x7e2   : > { %5885 = vmatprep.subr.bf16.mxu1 %v5476_v50  ;;  %v5218_v50 = vrot.slane %v8923_v54, %v7957_v41  ;;  %v5507_v2 = vunpack.c.l.s8.bf16 %v5355_v23 }
 0x7e4   : > { %5722 = vmatpush1.bf16.msra.mxu0 %v5473_v39  ;;  %v5510_v39 = vunpack.c.h.s8.bf16 %v5354_v20  ;;  %v5365_v20 = vld [vmem:[%s7903_s22 + $0x120] sm:$0xff] }
 0x7e5   : > { %5886 = vmatpush1.bf16.msra.mxu1 %v5475_v32  ;;  %5723 = vmatprep.subr.bf16.mxu0 %v5478_v21  ;;  %v5512_v32 = vunpack.c.h.s8.bf16 %v5356_v26  ;;  %v5358_v21 = vld [vmem:[%s7903_s22 + $0xe8] sm:$0xff] }
 0x7e6   : > { %5887 = vmatprep.subr.bf16.mxu1 %v5480_v25  ;;  %v5230_v25 = vrot.slane %v8923_v54, %v7966_v44  ;;  %v5514_v46 = vunpack.c.l.s8.bf16 %v5358_v21  ;;  %v5518_v58 = vunpack.c.h.s8.bf16 %v5358_v21 }
 0x7e8   : > { %5724 = vmatpush1.bf16.msra.mxu0 %v5477_v55  ;;  %v5255_v55 = vmul.f32 %v5218_v50, %v8900_v45  ;;  %v5533_v50 = vunpack.c.h.s8.bf16 %v5365_v20 }
 0x7e9   : > { %5888 = vmatpush1.bf16.msra.mxu1 %v5479_v47  ;;  %5725 = vmatprep.subr.bf16.mxu0 %v5482_v49  ;;  %v5268_v47 = vrot.slane %v8931_v22, %v7957_v41  ;;  %v5511_v49 = vunpack.c.h.s8.bf16 %v5355_v23  ;;  %v5370_v23 = vld [vmem:[%s7903_s22 + $0x148] sm:$0xff] }
 0x7ea   : > { %5889 = vmatprep.subr.bf16.mxu1 %v5484_v51  ;;  %v5357_v51 = vld [vmem:[%s7903_s22 + $0xe0] sm:$0xff] }
 0x7eb   : > { %v5513_v45 = vunpack.c.l.s8.bf16 %v5357_v51 }
 0x7ec   : > { %5726 = vmatpush1.bf16.msra.mxu0 %v5481_v34  ;;  %v5359_v34 = vld [vmem:[%s7903_s22 + $0xf0] sm:$0xff] }
 0x7ed   : > { %5890 = vmatpush1.bf16.msra.mxu1 %v5483_v29  ;;  %5727 = vmatprep.subr.bf16.mxu0 %v5486_v0  ;;  %v5258_v29 = vmul.f32 %v5230_v25, %v8907_v59  ;;  %v5280_v0 = vrot.slane %v8931_v22, %v7966_v44  ;;  %v5515_v53 = vunpack.c.l.s8.bf16 %v5359_v34  ;;  %v5519_v5 = vunpack.c.h.s8.bf16 %v5359_v34  ;;  %v5371_v25 = vld [vmem:[%s7903_s22 + $0x150] sm:$0xff] }
 0x7ee   : > { %5891 = vmatprep.subr.bf16.mxu1 %v5488_v57  ;;  %v5305_v57 = vadd.f32 %v5268_v47, %v5255_v55  ;;  %v5542_v55 = vunpack.c.h.s8.bf16 %v5370_v23 }
 0x7f0   : > { %5728 = vmatpush1.bf16.msra.mxu0 %v5485_v60  ;;  %v5520_v60 = vunpack.c.h.s8.bf16 %v5360_v62  ;;  %v5313_v59 = vmax.f32 %v5305_v57, 0.0 }
 0x7f1   : > { %5892 = vmatpush1.bf16.msra.mxu1 %v5487_v12  ;;  %5729 = vmatprep.subr.bf16.mxu0 %v5490_v9  ;;  %v5362_v12 = vld [vmem:[%s7903_s22 + $0x108] sm:$0xff]  ;;  %v5308_v9 = vadd.f32 %v5280_v0, %v5258_v29  ;;  %v5373_v29 = vld [vmem:[%s7903_s22 + $0x160] sm:$0xff] }
 0x7f2   : > { %5893 = vmatprep.subr.bf16.mxu1 %v5492_v38  ;;  %v5517_v38 = vunpack.c.h.s8.bf16 %v5357_v51  ;;  %v5545_v57 = vunpack.c.l.s8.bf16 %v5373_v29 }
 0x7f3   : > { %v5316_v13 = vmax.f32 %v5308_v9, 0.0  ;;  %v5380_v9 = vld [vmem:[%s7903_s22 + $0x198] sm:$0xff] }
 0x7f4   : > { %5730 = vmatpush1.bf16.msra.mxu0 %v5489_v4  ;;  %v5522_v4 = vunpack.c.l.s8.bf16 %v5362_v12 }
 0x7f5   : > { %5894 = vmatpush1.bf16.msra.mxu1 %v5491_v61  ;;  %5731 = vmatprep.subr.bf16.mxu0 %v5494_v6  ;;  %v5361_v61 = vld [vmem:[%s7903_s22 + $0x100] sm:$0xff]  ;;  %v5524_v6 = vunpack.c.l.s8.bf16 %v5364_v3  ;;  %v5549_v3 = vunpack.c.h.s8.bf16 %v5373_v29 }
 0x7f6   : > { %5895 = vmatprep.subr.bf16.mxu1 %v5496_v8  ;;  %v5363_v8 = vld [vmem:[%s7903_s22 + $0x110] sm:$0xff]  ;;  %v5521_v7 = vunpack.c.l.s8.bf16 %v5361_v61 }
 0x7f8   : > { %5732 = vmatpush1.bf16.msra.mxu0 %v5493_v16  ;;  %v5321_v16 = vpack.c.bf16 %v5313_v59, %v5313_v59 }
 0x7f9   : > { %5896 = vmatpush1.bf16.msra.mxu1 %v5495_v48  ;;  %5733 = vmatprep.subr.bf16.mxu0 %v5498_v15  ;;  %v5523_v48 = vunpack.c.l.s8.bf16 %v5363_v8  ;;  %v5526_v15 = vunpack.c.h.s8.bf16 %v5362_v12  ;;  %v5378_v12 = vld [vmem:[%s7903_s22 + $0x188] sm:$0xff] }
 0x7fa   : > { %5897 = vmatprep.subr.bf16.mxu1 %v5500_v14  ;;  %v5324_v14 = vpack.c.bf16 %v5316_v13, %v5316_v13  ;;  %v5554_v59 = vunpack.c.l.s8.bf16 %v5378_v12  ;;  %v5558_v13 = vunpack.c.h.s8.bf16 %v5378_v12 }
 0x7fc   : > { %5734 = vmatpush1.bf16.msra.mxu0 %v5497_v27  ;;  %v5368_v27 = vld [vmem:[%s7903_s22 + $0x138] sm:$0xff] }
 0x7fd   : > { %5898 = vmatpush1.bf16.msra.mxu1 %v5499_v56  ;;  %5735 = vmatprep.subr.bf16.mxu0 %v5502_v31  ;;  %v5525_v56 = vunpack.c.h.s8.bf16 %v5361_v61  ;;  %v5527_v31 = vunpack.c.h.s8.bf16 %v5363_v8  ;;  %v5532_v26 = vunpack.c.l.s8.bf16 %v5368_v27  ;;  %v5379_v61 = vld [vmem:[%s7903_s22 + $0x190] sm:$0xff] }
 0x7fe   : > { %5899 = vmatprep.subr.bf16.mxu1 %v5504_v33  ;;  %v5530_v33 = vunpack.c.l.s8.bf16 %v5366_v19  ;;  %v5555_v8 = vunpack.c.l.s8.bf16 %v5379_v61  ;;  %v5559_v19 = vunpack.c.h.s8.bf16 %v5379_v61 }
 0x800   : > { %5736 = vmatpush1.bf16.msra.mxu0 %v5501_v10  ;;  %v5367_v10 = vld [vmem:[%s7903_s22 + $0x130] sm:$0xff] }
 0x801   : > { %5900 = vmatpush1.bf16.msra.mxu1 %v5503_v17  ;;  %5737 = vmatprep.subr.bf16.mxu0 %v5506_v63  ;;  %v5529_v17 = vunpack.c.l.s8.bf16 %v5365_v20  ;;  %v5531_v63 = vunpack.c.l.s8.bf16 %v5367_v10 }
 0x802   : > { %5901 = vmatprep.subr.bf16.mxu1 %v5508_v40  ;;  %v5536_v40 = vunpack.c.h.s8.bf16 %v5368_v27 }
 0x804   : > { %5738 = vmatpush1.bf16.msra.mxu0 %v5505_v30  ;;  %v5372_v30 = vld [vmem:[%s7903_s22 + $0x158] sm:$0xff] }
 0x805   : > { %5902 = vmatpush1.bf16.msra.mxu1 %v5507_v2  ;;  %5739 = vmatprep.subr.bf16.mxu0 %v5510_v39  ;;  %v5535_v2 = vunpack.c.h.s8.bf16 %v5367_v10  ;;  %v5538_v39 = vunpack.c.l.s8.bf16 %v5370_v23  ;;  %v5540_v21 = vunpack.c.l.s8.bf16 %v5372_v30  ;;  %v5544_v47 = vunpack.c.h.s8.bf16 %v5372_v30  ;;  %v5386_v10 = vld [vmem:[%s7903_s22 + $0x1c8] sm:$0xff]  ;;  %v5385_v23 = vld [vmem:[%s7903_s22 + $0x1c0] sm:$0xff] }
 0x806   : > { %5903 = vmatprep.subr.bf16.mxu1 %v5512_v32  ;;  %v5369_v32 = vld [vmem:[%s7903_s22 + $0x140] sm:$0xff] }
 0x807   : > { %v5537_v62 = vunpack.c.l.s8.bf16 %v5369_v32  ;;  %v5541_v51 = vunpack.c.h.s8.bf16 %v5369_v32 }
 0x808   : > { %5740 = vmatpush1.bf16.msra.mxu0 %v5509_v36  ;;  %v5539_v36 = vunpack.c.l.s8.bf16 %v5371_v25 }
 0x809   : > { %5904 = vmatpush1.bf16.msra.mxu1 %v5511_v49  ;;  %5741 = vmatprep.subr.bf16.mxu0 %v5514_v46  ;;  %v5374_v49 = vld [vmem:[%s7903_s22 + $0x168] sm:$0xff]  ;;  %v5376_v46 = vld [vmem:[%s7903_s22 + $0x178] sm:$0xff] }
 0x80a   : > { %5905 = vmatprep.subr.bf16.mxu1 %v5516_v52  ;;  %v5543_v52 = vunpack.c.h.s8.bf16 %v5371_v25  ;;  %v5546_v34 = vunpack.c.l.s8.bf16 %v5374_v49  ;;  %v5548_v0 = vunpack.c.l.s8.bf16 %v5376_v46 }
 0x80c   : > { %5742 = vmatpush1.bf16.msra.mxu0 %v5513_v45  ;;  %v5375_v45 = vld [vmem:[%s7903_s22 + $0x170] sm:$0xff] }
 0x80d   : > { %5906 = vmatpush1.bf16.msra.mxu1 %v5515_v53  ;;  %5743 = vmatprep.subr.bf16.mxu0 %v5518_v58  ;;  %v5547_v53 = vunpack.c.l.s8.bf16 %v5375_v45  ;;  %v5550_v58 = vunpack.c.h.s8.bf16 %v5374_v49  ;;  %v5276_v49 = vrot.slane %v8931_v22, %v7960_v42 }
 0x80e   : > { %5907 = vmatprep.subr.bf16.mxu1 %v5520_v60  ;;  %v5552_v60 = vunpack.c.h.s8.bf16 %v5376_v46 }
 0x810   : > { %5744 = vmatpush1.bf16.msra.mxu0 %v5517_v38  ;;  %v5551_v38 = vunpack.c.h.s8.bf16 %v5375_v45 }
 0x811   : > { %5908 = vmatpush1.bf16.msra.mxu1 %v5519_v5  ;;  %5754 = vmatprep.subr.bf16.mxu0 %v5522_v4  ;;  %v5377_v5 = vld [vmem:[%s7903_s22 + $0x180] sm:$0xff]  ;;  %v5556_v4 = vunpack.c.l.s8.bf16 %v5380_v9 }
 0x812   : > { %5918 = vmatprep.subr.bf16.mxu1 %v5524_v6  ;;  %v5553_v6 = vunpack.c.l.s8.bf16 %v5377_v5 }
 0x813   : > { %5746 = vmatmul.mubr.bf16.vlgmr.msra.gmra.mrb[24].mxu0 %v5321_v16 }
 0x814   : > { %5910 = vmatmul.mubr.bf16.vlgmr.msra.gmra.mrb[24].mxu1 %v5321_v16  ;;  %5755 = vmatpush1.bf16.msra.mxu0 %v5521_v7  ;;  %v5560_v7 = vunpack.c.h.s8.bf16 %v5380_v9  ;;  %v5382_v16 = vld [vmem:[%s7903_s22 + $0x1a8] sm:$0xff] }
 0x815   : > { %5786 = vmatprep.mubr.bf16.mxu0 %v5324_v14  ;;  %5919 = vmatpush1.bf16.msra.mxu1 %v5523_v48  ;;  %v5384_v48 = vld [vmem:[%s7903_s22 + $0x1b8] sm:$0xff]  ;;  %v5566_v20 = vunpack.c.h.s8.bf16 %v5382_v16 }
 0x816   : > { %5950 = vmatprep.mubr.bf16.mxu1 %v5324_v14  ;;  %5756 = vmatprep.subr.bf16.mxu0 %v5526_v15  ;;  %v5557_v15 = vunpack.c.h.s8.bf16 %v5377_v5  ;;  %v5562_v14 = vunpack.c.l.s8.bf16 %v5382_v16  ;;  %v5564_v27 = vunpack.c.l.s8.bf16 %v5384_v48 }
 0x817   : > { %5920 = vmatprep.subr.bf16.mxu1 %v5528_v28  ;;  %v5381_v28 = vld [vmem:[%s7903_s22 + $0x1a0] sm:$0xff] }
 0x818   : > { %5757 = vmatpush1.bf16.msra.mxu0 %v5525_v56  ;;  %v5383_v56 = vld [vmem:[%s7903_s22 + $0x1b0] sm:$0xff] }
 0x819   : > { %5921 = vmatpush1.bf16.msra.mxu1 %v5527_v31  ;;  %5758 = vmatprep.subr.bf16.mxu0 %v5530_v33  ;;  %v5561_v31 = vunpack.c.l.s8.bf16 %v5381_v28  ;;  %v5563_v33 = vunpack.c.l.s8.bf16 %v5383_v56 }
 0x81a   : > { %5922 = vmatprep.subr.bf16.mxu1 %v5532_v26  ;;  %v5568_v26 = vunpack.c.h.s8.bf16 %v5384_v48 }
 0x81c   : > { %5759 = vmatpush1.bf16.msra.mxu0 %v5529_v17  ;;  %v5388_v17 = vld [vmem:[%s7903_s22 + $0x1d8] sm:$0xff] }
 0x81d   : > { %5923 = vmatpush1.bf16.msra.mxu1 %v5531_v63  ;;  %5760 = vmatprep.subr.bf16.mxu0 %v5534_v37  ;;  %v5565_v63 = vunpack.c.h.s8.bf16 %v5381_v28  ;;  %v5567_v37 = vunpack.c.h.s8.bf16 %v5383_v56  ;;  %v5572_v30 = vunpack.c.l.s8.bf16 %v5388_v17  ;;  %v5576_v25 = vunpack.c.h.s8.bf16 %v5388_v17  ;;  %v5399_v28 = vld [vmem:[%s7903_s22 + $0x230] sm:$0xff] }
 0x81e   : > { %5924 = vmatprep.subr.bf16.mxu1 %v5536_v40  ;;  %v5570_v40 = vunpack.c.l.s8.bf16 %v5386_v10  ;;  %v5595_v56 = vunpack.c.l.s8.bf16 %v5399_v28  ;;  %v5599_v17 = vunpack.c.h.s8.bf16 %v5399_v28 }
 0x820   : > { %5761 = vmatpush1.bf16.msra.mxu0 %v5533_v50  ;;  %v5387_v50 = vld [vmem:[%s7903_s22 + $0x1d0] sm:$0xff] }
 0x821   : > { %5925 = vmatpush1.bf16.msra.mxu1 %v5535_v2  ;;  %5762 = vmatprep.subr.bf16.mxu0 %v5538_v39  ;;  %v5569_v2 = vunpack.c.l.s8.bf16 %v5385_v23  ;;  %v5226_v39 = vrot.slane %v8923_v54, %v7960_v42  ;;  %v5571_v32 = vunpack.c.l.s8.bf16 %v5387_v50  ;;  %v5575_v54 = vunpack.c.h.s8.bf16 %v5387_v50 }
 0x822   : > { %5926 = vmatprep.subr.bf16.mxu1 %v5540_v21  ;;  %v5574_v21 = vunpack.c.h.s8.bf16 %v5386_v10 }
 0x824   : > { %5763 = vmatpush1.bf16.msra.mxu0 %v5537_v62  ;;  %v5390_v62 = vld [vmem:[%s7903_s22 + $0x1e8] sm:$0xff] }
 0x825   : > { %5927 = vmatpush1.bf16.msra.mxu1 %v5539_v36  ;;  %5764 = vmatprep.subr.bf16.mxu0 %v5542_v55  ;;  %v5392_v36 = vld [vmem:[%s7903_s22 + $0x1f8] sm:$0xff]  ;;  %v5573_v55 = vunpack.c.h.s8.bf16 %v5385_v23  ;;  %v5578_v46 = vunpack.c.l.s8.bf16 %v5390_v62  ;;  %v5582_v45 = vunpack.c.h.s8.bf16 %v5390_v62  ;;  %v5403_v23 = vld [vmem:[%s7903_s22 + $0x250] sm:$0xff] }
 0x826   : > { %5928 = vmatprep.subr.bf16.mxu1 %v5544_v47  ;;  %v5257_v47 = vmul.f32 %v5226_v39, %v8902_v35  ;;  %v5584_v22 = vunpack.c.h.s8.bf16 %v5392_v36  ;;  %v5603_v50 = vunpack.c.l.s8.bf16 %v5403_v23  ;;  %v5607_v62 = vunpack.c.h.s8.bf16 %v5403_v23 }
 0x828   : > { %5765 = vmatpush1.bf16.msra.mxu0 %v5541_v51  ;;  %v5389_v51 = vld [vmem:[%s7903_s22 + $0x1e0] sm:$0xff] }
 0x829   : > { %5929 = vmatpush1.bf16.msra.mxu1 %v5543_v52  ;;  %5766 = vmatprep.subr.bf16.mxu0 %v5546_v34  ;;  %v5580_v52 = vunpack.c.l.s8.bf16 %v5392_v36  ;;  %v5391_v34 = vld [vmem:[%s7903_s22 + $0x1f0] sm:$0xff]  ;;  %v5577_v29 = vunpack.c.l.s8.bf16 %v5389_v51 }
 0x82a   : > { %5930 = vmatprep.subr.bf16.mxu1 %v5548_v0  ;;  %v5307_v0 = vadd.f32 %v5276_v49, %v5257_v47  ;;  %v5579_v35 = vunpack.c.l.s8.bf16 %v5391_v34  ;;  %v5583_v12 = vunpack.c.h.s8.bf16 %v5391_v34  ;;  %v5407_v49 = vld [vmem:[%s7903_s22 + $0x270] sm:$0xff]  ;;  %v5410_v34 = vld [vmem:[%s7903_s22 + $0x288] sm:$0xff] }
 0x82c   : > { %5767 = vmatpush1.bf16.msra.mxu0 %v5545_v57  ;;  %v5394_v57 = vld [vmem:[%s7903_s22 + $0x208] sm:$0xff] }
 0x82d   : > { %5931 = vmatpush1.bf16.msra.mxu1 %v5547_v53  ;;  %5768 = vmatprep.subr.bf16.mxu0 %v5550_v58  ;;  %v5396_v53 = vld [vmem:[%s7903_s22 + $0x218] sm:$0xff]  ;;  %v5581_v58 = vunpack.c.h.s8.bf16 %v5389_v51  ;;  %v5586_v9 = vunpack.c.l.s8.bf16 %v5394_v57 }
 0x82e   : > { %5932 = vmatprep.subr.bf16.mxu1 %v5552_v60  ;;  %v5315_v60 = vmax.f32 %v5307_v0, 0.0 }
 0x830   : > { %5769 = vmatpush1.bf16.msra.mxu0 %v5549_v3  ;;  %v5393_v3 = vld [vmem:[%s7903_s22 + $0x200] sm:$0xff] }
 0x831   : > { %5933 = vmatpush1.bf16.msra.mxu1 %v5551_v38  ;;  %5770 = vmatprep.subr.bf16.mxu0 %v5554_v59  ;;  %v5588_v38 = vunpack.c.l.s8.bf16 %v5396_v53  ;;  %v5395_v59 = vld [vmem:[%s7903_s22 + $0x210] sm:$0xff]  ;;  %v5585_v5 = vunpack.c.l.s8.bf16 %v5393_v3  ;;  %v5589_v16 = vunpack.c.h.s8.bf16 %v5393_v3  ;;  %v5414_v3 = vld [vmem:[%s7903_s22 + $0x2a8] sm:$0xff] }
 0x832   : > { %5934 = vmatprep.subr.bf16.mxu1 %v5556_v4  ;;  %v5323_v4 = vpack.c.bf16 %v5315_v60, %v5315_v60  ;;  %v5587_v61 = vunpack.c.l.s8.bf16 %v5395_v59  ;;  %v5591_v48 = vunpack.c.h.s8.bf16 %v5395_v59 }
 0x834   : > { %5771 = vmatpush1.bf16.msra.mxu0 %v5553_v6  ;;  %v5590_v6 = vunpack.c.h.s8.bf16 %v5394_v57 }
 0x835   : > { %5935 = vmatpush1.bf16.msra.mxu1 %v5555_v8  ;;  %5772 = vmatprep.subr.bf16.mxu0 %v5558_v13  ;;  %v5592_v8 = vunpack.c.h.s8.bf16 %v5396_v53  ;;  %v5398_v13 = vld [vmem:[%s7903_s22 + $0x228] sm:$0xff]  ;;  %v5411_v53 = vld [vmem:[%s7903_s22 + $0x290] sm:$0xff] }
 0x836   : > { %5936 = vmatprep.subr.bf16.mxu1 %v5560_v7  ;;  %v5400_v7 = vld [vmem:[%s7903_s22 + $0x238] sm:$0xff]  ;;  %v5619_v60 = vunpack.c.l.s8.bf16 %v5411_v53 }
 0x838   : > { %5773 = vmatpush1.bf16.msra.mxu0 %v5557_v15  ;;  %v5594_v15 = vunpack.c.l.s8.bf16 %v5398_v13 }
 0x839   : > { %5937 = vmatpush1.bf16.msra.mxu1 %v5559_v19  ;;  %5774 = vmatprep.subr.bf16.mxu0 %v5562_v14  ;;  %v5397_v19 = vld [vmem:[%s7903_s22 + $0x220] sm:$0xff]  ;;  %v5596_v14 = vunpack.c.l.s8.bf16 %v5400_v7 }
 0x83a   : > { %5938 = vmatprep.subr.bf16.mxu1 %v5564_v27  ;;  %v5593_v27 = vunpack.c.l.s8.bf16 %v5397_v19  ;;  %v5597_v10 = vunpack.c.h.s8.bf16 %v5397_v19  ;;  %v5420_v19 = vld [vmem:[%s7903_s22 + $0x2d8] sm:$0xff] }
 0x83c   : > { %5775 = vmatpush1.bf16.msra.mxu0 %v5561_v31  ;;  %v5598_v31 = vunpack.c.h.s8.bf16 %v5398_v13 }
 0x83d   : > { %5939 = vmatpush1.bf16.msra.mxu1 %v5563_v33  ;;  %5776 = vmatprep.subr.bf16.mxu0 %v5566_v20  ;;  %v5600_v33 = vunpack.c.h.s8.bf16 %v5400_v7  ;;  %v5402_v20 = vld [vmem:[%s7903_s22 + $0x248] sm:$0xff] }
 0x83e   : > { %5940 = vmatprep.subr.bf16.mxu1 %v5568_v26  ;;  %v5404_v26 = vld [vmem:[%s7903_s22 + $0x258] sm:$0xff] }
 0x83f   : > { %v5608_v39 = vunpack.c.h.s8.bf16 %v5404_v26 }
 0x840   : > { %5777 = vmatpush1.bf16.msra.mxu0 %v5565_v63  ;;  %v5602_v63 = vunpack.c.l.s8.bf16 %v5402_v20 }
 0x841   : > { %5941 = vmatpush1.bf16.msra.mxu1 %v5567_v37  ;;  %5778 = vmatprep.subr.bf16.mxu0 %v5570_v40  ;;  %v5401_v37 = vld [vmem:[%s7903_s22 + $0x240] sm:$0xff]  ;;  %v5604_v40 = vunpack.c.l.s8.bf16 %v5404_v26 }
 0x842   : > { %5942 = vmatprep.subr.bf16.mxu1 %v5572_v30  ;;  %v5601_v30 = vunpack.c.l.s8.bf16 %v5401_v37 }
 0x844   : > { %5779 = vmatpush1.bf16.msra.mxu0 %v5569_v2  ;;  %v5606_v2 = vunpack.c.h.s8.bf16 %v5402_v20 }
 0x845   : > { %5943 = vmatpush1.bf16.msra.mxu1 %v5571_v32  ;;  %5780 = vmatprep.subr.bf16.mxu0 %v5574_v21  ;;  %v5406_v32 = vld [vmem:[%s7903_s22 + $0x268] sm:$0xff]  ;;  %v5408_v21 = vld [vmem:[%s7903_s22 + $0x278] sm:$0xff] }
 0x846   : > { %5944 = vmatprep.subr.bf16.mxu1 %v5576_v25  ;;  %v5605_v25 = vunpack.c.h.s8.bf16 %v5401_v37  ;;  %v5610_v36 = vunpack.c.l.s8.bf16 %v5406_v32  ;;  %v5612_v47 = vunpack.c.l.s8.bf16 %v5408_v21  ;;  %v5614_v51 = vunpack.c.h.s8.bf16 %v5406_v32  ;;  %v5424_v37 = vld [vmem:[%s7903_s22 + $0x2f8] sm:$0xff] }
 0x848   : > { %5781 = vmatpush1.bf16.msra.mxu0 %v5573_v55  ;;  %v5405_v55 = vld [vmem:[%s7903_s22 + $0x260] sm:$0xff] }
 0x849   : > { %5945 = vmatpush1.bf16.msra.mxu1 %v5575_v54  ;;  %5782 = vmatprep.subr.bf16.mxu0 %v5578_v46  ;;  %v5609_v54 = vunpack.c.l.s8.bf16 %v5405_v55  ;;  %v5611_v46 = vunpack.c.l.s8.bf16 %v5407_v49  ;;  %v5613_v0 = vunpack.c.h.s8.bf16 %v5405_v55  ;;  %v9055_v55 = vld [vmem:[%s7903_s22 + $0x318] sm:$0xff] }
 0x84a   : > { %5946 = vmatprep.subr.bf16.mxu1 %v5580_v52  ;;  %v5616_v52 = vunpack.c.h.s8.bf16 %v5408_v21 }
 0x84c   : > { %5783 = vmatpush1.bf16.msra.mxu0 %v5577_v29  ;;  %v5412_v29 = vld [vmem:[%s7903_s22 + $0x298] sm:$0xff] }
 0x84d   : > { %5947 = vmatpush1.bf16.msra.mxu1 %v5579_v35  ;;  %5784 = vmatprep.subr.bf16.mxu0 %v5582_v45  ;;  %v5615_v35 = vunpack.c.h.s8.bf16 %v5407_v49  ;;  %v5618_v45 = vunpack.c.l.s8.bf16 %v5410_v34  ;;  %v5620_v57 = vunpack.c.l.s8.bf16 %v5412_v29 }
 0x84e   : > { %5948 = vmatprep.subr.bf16.mxu1 %v5584_v22  ;;  %v5409_v22 = vld [vmem:[%s7903_s22 + $0x280] sm:$0xff] }
 0x84f   : > { %v5621_v59 = vunpack.c.h.s8.bf16 %v5409_v22 }
 0x850   : > { %5785 = vmatpush1.bf16.msra.mxu0 %v5581_v58  ;;  %v5617_v58 = vunpack.c.l.s8.bf16 %v5409_v22 }
 0x851   : > { %5949 = vmatpush1.bf16.msra.mxu1 %v5583_v12  ;;  %5795 = vmatprep.subr.bf16.mxu0 %v5586_v9  ;;  %v5622_v12 = vunpack.c.h.s8.bf16 %v5410_v34  ;;  %v5624_v9 = vunpack.c.h.s8.bf16 %v5412_v29  ;;  %v9069_v29 = vld [vmem:[%s812_s26] sm:$0xff] }
 0x852   : > { %5959 = vmatprep.subr.bf16.mxu1 %v5588_v38  ;;  %v5416_v38 = vld [vmem:[%s7903_s22 + $0x2b8] sm:$0xff]  ;;  %v5288_v22 = vrot.slane %v9069_v29, %v8271_v1 }
 0x853   : > { %5787 = vmatmul.mubr.bf16.vlgmr.msra.gmra.mrb[24].mxu0 %v5323_v4 }
 0x854   : > { %5951 = vmatmul.mubr.bf16.vlgmr.msra.gmra.mrb[24].mxu1 %v5323_v4  ;;  %5796 = vmatpush1.bf16.msra.mxu0 %v5585_v5  ;;  %v5623_v5 = vunpack.c.h.s8.bf16 %v5411_v53  ;;  %v5626_v4 = vunpack.c.l.s8.bf16 %v5414_v3 }
 0x855   : > { %5960 = vmatpush1.bf16.msra.mxu1 %v5587_v61  ;;  %5797 = vmatprep.subr.bf16.mxu0 %v5590_v6  ;;  %v5413_v61 = vld [vmem:[%s7903_s22 + $0x2a0] sm:$0xff]  ;;  %v5628_v6 = vunpack.c.l.s8.bf16 %v5416_v38 }
 0x856   : > { %5961 = vmatprep.subr.bf16.mxu1 %v5592_v8  ;;  %v5415_v8 = vld [vmem:[%s7903_s22 + $0x2b0] sm:$0xff]  ;;  %v5625_v13 = vunpack.c.l.s8.bf16 %v5413_v61 }
 0x857   : > { %v5627_v7 = vunpack.c.l.s8.bf16 %v5415_v8  ;;  %v5631_v28 = vunpack.c.h.s8.bf16 %v5415_v8  ;;  %v5425_v8 = vld [vmem:[%s7903_s22 + $0x300] sm:$0xff] }
 0x858   : > { %5798 = vmatpush1.bf16.msra.mxu0 %v5589_v16  ;;  %v5630_v16 = vunpack.c.h.s8.bf16 %v5414_v3 }
 0x859   : > { %5962 = vmatpush1.bf16.msra.mxu1 %v5591_v48  ;;  %5799 = vmatprep.subr.bf16.mxu0 %v5594_v15  ;;  %v5632_v48 = vunpack.c.h.s8.bf16 %v5416_v38  ;;  %v5418_v15 = vld [vmem:[%s7903_s22 + $0x2c8] sm:$0xff] }
 0x85a   : > { %5963 = vmatprep.subr.bf16.mxu1 %v5596_v14  ;;  %v5629_v14 = vunpack.c.h.s8.bf16 %v5413_v61 }
 0x85c   : > { %5800 = vmatpush1.bf16.msra.mxu0 %v5593_v27  ;;  %v5634_v27 = vunpack.c.l.s8.bf16 %v5418_v15 }
 0x85d   : > { %5964 = vmatpush1.bf16.msra.mxu1 %v5595_v56  ;;  %5801 = vmatprep.subr.bf16.mxu0 %v5598_v31  ;;  %v5417_v56 = vld [vmem:[%s7903_s22 + $0x2c0] sm:$0xff]  ;;  %v5636_v31 = vunpack.c.l.s8.bf16 %v5420_v19 }
 0x85e   : > { %5965 = vmatprep.subr.bf16.mxu1 %v5600_v33  ;;  %v5419_v33 = vld [vmem:[%s7903_s22 + $0x2d0] sm:$0xff]  ;;  %v5633_v20 = vunpack.c.l.s8.bf16 %v5417_v56 }
 0x85f   : > { %v5635_v26 = vunpack.c.l.s8.bf16 %v5419_v33  ;;  %v5639_v23 = vunpack.c.h.s8.bf16 %v5419_v33  ;;  %v5653_v33 = vunpack.c.h.s8.bf16 %v5425_v8 }
 0x860   : > { %5802 = vmatpush1.bf16.msra.mxu0 %v5597_v10  ;;  %v5638_v10 = vunpack.c.h.s8.bf16 %v5418_v15  ;;  %v5649_v15 = vunpack.c.l.s8.bf16 %v5425_v8 }
 0x861   : > { %5966 = vmatpush1.bf16.msra.mxu1 %v5599_v17  ;;  %5803 = vmatprep.subr.bf16.mxu0 %v5602_v63  ;;  %v5640_v17 = vunpack.c.h.s8.bf16 %v5420_v19  ;;  %v5422_v63 = vld [vmem:[%s7903_s22 + $0x2e8] sm:$0xff] }
 0x862   : > { %5967 = vmatprep.subr.bf16.mxu1 %v5604_v40  ;;  %v5637_v40 = vunpack.c.h.s8.bf16 %v5417_v56  ;;  %v5432_v56 = vld [vmem:[%s7903_s22 + $0x338] sm:$0xff] }
 0x864   : > { %5804 = vmatpush1.bf16.msra.mxu0 %v5601_v30  ;;  %v5642_v30 = vunpack.c.l.s8.bf16 %v5422_v63 }
 0x865   : > { %5968 = vmatpush1.bf16.msra.mxu1 %v5603_v50  ;;  %5805 = vmatprep.subr.bf16.mxu0 %v5606_v2  ;;  %v5421_v50 = vld [vmem:[%s7903_s22 + $0x2e0] sm:$0xff]  ;;  %v5644_v2 = vunpack.c.l.s8.bf16 %v5424_v37 }
 0x866   : > { %5969 = vmatprep.subr.bf16.mxu1 %v5608_v39  ;;  %v5423_v39 = vld [vmem:[%s7903_s22 + $0x2f0] sm:$0xff]  ;;  %v5641_v32 = vunpack.c.l.s8.bf16 %v5421_v50 }
 0x867   : > { %v5643_v21 = vunpack.c.l.s8.bf16 %v5423_v39  ;;  %v5647_v49 = vunpack.c.h.s8.bf16 %v5423_v39 }
 0x868   : > { %5806 = vmatpush1.bf16.msra.mxu0 %v5605_v25  ;;  %v5646_v25 = vunpack.c.h.s8.bf16 %v5422_v63  ;;  %v5431_v63 = vld [vmem:[%s7903_s22 + $0x330] sm:$0xff] }
 0x869   : > { %5970 = vmatpush1.bf16.msra.mxu1 %v5607_v62  ;;  %5807 = vmatprep.subr.bf16.mxu0 %v5610_v36  ;;  %v5648_v62 = vunpack.c.h.s8.bf16 %v5424_v37  ;;  %v9052_v36 = vld [vmem:[%s7903_s22 + $0x308] sm:$0xff] }
 0x86a   : > { %5971 = vmatprep.subr.bf16.mxu1 %v5612_v47  ;;  %v5645_v47 = vunpack.c.h.s8.bf16 %v5421_v50  ;;  %v5434_v50 = vld [vmem:[%s7903_s22 + $0x348] sm:$0xff] }
 0x86c   : > { %5808 = vmatpush1.bf16.msra.mxu0 %v5609_v54  ;;  %v5650_v54 = vunpack.c.l.s8.bf16 %v9052_v36 }
 0x86d   : > { %5972 = vmatpush1.bf16.msra.mxu1 %v5611_v46  ;;  %5809 = vmatprep.subr.bf16.mxu0 %v5614_v51  ;;  %v5652_v46 = vunpack.c.l.s8.bf16 %v9055_v55  ;;  %v9061_v51 = vld [vmem:[%s803_s16] sm:$0xff] }
 0x86e   : > { %5973 = vmatprep.subr.bf16.mxu1 %v5616_v52  ;;  %v5234_v52 = vrot.slane %v9061_v51, %v8325_v11  ;;  %v5238_v34 = vrot.slane %v9061_v51, %v8271_v1 }
 0x870   : > { %5810 = vmatpush1.bf16.msra.mxu0 %v5613_v0  ;;  %v5284_v0 = vrot.slane %v9069_v29, %v8325_v11 }
 0x871   : > { %5974 = vmatpush1.bf16.msra.mxu1 %v5615_v35  ;;  %5811 = vmatprep.subr.bf16.mxu0 %v5618_v45  ;;  %v5246_v35 = vrot.slane %v9061_v51, %v8330_v24 }
 0x872   : > { %5975 = vmatprep.subr.bf16.mxu1 %v5620_v57 }
 0x874   : > { %5812 = vmatpush1.bf16.msra.mxu0 %v5617_v58 }
 0x875   : > { %5976 = vmatpush1.bf16.msra.mxu1 %v5619_v60  ;;  %5813 = vmatprep.subr.bf16.mxu0 %v5622_v12  ;;  %v5296_v60 = vrot.slane %v9069_v29, %v8330_v24 }
 0x876   : > { %5977 = vmatprep.subr.bf16.mxu1 %v5624_v9 }
 0x878   : > { %5814 = vmatpush1.bf16.msra.mxu0 %v5621_v59 }
 0x879   : > { %5978 = vmatpush1.bf16.msra.mxu1 %v5623_v5  ;;  %5815 = vmatprep.subr.bf16.mxu0 %v5626_v4 }
 0x87a   : > { %5979 = vmatprep.subr.bf16.mxu1 %v5628_v6 }
 0x87c   : > { %5816 = vmatpush1.bf16.msra.mxu0 %v5625_v13  ;;  %v5427_v13 = vld [vmem:[%s7903_s22 + $0x310] sm:$0xff] }
 0x87d   : > { %5980 = vmatpush1.bf16.msra.mxu1 %v5627_v7  ;;  %5817 = vmatprep.subr.bf16.mxu0 %v5630_v16  ;;  %v5651_v24 = vunpack.c.l.s8.bf16 %v5427_v13 }
 0x87e   : > { %5981 = vmatprep.subr.bf16.mxu1 %v5632_v48 }
 0x880   : > { %5818 = vmatpush1.bf16.msra.mxu0 %v5629_v14  ;;  %v5654_v14 = vunpack.c.h.s8.bf16 %v9052_v36  ;;  %v5435_v36 = vld [vmem:[%s7903_s22 + $0x350] sm:$0xff] }
 0x881   : > { %5982 = vmatpush1.bf16.msra.mxu1 %v5631_v28  ;;  %5819 = vmatprep.subr.bf16.mxu0 %v5634_v27  ;;  %v5656_v28 = vunpack.c.h.s8.bf16 %v9055_v55  ;;  %v5430_v27 = vld [vmem:[%s7903_s22 + $0x328] sm:$0xff] }
 0x882   : > { %5983 = vmatprep.subr.bf16.mxu1 %v5636_v31 }
 0x884   : > { %5820 = vmatpush1.bf16.msra.mxu0 %v5633_v20  ;;  %v5655_v20 = vunpack.c.h.s8.bf16 %v5427_v13 }
 0x885   : > { %5984 = vmatpush1.bf16.msra.mxu1 %v5635_v26  ;;  %5821 = vmatprep.subr.bf16.mxu0 %v5638_v10  ;;  %v5658_v26 = vunpack.c.l.s8.bf16 %v5430_v27  ;;  %v5660_v10 = vunpack.c.l.s8.bf16 %v5432_v56 }
 0x886   : > { %5985 = vmatprep.subr.bf16.mxu1 %v5640_v17  ;;  %v5429_v17 = vld [vmem:[%s7903_s22 + $0x320] sm:$0xff] }
 0x887   : > { %v5657_v37 = vunpack.c.l.s8.bf16 %v5429_v17  ;;  %v5661_v39 = vunpack.c.h.s8.bf16 %v5429_v17 }
 0x888   : > { %5822 = vmatpush1.bf16.msra.mxu0 %v5637_v40  ;;  %v5659_v40 = vunpack.c.l.s8.bf16 %v5431_v63 }
 0x889   : > { %5986 = vmatpush1.bf16.msra.mxu1 %v5639_v23  ;;  %5823 = vmatprep.subr.bf16.mxu0 %v5642_v30  ;;  %v5662_v23 = vunpack.c.h.s8.bf16 %v5430_v27  ;;  %v5664_v30 = vunpack.c.h.s8.bf16 %v5432_v56  ;;  %v5447_v27 = vld [vmem:[%s7903_s22 + $0x3b0] sm:$0xff] }
 0x88a   : > { %5987 = vmatprep.subr.bf16.mxu1 %v5644_v2  ;;  %v5436_v2 = vld [vmem:[%s7903_s22 + $0x358] sm:$0xff] }
 0x88c   : > { %5824 = vmatpush1.bf16.msra.mxu0 %v5641_v32  ;;  %v5663_v32 = vunpack.c.h.s8.bf16 %v5431_v63  ;;  %v5695_v63 = vunpack.c.h.s8.bf16 %v5447_v27 }
 0x88d   : > { %5988 = vmatpush1.bf16.msra.mxu1 %v5643_v21  ;;  %5825 = vmatprep.subr.bf16.mxu0 %v5646_v25  ;;  %v5666_v21 = vunpack.c.l.s8.bf16 %v5434_v50  ;;  %v5668_v25 = vunpack.c.l.s8.bf16 %v5436_v2 }
 0x88e   : > { %5989 = vmatprep.subr.bf16.mxu1 %v5648_v62  ;;  %v5433_v62 = vld [vmem:[%s7903_s22 + $0x340] sm:$0xff] }
 0x88f   : > { %v5665_v55 = vunpack.c.l.s8.bf16 %v5433_v62 }
 0x890   : > { %5826 = vmatpush1.bf16.msra.mxu0 %v5645_v47  ;;  %v5667_v47 = vunpack.c.l.s8.bf16 %v5435_v36 }
 0x891   : > { %5990 = vmatpush1.bf16.msra.mxu1 %v5647_v49  ;;  %5836 = vmatprep.subr.bf16.mxu0 %v5650_v54  ;;  %v5670_v49 = vunpack.c.h.s8.bf16 %v5434_v50  ;;  %v5672_v54 = vunpack.c.h.s8.bf16 %v5436_v2 }
 0x892   : > { %6000 = vmatprep.subr.bf16.mxu1 %v5652_v46  ;;  %v5438_v46 = vld [vmem:[%s7903_s22 + $0x368] sm:$0xff] }
 0x8a6   : > { %v5042_v45 = vpop.f32.mrb[20].mxu0 }
 0x8a7   : > { %v5259_v57 = vmul.f32 %v5234_v52, %v5042_v45  ;;  %v9077_v53 = vpop.f32.mrb[20].mxu1  ;;  %v5044_v58 = vpop.f32.mrb[21].mxu0  ;;  %v5440_v52 = vld [vmem:[%s7903_s22 + $0x378] sm:$0xff] }
 0x8a8   : > { %v5260_v12 = vmul.f32 %v5238_v34, %v5044_v58  ;;  %v5208_v9 = vpop.f32.mrb[21].mxu1  ;;  %v5046_v3 = vpop.f32.mrb[22].mxu0  ;;  %v5669_v34 = vunpack.c.h.s8.bf16 %v5433_v62  ;;  %v5676_v45 = vunpack.c.l.s8.bf16 %v5440_v52  ;;  %v5456_v62 = vld [vmem:[%s7903_s22 + $0x3f8] sm:$0xff] }
 0x8a9   : > { %v5309_v11 = vadd.f32 %v5284_v0, %v5259_v57  ;;  %v5262_v38 = vmul.f32 %v5246_v35, %v5208_v9  ;;  %v5210_v59 = vpop.f32.mrb[22].mxu1  ;;  %v5047_v5 = vpop.f32.mrb[23].mxu0  ;;  %v5671_v0 = vunpack.c.h.s8.bf16 %v5435_v36  ;;  %v5674_v35 = vunpack.c.l.s8.bf16 %v5438_v46  ;;  %v5439_v57 = vld [vmem:[%s7903_s22 + $0x370] sm:$0xff]  ;;  %v5442_v3 = vld [vmem:[%s7903_s22 + $0x388] sm:$0xff] }
 0x8aa   : > { %v5310_v4 = vadd.f32 %v5288_v22, %v5260_v12  ;;  %v5211_v61 = vpop.f32.mrb[23].mxu1  ;;  %v5437_v22 = vld [vmem:[%s7903_s22 + $0x360] sm:$0xff]  ;;  %v5678_v12 = vunpack.c.h.s8.bf16 %v5438_v46  ;;  %v5680_v9 = vunpack.c.h.s8.bf16 %v5440_v52  ;;  %v5679_v59 = vunpack.c.h.s8.bf16 %v5439_v57  ;;  %v5455_v52 = vld [vmem:[%s7903_s22 + $0x3f0] sm:$0xff] }
 0x8ab   : > { %v5317_v1 = vmax.f32 %v5309_v11, 0.0  ;;  %v5312_v6 = vadd.f32 %v5296_v60, %v5262_v38  ;;  %v5673_v58 = vunpack.c.l.s8.bf16 %v5437_v22  ;;  %v5675_v60 = vunpack.c.l.s8.bf16 %v5439_v57  ;;  %v5444_v11 = vld [vmem:[%s7903_s22 + $0x398] sm:$0xff]  ;;  %v5441_v61 = vld [vmem:[%s7903_s22 + $0x380] sm:$0xff] }
 0x8ac   : > { %v5318_v7 = vmax.f32 %v5310_v4, 0.0  ;;  %v5677_v38 = vunpack.c.h.s8.bf16 %v5437_v22  ;;  %v5682_v5 = vunpack.c.l.s8.bf16 %v5442_v3  ;;  %v5684_v4 = vunpack.c.l.s8.bf16 %v5444_v11  ;;  %v5453_v46 = vld [vmem:[%s7903_s22 + $0x3e0] sm:$0xff] }
 0x8ad   : > { %v5320_v16 = vmax.f32 %v5312_v6, 0.0  ;;  %v5325_v19 = vpack.c.bf16 %v5317_v1, %v5317_v1  ;;  %v5443_v1 = vld [vmem:[%s7903_s22 + $0x390] sm:$0xff]  ;;  %v5681_v6 = vunpack.c.l.s8.bf16 %v5441_v61  ;;  %v5686_v13 = vunpack.c.h.s8.bf16 %v5442_v3 }
 0x8ae   : > { %v5326_v48 = vpack.c.bf16 %v5318_v7, %v5318_v7  ;;  %v5683_v8 = vunpack.c.l.s8.bf16 %v5443_v1  ;;  %v5688_v7 = vunpack.c.h.s8.bf16 %v5444_v11 }
 0x8af   : > { %v5328_v31 = vpack.c.bf16 %v5320_v16, %v5320_v16  ;;  %v5446_v16 = vld [vmem:[%s7903_s22 + $0x3a8] sm:$0xff] }
 0x8b0   : > { %5827 = vmatprep.mubr.bf16.mxu0 %v5326_v48  ;;  %5991 = vmatprep.mubr.bf16.mxu1 %v5326_v48  ;;  %v5448_v48 = vld [vmem:[%s7903_s22 + $0x3b8] sm:$0xff] }
 0x8b1   : > { %5828 = vmatmul.mubr.bf16.vlgmr.msra.gmra.mrb[24].mxu0 %v5325_v19  ;;  %5992 = vmatmul.mubr.bf16.vlgmr.msra.gmra.mrb[24].mxu1 %v5325_v19  ;;  %v5690_v19 = vunpack.c.l.s8.bf16 %v5446_v16 }
 0x8b2   : > { %5837 = vmatpush1.bf16.msra.mxu0 %v5649_v15  ;;  %6001 = vmatpush1.bf16.msra.mxu1 %v5651_v24  ;;  %v5685_v15 = vunpack.c.h.s8.bf16 %v5441_v61  ;;  %v5687_v24 = vunpack.c.h.s8.bf16 %v5443_v1 }
 0x8b3   : > { %5868 = vmatprep.mubr.bf16.mxu0 %v5328_v31  ;;  %6032 = vmatprep.mubr.bf16.mxu1 %v5328_v31  ;;  %v5691_v31 = vunpack.c.l.s8.bf16 %v5447_v27 }
 0x8b4   : > { %5838 = vmatprep.subr.bf16.mxu0 %v5654_v14  ;;  %6002 = vmatprep.subr.bf16.mxu1 %v5656_v28  ;;  %v5692_v14 = vunpack.c.l.s8.bf16 %v5448_v48  ;;  %v5445_v28 = vld [vmem:[%s7903_s22 + $0x3a0] sm:$0xff] }
 0x8b5   : > { %v5689_v56 = vunpack.c.l.s8.bf16 %v5445_v28  ;;  %v5693_v17 = vunpack.c.h.s8.bf16 %v5445_v28 }
 0x8b6   : > { %5839 = vmatpush1.bf16.msra.mxu0 %v5653_v33  ;;  %6003 = vmatpush1.bf16.msra.mxu1 %v5655_v20  ;;  %v5694_v33 = vunpack.c.h.s8.bf16 %v5446_v16  ;;  %v5696_v20 = vunpack.c.h.s8.bf16 %v5448_v48 }
 0x8b7   : > { %5840 = vmatprep.subr.bf16.mxu0 %v5658_v26  ;;  %6004 = vmatprep.subr.bf16.mxu1 %v5660_v10  ;;  %v5450_v26 = vld [vmem:[%s7903_s22 + $0x3c8] sm:$0xff]  ;;  %v5452_v10 = vld [vmem:[%s7903_s22 + $0x3d8] sm:$0xff] }
 0x8ba   : > { %5841 = vmatpush1.bf16.msra.mxu0 %v5657_v37  ;;  %6005 = vmatpush1.bf16.msra.mxu1 %v5659_v40  ;;  %v5698_v37 = vunpack.c.l.s8.bf16 %v5450_v26  ;;  %v5700_v40 = vunpack.c.l.s8.bf16 %v5452_v10 }
 0x8bb   : > { %5842 = vmatprep.subr.bf16.mxu0 %v5662_v23  ;;  %6006 = vmatprep.subr.bf16.mxu1 %v5664_v30  ;;  %v5449_v23 = vld [vmem:[%s7903_s22 + $0x3c0] sm:$0xff]  ;;  %v5451_v30 = vld [vmem:[%s7903_s22 + $0x3d0] sm:$0xff] }
 0x8bc   : > { %v5697_v50 = vunpack.c.l.s8.bf16 %v5449_v23  ;;  %v5699_v2 = vunpack.c.l.s8.bf16 %v5451_v30  ;;  %v5701_v36 = vunpack.c.h.s8.bf16 %v5449_v23 }
 0x8be   : > { %5843 = vmatpush1.bf16.msra.mxu0 %v5661_v39  ;;  %6007 = vmatpush1.bf16.msra.mxu1 %v5663_v32  ;;  %v5242_v39 = vrot.slane %v9061_v51, %v8381_v18  ;;  %v5702_v32 = vunpack.c.h.s8.bf16 %v5450_v26 }
 0x8bf   : > { %5844 = vmatprep.subr.bf16.mxu0 %v5666_v21  ;;  %6008 = vmatprep.subr.bf16.mxu1 %v5668_v25  ;;  %v5704_v21 = vunpack.c.h.s8.bf16 %v5452_v10  ;;  %v5454_v25 = vld [vmem:[%s7903_s22 + $0x3e8] sm:$0xff] }
 0x8c0   : > { %v5706_v51 = vunpack.c.l.s8.bf16 %v5454_v25 }
 0x8c2   : > { %5845 = vmatpush1.bf16.msra.mxu0 %v5665_v55  ;;  %6009 = vmatpush1.bf16.msra.mxu1 %v5667_v47  ;;  %v5703_v55 = vunpack.c.h.s8.bf16 %v5451_v30  ;;  %v5261_v47 = vmul.f32 %v5242_v39, %v9077_v53  ;;  %v5712_v53 = vunpack.c.h.s8.bf16 %v5456_v62 }
 0x8c3   : > { %5846 = vmatprep.subr.bf16.mxu0 %v5670_v49  ;;  %6010 = vmatprep.subr.bf16.mxu1 %v5672_v54  ;;  %v5292_v49 = vrot.slane %v9069_v29, %v8381_v18  ;;  %v5708_v54 = vunpack.c.l.s8.bf16 %v5456_v62  ;;  %v5709_v18 = vunpack.c.h.s8.bf16 %v5453_v46  ;;  %v5711_v29 = vunpack.c.h.s8.bf16 %v5455_v52 }
 0x8c6   : > { %5847 = vmatpush1.bf16.msra.mxu0 %v5669_v34  ;;  %6011 = vmatpush1.bf16.msra.mxu1 %v5671_v0  ;;  %v5705_v34 = vunpack.c.l.s8.bf16 %v5453_v46  ;;  %v5707_v0 = vunpack.c.l.s8.bf16 %v5455_v52 }
 0x8c7   : > { %5848 = vmatprep.subr.bf16.mxu0 %v5674_v35  ;;  %6012 = vmatprep.subr.bf16.mxu1 %v5676_v45  ;;  %v5311_v35 = vadd.f32 %v5292_v49, %v5261_v47  ;;  %v5710_v45 = vunpack.c.h.s8.bf16 %v5454_v25 }
 0x8c9   : > { %v5319_v22 = vmax.f32 %v5311_v35, 0.0 }
 0x8ca   : > { %5849 = vmatpush1.bf16.msra.mxu0 %v5673_v58  ;;  %6013 = vmatpush1.bf16.msra.mxu1 %v5675_v60  ;;  %v6041_v58 = vld [vmem:[%s830_s30] sm:$0xf]  ;;  %v6067_v60 = vld [vmem:[%s839_s20] sm:$0xf] }
 0x8cb   : > { %5850 = vmatprep.subr.bf16.mxu0 %v5678_v12  ;;  %6014 = vmatprep.subr.bf16.mxu1 %v5680_v9  ;;  %v5327_v57 = vpack.c.bf16 %v5319_v22, %v5319_v22  ;;  %v6046_v12 = vrot.slane %v6041_v58, %v7957_v41  ;;  %v6054_v9 = vrot.slane %v6041_v58, %v7960_v42 }
 0x8cc   : > { %v6050_v3 = vrot.slane %v6041_v58, %v7963_v43  ;;  %v6058_v11 = vrot.slane %v6041_v58, %v7966_v44  ;;  %v6076_v61 = vrot.slane %v6067_v60, %v7963_v43  ;;  %v6084_v1 = vrot.slane %v6067_v60, %v7966_v44 }
 0x8ce   : > { %5851 = vmatpush1.bf16.msra.mxu0 %v5677_v38  ;;  %6015 = vmatpush1.bf16.msra.mxu1 %v5679_v59  ;;  %v6072_v38 = vrot.slane %v6067_v60, %v7957_v41  ;;  %v6080_v59 = vrot.slane %v6067_v60, %v7960_v42 }
 0x8cf   : > { %5852 = vmatprep.subr.bf16.mxu0 %v5682_v5  ;;  %6016 = vmatprep.subr.bf16.mxu1 %v5684_v4 }
 0x8d2   : > { %5853 = vmatpush1.bf16.msra.mxu0 %v5681_v6  ;;  %6017 = vmatpush1.bf16.msra.mxu1 %v5683_v8 }
 0x8d3   : > { %5854 = vmatprep.subr.bf16.mxu0 %v5686_v13  ;;  %6018 = vmatprep.subr.bf16.mxu1 %v5688_v7 }
 0x8d6   : > { %5855 = vmatpush1.bf16.msra.mxu0 %v5685_v15  ;;  %6019 = vmatpush1.bf16.msra.mxu1 %v5687_v24 }
 0x8d7   : > { %5856 = vmatprep.subr.bf16.mxu0 %v5690_v19  ;;  %6020 = vmatprep.subr.bf16.mxu1 %v5692_v14 }
 0x8da   : > { %5857 = vmatpush1.bf16.msra.mxu0 %v5689_v56  ;;  %6021 = vmatpush1.bf16.msra.mxu1 %v5691_v31 }
 0x8db   : > { %5858 = vmatprep.subr.bf16.mxu0 %v5694_v33  ;;  %6022 = vmatprep.subr.bf16.mxu1 %v5696_v20 }
 0x8de   : > { %5859 = vmatpush1.bf16.msra.mxu0 %v5693_v17  ;;  %6023 = vmatpush1.bf16.msra.mxu1 %v5695_v63 }
 0x8df   : > { %5860 = vmatprep.subr.bf16.mxu0 %v5698_v37  ;;  %6024 = vmatprep.subr.bf16.mxu1 %v5700_v40 }
 0x8e2   : > { %5861 = vmatpush1.bf16.msra.mxu0 %v5697_v50  ;;  %6025 = vmatpush1.bf16.msra.mxu1 %v5699_v2 }
 0x8e3   : > { %5862 = vmatprep.subr.bf16.mxu0 %v5702_v32  ;;  %6026 = vmatprep.subr.bf16.mxu1 %v5704_v21 }
 0x8e6   : > { %5863 = vmatpush1.bf16.msra.mxu0 %v5701_v36  ;;  %6027 = vmatpush1.bf16.msra.mxu1 %v5703_v55 }
 0x8e7   : > { %5864 = vmatprep.subr.bf16.mxu0 %v5706_v51  ;;  %6028 = vmatprep.subr.bf16.mxu1 %v5708_v54 }
 0x8ea   : > { %5865 = vmatpush1.bf16.msra.mxu0 %v5705_v34  ;;  %6029 = vmatpush1.bf16.msra.mxu1 %v5707_v0 }
 0x8eb   : > { %5866 = vmatprep.subr.bf16.mxu0 %v5710_v45  ;;  %6030 = vmatprep.subr.bf16.mxu1 %v5712_v53 }
 0x8ee   : > { %5867 = vmatpush1.bf16.msra.mxu0 %v5709_v18  ;;  %6031 = vmatpush1.bf16.msra.mxu1 %v5711_v29 }
 0x8f1   : > { %5869 = vmatmul.mubr.bf16.vlgmr.msra.gmra.mrb[24].mxu0 %v5327_v57  ;;  %6033 = vmatmul.mubr.bf16.vlgmr.msra.gmra.mrb[24].mxu1 %v5327_v57 }
 0x9c2   : > { %6096 = sbr.rel (%p6529_p3) target bundleno = 2507 (0x9cb), region = 132 }
 0x9c4   : > { %v5870_v5 = vpop.f32.mrb[24].mxu0  ;;  %v6034_v4 = vpop.f32.mrb[24].mxu1 }
 0x9c5   : > { %v6063_v6 = vmul.f32 %v6046_v12, %v5870_v5  ;;  %v6065_v8 = vmul.f32 %v6054_v9, %v6034_v4  ;;  %v5872_v13 = vpop.f32.mrb[25].mxu0  ;;  %v6036_v7 = vpop.f32.mrb[25].mxu1 }
 0x9c6   : > { %v6064_v16 = vmul.f32 %v6050_v3, %v5872_v13  ;;  %v6066_v48 = vmul.f32 %v6058_v11, %v6036_v7  ;;  %v5874_v15 = vpop.f32.mrb[26].mxu0  ;;  %v6038_v24 = vpop.f32.mrb[26].mxu1 }
 0x9c7   : > { %v6089_v19 = vadd.f32 %v6072_v38, %v6063_v6  ;;  %v6091_v14 = vadd.f32 %v6080_v59, %v6065_v8  ;;  %v5875_v28 = vpop.f32.mrb[27].mxu0  ;;  %v6039_v41 = vpop.f32.mrb[27].mxu1 }
 0x9c8   : > { %v6090_v27 = vadd.f32 %v6076_v61, %v6064_v16  ;;  %v6092_v42 = vadd.f32 %v6084_v1, %v6066_v48 }
 0x9c9   : > { %6097 = vst [vmem:[#allocation23] sm:$0xff] %v6089_v19  ;;  %6099 = vst [vmem:[#allocation23 + $0x10] sm:$0xff] %v6091_v14 }
 0x9ca   : > { %6098 = vst [vmem:[#allocation23 + $0x8] sm:$0xff] %v6090_v27  ;;  %6100 = vst [vmem:[#allocation23 + $0x18] sm:$0xff] %v6092_v42 }
 0x9cb PF: > { %s9256_s27 = sld [smem:[#allocation34_spill]] }
 0x9d1   : > { %p6530_p11 = scmp.le.s32.totalorder %s9256_s27, 0 }
 0x9d2   : > { %v6105_v43 = vld [vmem:[#allocation23] sm:$0xff] (!%p6530_p11)  ;;  %v6106_v44 = vld [vmem:[#allocation23 + $0x8] sm:$0xff] (!%p6530_p11)  ;;  %v6107_v56 = vld [vmem:[#allocation23 + $0x10] sm:$0xff] (!%p6530_p11) }
 0x9d3   : > { %6104 = sbr.rel (%p6530_p11) target bundleno = 2522 (0x9da), region = 136  ;;  %v6109_v31 = vadd.f32 (!%p6530_p11), %v6105_v43, %v6089_v19  ;;  %v6110_v33 = vadd.f32 (!%p6530_p11), %v6106_v44, %v6090_v27  ;;  %v6111_v20 = vadd.f32 (!%p6530_p11), %v6107_v56, %v6091_v14  ;;  %v6108_v26 = vld [vmem:[#allocation23 + $0x18] sm:$0xff] (!%p6530_p11) }
 0x9d4   : > { %v6112_v10 = vadd.f32 (!%p6530_p11), %v6108_v26, %v6092_v42 }
 0x9d5   : > { %6113 = vst [vmem:[#allocation23] sm:$0xff] (!%p6530_p11), %v6109_v31  ;;  %6114 = vst [vmem:[#allocation23 + $0x8] sm:$0xff] (!%p6530_p11), %v6110_v33 }
 0x9d6   : > { %6115 = vst [vmem:[#allocation23 + $0x10] sm:$0xff] (!%p6530_p11), %v6111_v20  ;;  %6116 = vst [vmem:[#allocation23 + $0x18] sm:$0xff] (!%p6530_p11), %v6112_v10 }
 0x9da PF: > { %s9257_s29 = sld [smem:[#allocation37_spill]]  ;;  %s7296_s17 = smov [#allocation23]  }
 0x9db   : > { %s6124_s25 = sshll.u32 %s7296_s17, 4  ;;  %s6125_s25 = int_to_ptr.vmem [resolvable:$true] %s6124_s25 }
 0x9dc   : > { %s7165_s10 = scalar_lea.vmem %s6125_s25, 512  ;;  %p7172_p8 = scmp.lt.s32.totalorder %s6125_s25, %s6125_s25 }
 0x9dd   : > { %p7166_p1 = scmp.ne.s32.totalorder %s6125_s25, %s7165_s10  ;;  %p7173_p5 = scmp.lt.s32.totalorder %s7165_s10, %s7165_s10 }
 0x9df   : > { %p7174_p6 = por %p7173_p5, %p7172_p8 }
 0x9e0   : > { %p6722_p2 = scmp.eq.s32.totalorder %s9257_s29, 2 }
 0x9e2   : > { %p7167_p7 = pnand %p7166_p1, %p6722_p2 }
 0x9e4   : > { %p7168_p4 = pneg %p7167_p7 }
 0x9e6   : > { %p7175_p10 = pnand %p7174_p6, %p7168_p4 }
 0x9e8   : > { %7178 = shalt.err (!%p7175_p10)
}
 0x9e9   : > { %s9258_s15 = sld [smem:[#allocation48_spill]] }
 0x9ef   : > { %s9259_s8 = smov %s9258_s15  ;;  %s7179_s13 = scalar_lea.hbm %s9258_s15, 512 }
 0x9f0   : > { %p7180_p9 = scmp.ne.s32.totalorder %s9259_s8, %s7179_s13  ;;  %p7185_p0 = scmp.lt.u32.totalorder %s7179_s13, %s9259_s8 }
 0x9f2   : > { %p7181_p13 = pnand %p7180_p9, %p6722_p2 }
 0x9f4   : > { %p7182_p12 = pneg %p7181_p13 }
 0x9f6   : > { %p7187_p3 = pnand %p7185_p0, %p7182_p12 }
 0x9f8   : > { %7190 = shalt.err (!%p7187_p3)
}
 0x9f9   : > { %6719 = dma.vmem_to_hbm [thread:$0]  (%p6722_p2), %s6125_s25, 512, %s9259_s8, [#allocation4]  }
 0x9fa   : > { %7244 = dma.done.wait (%p6722_p2), [#allocation4], 512  }
 0x9fb   : > { %7246 = vsyncadd (%p6722_p2), [#allocation4], 4294966784 }
 0x9fc PF: > { %s9260_s24 = sld [smem:[#allocation36_spill]]  ;;  %s9261_s29 = sld [smem:[#allocation32_spill]] }
 0x9fd   : > { %s9262_s30 = sld [smem:[#allocation33_spill]]  ;;  %s9263_s15 = sld [smem:[#allocation40_spill]] }
 0x9fe   : > { %s9264_s16 = sld [smem:[#allocation35_spill]]  ;;  %s9265_s17 = sld [smem:[#allocation38_spill]] }
 0xa02   : > { %s46_s18 = sadd.s32 1, %s9260_s24  }
 0xa03   : > { %p43_p11 = scmp.ge.s32.totalorder %s46_s18, 5  }
 0xa05   :  { %45 = sbr.rel (!%p43_p11) target bundleno = 26 (0x1a), region = 268 }
 0xa0c   :  { %6137 = vsyncpa [#allocation3], 1 }
 0xa0d   :  { %6139 = vsyncpa [#allocation3 + $0x1], 1 }
 0xa0e   :  { %6140 = vsyncpa [#allocation6], 1 }
 0xa0f   :  { %6142 = vsyncpa [#allocation6 + $0x1], 1 }
 0xa10   :  { %6143 = vsyncpa [#allocation9], 1 }
 0xa11   :  { %6145 = vsyncpa [#allocation9 + $0x1], 1 }
 0xa12   :  { %6146 = vsyncpa [#allocation12], 1 }
 0xa13   :  { %6148 = vsyncpa [#allocation12 + $0x1], 1 }
 0xa14   :  { %6149 = vsyncpa [#allocation15], 1 }
 0xa15   :  { %6151 = vsyncpa [#allocation15 + $0x1], 1 }
 0xa16   :  { %6152 = vsyncpa [#allocation18], 1 }
 0xa17   :  { %6154 = vsyncpa [#allocation18 + $0x1], 1 }
 0xa18   :  { %6155 = vsyncpa [#allocation21], 1 }
 0xa19   :  { %6157 = vsyncpa [#allocation21 + $0x1], 1 }
 0xa1a   :  { %6158 = vsyncpa [#allocation4], 1 }
 0xa1b   :  { %6160 = vsyncpa [#allocation4 + $0x1], 1 }

</bundles_post_ra>
